<compile_context>
chip_gen: v5e
topology: v5e:2x2
jax: 0.10.0
libtpu: 0.0.40
codegen_flags: <defaults>
</compile_context>

<pallas_src>
import numpy as np
import jax
import jax.numpy as jnp
from jax import lax
from jax.experimental import pallas as pl
from jax.experimental.pallas import tpu as pltpu

LANES = 128   # every on-chip tensor keeps a full 128-wide lane axis
K = 4         # conv kernel size (both convs)
C1 = 8        # conv1 out channels
C2 = 8        # conv2 out channels


def _dims(H, W):
    H1, W1 = H - 1, W - 1                          # conv out, k=4 pad=1
    P1H, P1W = (H1 - 2) // 2 + 1, (W1 - 2) // 2 + 1
    H3, W3 = P1H - 1, P1W - 1
    P2H, P2W = (H3 - 2) // 2 + 1, (W3 - 2) // 2 + 1
    return H1, W1, P1H, P1W, H3, W3, P2H, P2W


# ---------------- host-side parameter re-layout (pure plumbing) ----------------

def _banded_conv_weight(w, cin, cout, w_out):
    """(cout,cin,K,K) torch conv weight -> (K, 128, 128) banded matrices.

    out[kh, (wo+kw)*cin + ci, wo*cout + co] = w[co, ci, kh, kw], so one MXU matmul
    per kh contracts over the whole (kw, cin) window of a row whose lanes pack
    (padded W, cin)."""
    kh, kw, ci, co, wo = np.meshgrid(np.arange(K), np.arange(K), np.arange(cin),
                                     np.arange(cout), np.arange(w_out), indexing="ij")
    rows = (wo + kw) * cin + ci
    cols = wo * cout + co
    vals = w[co, ci, kh, kw]
    return jnp.zeros((K, LANES, LANES), jnp.float32).at[kh, rows, cols].set(vals)


def _bias_row(b):
    return jnp.tile(b.astype(jnp.float32), LANES // b.shape[0])[None, :]


def _pool_select(c, n_out, out_off, odd):
    """0/1 selection: picks lane (2*w+odd)*c + ch into lane out_off + w*c + ch; all
    other output lanes are zero (used as the next conv's W zero-padding)."""
    s = np.zeros((LANES, LANES), np.float32)
    w, ch = np.meshgrid(np.arange(n_out), np.arange(c), indexing="ij")
    s[(2 * w + odd) * c + ch, out_off + w * c + ch] = 1.0
    return jnp.asarray(s)


def _fc_weight(wf, cout, p2h, p2w, out_dim):
    """(out_dim, cout*p2h*p2w) fc weight (torch CHW flatten) -> (p2h, 128, 128)."""
    h, w, c, o = np.meshgrid(np.arange(p2h), np.arange(p2w), np.arange(cout),
                             np.arange(out_dim), indexing="ij")
    rows = w * cout + c
    vals = wf[o, c * (p2h * p2w) + h * p2w + w]
    return jnp.zeros((p2h, LANES, LANES), jnp.float32).at[h, rows, o].set(vals)


# ------------------------------- the kernel ------------------------------------

def make_cnn_kernel(B, Hp, Hp2, P1H, P2H, R1, R2):
    f32 = jnp.float32
    HI = lax.Precision.HIGHEST

    def kernel(x_ref, w1_ref, b1_ref, s1e_ref, s1o_ref,
               w2_ref, b2_ref, s2e_ref, s2o_ref, wf_ref, bf_ref,
               out_ref, c1_ref, p1_ref, c2_ref, p2_ref):

        # ---- conv1 (pad=1): K banded MXU matmuls + bias + ReLU ------------------
        acc1 = jnp.zeros((R1, LANES), f32)
        for kh in range(K):
            acc1 = acc1 + jnp.dot(x_ref[pl.ds(kh, R1), :], w1_ref[kh],
                                  precision=HI, preferred_element_type=f32)
        c1_ref[...] = jnp.maximum(acc1 + b1_ref[...], 0.0)

        # ---- maxpool1 2x2/2: strided rows (H) + 0/1 selection matmuls (W) -------
        # Border rows of p1_ref are re-zeroed every step (megacore-safe); the
        # selection matmuls already leave zero lanes for conv2's W padding.
        zrow = jnp.zeros((1, LANES), f32)
        s1e = s1e_ref[...]
        s1o = s1o_ref[...]
        for b in range(B):
            hp = jnp.maximum(c1_ref[pl.ds(b * Hp, P1H, 2), :],
                             c1_ref[pl.ds(b * Hp + 1, P1H, 2), :])
            wp = jnp.maximum(
                jnp.dot(hp, s1e, precision=HI, preferred_element_type=f32),
                jnp.dot(hp, s1o, precision=HI, preferred_element_type=f32))
            p1_ref[pl.ds(b * Hp2, 1), :] = zrow              # top H-padding row
            p1_ref[pl.ds(b * Hp2 + 1, P1H), :] = wp          # pooled rows
            p1_ref[pl.ds(b * Hp2 + Hp2 - 1, 1), :] = zrow    # bottom H-padding row

        # ---- conv2 (pad=1): K banded MXU matmuls + bias + ReLU ------------------
        acc2 = jnp.zeros((R2, LANES), f32)
        for kh in range(K):
            acc2 = acc2 + jnp.dot(p1_ref[pl.ds(kh, R2), :], w2_ref[kh],
                                  precision=HI, preferred_element_type=f32)
        c2_ref[...] = jnp.maximum(acc2 + b2_ref[...], 0.0)

        # ---- maxpool2 2x2/2 ------------------------------------------------------
        s2e = s2e_ref[...]
        s2o = s2o_ref[...]
        for b in range(B):
            hp = jnp.maximum(c2_ref[pl.ds(b * Hp2, P2H, 2), :],
                             c2_ref[pl.ds(b * Hp2 + 1, P2H, 2), :])
            wp = jnp.maximum(
                jnp.dot(hp, s2e, precision=HI, preferred_element_type=f32),
                jnp.dot(hp, s2o, precision=HI, preferred_element_type=f32))
            p2_ref[pl.ds(b * P2H, P2H), :] = wp

        # ---- fc: out = bf + sum_h  p2_rows(h) @ wf[h] ---------------------------
        acc = jnp.zeros((B, LANES), f32)
        for h in range(P2H):
            acc = acc + jnp.dot(p2_ref[pl.ds(h, B, P2H), :], wf_ref[h],
                                precision=HI, preferred_element_type=f32)
        out_ref[...] = acc + bf_ref[...]

    return kernel


# ------------------------------- the wrapper ------------------------------------

def cnn_forward(x_nchw, params, output_dim, block_b=16):
    w1, b1, w2, b2, wf, bf = params
    N, Cin, H, W = x_nchw.shape
    H1, W1, P1H, P1W, H3, W3, P2H, P2W = _dims(H, W)
    Hp, Wp, Hp2 = H + 2, W + 2, P1H + 2

    # Single-lane-tile layout: (W, C) of every stage must pack into 128 lanes.
    # TODO(synk): wider inputs would need multiple lane tiles per row (not needed here).
    assert Wp * Cin <= LANES and W1 * C1 <= LANES and (P1W + 2) * C1 <= LANES
    assert W3 * C2 <= LANES and P2W * C2 <= LANES and output_dim <= LANES

    B = max(1, min(N, block_b))        # images per grid step
    NB = -(-N // B)
    Npad = NB * B
    R1 = B * Hp - (K - 1)              # conv1 output rows per step (stacked batch x H)
    R2 = B * Hp2 - (K - 1)             # conv2 output rows per step

    # input: NCHW -> stacked rows (batch, H) x lanes (W, C), zero-padded to 128 lanes
    x = jnp.transpose(x_nchw, (0, 2, 3, 1)).astype(jnp.float32)
    x = jnp.pad(x, ((0, Npad - N), (1, 1), (1, 1), (0, 0)))
    x = x.reshape(Npad, Hp, Wp * Cin)
    x = jnp.pad(x, ((0, 0), (0, 0), (0, LANES - Wp * Cin)))
    x = x.reshape(NB, B * Hp, LANES)

    # parameters -> banded / lane-packed form (layout plumbing only)
    w1b = _banded_conv_weight(w1, Cin, C1, W1)
    b1r = _bias_row(b1)
    s1e = _pool_select(C1, P1W, C1, 0)
    s1o = _pool_select(C1, P1W, C1, 1)
    w2b = _banded_conv_weight(w2, C1, C2, W3)
    b2r = _bias_row(b2)
    s2e = _pool_select(C2, P2W, 0, 0)
    s2o = _pool_select(C2, P2W, 0, 1)
    wfb = _fc_weight(wf, C2, P2H, P2W, output_dim)
    bfr = jnp.zeros((1, LANES), jnp.float32).at[0, :output_dim].set(
        bf.astype(jnp.float32))

    kernel = make_cnn_kernel(B, Hp, Hp2, P1H, P2H, R1, R2)

    grid_spec = pltpu.PrefetchScalarGridSpec(
        num_scalar_prefetch=0,
        grid=(NB,),
        in_specs=[
            pl.BlockSpec((None, B * Hp, LANES), lambda i: (i, 0, 0)),   # x block
            pl.BlockSpec((K, LANES, LANES), lambda i: (0, 0, 0)),       # conv1 banded W
            pl.BlockSpec((1, LANES), lambda i: (0, 0)),                 # conv1 bias row
            pl.BlockSpec((LANES, LANES), lambda i: (0, 0)),             # pool1 even sel
            pl.BlockSpec((LANES, LANES), lambda i: (0, 0)),             # pool1 odd sel
            pl.BlockSpec((K, LANES, LANES), lambda i: (0, 0, 0)),       # conv2 banded W
            pl.BlockSpec((1, LANES), lambda i: (0, 0)),                 # conv2 bias row
            pl.BlockSpec((LANES, LANES), lambda i: (0, 0)),             # pool2 even sel
            pl.BlockSpec((LANES, LANES), lambda i: (0, 0)),             # pool2 odd sel
            pl.BlockSpec((P2H, LANES, LANES), lambda i: (0, 0, 0)),     # fc weight
            pl.BlockSpec((1, LANES), lambda i: (0, 0)),                 # fc bias row
        ],
        out_specs=pl.BlockSpec((None, B, LANES), lambda i: (i, 0, 0)),
        scratch_shapes=[
            pltpu.VMEM((R1, LANES), jnp.float32),        # conv1 rows
            pltpu.VMEM((B * Hp2, LANES), jnp.float32),   # pooled1, zero-padded H & W
            pltpu.VMEM((R2, LANES), jnp.float32),        # conv2 rows
            pltpu.VMEM((B * P2H, LANES), jnp.float32),   # pooled2
        ],
    )

    out = pl.pallas_call(
        kernel,
        out_shape=jax.ShapeDtypeStruct((NB, B, LANES), jnp.float32),
        grid_spec=grid_spec,
        compiler_params=pltpu.CompilerParams(dimension_semantics=("parallel",)),
    )(x, w1b, b1r, s1e, s1o, w2b, b2r, s2e, s2o, wfb, bfr)

    return out.reshape(Npad, LANES)[:N, :output_dim]


# ------------------------------ init / reference --------------------------------

def init_params(key, in_channels, output_dim, fc_in):
    ks = jax.random.split(key, 6)

    def u(kk, shape, fan_in):
        bnd = 1.0 / np.sqrt(fan_in)
        return jax.random.uniform(kk, shape, jnp.float32, -bnd, bnd)

    w1 = u(ks[0], (C1, in_channels, K, K), in_channels * K * K)
    b1 = u(ks[1], (C1,), in_channels * K * K)
    w2 = u(ks[2], (C2, C1, K, K), C1 * K * K)
    b2 = u(ks[3], (C2,), C1 * K * K)
    wf = u(ks[4], (output_dim, fc_in), fc_in)
    bf = u(ks[5], (output_dim,), fc_in)
    return (w1, b1, w2, b2, wf, bf)


def ref_forward_np(x, params):
    """Pure-numpy reference matching the PyTorch forward (NCHW)."""
    w1, b1, w2, b2, wf, bf = [np.asarray(p, np.float32) for p in params]
    x = np.asarray(x, np.float32)

    def conv(x, w, b, pad):
        N, C, H, W = x.shape
        O, _, k, _ = w.shape
        xp = np.pad(x, ((0, 0), (0, 0), (pad, pad), (pad, pad)))
        Ho, Wo = H - k + 2 * pad + 1, W - k + 2 * pad + 1
        out = np.zeros((N, O, Ho, Wo), np.float32)
        for kh in range(k):
            for kw in range(k):
                patch = xp[:, :, kh:kh + Ho, kw:kw + Wo]
                out += np.einsum('nchw,oc->nohw', patch, w[:, :, kh, kw])
        return out + b[None, :, None, None]

    def pool(x):
        N, C, H, W = x.shape
        Ho, Wo = (H - 2) // 2 + 1, (W - 2) // 2 + 1
        x = x[:, :, :Ho * 2, :Wo * 2]
        return x.reshape(N, C, Ho, 2, Wo, 2).max(axis=(3, 5))

    h = np.maximum(conv(x, w1, b1, 1), 0.0)
    h = pool(h)
    h = np.maximum(conv(h, w2, b2, 1), 0.0)
    h = pool(h)
    h = h.reshape(h.shape[0], -1)
    return h @ wf.T + bf[None, :]


if __name__ == "__main__":
    N, Cin, H, W, out_dim = 2, 4, 16, 16, 10
    _, _, _, _, _, _, P2H, P2W = _dims(H, W)
    fc_in = P2H * P2W * C2

    key = jax.random.PRNGKey(0)
    kx, kp = jax.random.split(key)
    x = jax.random.normal(kx, (N, Cin, H, W), jnp.float32)
    params = init_params(kp, Cin, out_dim, fc_in)

    out = cnn_forward(x, params, out_dim)
    out = jax.block_until_ready(out)

    ref = ref_forward_np(np.asarray(x), params)
    out_np = np.asarray(out)
    err = np.max(np.abs(out_np - ref)) / (np.max(np.abs(ref)) + 1e-6)
    assert out_np.shape == (N, out_dim)
    assert np.isfinite(out_np).all()
    assert err < 1e-3, f"mismatch vs reference: rel err {err}"
    print("KERNEL_OK")
</pallas_src>

<mosaic_0001>
module attributes {stable_mosaic.version = 11 : i64} {
  func.func @kernel(%arg0: i32, %arg1: memref<1x36x128xf32, #tpu.memory_space<vmem>>, %arg2: memref<4x128x128xf32, #tpu.memory_space<vmem>>, %arg3: memref<1x128xf32, #tpu.memory_space<vmem>>, %arg4: memref<128x128xf32, #tpu.memory_space<vmem>>, %arg5: memref<128x128xf32, #tpu.memory_space<vmem>>, %arg6: memref<4x128x128xf32, #tpu.memory_space<vmem>>, %arg7: memref<1x128xf32, #tpu.memory_space<vmem>>, %arg8: memref<128x128xf32, #tpu.memory_space<vmem>>, %arg9: memref<128x128xf32, #tpu.memory_space<vmem>>, %arg10: memref<3x128x128xf32, #tpu.memory_space<vmem>>, %arg11: memref<1x128xf32, #tpu.memory_space<vmem>>, %arg12: memref<1x2x128xf32, #tpu.memory_space<vmem>>, %arg13: memref<33x128xf32, #tpu.memory_space<vmem>>, %arg14: memref<18x128xf32, #tpu.memory_space<vmem>>, %arg15: memref<15x128xf32, #tpu.memory_space<vmem>>, %arg16: memref<6x128xf32, #tpu.memory_space<vmem>>) attributes {dimension_semantics = [#tpu.dimension_semantics<parallel>], iteration_bounds = array<i64: 1>, scalar_prefetch = 0 : i64, scratch_operands = 4 : i64, tpu.core_type = #tpu.core_type<tc>, window_params = [{transform_indices = @transform_0, window_bounds = array<i64: 1, 36, 128>}, {pipeline_mode = #tpu.pipeline_mode<synchronous>, transform_indices = @transform_1, window_bounds = array<i64: 4, 128, 128>}, {pipeline_mode = #tpu.pipeline_mode<synchronous>, transform_indices = @transform_2, window_bounds = array<i64: 1, 128>}, {pipeline_mode = #tpu.pipeline_mode<synchronous>, transform_indices = @transform_3, window_bounds = array<i64: 128, 128>}, {pipeline_mode = #tpu.pipeline_mode<synchronous>, transform_indices = @transform_4, window_bounds = array<i64: 128, 128>}, {pipeline_mode = #tpu.pipeline_mode<synchronous>, transform_indices = @transform_5, window_bounds = array<i64: 4, 128, 128>}, {pipeline_mode = #tpu.pipeline_mode<synchronous>, transform_indices = @transform_6, window_bounds = array<i64: 1, 128>}, {pipeline_mode = #tpu.pipeline_mode<synchronous>, transform_indices = @transform_7, window_bounds = array<i64: 128, 128>}, {pipeline_mode = #tpu.pipeline_mode<synchronous>, transform_indices = @transform_8, window_bounds = array<i64: 128, 128>}, {pipeline_mode = #tpu.pipeline_mode<synchronous>, transform_indices = @transform_9, window_bounds = array<i64: 3, 128, 128>}, {pipeline_mode = #tpu.pipeline_mode<synchronous>, transform_indices = @transform_10, window_bounds = array<i64: 1, 128>}, {transform_indices = @transform_11, window_bounds = array<i64: 1, 2, 128>}]} {
    %cst = arith.constant 0.000000e+00 : f32
    %0 = vector.broadcast %cst : f32 to vector<33x128xf32>
    %c0 = arith.constant 0 : index
    %c0_0 = arith.constant 0 : index
    %c0_1 = arith.constant 0 : index
    %1 = vector.load %arg1[%c0, %c0_0, %c0_1] : memref<1x36x128xf32, #tpu.memory_space<vmem>>, vector<1x33x128xf32>
    %2 = vector.shape_cast %1 : vector<1x33x128xf32> to vector<33x128xf32>
    %c0_2 = arith.constant 0 : index
    %c0_3 = arith.constant 0 : index
    %c0_4 = arith.constant 0 : index
    %3 = vector.load %arg2[%c0_2, %c0_3, %c0_4] : memref<4x128x128xf32, #tpu.memory_space<vmem>>, vector<1x128x128xf32>
    %4 = vector.shape_cast %3 : vector<1x128x128xf32> to vector<128x128xf32>
    %cst_5 = arith.constant dense<0.000000e+00> : vector<33x128xf32>
    %5 = tpu.matmul %2, %4, %cst_5 {dimension_numbers = #tpu.dot_dimension_numbers<[1], [0], [0], [1], [0, 0, 1, 1], [], []>, precision = #tpu.contract_precision<fp32>} : vector<33x128xf32>, vector<128x128xf32>, vector<33x128xf32> -> vector<33x128xf32>
    %6 = arith.addf %0, %5 : vector<33x128xf32>
    %c0_6 = arith.constant 0 : index
    %c1 = arith.constant 1 : index
    %c0_7 = arith.constant 0 : index
    %7 = vector.load %arg1[%c0_6, %c1, %c0_7] : memref<1x36x128xf32, #tpu.memory_space<vmem>>, vector<1x33x128xf32>
    %8 = vector.shape_cast %7 : vector<1x33x128xf32> to vector<33x128xf32>
    %c1_8 = arith.constant 1 : index
    %c0_9 = arith.constant 0 : index
    %c0_10 = arith.constant 0 : index
    %9 = vector.load %arg2[%c1_8, %c0_9, %c0_10] : memref<4x128x128xf32, #tpu.memory_space<vmem>>, vector<1x128x128xf32>
    %10 = vector.shape_cast %9 : vector<1x128x128xf32> to vector<128x128xf32>
    %cst_11 = arith.constant dense<0.000000e+00> : vector<33x128xf32>
    %11 = tpu.matmul %8, %10, %cst_11 {dimension_numbers = #tpu.dot_dimension_numbers<[1], [0], [0], [1], [0, 0, 1, 1], [], []>, precision = #tpu.contract_precision<fp32>} : vector<33x128xf32>, vector<128x128xf32>, vector<33x128xf32> -> vector<33x128xf32>
    %12 = arith.addf %6, %11 : vector<33x128xf32>
    %c0_12 = arith.constant 0 : index
    %c2 = arith.constant 2 : index
    %c0_13 = arith.constant 0 : index
    %13 = vector.load %arg1[%c0_12, %c2, %c0_13] : memref<1x36x128xf32, #tpu.memory_space<vmem>>, vector<1x33x128xf32>
    %14 = vector.shape_cast %13 : vector<1x33x128xf32> to vector<33x128xf32>
    %c2_14 = arith.constant 2 : index
    %c0_15 = arith.constant 0 : index
    %c0_16 = arith.constant 0 : index
    %15 = vector.load %arg2[%c2_14, %c0_15, %c0_16] : memref<4x128x128xf32, #tpu.memory_space<vmem>>, vector<1x128x128xf32>
    %16 = vector.shape_cast %15 : vector<1x128x128xf32> to vector<128x128xf32>
    %cst_17 = arith.constant dense<0.000000e+00> : vector<33x128xf32>
    %17 = tpu.matmul %14, %16, %cst_17 {dimension_numbers = #tpu.dot_dimension_numbers<[1], [0], [0], [1], [0, 0, 1, 1], [], []>, precision = #tpu.contract_precision<fp32>} : vector<33x128xf32>, vector<128x128xf32>, vector<33x128xf32> -> vector<33x128xf32>
    %18 = arith.addf %12, %17 : vector<33x128xf32>
    %c0_18 = arith.constant 0 : index
    %c3 = arith.constant 3 : index
    %c0_19 = arith.constant 0 : index
    %19 = vector.load %arg1[%c0_18, %c3, %c0_19] : memref<1x36x128xf32, #tpu.memory_space<vmem>>, vector<1x33x128xf32>
    %20 = vector.shape_cast %19 : vector<1x33x128xf32> to vector<33x128xf32>
    %c3_20 = arith.constant 3 : index
    %c0_21 = arith.constant 0 : index
    %c0_22 = arith.constant 0 : index
    %21 = vector.load %arg2[%c3_20, %c0_21, %c0_22] : memref<4x128x128xf32, #tpu.memory_space<vmem>>, vector<1x128x128xf32>
    %22 = vector.shape_cast %21 : vector<1x128x128xf32> to vector<128x128xf32>
    %cst_23 = arith.constant dense<0.000000e+00> : vector<33x128xf32>
    %23 = tpu.matmul %20, %22, %cst_23 {dimension_numbers = #tpu.dot_dimension_numbers<[1], [0], [0], [1], [0, 0, 1, 1], [], []>, precision = #tpu.contract_precision<fp32>} : vector<33x128xf32>, vector<128x128xf32>, vector<33x128xf32> -> vector<33x128xf32>
    %24 = arith.addf %18, %23 : vector<33x128xf32>
    %c0_24 = arith.constant 0 : index
    %c0_25 = arith.constant 0 : index
    %25 = vector.load %arg3[%c0_24, %c0_25] : memref<1x128xf32, #tpu.memory_space<vmem>>, vector<1x128xf32>
    %26 = vector.broadcast %25 : vector<1x128xf32> to vector<33x128xf32>
    %27 = arith.addf %24, %26 : vector<33x128xf32>
    %cst_26 = arith.constant 0.000000e+00 : f32
    %28 = vector.broadcast %cst_26 : f32 to vector<33x128xf32>
    %29 = arith.maximumf %27, %28 : vector<33x128xf32>
    %c0_27 = arith.constant 0 : index
    %c0_28 = arith.constant 0 : index
    %30 = vector.load %arg13[%c0_27, %c0_28] : memref<33x128xf32, #tpu.memory_space<vmem>>, vector<33x128xf32>
    tpu.vector_store %arg13[%c0_27, %c0_28], %29 {strides = array<i32>} : memref<33x128xf32, #tpu.memory_space<vmem>>, vector<33x128xf32>,
    %cst_29 = arith.constant 0.000000e+00 : f32
    %31 = vector.broadcast %cst_29 : f32 to vector<1x128xf32>
    %c0_30 = arith.constant 0 : index
    %c0_31 = arith.constant 0 : index
    %32 = vector.load %arg4[%c0_30, %c0_31] : memref<128x128xf32, #tpu.memory_space<vmem>>, vector<128x128xf32>
    %c0_32 = arith.constant 0 : index
    %c0_33 = arith.constant 0 : index
    %33 = vector.load %arg5[%c0_32, %c0_33] : memref<128x128xf32, #tpu.memory_space<vmem>>, vector<128x128xf32>
    %c0_34 = arith.constant 0 : index
    %c0_35 = arith.constant 0 : index
    %34 = tpu.strided_load %arg13[%c0_34, %c0_35] {strides = array<i32: 2, 1>} : memref<33x128xf32, #tpu.memory_space<vmem>>, vector<7x128xf32>
    %c1_36 = arith.constant 1 : index
    %c0_37 = arith.constant 0 : index
    %35 = tpu.strided_load %arg13[%c1_36, %c0_37] {strides = array<i32: 2, 1>} : memref<33x128xf32, #tpu.memory_space<vmem>>, vector<7x128xf32>
    %36 = arith.maximumf %34, %35 : vector<7x128xf32>
    %cst_38 = arith.constant dense<0.000000e+00> : vector<7x128xf32>
    %37 = tpu.matmul %36, %32, %cst_38 {dimension_numbers = #tpu.dot_dimension_numbers<[1], [0], [0], [1], [0, 0, 1, 1], [], []>, precision = #tpu.contract_precision<fp32>} : vector<7x128xf32>, vector<128x128xf32>, vector<7x128xf32> -> vector<7x128xf32>
    %cst_39 = arith.constant dense<0.000000e+00> : vector<7x128xf32>
    %38 = tpu.matmul %36, %33, %cst_39 {dimension_numbers = #tpu.dot_dimension_numbers<[1], [0], [0], [1], [0, 0, 1, 1], [], []>, precision = #tpu.contract_precision<fp32>} : vector<7x128xf32>, vector<128x128xf32>, vector<7x128xf32> -> vector<7x128xf32>
    %39 = arith.maximumf %37, %38 : vector<7x128xf32>
    %c0_40 = arith.constant 0 : index
    %c0_41 = arith.constant 0 : index
    %40 = vector.load %arg14[%c0_40, %c0_41] : memref<18x128xf32, #tpu.memory_space<vmem>>, vector<1x128xf32>
    tpu.vector_store %arg14[%c0_40, %c0_41], %31 {strides = array<i32>} : memref<18x128xf32, #tpu.memory_space<vmem>>, vector<1x128xf32>,
    %c1_42 = arith.constant 1 : index
    %c0_43 = arith.constant 0 : index
    %41 = vector.load %arg14[%c1_42, %c0_43] : memref<18x128xf32, #tpu.memory_space<vmem>>, vector<7x128xf32>
    tpu.vector_store %arg14[%c1_42, %c0_43], %39 {strides = array<i32>} : memref<18x128xf32, #tpu.memory_space<vmem>>, vector<7x128xf32>,
    %c8 = arith.constant 8 : index
    %c0_44 = arith.constant 0 : index
    %42 = vector.load %arg14[%c8, %c0_44] : memref<18x128xf32, #tpu.memory_space<vmem>>, vector<1x128xf32>
    tpu.vector_store %arg14[%c8, %c0_44], %31 {strides = array<i32>} : memref<18x128xf32, #tpu.memory_space<vmem>>, vector<1x128xf32>,
    %c18 = arith.constant 18 : index
    %c0_45 = arith.constant 0 : index
    %43 = tpu.strided_load %arg13[%c18, %c0_45] {strides = array<i32: 2, 1>} : memref<33x128xf32, #tpu.memory_space<vmem>>, vector<7x128xf32>
    %c19 = arith.constant 19 : index
    %c0_46 = arith.constant 0 : index
    %44 = tpu.strided_load %arg13[%c19, %c0_46] {strides = array<i32: 2, 1>} : memref<33x128xf32, #tpu.memory_space<vmem>>, vector<7x128xf32>
    %45 = arith.maximumf %43, %44 : vector<7x128xf32>
    %cst_47 = arith.constant dense<0.000000e+00> : vector<7x128xf32>
    %46 = tpu.matmul %45, %32, %cst_47 {dimension_numbers = #tpu.dot_dimension_numbers<[1], [0], [0], [1], [0, 0, 1, 1], [], []>, precision = #tpu.contract_precision<fp32>} : vector<7x128xf32>, vector<128x128xf32>, vector<7x128xf32> -> vector<7x128xf32>
    %cst_48 = arith.constant dense<0.000000e+00> : vector<7x128xf32>
    %47 = tpu.matmul %45, %33, %cst_48 {dimension_numbers = #tpu.dot_dimension_numbers<[1], [0], [0], [1], [0, 0, 1, 1], [], []>, precision = #tpu.contract_precision<fp32>} : vector<7x128xf32>, vector<128x128xf32>, vector<7x128xf32> -> vector<7x128xf32>
    %48 = arith.maximumf %46, %47 : vector<7x128xf32>
    %c9 = arith.constant 9 : index
    %c0_49 = arith.constant 0 : index
    %49 = vector.load %arg14[%c9, %c0_49] : memref<18x128xf32, #tpu.memory_space<vmem>>, vector<1x128xf32>
    tpu.vector_store %arg14[%c9, %c0_49], %31 {strides = array<i32>} : memref<18x128xf32, #tpu.memory_space<vmem>>, vector<1x128xf32>,
    %c10 = arith.constant 10 : index
    %c0_50 = arith.constant 0 : index
    %50 = vector.load %arg14[%c10, %c0_50] : memref<18x128xf32, #tpu.memory_space<vmem>>, vector<7x128xf32>
    tpu.vector_store %arg14[%c10, %c0_50], %48 {strides = array<i32>} : memref<18x128xf32, #tpu.memory_space<vmem>>, vector<7x128xf32>,
    %c17 = arith.constant 17 : index
    %c0_51 = arith.constant 0 : index
    %51 = vector.load %arg14[%c17, %c0_51] : memref<18x128xf32, #tpu.memory_space<vmem>>, vector<1x128xf32>
    tpu.vector_store %arg14[%c17, %c0_51], %31 {strides = array<i32>} : memref<18x128xf32, #tpu.memory_space<vmem>>, vector<1x128xf32>,
    %cst_52 = arith.constant 0.000000e+00 : f32
    %52 = vector.broadcast %cst_52 : f32 to vector<15x128xf32>
    %c0_53 = arith.constant 0 : index
    %c0_54 = arith.constant 0 : index
    %53 = vector.load %arg14[%c0_53, %c0_54] : memref<18x128xf32, #tpu.memory_space<vmem>>, vector<15x128xf32>
    %c0_55 = arith.constant 0 : index
    %c0_56 = arith.constant 0 : index
    %c0_57 = arith.constant 0 : index
    %54 = vector.load %arg6[%c0_55, %c0_56, %c0_57] : memref<4x128x128xf32, #tpu.memory_space<vmem>>, vector<1x128x128xf32>
    %55 = vector.shape_cast %54 : vector<1x128x128xf32> to vector<128x128xf32>
    %cst_58 = arith.constant dense<0.000000e+00> : vector<15x128xf32>
    %56 = tpu.matmul %53, %55, %cst_58 {dimension_numbers = #tpu.dot_dimension_numbers<[1], [0], [0], [1], [0, 0, 1, 1], [], []>, precision = #tpu.contract_precision<fp32>} : vector<15x128xf32>, vector<128x128xf32>, vector<15x128xf32> -> vector<15x128xf32>
    %57 = arith.addf %52, %56 : vector<15x128xf32>
    %c1_59 = arith.constant 1 : index
    %c0_60 = arith.constant 0 : index
    %58 = vector.load %arg14[%c1_59, %c0_60] : memref<18x128xf32, #tpu.memory_space<vmem>>, vector<15x128xf32>
    %c1_61 = arith.constant 1 : index
    %c0_62 = arith.constant 0 : index
    %c0_63 = arith.constant 0 : index
    %59 = vector.load %arg6[%c1_61, %c0_62, %c0_63] : memref<4x128x128xf32, #tpu.memory_space<vmem>>, vector<1x128x128xf32>
    %60 = vector.shape_cast %59 : vector<1x128x128xf32> to vector<128x128xf32>
    %cst_64 = arith.constant dense<0.000000e+00> : vector<15x128xf32>
    %61 = tpu.matmul %58, %60, %cst_64 {dimension_numbers = #tpu.dot_dimension_numbers<[1], [0], [0], [1], [0, 0, 1, 1], [], []>, precision = #tpu.contract_precision<fp32>} : vector<15x128xf32>, vector<128x128xf32>, vector<15x128xf32> -> vector<15x128xf32>
    %62 = arith.addf %57, %61 : vector<15x128xf32>
    %c2_65 = arith.constant 2 : index
    %c0_66 = arith.constant 0 : index
    %63 = vector.load %arg14[%c2_65, %c0_66] : memref<18x128xf32, #tpu.memory_space<vmem>>, vector<15x128xf32>
    %c2_67 = arith.constant 2 : index
    %c0_68 = arith.constant 0 : index
    %c0_69 = arith.constant 0 : index
    %64 = vector.load %arg6[%c2_67, %c0_68, %c0_69] : memref<4x128x128xf32, #tpu.memory_space<vmem>>, vector<1x128x128xf32>
    %65 = vector.shape_cast %64 : vector<1x128x128xf32> to vector<128x128xf32>
    %cst_70 = arith.constant dense<0.000000e+00> : vector<15x128xf32>
    %66 = tpu.matmul %63, %65, %cst_70 {dimension_numbers = #tpu.dot_dimension_numbers<[1], [0], [0], [1], [0, 0, 1, 1], [], []>, precision = #tpu.contract_precision<fp32>} : vector<15x128xf32>, vector<128x128xf32>, vector<15x128xf32> -> vector<15x128xf32>
    %67 = arith.addf %62, %66 : vector<15x128xf32>
    %c3_71 = arith.constant 3 : index
    %c0_72 = arith.constant 0 : index
    %68 = vector.load %arg14[%c3_71, %c0_72] : memref<18x128xf32, #tpu.memory_space<vmem>>, vector<15x128xf32>
    %c3_73 = arith.constant 3 : index
    %c0_74 = arith.constant 0 : index
    %c0_75 = arith.constant 0 : index
    %69 = vector.load %arg6[%c3_73, %c0_74, %c0_75] : memref<4x128x128xf32, #tpu.memory_space<vmem>>, vector<1x128x128xf32>
    %70 = vector.shape_cast %69 : vector<1x128x128xf32> to vector<128x128xf32>
    %cst_76 = arith.constant dense<0.000000e+00> : vector<15x128xf32>
    %71 = tpu.matmul %68, %70, %cst_76 {dimension_numbers = #tpu.dot_dimension_numbers<[1], [0], [0], [1], [0, 0, 1, 1], [], []>, precision = #tpu.contract_precision<fp32>} : vector<15x128xf32>, vector<128x128xf32>, vector<15x128xf32> -> vector<15x128xf32>
    %72 = arith.addf %67, %71 : vector<15x128xf32>
    %c0_77 = arith.constant 0 : index
    %c0_78 = arith.constant 0 : index
    %73 = vector.load %arg7[%c0_77, %c0_78] : memref<1x128xf32, #tpu.memory_space<vmem>>, vector<1x128xf32>
    %74 = vector.broadcast %73 : vector<1x128xf32> to vector<15x128xf32>
    %75 = arith.addf %72, %74 : vector<15x128xf32>
    %cst_79 = arith.constant 0.000000e+00 : f32
    %76 = vector.broadcast %cst_79 : f32 to vector<15x128xf32>
    %77 = arith.maximumf %75, %76 : vector<15x128xf32>
    %c0_80 = arith.constant 0 : index
    %c0_81 = arith.constant 0 : index
    %78 = vector.load %arg15[%c0_80, %c0_81] : memref<15x128xf32, #tpu.memory_space<vmem>>, vector<15x128xf32>
    tpu.vector_store %arg15[%c0_80, %c0_81], %77 {strides = array<i32>} : memref<15x128xf32, #tpu.memory_space<vmem>>, vector<15x128xf32>,
    %c0_82 = arith.constant 0 : index
    %c0_83 = arith.constant 0 : index
    %79 = vector.load %arg8[%c0_82, %c0_83] : memref<128x128xf32, #tpu.memory_space<vmem>>, vector<128x128xf32>
    %c0_84 = arith.constant 0 : index
    %c0_85 = arith.constant 0 : index
    %80 = vector.load %arg9[%c0_84, %c0_85] : memref<128x128xf32, #tpu.memory_space<vmem>>, vector<128x128xf32>
    %c0_86 = arith.constant 0 : index
    %c0_87 = arith.constant 0 : index
    %81 = tpu.strided_load %arg15[%c0_86, %c0_87] {strides = array<i32: 2, 1>} : memref<15x128xf32, #tpu.memory_space<vmem>>, vector<3x128xf32>
    %c1_88 = arith.constant 1 : index
    %c0_89 = arith.constant 0 : index
    %82 = tpu.strided_load %arg15[%c1_88, %c0_89] {strides = array<i32: 2, 1>} : memref<15x128xf32, #tpu.memory_space<vmem>>, vector<3x128xf32>
    %83 = arith.maximumf %81, %82 : vector<3x128xf32>
    %cst_90 = arith.constant dense<0.000000e+00> : vector<3x128xf32>
    %84 = tpu.matmul %83, %79, %cst_90 {dimension_numbers = #tpu.dot_dimension_numbers<[1], [0], [0], [1], [0, 0, 1, 1], [], []>, precision = #tpu.contract_precision<fp32>} : vector<3x128xf32>, vector<128x128xf32>, vector<3x128xf32> -> vector<3x128xf32>
    %cst_91 = arith.constant dense<0.000000e+00> : vector<3x128xf32>
    %85 = tpu.matmul %83, %80, %cst_91 {dimension_numbers = #tpu.dot_dimension_numbers<[1], [0], [0], [1], [0, 0, 1, 1], [], []>, precision = #tpu.contract_precision<fp32>} : vector<3x128xf32>, vector<128x128xf32>, vector<3x128xf32> -> vector<3x128xf32>
    %86 = arith.maximumf %84, %85 : vector<3x128xf32>
    %c0_92 = arith.constant 0 : index
    %c0_93 = arith.constant 0 : index
    %87 = vector.load %arg16[%c0_92, %c0_93] : memref<6x128xf32, #tpu.memory_space<vmem>>, vector<3x128xf32>
    tpu.vector_store %arg16[%c0_92, %c0_93], %86 {strides = array<i32>} : memref<6x128xf32, #tpu.memory_space<vmem>>, vector<3x128xf32>,
    %c9_94 = arith.constant 9 : index
    %c0_95 = arith.constant 0 : index
    %88 = tpu.strided_load %arg15[%c9_94, %c0_95] {strides = array<i32: 2, 1>} : memref<15x128xf32, #tpu.memory_space<vmem>>, vector<3x128xf32>
    %c10_96 = arith.constant 10 : index
    %c0_97 = arith.constant 0 : index
    %89 = tpu.strided_load %arg15[%c10_96, %c0_97] {strides = array<i32: 2, 1>} : memref<15x128xf32, #tpu.memory_space<vmem>>, vector<3x128xf32>
    %90 = arith.maximumf %88, %89 : vector<3x128xf32>
    %cst_98 = arith.constant dense<0.000000e+00> : vector<3x128xf32>
    %91 = tpu.matmul %90, %79, %cst_98 {dimension_numbers = #tpu.dot_dimension_numbers<[1], [0], [0], [1], [0, 0, 1, 1], [], []>, precision = #tpu.contract_precision<fp32>} : vector<3x128xf32>, vector<128x128xf32>, vector<3x128xf32> -> vector<3x128xf32>
    %cst_99 = arith.constant dense<0.000000e+00> : vector<3x128xf32>
    %92 = tpu.matmul %90, %80, %cst_99 {dimension_numbers = #tpu.dot_dimension_numbers<[1], [0], [0], [1], [0, 0, 1, 1], [], []>, precision = #tpu.contract_precision<fp32>} : vector<3x128xf32>, vector<128x128xf32>, vector<3x128xf32> -> vector<3x128xf32>
    %93 = arith.maximumf %91, %92 : vector<3x128xf32>
    %c3_100 = arith.constant 3 : index
    %c0_101 = arith.constant 0 : index
    %94 = vector.load %arg16[%c3_100, %c0_101] : memref<6x128xf32, #tpu.memory_space<vmem>>, vector<3x128xf32>
    tpu.vector_store %arg16[%c3_100, %c0_101], %93 {strides = array<i32>} : memref<6x128xf32, #tpu.memory_space<vmem>>, vector<3x128xf32>,
    %cst_102 = arith.constant 0.000000e+00 : f32
    %95 = vector.broadcast %cst_102 : f32 to vector<2x128xf32>
    %c0_103 = arith.constant 0 : index
    %c0_104 = arith.constant 0 : index
    %96 = tpu.strided_load %arg16[%c0_103, %c0_104] {strides = array<i32: 3, 1>} : memref<6x128xf32, #tpu.memory_space<vmem>>, vector<2x128xf32>
    %c0_105 = arith.constant 0 : index
    %c0_106 = arith.constant 0 : index
    %c0_107 = arith.constant 0 : index
    %97 = vector.load %arg10[%c0_105, %c0_106, %c0_107] : memref<3x128x128xf32, #tpu.memory_space<vmem>>, vector<1x128x128xf32>
    %98 = vector.shape_cast %97 : vector<1x128x128xf32> to vector<128x128xf32>
    %cst_108 = arith.constant dense<0.000000e+00> : vector<2x128xf32>
    %99 = tpu.matmul %96, %98, %cst_108 {dimension_numbers = #tpu.dot_dimension_numbers<[1], [0], [0], [1], [0, 0, 1, 1], [], []>, precision = #tpu.contract_precision<fp32>} : vector<2x128xf32>, vector<128x128xf32>, vector<2x128xf32> -> vector<2x128xf32>
    %100 = arith.addf %95, %99 : vector<2x128xf32>
    %c1_109 = arith.constant 1 : index
    %c0_110 = arith.constant 0 : index
    %101 = tpu.strided_load %arg16[%c1_109, %c0_110] {strides = array<i32: 3, 1>} : memref<6x128xf32, #tpu.memory_space<vmem>>, vector<2x128xf32>
    %c1_111 = arith.constant 1 : index
    %c0_112 = arith.constant 0 : index
    %c0_113 = arith.constant 0 : index
    %102 = vector.load %arg10[%c1_111, %c0_112, %c0_113] : memref<3x128x128xf32, #tpu.memory_space<vmem>>, vector<1x128x128xf32>
    %103 = vector.shape_cast %102 : vector<1x128x128xf32> to vector<128x128xf32>
    %cst_114 = arith.constant dense<0.000000e+00> : vector<2x128xf32>
    %104 = tpu.matmul %101, %103, %cst_114 {dimension_numbers = #tpu.dot_dimension_numbers<[1], [0], [0], [1], [0, 0, 1, 1], [], []>, precision = #tpu.contract_precision<fp32>} : vector<2x128xf32>, vector<128x128xf32>, vector<2x128xf32> -> vector<2x128xf32>
    %105 = arith.addf %100, %104 : vector<2x128xf32>
    %c2_115 = arith.constant 2 : index
    %c0_116 = arith.constant 0 : index
    %106 = tpu.strided_load %arg16[%c2_115, %c0_116] {strides = array<i32: 3, 1>} : memref<6x128xf32, #tpu.memory_space<vmem>>, vector<2x128xf32>
    %c2_117 = arith.constant 2 : index
    %c0_118 = arith.constant 0 : index
    %c0_119 = arith.constant 0 : index
    %107 = vector.load %arg10[%c2_117, %c0_118, %c0_119] : memref<3x128x128xf32, #tpu.memory_space<vmem>>, vector<1x128x128xf32>
    %108 = vector.shape_cast %107 : vector<1x128x128xf32> to vector<128x128xf32>
    %cst_120 = arith.constant dense<0.000000e+00> : vector<2x128xf32>
    %109 = tpu.matmul %106, %108, %cst_120 {dimension_numbers = #tpu.dot_dimension_numbers<[1], [0], [0], [1], [0, 0, 1, 1], [], []>, precision = #tpu.contract_precision<fp32>} : vector<2x128xf32>, vector<128x128xf32>, vector<2x128xf32> -> vector<2x128xf32>
    %110 = arith.addf %105, %109 : vector<2x128xf32>
    %c0_121 = arith.constant 0 : index
    %c0_122 = arith.constant 0 : index
    %111 = vector.load %arg11[%c0_121, %c0_122] : memref<1x128xf32, #tpu.memory_space<vmem>>, vector<1x128xf32>
    %112 = vector.broadcast %111 : vector<1x128xf32> to vector<2x128xf32>
    %113 = arith.addf %110, %112 : vector<2x128xf32>
    %c0_123 = arith.constant 0 : index
    %c0_124 = arith.constant 0 : index
    %c0_125 = arith.constant 0 : index
    %114 = vector.load %arg12[%c0_123, %c0_124, %c0_125] : memref<1x2x128xf32, #tpu.memory_space<vmem>>, vector<1x2x128xf32>
    %115 = vector.shape_cast %114 : vector<1x2x128xf32> to vector<2x128xf32>
    %116 = vector.shape_cast %113 : vector<2x128xf32> to vector<1x2x128xf32>
    tpu.vector_store %arg12[%c0_123, %c0_124, %c0_125], %116 {strides = array<i32>} : memref<1x2x128xf32, #tpu.memory_space<vmem>>, vector<1x2x128xf32>,
    return
  }
  func.func @transform_0(%arg0: i32) -> (i32, i32, i32) {
    %c0_i32 = arith.constant 0 : i32
    %c0_i32_0 = arith.constant 0 : i32
    %c0_i32_1 = arith.constant 0 : i32
    return %arg0, %c0_i32, %c0_i32_0 : i32, i32, i32
  }
  func.func @transform_1(%arg0: i32) -> (i32, i32, i32) {
    %c0_i32 = arith.constant 0 : i32
    %c0_i32_0 = arith.constant 0 : i32
    %c0_i32_1 = arith.constant 0 : i32
    %c0_i32_2 = arith.constant 0 : i32
    return %c0_i32, %c0_i32_0, %c0_i32_1 : i32, i32, i32
  }
  func.func @transform_2(%arg0: i32) -> (i32, i32) {
    %c0_i32 = arith.constant 0 : i32
    %c0_i32_0 = arith.constant 0 : i32
    %c0_i32_1 = arith.constant 0 : i32
    return %c0_i32, %c0_i32_0 : i32, i32
  }
  func.func @transform_3(%arg0: i32) -> (i32, i32) {
    %c0_i32 = arith.constant 0 : i32
    %c0_i32_0 = arith.constant 0 : i32
    %c0_i32_1 = arith.constant 0 : i32
    return %c0_i32, %c0_i32_0 : i32, i32
  }
  func.func @transform_4(%arg0: i32) -> (i32, i32) {
    %c0_i32 = arith.constant 0 : i32
    %c0_i32_0 = arith.constant 0 : i32
    %c0_i32_1 = arith.constant 0 : i32
    return %c0_i32, %c0_i32_0 : i32, i32
  }
  func.func @transform_5(%arg0: i32) -> (i32, i32, i32) {
    %c0_i32 = arith.constant 0 : i32
    %c0_i32_0 = arith.constant 0 : i32
    %c0_i32_1 = arith.constant 0 : i32
    %c0_i32_2 = arith.constant 0 : i32
    return %c0_i32, %c0_i32_0, %c0_i32_1 : i32, i32, i32
  }
  func.func @transform_6(%arg0: i32) -> (i32, i32) {
    %c0_i32 = arith.constant 0 : i32
    %c0_i32_0 = arith.constant 0 : i32
    %c0_i32_1 = arith.constant 0 : i32
    return %c0_i32, %c0_i32_0 : i32, i32
  }
  func.func @transform_7(%arg0: i32) -> (i32, i32) {
    %c0_i32 = arith.constant 0 : i32
    %c0_i32_0 = arith.constant 0 : i32
    %c0_i32_1 = arith.constant 0 : i32
    return %c0_i32, %c0_i32_0 : i32, i32
  }
  func.func @transform_8(%arg0: i32) -> (i32, i32) {
    %c0_i32 = arith.constant 0 : i32
    %c0_i32_0 = arith.constant 0 : i32
    %c0_i32_1 = arith.constant 0 : i32
    return %c0_i32, %c0_i32_0 : i32, i32
  }
  func.func @transform_9(%arg0: i32) -> (i32, i32, i32) {
    %c0_i32 = arith.constant 0 : i32
    %c0_i32_0 = arith.constant 0 : i32
    %c0_i32_1 = arith.constant 0 : i32
    %c0_i32_2 = arith.constant 0 : i32
    return %c0_i32, %c0_i32_0, %c0_i32_1 : i32, i32, i32
  }
  func.func @transform_10(%arg0: i32) -> (i32, i32) {
    %c0_i32 = arith.constant 0 : i32
    %c0_i32_0 = arith.constant 0 : i32
    %c0_i32_1 = arith.constant 0 : i32
    return %c0_i32, %c0_i32_0 : i32, i32
  }
  func.func @transform_11(%arg0: i32) -> (i32, i32, i32) {
    %c0_i32 = arith.constant 0 : i32
    %c0_i32_0 = arith.constant 0 : i32
    %c0_i32_1 = arith.constant 0 : i32
    return %arg0, %c0_i32, %c0_i32_0 : i32, i32, i32
  }
}

</mosaic_0001>

<bundles_post_ra>
// kernel: tpu_custom_call.1
= control target key start
LH: loop header
LB: loop body
LE: loop exit
PB: predicated region body
PF: predicated region fallthrough
CT: control target
= control target key end

     0   :  { %16 = vsyncpa [#allocation7], 0  ;;  %s13015_s0 = inlined_call_operand.vmem [shape: f32[1,36,128], index: 0, kind: input, shape index: {}]   ;;  %s13016_s1 = inlined_call_operand.hbm [shape: f32[4,128,128], index: 1, kind: input, shape index: {}]   ;;  %s13017_s2 = inlined_call_operand.vmem [shape: f32[1,128], index: 2, kind: input, shape index: {}]   ;;  %s13018_s3 = inlined_call_operand.hbm [shape: f32[128,128], index: 3, kind: input, shape index: {}]   ;;  %s13019_s4 = inlined_call_operand.hbm [shape: f32[128,128], index: 4, kind: input, shape index: {}]   ;;  %s13020_s5 = inlined_call_operand.hbm [shape: f32[4,128,128], index: 5, kind: input, shape index: {}]   ;;  %s13021_s6 = inlined_call_operand.vmem [shape: f32[1,128], index: 6, kind: input, shape index: {}]   ;;  %s13022_s7 = inlined_call_operand.hbm [shape: f32[128,128], index: 7, kind: input, shape index: {}]   ;;  %s13023_s8 = inlined_call_operand.hbm [shape: f32[128,128], index: 8, kind: input, shape index: {}]   ;;  %s13024_s9 = inlined_call_operand.hbm [shape: f32[3,128,128], index: 9, kind: input, shape index: {}]   ;;  %s13025_s10 = inlined_call_operand.vmem [shape: f32[1,128], index: 10, kind: input, shape index: {}]   ;;  %s13026_s11 = inlined_call_operand.hbm [shape: f32[1,2,128], index: 11, kind: output, shape index: {}]  }
   0x1   :  { %17 = vsyncpa [#allocation10], 0 }
   0x2   :  { %18 = vsyncpa [#allocation13], 0 }
   0x3   :  { %19 = vsyncpa [#allocation16], 0 }
   0x4   :  { %20 = vsyncpa [#allocation8], 0  ;;  %s42_s19 = sshll.u32 %s13018_s3, 4  ;;  %s7844_s20 = smov [#allocation9]   ;;  %s43_s19 = int_to_ptr.hbm [resolvable:$true] %s42_s19 }
   0x5   :  { %s44_s21 = sshll.u32 %s7844_s20, 4  ;;  %s68_s24 = sshll.u32 %s13020_s5, 4  ;;  %s45_s21 = int_to_ptr.vmem [resolvable:$true] %s44_s21  ;;  %s69_s24 = int_to_ptr.hbm [resolvable:$true] %s68_s24 }
   0x6   :  { %s7845_s25 = smov 128   ;;  %s7846_s26 = smov 8  }
   0x7   :  { %50 = dma.hbm_to_vmem [thread:$0]  %s43_s19, 2048, %s45_s21, [#allocation10], %s7845_s25, %s7845_s25, %s7846_s26  }
   0x8   :  { %s7847_s27 = smov [#allocation12]   ;;  %s96_s3 = sshll.u32 %s13023_s8, 4  ;;  %s97_s3 = int_to_ptr.hbm [resolvable:$true] %s96_s3 }
   0x9   :  { %s70_s28 = sshll.u32 %s7847_s27, 4  ;;  %s27_s13 = sshll.u32 %s13016_s1, 4  ;;  %s71_s28 = int_to_ptr.vmem [resolvable:$true] %s70_s28  ;;  %s28_s13 = int_to_ptr.hbm [resolvable:$true] %s27_s13 }
   0xa   :  { %76 = dma.hbm_to_vmem [thread:$0]  %s69_s24, 8192, %s71_s28, [#allocation13], %s7845_s25, %s7845_s25, %s7846_s26  }
   0xb   :  { %s7848_s14 = smov [#allocation15]   ;;  %s7849_s16 = smov [#allocation6]  }
   0xc   :  { %s98_s15 = sshll.u32 %s7848_s14, 4  ;;  %s29_s8 = sshll.u32 %s7849_s16, 4  ;;  %s99_s15 = int_to_ptr.vmem [resolvable:$true] %s98_s15  ;;  %s30_s8 = int_to_ptr.vmem [resolvable:$true] %s29_s8 }
   0xd   :  { %104 = dma.hbm_to_vmem [thread:$0]  %s97_s3, 2048, %s99_s15, [#allocation16], %s7845_s25, %s7845_s25, %s7846_s26  }
   0xe   :  { %s55_s19 = sshll.u32 %s13019_s4, 4  ;;  %s83_s21 = sshll.u32 %s13022_s7, 4  ;;  %s56_s19 = int_to_ptr.hbm [resolvable:$true] %s55_s19  ;;  %s84_s21 = int_to_ptr.hbm [resolvable:$true] %s83_s21 }
   0xf   :  { %35 = dma.hbm_to_vmem [thread:$0]  %s28_s13, 8192, %s30_s8, [#allocation7], %s7845_s25, %s7845_s25, %s7846_s26  }
  0x10   :  { %s7850_s22 = smov [#allocation11]   ;;  %s7851_s24 = smov [#allocation14]  }
  0x11   :  { %s57_s23 = sshll.u32 %s7850_s22, 4  ;;  %s85_s4 = sshll.u32 %s7851_s24, 4  ;;  %s58_s23 = int_to_ptr.vmem [resolvable:$true] %s57_s23  ;;  %s86_s4 = int_to_ptr.vmem [resolvable:$true] %s85_s4 }
  0x12   :  { %63 = dma.hbm_to_vmem [thread:$0]  %s56_s19, 2048, %s58_s23, [#allocation10], %s7845_s25, %s7845_s25, %s7846_s26  }
  0x13   :  { %s109_s29 = sshll.u32 %s13024_s9, 4  ;;  %s7852_s7 = smov [#allocation17]   ;;  %s110_s29 = int_to_ptr.hbm [resolvable:$true] %s109_s29 }
  0x14   :  { %91 = dma.hbm_to_vmem [thread:$0]  %s84_s21, 2048, %s86_s4, [#allocation13], %s7845_s25, %s7845_s25, %s7846_s26  }
  0x15   :  { %s111_s30 = sshll.u32 %s7852_s7, 4  ;;  %s112_s30 = int_to_ptr.vmem [resolvable:$true] %s111_s30 }
  0x16   :  { %117 = dma.hbm_to_vmem [thread:$0]  %s110_s29, 6144, %s112_s30, [#allocation16], %s7845_s25, %s7845_s25, %s7846_s26  }
  0x17   :  { %7834 = dma.done.wait [#allocation7], 8192  }
  0x18   :  { %7835 = vsyncadd [#allocation7], 4294959104 }
  0x19   :  { %7836 = dma.done.wait [#allocation10], 4096  }
  0x1a   :  { %7837 = vsyncadd [#allocation10], 4294963200 }
  0x1b   :  { %7838 = dma.done.wait [#allocation13], 10240  }
  0x1c   :  { %7839 = vsyncadd [#allocation13], 4294957056 }
  0x1d   :  { %7840 = dma.done.wait [#allocation16], 8192  }
  0x1e   :  { %7841 = vsyncadd [#allocation16], 4294959104  ;;  %v190_v0 = vld [vmem:[#allocation6 + $0xf8] sm:$0xff]  ;;  %v189_v1 = vld [vmem:[#allocation6 + $0xf0] sm:$0xff]  ;;  %s7854_s22 = smov [#allocation18]   ;;  %s7615_s27 = sshll.u32 %s13026_s11, 4  ;;  %s7616_s27 = int_to_ptr.hbm [resolvable:$true] %s7615_s27 }
  0x1f   :  { %v188_v2 = vld [vmem:[#allocation6 + $0xe8] sm:$0xff]  ;;  %v7957_v3 = vand.u32 4294901760, %v190_v0  ;;  %v7959_v4 = vand.u32 4294901760, %v189_v1  ;;  %v187_v6 = vld [vmem:[#allocation6 + $0xe0] sm:$0xff]  ;;  %v186_v7 = vld [vmem:[#allocation6 + $0xd8] sm:$0xff]  ;;  %s7613_s23 = sshll.u32 %s7854_s22, 4  ;;  %s7614_s23 = int_to_ptr.vmem [resolvable:$true] %s7613_s23 }
  0x20   :  { %v7961_v5 = vand.u32 4294901760, %v188_v2  ;;  %v185_v8 = vld [vmem:[#allocation6 + $0xd0] sm:$0xff]  ;;  %v7963_v9 = vand.u32 4294901760, %v187_v6  ;;  %v7965_v10 = vand.u32 4294901760, %v186_v7  ;;  %v184_v12 = vld [vmem:[#allocation6 + $0xc8] sm:$0xff]  ;;  %v183_v13 = vld [vmem:[#allocation6 + $0xc0] sm:$0xff] }
  0x21   :  { %v7967_v11 = vand.u32 4294901760, %v185_v8  ;;  %192 = vmatpush.msra.mxu0 %v7957_v3  ;;  %v7971_v14 = vsub.f32 %v190_v0, %v7957_v3  ;;  %456 = vmatpush.msra.mxu3 %v7957_v3  ;;  %v7975_v15 = vsub.f32 %v189_v1, %v7959_v4  ;;  %v7980_v17 = vand.u32 4294901760, %v184_v12  ;;  %v182_v18 = vld [vmem:[#allocation6 + $0xb8] sm:$0xff]  ;;  %v181_v26 = vld [vmem:[#allocation6 + $0xb0] sm:$0xff]  ;;  %v180_v36 = vld [vmem:[#allocation6 + $0xa8] sm:$0xff] }
  0x22   :  { %v7978_v16 = vsub.f32 %v188_v2, %v7961_v5  ;;  %v7983_v19 = vsub.f32 %v187_v6, %v7963_v9  ;;  %v7986_v20 = vsub.f32 %v186_v7, %v7965_v10  ;;  %v7996_v25 = vand.u32 4294901760, %v183_v13  ;;  %v179_v41 = vld [vmem:[#allocation6 + $0xa0] sm:$0xff]  ;;  %v178_v49 = vld [vmem:[#allocation6 + $0x98] sm:$0xff]  ;;  %v177_v55 = vld [vmem:[#allocation6 + $0x90] sm:$0xff] }
  0x23   :  { %v7989_v21 = vsub.f32 %v185_v8, %v7967_v11  ;;  %194 = vmatpush.msra.mxu0 %v7959_v4  ;;  %383 = vmatpush.msra.mxu2 %v7971_v14  ;;  %v13040_v22 = vand.u32 4294901760, %v7971_v14  ;;  %v13039_v23 = vand.u32 4294901760, %v7975_v15  ;;  %v8000_v28 = vand.u32 4294901760, %v182_v18  ;;  %v169_v56 = vld [vmem:[%s13015_s0 + $0x1] sm:$0xff]  ;;  %v168_v6 = vld [vmem:[#allocation6 + $0x78] sm:$0xff] }
  0x24   :  { %v13037_v24 = vand.u32 4294901760, %v7978_v16  ;;  %458 = vmatpush.msra.mxu3 %v7959_v4  ;;  %v13036_v27 = vand.u32 4294901760, %v7983_v19  ;;  %v8003_v29 = vsub.f32 %v184_v12, %v7980_v17  ;;  %v13035_v33 = vand.u32 4294901760, %v7986_v20  ;;  %v176_v62 = vld [vmem:[#allocation6 + $0x88] sm:$0xff]  ;;  %v175_v12 = vld [vmem:[#allocation6 + $0x80] sm:$0xff] }
  0x25   :  { %196 = vmatpush.msra.mxu0 %v7961_v5  ;;  %386 = vmatpush.msra.mxu2 %v7975_v15  ;;  %v267_v30 = vsub.f32 %v7971_v14, %v13040_v22  ;;  %v273_v31 = vsub.f32 %v7975_v15, %v13039_v23  ;;  %v8018_v34 = vand.u32 4294901760, %v181_v26  ;;  %v13033_v35 = vand.u32 4294901760, %v7989_v21 }
  0x26   :  { %v279_v32 = vsub.f32 %v7978_v16, %v13037_v24  ;;  %460 = vmatpush.msra.mxu3 %v7961_v5  ;;  %v285_v39 = vsub.f32 %v7983_v19, %v13036_v27  ;;  %v8027_v40 = vsub.f32 %v183_v13, %v7996_v25  ;;  %v13032_v42 = vand.u32 4294901760, %v8003_v29 }
  0x27   :  { %198 = vmatpush.msra.mxu0 %v7963_v9  ;;  %v268_v37 = vand.u32 4294901760, %v267_v30  ;;  %389 = vmatpush.msra.mxu2 %v7978_v16  ;;  %v274_v38 = vand.u32 4294901760, %v273_v31  ;;  %v8032_v43 = vsub.f32 %v182_v18, %v8000_v28  ;;  %v291_v45 = vsub.f32 %v7986_v20, %v13035_v33  ;;  %v170_v31 = vld [vmem:[%s13015_s0 + $0x9] sm:$0xff] }
  0x28   :  { %462 = vmatpush.msra.mxu3 %v7963_v9  ;;  %v280_v44 = vand.u32 4294901760, %v279_v32  ;;  %v8038_v46 = vand.u32 4294901760, %v180_v36  ;;  %v297_v47 = vsub.f32 %v7989_v21, %v13033_v35  ;;  %v8045_v48 = vand.u32 4294901760, %v179_v41  ;;  %v167_v32 = vld [vmem:[#allocation6 + $0x70] sm:$0xff]  ;;  %v164_v35 = vld [vmem:[#allocation6 + $0x58] sm:$0xff] }
  0x29   :  { %200 = vmatpush.msra.mxu0 %v7965_v10  ;;  %269 = vmatpush.msra.mxu1 %v268_v37  ;;  %v286_v50 = vand.u32 4294901760, %v285_v39  ;;  %v13031_v51 = vand.u32 4294901760, %v8027_v40  ;;  %v8050_v52 = vsub.f32 %v181_v26, %v8018_v34  ;;  %v303_v53 = vsub.f32 %v8003_v29, %v13032_v42 }
  0x2a   :  { %392 = vmatpush.msra.mxu2 %v7983_v19  ;;  %464 = vmatpush.msra.mxu3 %v7965_v10  ;;  %v13030_v54 = vand.u32 4294901760, %v8032_v43  ;;  %v292_v57 = vand.u32 4294901760, %v291_v45  ;;  %v8062_v58 = vand.u32 4294901760, %v178_v49  ;;  %v8065_v59 = vsub.f32 %v180_v36, %v8038_v46 }
  0x2b   :  { %202 = vmatpush.msra.mxu0 %v7967_v11  ;;  %275 = vmatpush.msra.mxu1 %v274_v38  ;;  %v298_v60 = vand.u32 4294901760, %v297_v47  ;;  %v8070_v61 = vsub.f32 %v179_v41, %v8045_v48  ;;  %v309_v63 = vsub.f32 %v8027_v40, %v13031_v51  ;;  %v8076_v0 = vand.u32 4294901760, %v177_v55 }
  0x2c   :  { %395 = vmatpush.msra.mxu2 %v7986_v20  ;;  %466 = vmatpush.msra.mxu3 %v7967_v11  ;;  %v13029_v1 = vand.u32 4294901760, %v8050_v52  ;;  %v8079_v2 = vand.u32 4294901760, %v169_v56  ;;  %v304_v7 = vand.u32 4294901760, %v303_v53  ;;  %v315_v8 = vsub.f32 %v8032_v43, %v13030_v54 }
  0x2d   :  { %204 = vmatpush.msra.mxu0 %v7980_v17  ;;  %281 = vmatpush.msra.mxu1 %v280_v44  ;;  %13399 = vst [vmem:[#allocation24_spill] sm:$0xff] %v8076_v0  ;;  %v8087_v13 = vand.u32 4294901760, %v176_v62  ;;  %v13027_v18 = vand.u32 4294901760, %v8065_v59  ;;  %v8091_v26 = vsub.f32 %v178_v49, %v8062_v58  ;;  %v13028_v36 = vand.u32 4294901760, %v8070_v61 }
  0x2e   :  { %398 = vmatpush.msra.mxu2 %v7989_v21  ;;  %468 = vmatpush.msra.mxu3 %v7980_v17  ;;  %v8094_v30 = vsub.f32 %v169_v56, %v8079_v2  ;;  %v8102_v37 = vand.u32 4294901760, %v168_v6  ;;  %v310_v38 = vand.u32 4294901760, %v309_v63  ;;  %v321_v39 = vsub.f32 %v8050_v52, %v13029_v1 }
  0x2f   :  { %206 = vmatpush.msra.mxu0 %v7996_v25  ;;  %287 = vmatpush.msra.mxu1 %v286_v50  ;;  %13400 = vst [vmem:[#allocation25_spill] sm:$0xff] %v8087_v13  ;;  %v8108_v41 = vand.u32 4294901760, %v175_v12  ;;  %v8111_v44 = vsub.f32 %v177_v55, %v8076_v0  ;;  %v316_v45 = vand.u32 4294901760, %v315_v8  ;;  %v8116_v49 = vand.u32 4294901760, %v170_v31 }
  0x30   :  { %401 = vmatpush.msra.mxu2 %v8003_v29  ;;  %470 = vmatpush.msra.mxu3 %v7996_v25  ;;  %v13043_v47 = vand.u32 4294901760, %v8094_v30  ;;  %v8118_v50 = vand.u32 4294901760, %v167_v32  ;;  %v327_v53 = vsub.f32 %v8065_v59, %v13027_v18  ;;  %v13034_v55 = vand.u32 4294901760, %v8091_v26  ;;  %v165_v18 = vld [vmem:[#allocation6 + $0x60] sm:$0xff] }
  0x31   :  { %208 = vmatpush.msra.mxu0 %v8000_v28  ;;  %293 = vmatpush.msra.mxu1 %v292_v57  ;;  %13401 = vst [vmem:[#allocation26_spill] sm:$0xff] %v8108_v41  ;;  %v8126_v56 = vsub.f32 %v176_v62, %v8087_v13  ;;  %v8129_v57 = vsub.f32 %v168_v6, %v8102_v37  ;;  %v13038_v8 = vand.u32 4294901760, %v8111_v44  ;;  %v8165_v42 = vand.u32 4294901760, %v165_v18 }
  0x32   :  { %404 = vmatpush.msra.mxu2 %v8027_v40  ;;  %472 = vmatpush.msra.mxu3 %v8000_v28  ;;  %v333_v63 = vsub.f32 %v8070_v61, %v13028_v36  ;;  %v8139_v62 = vsub.f32 %v175_v12, %v8108_v41  ;;  %v8142_v6 = vsub.f32 %v167_v32, %v8118_v50  ;;  %v171_v12 = vld [vmem:[%s13015_s0 + $0x11] sm:$0xff]  ;;  %v328_v32 = vand.u32 4294901760, %v327_v53 }
  0x33   :  { %210 = vmatpush.msra.mxu0 %v8018_v34  ;;  %299 = vmatpush.msra.mxu1 %v298_v60  ;;  %v166_v60 = vld [vmem:[#allocation6 + $0x68] sm:$0xff]  ;;  %v226_v36 = vsub.f32 %v8094_v30, %v13043_v47  ;;  %v339_v1 = vsub.f32 %v8091_v26, %v13034_v55  ;;  %v13042_v54 = vand.u32 4294901760, %v8126_v56  ;;  %v13041_v51 = vand.u32 4294901760, %v8129_v57 }
  0x34   :  { %407 = vmatpush.msra.mxu2 %v8032_v43  ;;  %474 = vmatpush.msra.mxu3 %v8018_v34  ;;  %13402 = vst [vmem:[#allocation27_spill] sm:$0xff] %v8142_v6  ;;  %v13044_v53 = vand.u32 4294901760, %v8139_v62  ;;  %v13045_v55 = vand.u32 4294901760, %v8142_v6  ;;  %v8173_v33 = vand.u32 4294901760, %v171_v12  ;;  %v8188_v22 = vand.u32 4294901760, %v164_v35  ;;  %v162_v47 = vld [vmem:[#allocation6 + $0x48] sm:$0xff] }
  0x35   :  { %212 = vmatpush.msra.mxu0 %v8038_v46  ;;  %305 = vmatpush.msra.mxu1 %v304_v7  ;;  %v322_v7 = vand.u32 4294901760, %v321_v39  ;;  %v8155_v39 = vand.u32 4294901760, %v166_v60  ;;  %v732_v23 = vsub.f32 %v8129_v57, %v13041_v51 }
  0x36   :  { %410 = vmatpush.msra.mxu2 %v8050_v52  ;;  %476 = vmatpush.msra.mxu3 %v8038_v46  ;;  %v738_v51 = vsub.f32 %v8142_v6, %v13045_v55  ;;  %v8223_v6 = vand.u32 4294901760, %v162_v47 }
  0x37   :  { %214 = vmatpush.msra.mxu0 %v8045_v48  ;;  %311 = vmatpush.msra.mxu1 %v310_v38  ;;  %v8150_v38 = vsub.f32 %v170_v31, %v8116_v49  ;;  %v334_v31 = vand.u32 4294901760, %v333_v63  ;;  %v227_v63 = vand.u32 4294901760, %v226_v36  ;;  %v8179_v24 = vsub.f32 %v166_v60, %v8155_v39  ;;  %v163_v36 = vld [vmem:[#allocation6 + $0x50] sm:$0xff] }
  0x38   :  { %413 = vmatpush.msra.mxu2 %v8065_v59  ;;  %478 = vmatpush.msra.mxu3 %v8045_v48  ;;  %v8193_v60 = vsub.f32 %v165_v18, %v8165_v42  ;;  %v733_v55 = vand.u32 4294901760, %v732_v23 }
  0x39   :  { %216 = vmatpush.msra.mxu0 %v8062_v58  ;;  %317 = vmatpush.msra.mxu1 %v316_v45  ;;  %v345_v45 = vsub.f32 %v8111_v44, %v13038_v8  ;;  %v13046_v27 = vand.u32 4294901760, %v8150_v38  ;;  %v351_v8 = vsub.f32 %v8126_v56, %v13042_v54  ;;  %v8203_v54 = vsub.f32 %v171_v12, %v8173_v33 }
  0x3a   :  { %416 = vmatpush.msra.mxu2 %v8070_v61  ;;  %480 = vmatpush.msra.mxu3 %v8062_v58  ;;  %v8214_v12 = vsub.f32 %v164_v35, %v8188_v22  ;;  %v739_v35 = vand.u32 4294901760, %v738_v51 }
  0x3b   :  { %218 = vmatpush.msra.mxu0 %v8076_v0  ;;  %323 = vmatpush.msra.mxu1 %v322_v7  ;;  %v340_v7 = vand.u32 4294901760, %v339_v1  ;;  %v346_v1 = vand.u32 4294901760, %v345_v45  ;;  %v234_v18 = vsub.f32 %v8150_v38, %v13046_v27  ;;  %v8210_v45 = vand.u32 4294901760, %v163_v36 }
  0x3c   :  { %419 = vmatpush.msra.mxu2 %v8091_v26  ;;  %482 = vmatpush.msra.mxu3 %v8076_v0  ;;  %13403 = vst [vmem:[#allocation28_spill] sm:$0xff] %v8214_v12  ;;  %v13404_v27 = vand.u32 4294901760, %v8094_v30  ;;  %v13052_v51 = vand.u32 4294901760, %v8214_v12 }
  0x3d   :  { %220 = vmatpush.msra.mxu0 %v8087_v13  ;;  %329 = vmatpush.msra.mxu1 %v328_v32  ;;  %v357_v32 = vsub.f32 %v8139_v62, %v13044_v53  ;;  %v352_v53 = vand.u32 4294901760, %v351_v8  ;;  %v13053_v8 = vand.u32 4294901760, %v8203_v54  ;;  %v8234_v0 = vsub.f32 %v163_v36, %v8210_v45 }
  0x3e   :  { %422 = vmatpush.msra.mxu2 %v8111_v44  ;;  %484 = vmatpush.msra.mxu3 %v8087_v13  ;;  %v13405_v13 = vand.u32 4294901760, %v7971_v14  ;;  %v13407_v14 = vand.u32 4294901760, %v7975_v15  ;;  %v8248_v36 = vsub.f32 %v162_v47, %v8223_v6  ;;  %v13409_v47 = vand.u32 4294901760, %v7978_v16 }
  0x3f   :  { %222 = vmatpush.msra.mxu0 %v8108_v41  ;;  %335 = vmatpush.msra.mxu1 %v334_v31  ;;  %v358_v23 = vand.u32 4294901760, %v357_v32  ;;  %v160_v32 = vld [vmem:[#allocation6 + $0x38] sm:$0xff] }
  0x40   :  { %228 = vmatmul.f32.vlgmr.msra.gmra.mxu0 %v227_v63  ;;  %425 = vmatpush.msra.mxu2 %v8126_v56  ;;  %v172_v63 = vld [vmem:[%s13015_s0 + $0x19] sm:$0xff] }
  0x41   :  { %341 = vmatpush.msra.mxu1 %v340_v7  ;;  %486 = vmatpush.msra.mxu3 %v8108_v41  ;;  %v161_v7 = vld [vmem:[#allocation6 + $0x40] sm:$0xff]  ;;  %v235_v41 = vand.u32 4294901760, %v234_v18 }
  0x42   :  { %428 = vmatpush.msra.mxu2 %v8139_v62  ;;  %490 = vmatmul.f32.vlgmr.msra.gmra.mxu3 %v13404_v27  ;;  %v13406_v27 = vand.u32 4294901760, %v8179_v24 }
  0x43   :  { %347 = vmatpush.msra.mxu1 %v346_v1  ;;  %431 = vmatmul.f32.vlgmr.msra.gmra.mxu2 %v8094_v30  ;;  %v8236_v1 = vand.u32 4294901760, %v172_v63  ;;  %v8239_v30 = vand.u32 4294901760, %v161_v7 }
  0x44   :  { %521 = vmatpush.msrb.mxu0 %v13405_v13  ;;  %657 = vmatpush.msrb.mxu2 %v8102_v37  ;;  %v744_v31 = vsub.f32 %v8179_v24, %v13406_v27  ;;  %v13408_v13 = vand.u32 4294901760, %v8193_v60  ;;  %v13056_v27 = vand.u32 4294901760, %v8234_v0 }
  0x45   :  { %353 = vmatpush.msra.mxu1 %v352_v53  ;;  %734 = vmatpush.msrb.mxu3 %v733_v55  ;;  %v242_v55 = vsub.f32 %v8203_v54, %v13053_v8  ;;  %v159_v53 = vld [vmem:[#allocation6 + $0x30] sm:$0xff] }
  0x46   :  { %525 = vmatpush.msrb.mxu0 %v13407_v14  ;;  %659 = vmatpush.msrb.mxu2 %v8118_v50  ;;  %v750_v18 = vsub.f32 %v8193_v60, %v13408_v13  ;;  %v745_v15 = vand.u32 4294901760, %v744_v31  ;;  %v8256_v14 = vsub.f32 %v172_v63, %v8236_v1  ;;  %v8258_v13 = vand.u32 4294901760, %v160_v32  ;;  %v173_v31 = vld [vmem:[%s13015_s0 + $0x21] sm:$0x1] }
  0x47   :  { %359 = vmatpush.msra.mxu1 %v358_v23  ;;  %740 = vmatpush.msrb.mxu3 %v739_v35  ;;  %v756_v23 = vsub.f32 %v8214_v12, %v13052_v51  ;;  %v13410_v63 = vand.u32 4294901760, %v8150_v38  ;;  %v243_v51 = vand.u32 4294901760, %v242_v55  ;;  %v8289_v35 = vand.u32 4294901760, %v173_v31  ;;  %v157_v12 = vld [vmem:[#allocation6 + $0x20] sm:$0xff] }
  0x48   :  { %236 = vmatmul.f32.gmra.mxu0 %v235_v41  ;;  %361 = vmatmul.f32.vlgmr.msra.gmra.mxu1 %v8079_v2  ;;  %v8267_v41 = vsub.f32 %v161_v7, %v8239_v30  ;;  %v751_v16 = vand.u32 4294901760, %v750_v18  ;;  %v13411_v7 = vand.u32 4294901760, %v7983_v19  ;;  %v13057_v18 = vand.u32 4294901760, %v8256_v14 }
  0x49   :  { %529 = vmatpush.msrb.mxu0 %v13409_v47  ;;  %604 = vmatpush.msrb.mxu1 %v7957_v3  ;;  %v8276_v3 = vand.u32 4294901760, %v159_v53  ;;  %v158_v47 = vld [vmem:[#allocation6 + $0x28] sm:$0xff]  ;;  %v8287_v8 = vsub.f32 %v160_v32, %v8258_v13  ;;  %v757_v19 = vand.u32 4294901760, %v756_v23  ;;  %v8307_v23 = vand.u32 4294901760, %v157_v12 }
  0x4a   :  { %496 = vmatmul.f32.gmra.mxu3 %v13410_v63  ;;  %661 = vmatpush.msrb.mxu2 %v8155_v39  ;;  %v762_v63 = vsub.f32 %v8234_v0, %v13056_v27  ;;  %v8295_v55 = vand.u32 4294901760, %v158_v47  ;;  %v13416_v27 = vand.u32 4294901760, %v8203_v54 }
  0x4b   :  { %436 = vmatmul.f32.gmra.mxu2 %v8150_v38  ;;  %533 = vmatpush.msrb.mxu0 %v13411_v7  ;;  %v13412_v38 = vand.u32 4294901760, %v7986_v20  ;;  %v8302_v7 = vsub.f32 %v159_v53, %v8276_v3  ;;  %v13414_v20 = vand.u32 4294901760, %v7989_v21  ;;  %v8315_v53 = vsub.f32 %v173_v31, %v8289_v35 }
  0x4c   :  { %746 = vmatpush.msrb.mxu3 %v745_v15  ;;  %606 = vmatpush.msrb.mxu1 %v7959_v4  ;;  %v13058_v4 = vand.u32 4294901760, %v8267_v41  ;;  %v13413_v15 = vand.u32 4294901760, %v8248_v36  ;;  %v13415_v21 = vand.u32 4294901760, %v8003_v29  ;;  %v13417_v29 = vand.u32 4294901760, %v8027_v40 }
  0x4d   :  { %537 = vmatpush.msrb.mxu0 %v13412_v38  ;;  %663 = vmatpush.msrb.mxu2 %v8165_v42  ;;  %v156_v38 = vld [vmem:[#allocation6 + $0x18] sm:$0xff]  ;;  %v13059_v31 = vand.u32 4294901760, %v8302_v7 }
  0x4e   :  { %752 = vmatpush.msrb.mxu3 %v751_v16  ;;  %608 = vmatpush.msrb.mxu1 %v7961_v5  ;;  %v768_v32 = vsub.f32 %v8248_v36, %v13413_v15  ;;  %v763_v16 = vand.u32 4294901760, %v762_v63  ;;  %v250_v5 = vsub.f32 %v8256_v14, %v13057_v18  ;;  %v155_v63 = vld [vmem:[#allocation6 + $0x10] sm:$0xff]  ;;  %v8329_v15 = vand.u32 4294901760, %v156_v38 }
  0x4f   :  { %541 = vmatpush.msrb.mxu0 %v13414_v20  ;;  %665 = vmatpush.msrb.mxu2 %v8188_v22  ;;  %v8323_v20 = vsub.f32 %v158_v47, %v8295_v55 }
  0x50   :  { %244 = vmatmul.f32.gmra.mxu0 %v243_v51  ;;  %365 = vmatmul.f32.gmra.mxu1 %v8116_v49  ;;  %v774_v51 = vsub.f32 %v8267_v41, %v13058_v4  ;;  %v769_v18 = vand.u32 4294901760, %v768_v32  ;;  %v251_v47 = vand.u32 4294901760, %v250_v5  ;;  %v257_v32 = vand.u32 4294901760, %v8315_v53  ;;  %v154_v4 = vld [vmem:[#allocation6 + $0x8] sm:$0xff] }
  0x51   :  { %545 = vmatpush.msrb.mxu0 %v13415_v21  ;;  %758 = vmatpush.msrb.mxu3 %v757_v19  ;;  %v8335_v19 = vsub.f32 %v157_v12, %v8307_v23  ;;  %v8342_v21 = vand.u32 4294901760, %v155_v63  ;;  %v13060_v12 = vand.u32 4294901760, %v8323_v20  ;;  %v8353_v5 = vsub.f32 %v156_v38, %v8329_v15 }
  0x52   :  { %502 = vmatmul.f32.gmra.mxu3 %v13416_v27  ;;  %610 = vmatpush.msrb.mxu1 %v7963_v9  ;;  %v13418_v27 = vand.u32 4294901760, %v8287_v8  ;;  %v775_v40 = vand.u32 4294901760, %v774_v51  ;;  %v258_v38 = vsub.f32 %v8315_v53, %v257_v32 }
  0x53   :  { %441 = vmatmul.f32.gmra.mxu2 %v8203_v54  ;;  %549 = vmatpush.msrb.mxu0 %v13417_v29  ;;  %v13419_v54 = vand.u32 4294901760, %v8032_v43  ;;  %v153_v29 = vld [vmem:[#allocation6] sm:$0xff]  ;;  %v148_v43 = vld [vmem:[%s13015_s0] sm:$0xff]  ;;  %v797_v51 = vand.u32 4294901760, %v8335_v19 }
  0x54   :  { %667 = vmatpush.msrb.mxu2 %v8210_v45  ;;  %764 = vmatpush.msrb.mxu3 %v763_v16  ;;  %v780_v9 = vsub.f32 %v8287_v8, %v13418_v27  ;;  %v786_v16 = vsub.f32 %v8302_v7, %v13059_v31 }
  0x55   :  { %553 = vmatpush.msrb.mxu0 %v13419_v54  ;;  %612 = vmatpush.msrb.mxu1 %v7965_v10  ;;  %v13420_v10 = vand.u32 4294901760, %v8050_v52  ;;  %v8369_v54 = vsub.f32 %v155_v63, %v8342_v21  ;;  %v8375_v52 = vand.u32 4294901760, %v153_v29  ;;  %v803_v63 = vand.u32 4294901760, %v8353_v5 }
  0x56   :  { %669 = vmatpush.msrb.mxu2 %v8223_v6  ;;  %770 = vmatpush.msrb.mxu3 %v769_v18  ;;  %v8362_v18 = vand.u32 4294901760, %v154_v4  ;;  %v781_v27 = vand.u32 4294901760, %v780_v9  ;;  %v13421_v9 = vand.u32 4294901760, %v8256_v14  ;;  %v787_v31 = vand.u32 4294901760, %v786_v16 }
  0x57   :  { %557 = vmatpush.msrb.mxu0 %v13420_v10  ;;  %614 = vmatpush.msrb.mxu1 %v7967_v11  ;;  %v792_v11 = vsub.f32 %v8323_v20, %v13060_v12  ;;  %v13422_v10 = vand.u32 4294901760, %v8065_v59  ;;  %v809_v59 = vand.u32 4294901760, %v8369_v54  ;;  %v13423_v16 = vand.u32 4294901760, %v8070_v61  ;;  %v149_v61 = vld [vmem:[%s13015_s0 + $0x8] sm:$0xff] }
  0x58   :  { %252 = vmatmul.f32.gmra.mxu0 %v251_v47  ;;  %369 = vmatmul.f32.gmra.mxu1 %v8173_v33  ;;  %v8377_v47 = vand.u32 4294901760, %v148_v43  ;;  %v8390_v12 = vsub.f32 %v154_v4, %v8362_v18  ;;  %v804_v4 = vsub.f32 %v8353_v5, %v803_v63 }
  0x59   :  { %671 = vmatpush.msrb.mxu2 %v8239_v30  ;;  %776 = vmatpush.msrb.mxu3 %v775_v40  ;;  %v798_v40 = vsub.f32 %v8335_v19, %v797_v51 }
  0x5a   :  { %508 = vmatmul.f32.gmra.mxu3 %v13421_v9  ;;  %561 = vmatpush.msrb.mxu0 %v13422_v10  ;;  %v259_v9 = vand.u32 4294901760, %v258_v38  ;;  %v8401_v10 = vsub.f32 %v148_v43, %v8377_v47  ;;  %v815_v43 = vand.u32 4294901760, %v8390_v12  ;;  %v8421_v38 = vand.u32 4294901760, %v149_v61 }
  0x5b   :  { %446 = vmatmul.f32.gmra.mxu2 %v8256_v14  ;;  %616 = vmatpush.msrb.mxu1 %v7980_v17  ;;  %v793_v14 = vand.u32 4294901760, %v792_v11  ;;  %v8398_v17 = vsub.f32 %v153_v29, %v8375_v52  ;;  %v799_v29 = vand.u32 4294901760, %v798_v40  ;;  %v805_v11 = vand.u32 4294901760, %v804_v4 }
  0x5c   :  { %673 = vmatpush.msrb.mxu2 %v8258_v13  ;;  %782 = vmatpush.msrb.mxu3 %v781_v27  ;;  %v816_v40 = vsub.f32 %v8390_v12, %v815_v43 }
  0x5d   :  { %565 = vmatpush.msrb.mxu0 %v13423_v16  ;;  %618 = vmatpush.msrb.mxu1 %v7996_v25  ;;  %v13424_v25 = vand.u32 4294901760, %v8091_v26  ;;  %v821_v27 = vand.u32 4294901760, %v8398_v17  ;;  %v690_v26 = vand.u32 4294901760, %v8401_v10  ;;  %v13426_v16 = vand.u32 4294901760, %v8126_v56  ;;  %v150_v56 = vld [vmem:[%s13015_s0 + $0x10] sm:$0xff] }
  0x5e   :  { %675 = vmatpush.msrb.mxu2 %v8276_v3  ;;  %788 = vmatpush.msrb.mxu3 %v787_v31  ;;  %v810_v31 = vsub.f32 %v8369_v54, %v809_v59 }
  0x5f   :  { %569 = vmatpush.msrb.mxu0 %v13424_v25  ;;  %620 = vmatpush.msrb.mxu1 %v8000_v28  ;;  %v13425_v28 = vand.u32 4294901760, %v8111_v44  ;;  %v691_v44 = vsub.f32 %v8401_v10, %v690_v26  ;;  %v8456_v25 = vand.u32 4294901760, %v150_v56 }
  0x60   :  { %260 = vmatmul.f32.gmra.mxu0 %v259_v9  ;;  %373 = vmatmul.f32.gmra.mxu1 %v8236_v1  ;;  %v811_v9 = vand.u32 4294901760, %v810_v31  ;;  %v151_v31 = vld [vmem:[%s13015_s0 + $0x18] sm:$0xff] }
  0x61   :  { %677 = vmatpush.msrb.mxu2 %v8295_v55  ;;  %794 = vmatpush.msrb.mxu3 %v793_v14  ;;  %v8443_v14 = vsub.f32 %v149_v61, %v8421_v38  ;;  %v692_v4 = vand.u32 4294901760, %v691_v44 }
  0x62   :  { %573 = vmatpush.msrb.mxu0 %v13425_v28  ;;  %622 = vmatpush.msrb.mxu1 %v8018_v34  ;;  %v822_v34 = vsub.f32 %v8398_v17, %v821_v27  ;;  %v13430_v28 = vld [vmem:[#allocation27_spill] sm:$0xff] }
  0x63   :  { %679 = vmatpush.msrb.mxu2 %v8307_v23  ;;  %800 = vmatpush.msrb.mxu3 %v799_v29  ;;  %v698_v61 = vand.u32 4294901760, %v8443_v14  ;;  %v8467_v29 = vsub.f32 %v150_v56, %v8456_v25  ;;  %v13433_v44 = vand.u32 4294901760, %v13430_v28 }
  0x64   :  { %451 = vmatmul.f32.gmra.mxu2 %v8315_v53  ;;  %514 = vmatmul.f32.gmra.mxu3 %v257_v32  ;;  %v817_v53 = vand.u32 4294901760, %v816_v40  ;;  %v823_v32 = vand.u32 4294901760, %v822_v34  ;;  %v13432_v40 = vld [vmem:[#allocation26_spill] sm:$0xff]  ;;  %v8482_v34 = vand.u32 4294901760, %v151_v31 }
  0x65   :  { %577 = vmatpush.msrb.mxu0 %v13426_v16  ;;  %624 = vmatpush.msrb.mxu1 %v8038_v46  ;;  %v13427_v46 = vand.u32 4294901760, %v8139_v62  ;;  %v699_v62 = vsub.f32 %v8443_v14, %v698_v61  ;;  %v706_v16 = vand.u32 4294901760, %v8467_v29 }
  0x66   :  { %681 = vmatpush.msrb.mxu2 %v8329_v15  ;;  %806 = vmatpush.msrb.mxu3 %v805_v11  ;;  %v13431_v11 = vand.u32 4294901760, %v8129_v57  ;;  %v8497_v56 = vsub.f32 %v151_v31, %v8482_v34 }
  0x67   :  { %581 = vmatpush.msrb.mxu0 %v13427_v46  ;;  %626 = vmatpush.msrb.mxu1 %v8045_v48  ;;  %v13428_v48 = vld [vmem:[#allocation24_spill] sm:$0xff] }
  0x68   :  { %683 = vmatpush.msrb.mxu2 %v8342_v21  ;;  %812 = vmatpush.msrb.mxu3 %v811_v9  ;;  %v700_v9 = vand.u32 4294901760, %v699_v62  ;;  %v13435_v46 = vld [vmem:[#allocation28_spill] sm:$0xff]  ;;  %v13440_v62 = vand.u32 4294901760, %v8267_v41 }
  0x69   :  { %377 = vmatmul.f32.gmra.mxu1 %v8289_v35  ;;  %583 = vmatmul.f32.vlgmr.msrb.gmra.mxu0 %v8079_v2 }
  0x6a   :  { %628 = vmatpush.msrb.mxu1 %v8062_v58  ;;  %685 = vmatpush.msrb.mxu2 %v8362_v18  ;;  %v13429_v58 = vld [vmem:[#allocation25_spill] sm:$0xff] }
  0x6b   :  { %818 = vmatpush.msrb.mxu3 %v817_v53  ;;  %848 = vmatpush.msra.mxu0 %v8129_v57  ;;  %v13434_v57 = vand.u32 4294901760, %v8179_v24 }
  0x6c   :  { %630 = vmatpush.msrb.mxu1 %v13428_v48  ;;  %687 = vmatpush.msrb.mxu2 %v8375_v52 }
  0x6d   :  { %824 = vmatpush.msrb.mxu3 %v823_v32  ;;  %693 = vmatmul.f32.vlgmr.msrb.gmra.mxu2 %v692_v4  ;;  %v714_v32 = vand.u32 4294901760, %v8497_v56 }
  0x6e   :  { %826 = vmatmul.f32.vlgmr.msrb.gmra.mxu3 %v8377_v47  ;;  %632 = vmatpush.msrb.mxu1 %v13429_v58  ;;  %v13443_v58 = vand.u32 4294901760, %v8323_v20 }
  0x6f   :  { %851 = vmatpush.msra.mxu0 %v13430_v28  ;;  %986 = vmatpush.msra.mxu2 %v13431_v11 }
  0x70   :  { %634 = vmatpush.msrb.mxu1 %v13432_v40  ;;  %1069 = vmatpush.msra.mxu3 %v8102_v37 }
  0x71   :  { %587 = vmatmul.f32.gmra.mxu0 %v8116_v49  ;;  %636 = vmatmul.f32.vlgmr.msrb.gmra.mxu1 %v8079_v2  ;;  %v707_v2 = vsub.f32 %v8467_v29, %v706_v16 }
  0x72   :  { %854 = vmatpush.msra.mxu0 %v8179_v24  ;;  %990 = vmatpush.msra.mxu2 %v13433_v44  ;;  %v152_v24 = vld [vmem:[%s13015_s0 + $0x20] sm:$0x1] }
  0x73   :  { %1071 = vmatpush.msra.mxu3 %v8118_v50  ;;  %921 = vmatpush.msra.mxu1 %v8102_v37  ;;  %v13436_v37 = vand.u32 4294901760, %v8193_v60  ;;  %v708_v53 = vand.u32 4294901760, %v707_v2 }
  0x74   :  { %857 = vmatpush.msra.mxu0 %v8193_v60  ;;  %994 = vmatpush.msra.mxu2 %v13434_v57  ;;  %v13437_v60 = vand.u32 4294901760, %v13435_v46  ;;  %v1133_v57 = vld [vmem:[#allocation6 + $0x130] sm:$0xff] }
  0x75   :  { %701 = vmatmul.f32.gmra.mxu2 %v700_v9  ;;  %1073 = vmatpush.msra.mxu3 %v8155_v39  ;;  %v1134_v9 = vld [vmem:[#allocation6 + $0x138] sm:$0xff] }
  0x76   :  { %830 = vmatmul.f32.gmra.mxu3 %v8421_v38  ;;  %860 = vmatpush.msra.mxu0 %v13435_v46  ;;  %v8665_v46 = vand.u32 4294901760, %v1134_v9 }
  0x77   :  { %923 = vmatpush.msra.mxu1 %v8118_v50  ;;  %998 = vmatpush.msra.mxu2 %v13436_v37  ;;  %v8514_v50 = vand.u32 4294901760, %v152_v24 }
  0x78   :  { %863 = vmatpush.msra.mxu0 %v8234_v0  ;;  %1075 = vmatpush.msra.mxu3 %v8165_v42 }
  0x79   :  { %591 = vmatmul.f32.gmra.mxu0 %v8173_v33  ;;  %640 = vmatmul.f32.gmra.mxu1 %v8116_v49  ;;  %v715_v49 = vsub.f32 %v8497_v56, %v714_v32  ;;  %v8529_v4 = vsub.f32 %v152_v24, %v8514_v50 }
  0x7a   :  { %866 = vmatpush.msra.mxu0 %v8248_v36  ;;  %925 = vmatpush.msra.mxu1 %v8155_v39  ;;  %v13438_v39 = vand.u32 4294901760, %v8234_v0 }
  0x7b   :  { %1002 = vmatpush.msra.mxu2 %v13437_v60  ;;  %1077 = vmatpush.msra.mxu3 %v8188_v22  ;;  %v716_v48 = vand.u32 4294901760, %v715_v49  ;;  %v722_v0 = vand.u32 4294901760, %v8529_v4  ;;  %v8677_v60 = vand.u32 4294901760, %v1133_v57  ;;  %v1132_v49 = vld [vmem:[#allocation6 + $0x128] sm:$0xff] }
  0x7c   :  { %869 = vmatpush.msra.mxu0 %v8267_v41  ;;  %927 = vmatpush.msra.mxu1 %v8165_v42  ;;  %v13439_v42 = vand.u32 4294901760, %v8248_v36  ;;  %v13442_v36 = vand.u32 4294901760, %v8302_v7  ;;  %v1141_v41 = vld [vmem:[#allocation6 + $0x170] sm:$0xff] }
  0x7d   :  { %709 = vmatmul.f32.gmra.mxu2 %v708_v53  ;;  %1079 = vmatpush.msra.mxu3 %v8210_v45 }
  0x7e   :  { %834 = vmatmul.f32.gmra.mxu3 %v8456_v25  ;;  %1006 = vmatpush.msra.mxu2 %v13438_v39 }
  0x7f   :  { %872 = vmatpush.msra.mxu0 %v8287_v8  ;;  %929 = vmatpush.msra.mxu1 %v8188_v22  ;;  %v13441_v22 = vand.u32 4294901760, %v8287_v8 }
  0x80   :  { %1010 = vmatpush.msra.mxu2 %v13439_v42  ;;  %1081 = vmatpush.msra.mxu3 %v8223_v6 }
  0x81   :  { %595 = vmatmul.f32.gmra.mxu0 %v8236_v1  ;;  %644 = vmatmul.f32.gmra.mxu1 %v8173_v33  ;;  %v723_v33 = vsub.f32 %v8529_v4, %v722_v0 }
  0x82   :  { %875 = vmatpush.msra.mxu0 %v8302_v7  ;;  %931 = vmatpush.msra.mxu1 %v8210_v45  ;;  %v1142_v45 = vld [vmem:[#allocation6 + $0x178] sm:$0xff]  ;;  %v1139_v7 = vld [vmem:[#allocation6 + $0x160] sm:$0xff] }
  0x83   :  { %1014 = vmatpush.msra.mxu2 %v13440_v62  ;;  %1083 = vmatpush.msra.mxu3 %v8239_v30  ;;  %v724_v8 = vand.u32 4294901760, %v723_v33  ;;  %v1131_v62 = vld [vmem:[#allocation6 + $0x120] sm:$0xff]  ;;  %v8692_v33 = vand.u32 4294901760, %v1132_v49 }
  0x84   :  { %878 = vmatpush.msra.mxu0 %v8323_v20  ;;  %933 = vmatpush.msra.mxu1 %v8223_v6  ;;  %v8560_v6 = vand.u32 4294901760, %v1142_v45 }
  0x85   :  { %717 = vmatmul.f32.gmra.mxu2 %v716_v48  ;;  %1085 = vmatpush.msra.mxu3 %v8258_v13  ;;  %v8688_v48 = vsub.f32 %v1134_v9, %v8665_v46  ;;  %v1127_v9 = vld [vmem:[#allocation6 + $0x100] sm:$0xff] }
  0x86   :  { %838 = vmatmul.f32.gmra.mxu3 %v8482_v34  ;;  %1018 = vmatpush.msra.mxu2 %v13441_v22 }
  0x87   :  { %881 = vmatpush.msra.mxu0 %v8335_v19  ;;  %935 = vmatpush.msra.mxu1 %v8239_v30  ;;  %v1140_v30 = vld [vmem:[#allocation6 + $0x168] sm:$0xff] }
  0x88   :  { %1022 = vmatpush.msra.mxu2 %v13442_v36  ;;  %1087 = vmatpush.msra.mxu3 %v8276_v3  ;;  %v1121_v36 = vld [vmem:[%s13015_s0 + $0x2] sm:$0xff] }
  0x89   :  { %599 = vmatmul.f32.gmra.mxu0 %v8289_v35  ;;  %648 = vmatmul.f32.gmra.mxu1 %v8236_v1  ;;  %v8572_v1 = vand.u32 4294901760, %v1141_v41 }
  0x8a   :  { %884 = vmatpush.msra.mxu0 %v8353_v5  ;;  %937 = vmatpush.msra.mxu1 %v8258_v13  ;;  %v8575_v13 = vsub.f32 %v1142_v45, %v8560_v6  ;;  %v1138_v5 = vld [vmem:[#allocation6 + $0x158] sm:$0xff]  ;;  %v8700_v45 = vsub.f32 %v1133_v57, %v8677_v60 }
  0x8b   :  { %1026 = vmatpush.msra.mxu2 %v13443_v58  ;;  %1089 = vmatpush.msra.mxu3 %v8295_v55  ;;  %v8588_v20 = vsub.f32 %v1141_v41, %v8572_v1  ;;  %v1130_v41 = vld [vmem:[#allocation6 + $0x118] sm:$0xff] }
  0x8c   :  { %887 = vmatpush.msra.mxu0 %v8369_v54  ;;  %939 = vmatpush.msra.mxu1 %v8276_v3  ;;  %v8583_v3 = vand.u32 4294901760, %v1140_v30  ;;  %v13076_v19 = vand.u32 4294901760, %v8575_v13  ;;  %v1137_v54 = vld [vmem:[#allocation6 + $0x150] sm:$0xff]  ;;  %v1634_v57 = vld [vmem:[#allocation6 + $0x1f8] sm:$0xff] }
  0x8d   :  { %1030 = vmatpush.msra.mxu2 %v797_v51  ;;  %1091 = vmatpush.msra.mxu3 %v8307_v23  ;;  %v8606_v51 = vand.u32 4294901760, %v1138_v5 }
  0x8e   :  { %725 = vmatmul.f32.gmra.mxu2 %v724_v8  ;;  %842 = vmatmul.f32.gmra.mxu3 %v8514_v50  ;;  %v8707_v8 = vand.u32 4294901760, %v1131_v62 }
  0x8f   :  { %890 = vmatpush.msra.mxu0 %v8390_v12  ;;  %941 = vmatpush.msra.mxu1 %v8295_v55  ;;  %v8594_v55 = vand.u32 4294901760, %v1139_v7  ;;  %v1136_v12 = vld [vmem:[#allocation6 + $0x148] sm:$0xff] }
  0x90   :  { %1034 = vmatpush.msra.mxu2 %v803_v63  ;;  %1093 = vmatpush.msra.mxu3 %v8329_v15  ;;  %v13072_v63 = vand.u32 4294901760, %v8588_v20 }
  0x91   :  { %893 = vmatpush.msra.mxu0 %v8398_v17  ;;  %943 = vmatpush.msra.mxu1 %v8307_v23  ;;  %v8602_v23 = vsub.f32 %v1140_v30, %v8583_v3  ;;  %v13063_v30 = vand.u32 4294901760, %v8688_v48 }
  0x92   :  { %1038 = vmatpush.msra.mxu2 %v809_v59  ;;  %1095 = vmatpush.msra.mxu3 %v8342_v21  ;;  %v8622_v59 = vand.u32 4294901760, %v1137_v54  ;;  %v1225_v17 = vsub.f32 %v8588_v20, %v13072_v63 }
  0x93   :  { %652 = vmatmul.f32.gmra.mxu1 %v8289_v35  ;;  %896 = vmatmul.f32.vlgmr.msra.gmra.mxu0 %v8401_v10  ;;  %v1219_v35 = vsub.f32 %v8575_v13, %v13076_v19 }
  0x94   :  { %945 = vmatpush.msra.mxu1 %v8329_v15  ;;  %1042 = vmatpush.msra.mxu2 %v815_v43  ;;  %v8616_v15 = vsub.f32 %v1139_v7, %v8594_v55  ;;  %v13071_v43 = vand.u32 4294901760, %v8602_v23  ;;  %v8647_v28 = vsub.f32 %v1137_v54, %v8622_v59  ;;  %v1226_v11 = vand.u32 4294901760, %v1225_v17 }
  0x95   :  { %1097 = vmatpush.msra.mxu3 %v8362_v18  ;;  %1144 = vmatpush.msrb.mxu0 %v8560_v6  ;;  %v8719_v54 = vand.u32 4294901760, %v1121_v36  ;;  %v8730_v17 = vsub.f32 %v1131_v62, %v8707_v8 }
  0x96   :  { %947 = vmatpush.msra.mxu1 %v8342_v21  ;;  %1046 = vmatpush.msra.mxu2 %v821_v27  ;;  %v1220_v21 = vand.u32 4294901760, %v1219_v35  ;;  %v8631_v27 = vsub.f32 %v1138_v5, %v8606_v51  ;;  %v13070_v31 = vand.u32 4294901760, %v8616_v15  ;;  %v13067_v37 = vand.u32 4294901760, %v8647_v28  ;;  %v1129_v35 = vld [vmem:[#allocation6 + $0x110] sm:$0xff] }
  0x97   :  { %1099 = vmatpush.msra.mxu3 %v8375_v52  ;;  %1048 = vmatmul.f32.vlgmr.msra.gmra.mxu2 %v8377_v47  ;;  %v8717_v5 = vsub.f32 %v1132_v49, %v8692_v33  ;;  %v1122_v49 = vld [vmem:[%s13015_s0 + $0xa] sm:$0xff]  ;;  %v13064_v62 = vand.u32 4294901760, %v8730_v17 }
  0x98   :  { %1101 = vmatmul.f32.vlgmr.msra.gmra.mxu3 %v8377_v47  ;;  %949 = vmatpush.msra.mxu1 %v8362_v18  ;;  %v8635_v18 = vand.u32 4294901760, %v1136_v12  ;;  %v1135_v47 = vld [vmem:[#allocation6 + $0x140] sm:$0xff]  ;;  %v13069_v10 = vand.u32 4294901760, %v8631_v27  ;;  %v1249_v42 = vsub.f32 %v8647_v28, %v13067_v37 }
  0x99   :  { %1146 = vmatpush.msrb.mxu0 %v8572_v1  ;;  %1335 = vmatpush.msrb.mxu2 %v8575_v13  ;;  %v8650_v40 = vand.u32 4294901760, %v1135_v47 }
  0x9a   :  { %951 = vmatpush.msra.mxu1 %v8375_v52  ;;  %1408 = vmatpush.msrb.mxu3 %v8560_v6  ;;  %v1231_v52 = vsub.f32 %v8602_v23, %v13071_v43  ;;  %v8659_v44 = vsub.f32 %v1136_v12, %v8635_v18  ;;  %v1243_v24 = vsub.f32 %v8631_v27, %v13069_v10  ;;  %v1250_v58 = vand.u32 4294901760, %v1249_v42 }
  0x9b   :  { %901 = vmatmul.f32.gmra.mxu0 %v8443_v14  ;;  %955 = vmatmul.f32.vlgmr.msra.gmra.mxu1 %v690_v26  ;;  %v1237_v26 = vsub.f32 %v8616_v15, %v13070_v31  ;;  %v8673_v53 = vsub.f32 %v1135_v47, %v8650_v40  ;;  %v8723_v12 = vand.u32 4294901760, %v1130_v41  ;;  %v1128_v47 = vld [vmem:[#allocation6 + $0x108] sm:$0xff]  ;;  %v8758_v42 = vand.u32 4294901760, %v1127_v9  ;;  %v1630_v31 = vld [vmem:[#allocation6 + $0x1d8] sm:$0xff] }
  0x9c   :  { %1148 = vmatpush.msrb.mxu0 %v8583_v3  ;;  %1338 = vmatpush.msrb.mxu2 %v8588_v20  ;;  %v1232_v2 = vand.u32 4294901760, %v1231_v52  ;;  %v13066_v39 = vand.u32 4294901760, %v8659_v44  ;;  %v1244_v22 = vand.u32 4294901760, %v1243_v24  ;;  %v1267_v52 = vsub.f32 %v8688_v48, %v13063_v30 }
  0x9d   :  { %1410 = vmatpush.msrb.mxu3 %v8572_v1  ;;  %1221 = vmatpush.msrb.mxu1 %v1220_v21  ;;  %v13065_v14 = vand.u32 4294901760, %v8673_v53  ;;  %v13061_v21 = vand.u32 4294901760, %v8700_v45  ;;  %v8748_v24 = vand.u32 4294901760, %v1128_v47  ;;  %13446 = vst [vmem:[#allocation27_spill] sm:$0xff] %v8758_v42 }
  0x9e   :  { %1150 = vmatpush.msrb.mxu0 %v8594_v55  ;;  %1341 = vmatpush.msrb.mxu2 %v8602_v23 }
  0x9f   :  { %1052 = vmatmul.f32.gmra.mxu2 %v8421_v38  ;;  %1412 = vmatpush.msrb.mxu3 %v8583_v3  ;;  %v1261_v7 = vsub.f32 %v8673_v53, %v13065_v14  ;;  %13445 = vst [vmem:[#allocation25_spill] sm:$0xff] %v8748_v24 }
  0xa0   :  { %1105 = vmatmul.f32.gmra.mxu3 %v8421_v38  ;;  %1152 = vmatpush.msrb.mxu0 %v8606_v51  ;;  %v1238_v38 = vand.u32 4294901760, %v1237_v26  ;;  %v8742_v26 = vsub.f32 %v1121_v36, %v8719_v54  ;;  %v8766_v36 = vand.u32 4294901760, %v1634_v57 }
  0xa1   :  { %1227 = vmatpush.msrb.mxu1 %v1226_v11  ;;  %1344 = vmatpush.msrb.mxu2 %v8616_v15  ;;  %v8736_v11 = vand.u32 4294901760, %v1129_v35 }
  0xa2   :  { %1154 = vmatpush.msrb.mxu0 %v8622_v59  ;;  %1414 = vmatpush.msrb.mxu3 %v8594_v55 }
  0xa3   :  { %906 = vmatmul.f32.gmra.mxu0 %v8467_v29  ;;  %961 = vmatmul.f32.gmra.mxu1 %v698_v61  ;;  %v1255_v61 = vsub.f32 %v8659_v44, %v13066_v39  ;;  %13444 = vst [vmem:[#allocation24_spill] sm:$0xff] %v8736_v11  ;;  %v1262_v29 = vand.u32 4294901760, %v1261_v7  ;;  %v13074_v7 = vand.u32 4294901760, %v8742_v26 }
  0xa4   :  { %1156 = vmatpush.msrb.mxu0 %v8635_v18  ;;  %1233 = vmatpush.msrb.mxu1 %v1232_v2  ;;  %v1273_v2 = vsub.f32 %v8700_v45, %v13061_v21  ;;  %v1632_v21 = vld [vmem:[#allocation6 + $0x1e8] sm:$0xff] }
  0xa5   :  { %1347 = vmatpush.msrb.mxu2 %v8631_v27  ;;  %1416 = vmatpush.msrb.mxu3 %v8606_v51 }
  0xa6   :  { %1158 = vmatpush.msrb.mxu0 %v8650_v40  ;;  %1239 = vmatpush.msrb.mxu1 %v1238_v38  ;;  %v8751_v38 = vsub.f32 %v1130_v41, %v8723_v12  ;;  %v1633_v41 = vld [vmem:[#allocation6 + $0x1f0] sm:$0xff] }
  0xa7   :  { %1056 = vmatmul.f32.gmra.mxu2 %v8456_v25  ;;  %1418 = vmatpush.msrb.mxu3 %v8622_v59  ;;  %v8790_v30 = vand.u32 4294901760, %v1633_v41 }
  0xa8   :  { %1109 = vmatmul.f32.gmra.mxu3 %v8456_v25  ;;  %1350 = vmatpush.msrb.mxu2 %v8647_v28  ;;  %v1256_v25 = vand.u32 4294901760, %v1255_v61  ;;  %v8764_v61 = vsub.f32 %v1129_v35, %v8736_v11  ;;  %v13068_v35 = vand.u32 4294901760, %v8751_v38 }
  0xa9   :  { %1160 = vmatpush.msrb.mxu0 %v8665_v46  ;;  %1245 = vmatpush.msrb.mxu1 %v1244_v22  ;;  %v1268_v22 = vand.u32 4294901760, %v1267_v52  ;;  %v8779_v52 = vsub.f32 %v1128_v47, %v8748_v24  ;;  %v8819_v37 = vsub.f32 %v1633_v41, %v8790_v30 }
  0xaa   :  { %1353 = vmatpush.msrb.mxu2 %v8659_v44  ;;  %1420 = vmatpush.msrb.mxu3 %v8635_v18  ;;  %v13073_v47 = vand.u32 4294901760, %v8764_v61 }
  0xab   :  { %911 = vmatmul.f32.gmra.mxu0 %v8497_v56  ;;  %967 = vmatmul.f32.gmra.mxu1 %v706_v16  ;;  %v13062_v16 = vand.u32 4294901760, %v8717_v5  ;;  %v13075_v14 = vand.u32 4294901760, %v8779_v52  ;;  %13447 = vst [vmem:[#allocation26_spill] sm:$0xff] %v8819_v37 }
  0xac   :  { %1162 = vmatpush.msrb.mxu0 %v8677_v60  ;;  %1251 = vmatpush.msrb.mxu1 %v1250_v58 }
  0xad   :  { %1356 = vmatpush.msrb.mxu2 %v8673_v53  ;;  %1422 = vmatpush.msrb.mxu3 %v8650_v40  ;;  %v1279_v58 = vsub.f32 %v8717_v5, %v13062_v16  ;;  %v8788_v16 = vsub.f32 %v1127_v9, %v8758_v42 }
  0xae   :  { %1164 = vmatpush.msrb.mxu0 %v8692_v33  ;;  %1257 = vmatpush.msrb.mxu1 %v1256_v25  ;;  %v8773_v25 = vand.u32 4294901760, %v1122_v49 }
  0xaf   :  { %1060 = vmatmul.f32.gmra.mxu2 %v8482_v34  ;;  %1424 = vmatpush.msrb.mxu3 %v8665_v46  ;;  %v1280_v56 = vand.u32 4294901760, %v1279_v58  ;;  %v1123_v58 = vld [vmem:[%s13015_s0 + $0x12] sm:$0xff]  ;;  %v13077_v39 = vand.u32 4294901760, %v8788_v16 }
  0xb0   :  { %1113 = vmatmul.f32.gmra.mxu3 %v8482_v34  ;;  %1359 = vmatpush.msrb.mxu2 %v8688_v48  ;;  %v1274_v34 = vand.u32 4294901760, %v1273_v2  ;;  %v8795_v2 = vsub.f32 %v1634_v57, %v8766_v36  ;;  %v8803_v9 = vsub.f32 %v1122_v49, %v8773_v25  ;;  %v1291_v57 = vsub.f32 %v8751_v38, %v13068_v35 }
  0xb1   :  { %1166 = vmatpush.msrb.mxu0 %v8707_v8  ;;  %1263 = vmatpush.msrb.mxu1 %v1262_v29  ;;  %v1285_v29 = vsub.f32 %v8730_v17, %v13064_v62  ;;  %v8805_v62 = vand.u32 4294901760, %v1632_v21  ;;  %v8831_v43 = vand.u32 4294901760, %v1123_v58 }
  0xb2   :  { %1362 = vmatpush.msrb.mxu2 %v8700_v45  ;;  %1426 = vmatpush.msrb.mxu3 %v8677_v60  ;;  %v13079_v35 = vand.u32 4294901760, %v8795_v2  ;;  %v13080_v41 = vand.u32 4294901760, %v8803_v9 }
  0xb3   :  { %916 = vmatmul.f32.gmra.mxu0 %v8529_v4  ;;  %973 = vmatmul.f32.gmra.mxu1 %v714_v32  ;;  %v1178_v32 = vsub.f32 %v8742_v26, %v13074_v7  ;;  %v1286_v49 = vand.u32 4294901760, %v1285_v29  ;;  %v8834_v63 = vsub.f32 %v1632_v21, %v8805_v62  ;;  %v1629_v7 = vld [vmem:[#allocation6 + $0x1d0] sm:$0xff]  ;;  %v8864_v21 = vsub.f32 %v1123_v58, %v8831_v43  ;;  %v1628_v4 = vld [vmem:[#allocation6 + $0x1c8] sm:$0xff] }
  0xb4   :  { %1168 = vmatpush.msrb.mxu0 %v8723_v12  ;;  %1269 = vmatpush.msrb.mxu1 %v1268_v22  ;;  %v1631_v22 = vld [vmem:[#allocation6 + $0x1e0] sm:$0xff]  ;;  %v13451_v58 = vand.u32 4294901760, %v8819_v37 }
  0xb5   :  { %1365 = vmatpush.msrb.mxu2 %v8717_v5  ;;  %1428 = vmatpush.msrb.mxu3 %v8692_v33  ;;  %v8827_v10 = vand.u32 4294901760, %v1631_v22  ;;  %v1179_v29 = vand.u32 4294901760, %v1178_v32  ;;  %v8846_v32 = vand.u32 4294901760, %v1630_v31 }
  0xb6   :  { %1170 = vmatpush.msrb.mxu0 %v8736_v11  ;;  %1275 = vmatpush.msrb.mxu1 %v1274_v34  ;;  %v1297_v34 = vsub.f32 %v8764_v61, %v13073_v47  ;;  %v1303_v47 = vsub.f32 %v8779_v52, %v13075_v14  ;;  %v1711_v14 = vsub.f32 %v8795_v2, %v13079_v35  ;;  %v13450_v35 = vand.u32 4294901760, %v8575_v13 }
  0xb7   :  { %1368 = vmatpush.msrb.mxu2 %v8730_v17  ;;  %1430 = vmatpush.msrb.mxu3 %v8707_v8  ;;  %13448 = vst [vmem:[#allocation28_spill] sm:$0xff] %v8827_v10  ;;  %v8854_v19 = vsub.f32 %v1631_v22, %v8827_v10  ;;  %v1124_v22 = vld [vmem:[%s13015_s0 + $0x1a] sm:$0xff] }
  0xb8   :  { %1064 = vmatmul.f32.gmra.mxu2 %v8514_v50  ;;  %1117 = vmatmul.f32.gmra.mxu3 %v8514_v50  ;;  %v1292_v50 = vand.u32 4294901760, %v1291_v57  ;;  %v1298_v57 = vand.u32 4294901760, %v1297_v34  ;;  %v8880_v34 = vsub.f32 %v1630_v31, %v8846_v32  ;;  %v13452_v31 = vand.u32 4294901760, %v8834_v63 }
  0xb9   :  { %1172 = vmatpush.msrb.mxu0 %v8748_v24  ;;  %1281 = vmatpush.msrb.mxu1 %v1280_v56  ;;  %v1309_v56 = vsub.f32 %v8788_v16, %v13077_v39  ;;  %v1186_v39 = vsub.f32 %v8803_v9, %v13080_v41  ;;  %v1717_v41 = vsub.f32 %v8819_v37, %v13451_v58  ;;  %v13453_v58 = vand.u32 4294901760, %v8742_v26 }
  0xba   :  { %1371 = vmatpush.msrb.mxu2 %v8751_v38  ;;  %1432 = vmatpush.msrb.mxu3 %v8723_v12  ;;  %v13454_v37 = vand.u32 4294901760, %v8588_v20 }
  0xbb   :  { %1174 = vmatpush.msrb.mxu0 %v8758_v42  ;;  %1287 = vmatpush.msrb.mxu1 %v1286_v49  ;;  %v1187_v13 = vand.u32 4294901760, %v1186_v39  ;;  %v1718_v39 = vand.u32 4294901760, %v1717_v41  ;;  %v13458_v41 = vand.u32 4294901760, %v8864_v21 }
  0xbc   :  { %1374 = vmatpush.msrb.mxu2 %v8764_v61  ;;  %1434 = vmatpush.msrb.mxu3 %v8736_v11  ;;  %v8867_v11 = vand.u32 4294901760, %v1629_v7 }
  0xbd   :  { %979 = vmatmul.f32.gmra.mxu1 %v722_v0  ;;  %1180 = vmatmul.f32.vlgmr.msrb.gmra.mxu0 %v1179_v29  ;;  %v8858_v49 = vpop.f32.mrf.mxu0  ;;  %v1304_v0 = vand.u32 4294901760, %v1303_v47  ;;  %v1310_v29 = vand.u32 4294901760, %v1309_v56  ;;  %v8884_v47 = vand.u32 4294901760, %v1124_v22  ;;  %v1627_v56 = vld [vmem:[#allocation6 + $0x1c0] sm:$0xff] }
  0xbe   :  { %13449 = vst [vmem:[#allocation29_spill] sm:$0xff] %v8858_v49  ;;  %1293 = vmatpush.msrb.mxu1 %v1292_v50  ;;  %1377 = vmatpush.msrb.mxu2 %v8779_v52  ;;  %v1712_v50 = vand.u32 4294901760, %v1711_v14  ;;  %v8895_v14 = vsub.f32 %v1629_v7, %v8867_v11  ;;  %v1626_v49 = vld [vmem:[#allocation6 + $0x1b8] sm:$0xff]  ;;  %v13455_v7 = vand.u32 4294901760, %v8854_v19 }
  0xbf   :  { %1436 = vmatpush.msrb.mxu3 %v8748_v24  ;;  %1473 = vmatpush.msra.mxu0 %v13450_v35  ;;  %v8886_v24 = vand.u32 4294901760, %v1628_v4 }
  0xc0   :  { %1299 = vmatpush.msrb.mxu1 %v1298_v57  ;;  %1380 = vmatpush.msrb.mxu2 %v8788_v16  ;;  %v1723_v57 = vsub.f32 %v8834_v63, %v13452_v31  ;;  %v1729_v31 = vsub.f32 %v8854_v19, %v13455_v7  ;;  %v8923_v7 = vand.u32 4294901760, %v1626_v49 }
  0xc1   :  { %1438 = vmatpush.msrb.mxu3 %v8758_v42  ;;  %1383 = vmatmul.f32.vlgmr.msrb.gmra.mxu2 %v8742_v26  ;;  %v8903_v42 = vand.u32 4294901760, %v1627_v56  ;;  %v8909_v26 = vsub.f32 %v1124_v22, %v8884_v47  ;;  %v1625_v22 = vld [vmem:[#allocation6 + $0x1b0] sm:$0xff] }
  0xc2   :  { %1442 = vmatmul.f32.vlgmr.msrb.gmra.mxu3 %v13453_v58  ;;  %1305 = vmatpush.msrb.mxu1 %v1304_v0  ;;  %v8912_v0 = vsub.f32 %v1628_v4, %v8886_v24  ;;  %v13459_v4 = vand.u32 4294901760, %v8602_v23  ;;  %v1730_v58 = vand.u32 4294901760, %v1729_v31  ;;  %v13465_v31 = vand.u32 4294901760, %v8803_v9 }
  0xc3   :  { %1477 = vmatpush.msra.mxu0 %v13454_v37  ;;  %1636 = vmatpush.msra.mxu2 %v8766_v36  ;;  %v8940_v23 = vsub.f32 %v1627_v56, %v8903_v42  ;;  %v13464_v56 = vand.u32 4294901760, %v8895_v14 }
  0xc4   :  { %1311 = vmatpush.msrb.mxu1 %v1310_v29  ;;  %1713 = vmatpush.msra.mxu3 %v1712_v50  ;;  %v1194_v29 = vsub.f32 %v8864_v21, %v13458_v41  ;;  %v1724_v50 = vand.u32 4294901760, %v1723_v57  ;;  %v13462_v57 = vand.u32 4294901760, %v8880_v34 }
  0xc5   :  { %1188 = vmatmul.f32.gmra.mxu0 %v1187_v13  ;;  %1313 = vmatmul.f32.vlgmr.msrb.gmra.mxu1 %v8719_v54  ;;  %v8915_v20 = vpop.f32.mrf.mxu0  ;;  %v8917_v37 = vpop.f32.mrf.mxu1 }
  0xc6   :  { %13456 = vst [vmem:[#allocation30_spill] sm:$0xff] %v8915_v20  ;;  %1481 = vmatpush.msra.mxu0 %v13459_v4  ;;  %v8927_v13 = vpop.f32.mrf.mxu2  ;;  %v8929_v35 = vpop.f32.mrf.mxu3  ;;  %1638 = vmatpush.msra.mxu2 %v8790_v30  ;;  %v1125_v20 = vld [vmem:[%s13015_s0 + $0x22] sm:$0x1]  ;;  %v1735_v41 = vsub.f32 %v8880_v34, %v13462_v57  ;;  %v13463_v4 = vand.u32 4294901760, %v8616_v15  ;;  %v1741_v57 = vsub.f32 %v8895_v14, %v13464_v56 }
  0xc7   :  { %13457 = vst [vmem:[#allocation31_spill] sm:$0xff] %v8917_v37  ;;  %1719 = vmatpush.msra.mxu3 %v1718_v39  ;;  %1556 = vmatpush.msra.mxu1 %v8560_v6  ;;  %v8947_v39 = vand.u32 4294901760, %v1625_v22  ;;  %v1624_v6 = vld [vmem:[#allocation6 + $0x1a8] sm:$0xff]  ;;  %v1195_v37 = vand.u32 4294901760, %v1194_v29  ;;  %v8954_v15 = vsub.f32 %v1626_v49, %v8923_v7  ;;  %v13467_v49 = vand.u32 4294901760, %v8647_v28 }
  0xc8   :  { %13460 = vst [vmem:[#allocation32_spill] sm:$0xff] %v8927_v13  ;;  %1485 = vmatpush.msra.mxu0 %v13463_v4  ;;  %1640 = vmatpush.msra.mxu2 %v8805_v62  ;;  %v8956_v4 = vand.u32 4294901760, %v1125_v20  ;;  %v13466_v13 = vand.u32 4294901760, %v8631_v27  ;;  %v1736_v29 = vand.u32 4294901760, %v1735_v41  ;;  %v8965_v56 = vand.u32 4294901760, %v1624_v6 }
  0xc9   :  { %13461 = vst [vmem:[#allocation33_spill] sm:$0xff] %v8929_v35  ;;  %1388 = vmatmul.f32.gmra.mxu2 %v8803_v9  ;;  %1725 = vmatpush.msra.mxu3 %v1724_v50  ;;  %v1623_v35 = vld [vmem:[#allocation6 + $0x1a0] sm:$0xff]  ;;  %v13468_v9 = vand.u32 4294901760, %v8909_v26  ;;  %v13469_v27 = vand.u32 4294901760, %v8912_v0  ;;  %v1742_v28 = vand.u32 4294901760, %v1741_v57  ;;  %v13475_v57 = vand.u32 4294901760, %v8940_v23 }
  0xca   :  { %1448 = vmatmul.f32.gmra.mxu3 %v13465_v31  ;;  %1489 = vmatpush.msra.mxu0 %v13466_v13 }
  0xcb   :  { %1558 = vmatpush.msra.mxu1 %v8572_v1  ;;  %1642 = vmatpush.msra.mxu2 %v8827_v10  ;;  %v1202_v31 = vsub.f32 %v8909_v26, %v13468_v9  ;;  %v1747_v13 = vsub.f32 %v8912_v0, %v13469_v27  ;;  %v8976_v1 = vsub.f32 %v1625_v22, %v8947_v39  ;;  %v8987_v9 = vand.u32 4294901760, %v1623_v35  ;;  %v1622_v10 = vld [vmem:[#allocation6 + $0x198] sm:$0xff] }
  0xcc   :  { %1493 = vmatpush.msra.mxu0 %v13467_v49  ;;  %1731 = vmatpush.msra.mxu3 %v1730_v58  ;;  %v8985_v49 = vsub.f32 %v1125_v20, %v8956_v4  ;;  %v13472_v27 = vand.u32 4294901760, %v8659_v44  ;;  %v1753_v20 = vsub.f32 %v8940_v23, %v13475_v57  ;;  %v9001_v58 = vsub.f32 %v1624_v6, %v8965_v56 }
  0xcd   :  { %1196 = vmatmul.f32.gmra.mxu0 %v1195_v37  ;;  %1317 = vmatmul.f32.gmra.mxu1 %v8773_v25  ;;  %v8979_v41 = vpop.f32.mrf.mxu0  ;;  %v8981_v50 = vpop.f32.mrf.mxu1  ;;  %v13476_v44 = vand.u32 4294901760, %v8673_v53  ;;  %v13477_v57 = vand.u32 4294901760, %v8954_v15  ;;  %v9015_v53 = vsub.f32 %v1623_v35, %v8987_v9 }
  0xce   :  { %13470 = vst [vmem:[#allocation34_spill] sm:$0xff] %v8979_v41  ;;  %1497 = vmatpush.msra.mxu0 %v13472_v27  ;;  %1560 = vmatpush.msra.mxu1 %v8583_v3  ;;  %v8992_v37 = vpop.f32.mrf.mxu2  ;;  %v8994_v22 = vpop.f32.mrf.mxu3  ;;  %v1621_v41 = vld [vmem:[#allocation6 + $0x190] sm:$0xff]  ;;  %v1748_v3 = vand.u32 4294901760, %v1747_v13  ;;  %v13087_v27 = vand.u32 4294901760, %v8976_v1 }
  0xcf   :  { %13471 = vst [vmem:[#allocation35_spill] sm:$0xff] %v8981_v50  ;;  %1644 = vmatpush.msra.mxu2 %v8846_v32  ;;  %1737 = vmatpush.msra.mxu3 %v1736_v29  ;;  %v1203_v29 = vand.u32 4294901760, %v1202_v31  ;;  %v1759_v6 = vsub.f32 %v8954_v15, %v13477_v57  ;;  %v9020_v13 = vand.u32 4294901760, %v1621_v41  ;;  %v1754_v31 = vand.u32 4294901760, %v1753_v20 }
  0xd0   :  { %13473 = vst [vmem:[#allocation36_spill] sm:$0xff] %v8992_v37  ;;  %1501 = vmatpush.msra.mxu0 %v13476_v44  ;;  %1562 = vmatpush.msra.mxu1 %v8594_v55  ;;  %v13088_v37 = vand.u32 4294901760, %v8985_v49  ;;  %v13478_v55 = vand.u32 4294901760, %v8864_v21  ;;  %v1620_v44 = vld [vmem:[#allocation6 + $0x188] sm:$0xff]  ;;  %v13482_v57 = vand.u32 4294901760, %v8700_v45 }
  0xd1   :  { %13474 = vst [vmem:[#allocation37_spill] sm:$0xff] %v8994_v22  ;;  %v9007_v22 = vand.u32 4294901760, %v1622_v10  ;;  %1393 = vmatmul.f32.gmra.mxu2 %v8864_v21  ;;  %1743 = vmatpush.msra.mxu3 %v1742_v28  ;;  %v13479_v28 = vand.u32 4294901760, %v8688_v48  ;;  %v1765_v21 = vsub.f32 %v8976_v1, %v13087_v27  ;;  %v1613_v48 = vld [vmem:[%s13015_s0 + $0x3] sm:$0xff]  ;;  %v9045_v27 = vand.u32 4294901760, %v1620_v44 }
  0xd2   :  { %1454 = vmatmul.f32.gmra.mxu3 %v13478_v55  ;;  %1646 = vmatpush.msra.mxu2 %v8867_v11  ;;  %v1619_v55 = vld [vmem:[#allocation6 + $0x180] sm:$0xff]  ;;  %v9063_v45 = vand.u32 4294901760, %v1613_v48 }
  0xd3   :  { %1505 = vmatpush.msra.mxu0 %v13479_v28  ;;  %1564 = vmatpush.msra.mxu1 %v8606_v51  ;;  %v9031_v35 = vsub.f32 %v1622_v10, %v9007_v22  ;;  %v1210_v28 = vsub.f32 %v8985_v49, %v13088_v37  ;;  %v9061_v10 = vand.u32 4294901760, %v1619_v55 }
  0xd4   :  { %1648 = vmatpush.msra.mxu2 %v8886_v24  ;;  %1749 = vmatpush.msra.mxu3 %v1748_v3  ;;  %v1760_v3 = vand.u32 4294901760, %v1759_v6  ;;  %v13485_v6 = vand.u32 4294901760, %v9001_v58 }
  0xd5   :  { %1204 = vmatmul.f32.gmra.mxu0 %v1203_v29  ;;  %1321 = vmatmul.f32.gmra.mxu1 %v8831_v43  ;;  %v9037_v51 = vpop.f32.mrf.mxu0  ;;  %v9039_v20 = vpop.f32.mrf.mxu1 }
  0xd6   :  { %13480 = vst [vmem:[#allocation38_spill] sm:$0xff] %v9037_v51  ;;  %1509 = vmatpush.msra.mxu0 %v13482_v57  ;;  %1566 = vmatpush.msra.mxu1 %v8622_v59  ;;  %v9050_v29 = vpop.f32.mrf.mxu2  ;;  %v9052_v50 = vpop.f32.mrf.mxu3  ;;  %v9055_v51 = vsub.f32 %v1621_v41, %v9020_v13  ;;  %v1771_v37 = vsub.f32 %v9001_v58, %v13485_v6  ;;  %v13486_v59 = vand.u32 4294901760, %v8717_v5  ;;  %v1766_v57 = vand.u32 4294901760, %v1765_v21 }
  0xd7   :  { %13481 = vst [vmem:[#allocation39_spill] sm:$0xff] %v9039_v20  ;;  %1650 = vmatpush.msra.mxu2 %v8903_v42  ;;  %1755 = vmatpush.msra.mxu3 %v1754_v31  ;;  %v1782_v41 = vand.u32 4294901760, %v9031_v35  ;;  %v1211_v31 = vand.u32 4294901760, %v1210_v28  ;;  %v13488_v20 = vand.u32 4294901760, %v8909_v26  ;;  %v13489_v5 = vand.u32 4294901760, %v8730_v17  ;;  %v1614_v17 = vld [vmem:[%s13015_s0 + $0xb] sm:$0xff] }
  0xd8   :  { %13483 = vst [vmem:[#allocation40_spill] sm:$0xff] %v9050_v29  ;;  %1513 = vmatpush.msra.mxu0 %v13486_v59  ;;  %1568 = vmatpush.msra.mxu1 %v8635_v18  ;;  %v9074_v29 = vsub.f32 %v1620_v44, %v9045_v27  ;;  %v1788_v18 = vand.u32 4294901760, %v9055_v51  ;;  %v1772_v21 = vand.u32 4294901760, %v1771_v37 }
  0xd9   :  { %13484 = vst [vmem:[#allocation41_spill] sm:$0xff] %v9052_v50  ;;  %1398 = vmatmul.f32.gmra.mxu2 %v8909_v26  ;;  %1761 = vmatpush.msra.mxu3 %v1760_v3  ;;  %v13487_v50 = vand.u32 4294901760, %v9015_v53  ;;  %v9084_v3 = vsub.f32 %v1619_v55, %v9061_v10  ;;  %v1783_v26 = vsub.f32 %v9031_v35, %v1782_v41 }
  0xda   :  { %1460 = vmatmul.f32.gmra.mxu3 %v13488_v20  ;;  %1652 = vmatpush.msra.mxu2 %v8923_v7  ;;  %v1794_v55 = vand.u32 4294901760, %v9074_v29  ;;  %v1789_v59 = vsub.f32 %v9055_v51, %v1788_v18 }
  0xdb   :  { %v1777_v6 = vsub.f32 %v9015_v53, %v13487_v50  ;;  %1517 = vmatpush.msra.mxu0 %v13489_v5  ;;  %1570 = vmatpush.msra.mxu1 %v8650_v40  ;;  %v9087_v50 = vsub.f32 %v1613_v48, %v9063_v45  ;;  %v13490_v48 = vand.u32 4294901760, %v8751_v38  ;;  %v13492_v38 = vand.u32 4294901760, %v8764_v61 }
  0xdc   :  { %1654 = vmatpush.msra.mxu2 %v8947_v39  ;;  %1767 = vmatpush.msra.mxu3 %v1766_v57  ;;  %v1800_v57 = vand.u32 4294901760, %v9084_v3  ;;  %v1795_v5 = vsub.f32 %v9074_v29, %v1794_v55 }
  0xdd   :  { %1212 = vmatmul.f32.gmra.mxu0 %v1211_v31  ;;  %1325 = vmatmul.f32.gmra.mxu1 %v8884_v47  ;;  %v1778_v40 = vand.u32 4294901760, %v1777_v6  ;;  %v261_v37 = vpop.f32.mrf.mxu0  ;;  %v9097_v44 = vpop.f32.mrf.mxu1  ;;  %v1669_v31 = vand.u32 4294901760, %v9087_v50  ;;  %v9113_v6 = vand.u32 4294901760, %v1614_v17 }
  0xde   :  { %1521 = vmatpush.msra.mxu0 %v13490_v48  ;;  %1572 = vmatpush.msra.mxu1 %v8665_v46  ;;  %v9103_v20 = vpop.f32.mrf.mxu2  ;;  %v9105_v28 = vpop.f32.mrf.mxu3  ;;  %v1784_v46 = vand.u32 4294901760, %v1783_v26  ;;  %v1790_v37 = vand.u32 4294901760, %v1789_v59  ;;  %v13494_v48 = vand.u32 4294901760, %v8779_v52  ;;  %v1615_v52 = vld [vmem:[%s13015_s0 + $0x13] sm:$0xff] }
  0xdf   :  { %13491 = vst [vmem:[#allocation42_spill] sm:$0xff] %v9105_v28  ;;  %1656 = vmatpush.msra.mxu2 %v8965_v56  ;;  %1773 = vmatpush.msra.mxu3 %v1772_v21  ;;  %v13493_v21 = vand.u32 4294901760, %v8985_v49  ;;  %v1670_v61 = vsub.f32 %v9087_v50, %v1669_v31  ;;  %v9135_v26 = vsub.f32 %v1614_v17, %v9113_v6 }
  0xe0   :  { %1525 = vmatpush.msra.mxu0 %v13492_v38  ;;  %1574 = vmatpush.msra.mxu1 %v8677_v60  ;;  %v1801_v60 = vsub.f32 %v9084_v3, %v1800_v57 }
  0xe1   :  { %1658 = vmatpush.msra.mxu2 %v8987_v9  ;;  %1779 = vmatpush.msra.mxu3 %v1778_v40  ;;  %v1671_v38 = vand.u32 4294901760, %v1670_v61  ;;  %v13498_v61 = vld [vmem:[#allocation26_spill] sm:$0xff] }
  0xe2   :  { %1403 = vmatmul.f32.gmra.mxu2 %v8985_v49  ;;  %1466 = vmatmul.f32.gmra.mxu3 %v13493_v21  ;;  %v1796_v49 = vand.u32 4294901760, %v1795_v5  ;;  %v1802_v17 = vand.u32 4294901760, %v1801_v60  ;;  %v1616_v60 = vld [vmem:[%s13015_s0 + $0x1b] sm:$0xff] }
  0xe3   :  { %1529 = vmatpush.msra.mxu0 %v13494_v48  ;;  %1576 = vmatpush.msra.mxu1 %v8692_v33  ;;  %v13495_v33 = vand.u32 4294901760, %v8788_v16  ;;  %v1677_v16 = vand.u32 4294901760, %v9135_v26  ;;  %v9150_v48 = vand.u32 4294901760, %v1615_v52 }
  0xe4   :  { %1660 = vmatpush.msra.mxu2 %v9007_v22  ;;  %1785 = vmatpush.msra.mxu3 %v1784_v46 }
  0xe5   :  { %1533 = vmatpush.msra.mxu0 %v13495_v33  ;;  %1578 = vmatpush.msra.mxu1 %v8707_v8  ;;  %v13496_v8 = vld [vmem:[#allocation24_spill] sm:$0xff]  ;;  %v1678_v5 = vsub.f32 %v9135_v26, %v1677_v16  ;;  %v13499_v33 = vand.u32 4294901760, %v8795_v2 }
  0xe6   :  { %1662 = vmatpush.msra.mxu2 %v9020_v13  ;;  %1791 = vmatpush.msra.mxu3 %v1790_v37  ;;  %v378_v40 = vpop.f32.mrf.mxu1  ;;  %v9145_v59 = vpop.f32.mrf.mxu0  ;;  %v9161_v37 = vsub.f32 %v1615_v52, %v9150_v48 }
  0xe7   :  { %1329 = vmatmul.f32.gmra.mxu1 %v8956_v4  ;;  %1535 = vmatmul.f32.vlgmr.msra.gmra.mxu0 %v8719_v54  ;;  %v452_v46 = vpop.f32.mrf.mxu2  ;;  %v515_v21 = vpop.f32.mrf.mxu3  ;;  %v1679_v52 = vand.u32 4294901760, %v1678_v5 }
  0xe8   :  { %1580 = vmatpush.msra.mxu1 %v8723_v12  ;;  %1664 = vmatpush.msra.mxu2 %v9045_v27  ;;  %v13497_v12 = vld [vmem:[#allocation25_spill] sm:$0xff]  ;;  %v9180_v46 = vand.u32 4294901760, %v1616_v60  ;;  %v13501_v21 = vand.u32 4294901760, %v13498_v61 }
  0xe9   :  { %1797 = vmatpush.msra.mxu3 %v1796_v49  ;;  %1827 = vmatpush.msrb.mxu0 %v8795_v2  ;;  %v13500_v49 = vld [vmem:[#allocation27_spill] sm:$0xff] }
  0xea   :  { %1582 = vmatpush.msra.mxu1 %v13496_v8  ;;  %1666 = vmatpush.msra.mxu2 %v9061_v10 }
  0xeb   :  { %1803 = vmatpush.msra.mxu3 %v1802_v17  ;;  %1672 = vmatmul.f32.vlgmr.msra.gmra.mxu2 %v1671_v38  ;;  %v1685_v38 = vand.u32 4294901760, %v9161_v37 }
  0xec   :  { %1805 = vmatmul.f32.vlgmr.msra.gmra.mxu3 %v9063_v45  ;;  %1584 = vmatpush.msra.mxu1 %v13497_v12  ;;  %v9199_v12 = vsub.f32 %v1616_v60, %v9180_v46 }
  0xed   :  { %1830 = vmatpush.msrb.mxu0 %v13498_v61  ;;  %1965 = vmatpush.msrb.mxu2 %v13499_v33  ;;  %v1686_v5 = vsub.f32 %v9161_v37, %v1685_v38 }
  0xee   :  { %1586 = vmatpush.msra.mxu1 %v13500_v49  ;;  %v9172_v40 = vpop.f32.mrf.mxu0  ;;  %v9174_v17 = vpop.f32.mrf.mxu1  ;;  %2048 = vmatpush.msrb.mxu3 %v8766_v36  ;;  %v1693_v33 = vand.u32 4294901760, %v9199_v12 }
  0xef   :  { %1539 = vmatmul.f32.gmra.mxu0 %v8773_v25  ;;  %1588 = vmatmul.f32.vlgmr.msra.gmra.mxu1 %v8719_v54  ;;  %v13502_v54 = vand.u32 4294901760, %v8834_v63  ;;  %v1687_v60 = vand.u32 4294901760, %v1686_v5  ;;  %v13507_v5 = vand.u32 4294901760, %v8912_v0 }
  0xf0   :  { %1833 = vmatpush.msrb.mxu0 %v8834_v63  ;;  %v9183_v2 = vpop.f32.mrf.mxu2  ;;  %1969 = vmatpush.msrb.mxu2 %v13501_v21  ;;  %v13503_v63 = vand.u32 4294901760, %v8854_v19  ;;  %v13505_v21 = vld [vmem:[#allocation28_spill] sm:$0xff] }
  0xf1   :  { %v9187_v8 = vpop.f32.mrf.mxu3  ;;  %1900 = vmatpush.msrb.mxu1 %v8766_v36  ;;  %2050 = vmatpush.msrb.mxu3 %v8790_v30  ;;  %v1617_v36 = vld [vmem:[%s13015_s0 + $0x23] sm:$0x1] }
  0xf2   :  { %1836 = vmatpush.msrb.mxu0 %v8854_v19  ;;  %1973 = vmatpush.msrb.mxu2 %v13502_v54  ;;  %v9218_v49 = vand.u32 4294901760, %v1617_v36  ;;  %v13504_v19 = vand.u32 4294901760, %v8880_v34 }
  0xf3   :  { %1680 = vmatmul.f32.gmra.mxu2 %v1679_v52  ;;  %1902 = vmatpush.msrb.mxu1 %v8790_v30 }
  0xf4   :  { %1809 = vmatmul.f32.gmra.mxu3 %v9113_v6  ;;  %1839 = vmatpush.msrb.mxu0 %v8880_v34  ;;  %v9237_v34 = vsub.f32 %v1617_v36, %v9218_v49 }
  0xf5   :  { %1977 = vmatpush.msrb.mxu2 %v13503_v63  ;;  %2052 = vmatpush.msrb.mxu3 %v8805_v62 }
  0xf6   :  { %1842 = vmatpush.msrb.mxu0 %v8895_v14  ;;  %v9210_v30 = vpop.f32.mrf.mxu0  ;;  %v9212_v61 = vpop.f32.mrf.mxu1  ;;  %1904 = vmatpush.msrb.mxu1 %v8805_v62  ;;  %v13506_v62 = vand.u32 4294901760, %v8895_v14 }
  0xf7   :  { %1543 = vmatmul.f32.gmra.mxu0 %v8831_v43  ;;  %1592 = vmatmul.f32.gmra.mxu1 %v8773_v25  ;;  %v1694_v25 = vsub.f32 %v9199_v12, %v1693_v33 }
  0xf8   :  { %1845 = vmatpush.msrb.mxu0 %v8912_v0  ;;  %1981 = vmatpush.msrb.mxu2 %v13504_v19  ;;  %v9223_v52 = vpop.f32.mrf.mxu2 }
  0xf9   :  { %2054 = vmatpush.msrb.mxu3 %v13505_v21  ;;  %v9226_v54 = vpop.f32.mrf.mxu3  ;;  %1906 = vmatpush.msrb.mxu1 %v13505_v21  ;;  %v1695_v36 = vand.u32 4294901760, %v1694_v25  ;;  %v13519_v25 = vand.u32 4294901760, %v9015_v53 }
  0xfa   :  { %1848 = vmatpush.msrb.mxu0 %v8940_v23  ;;  %1985 = vmatpush.msrb.mxu2 %v13506_v62  ;;  %v13516_v62 = vand.u32 4294901760, %v9001_v58 }
  0xfb   :  { %1688 = vmatmul.f32.gmra.mxu2 %v1687_v60  ;;  %2056 = vmatpush.msrb.mxu3 %v8846_v32  ;;  %v1701_v60 = vand.u32 4294901760, %v9237_v34 }
  0xfc   :  { %1813 = vmatmul.f32.gmra.mxu3 %v9150_v48  ;;  %1851 = vmatpush.msrb.mxu0 %v8954_v15 }
  0xfd   :  { %1908 = vmatpush.msrb.mxu1 %v8846_v32  ;;  %1989 = vmatpush.msrb.mxu2 %v13507_v5  ;;  %v13510_v32 = vand.u32 4294901760, %v8940_v23  ;;  %v13514_v23 = vand.u32 4294901760, %v8976_v1  ;;  %v2138_v5 = vld [vmem:[#allocation9 + $0x70] sm:$0xff] }
  0xfe   :  { %2058 = vmatpush.msrb.mxu3 %v8867_v11  ;;  %1854 = vmatpush.msrb.mxu0 %v8976_v1  ;;  %v9246_v14 = vpop.f32.mrf.mxu0  ;;  %v9248_v63 = vpop.f32.mrf.mxu1 }
  0xff   :  { %13508 = vst [vmem:[#allocation24_spill] sm:$0xff] %v9246_v14  ;;  %1547 = vmatmul.f32.gmra.mxu0 %v8884_v47  ;;  %1596 = vmatmul.f32.gmra.mxu1 %v8831_v43  ;;  %v13513_v43 = vand.u32 4294901760, %v8954_v15 }
 0x100   :  { %13509 = vst [vmem:[#allocation25_spill] sm:$0xff] %v9248_v63  ;;  %1910 = vmatpush.msrb.mxu1 %v8867_v11  ;;  %1993 = vmatpush.msrb.mxu2 %v13510_v32  ;;  %v9256_v0 = vpop.f32.mrf.mxu2  ;;  %v1702_v11 = vsub.f32 %v9237_v34, %v1701_v60  ;;  %v2153_v63 = vld [vmem:[#allocation11 + $0x68] sm:$0xff] }
 0x101   :  { %13511 = vst [vmem:[#allocation26_spill] sm:$0xff] %v9256_v0  ;;  %2060 = vmatpush.msrb.mxu3 %v8886_v24  ;;  %1857 = vmatpush.msrb.mxu0 %v9001_v58  ;;  %v9260_v19 = vpop.f32.mrf.mxu3 }
 0x102   :  { %13512 = vst [vmem:[#allocation27_spill] sm:$0xff] %v9260_v19  ;;  %1912 = vmatpush.msrb.mxu1 %v8886_v24  ;;  %1997 = vmatpush.msrb.mxu2 %v13513_v43  ;;  %v1703_v21 = vand.u32 4294901760, %v1702_v11  ;;  %v2137_v11 = vld [vmem:[#allocation9 + $0x68] sm:$0xff] }
 0x103   :  { %1696 = vmatmul.f32.gmra.mxu2 %v1695_v36  ;;  %2062 = vmatpush.msrb.mxu3 %v8903_v42 }
 0x104   :  { %1817 = vmatmul.f32.gmra.mxu3 %v9180_v46  ;;  %1860 = vmatpush.msrb.mxu0 %v9015_v53 }
 0x105   :  { %1914 = vmatpush.msrb.mxu1 %v8903_v42  ;;  %2001 = vmatpush.msrb.mxu2 %v13514_v23 }
 0x106   :  { %2064 = vmatpush.msrb.mxu3 %v8923_v7  ;;  %1863 = vmatpush.msrb.mxu0 %v9031_v35  ;;  %v600_v24 = vpop.f32.mrf.mxu0  ;;  %v9276_v15 = vpop.f32.mrf.mxu1 }
 0x107   :  { %13515 = vst [vmem:[#allocation28_spill] sm:$0xff] %v9276_v15  ;;  %1551 = vmatmul.f32.gmra.mxu0 %v8956_v4  ;;  %1600 = vmatmul.f32.gmra.mxu1 %v8884_v47 }
 0x108   :  { %1916 = vmatpush.msrb.mxu1 %v8923_v7  ;;  %2005 = vmatpush.msrb.mxu2 %v13516_v62  ;;  %v9283_v42 = vpop.f32.mrf.mxu2 }
 0x109   :  { %13517 = vst [vmem:[#allocation43_spill] sm:$0xff] %v9283_v42  ;;  %2066 = vmatpush.msrb.mxu3 %v8947_v39  ;;  %1866 = vmatpush.msrb.mxu0 %v9055_v51  ;;  %v9287_v1 = vpop.f32.mrf.mxu3 }
 0x10a   :  { %13518 = vst [vmem:[#allocation44_spill] sm:$0xff] %v9287_v1  ;;  %1918 = vmatpush.msrb.mxu1 %v8947_v39  ;;  %2009 = vmatpush.msrb.mxu2 %v13519_v25  ;;  %v2136_v25 = vld [vmem:[#allocation9 + $0x60] sm:$0xff] }
 0x10b   :  { %2068 = vmatpush.msrb.mxu3 %v8965_v56  ;;  %1704 = vmatmul.f32.gmra.mxu2 %v1703_v21  ;;  %v9411_v21 = vand.u32 4294901760, %v2137_v11 }
 0x10c   :  { %1821 = vmatmul.f32.gmra.mxu3 %v9218_v49  ;;  %1869 = vmatpush.msrb.mxu0 %v9074_v29 }
 0x10d   :  { %1920 = vmatpush.msrb.mxu1 %v8965_v56  ;;  %2013 = vmatpush.msrb.mxu2 %v1782_v41  ;;  %13544 = vst [vmem:[#allocation69_spill] sm:$0xff] %v9411_v21 }
 0x10e   :  { %2070 = vmatpush.msrb.mxu3 %v8987_v9  ;;  %1872 = vmatpush.msrb.mxu0 %v9084_v3 }
 0x10f   :  { %1922 = vmatpush.msrb.mxu1 %v8987_v9  ;;  %2017 = vmatpush.msrb.mxu2 %v1788_v18 }
 0x110   :  { %2072 = vmatpush.msrb.mxu3 %v9007_v22  ;;  %1604 = vmatmul.f32.gmra.mxu1 %v8956_v4  ;;  %v653_v47 = vpop.f32.mrf.mxu1  ;;  %v9305_v7 = vpop.f32.mrf.mxu0 }
 0x111   :  { %1875 = vmatmul.f32.vlgmr.msrb.gmra.mxu0 %v9087_v50  ;;  %1924 = vmatpush.msrb.mxu1 %v9007_v22  ;;  %v726_v39 = vpop.f32.mrf.mxu2  ;;  %v843_v56 = vpop.f32.mrf.mxu3 }
 0x112   :  { %2021 = vmatpush.msrb.mxu2 %v1794_v55  ;;  %2074 = vmatpush.msrb.mxu3 %v9020_v13 }
 0x113   :  { %1926 = vmatpush.msrb.mxu1 %v9020_v13 }
 0x114   :  { %2025 = vmatpush.msrb.mxu2 %v1800_v57  ;;  %2076 = vmatpush.msrb.mxu3 %v9045_v27 }
 0x115   :  { %2027 = vmatmul.f32.vlgmr.msrb.gmra.mxu2 %v9063_v45  ;;  %1928 = vmatpush.msrb.mxu1 %v9045_v27 }
 0x116   :  { %2078 = vmatpush.msrb.mxu3 %v9061_v10 }
 0x117   :  { %2080 = vmatmul.f32.vlgmr.msrb.gmra.mxu3 %v9063_v45  ;;  %1930 = vmatpush.msrb.mxu1 %v9061_v10 }
 0x118   :  { %1934 = vmatmul.f32.vlgmr.msrb.gmra.mxu1 %v1669_v31  ;;  %v9323_v4 = vpop.f32.mrf.mxu0  ;;  %v9325_v58 = vpop.f32.mrf.mxu1 }
 0x119   :  { %13520 = vst [vmem:[#allocation45_spill] sm:$0xff] %v9323_v4  ;;  %1880 = vmatmul.f32.gmra.mxu0 %v9135_v26 }
 0x11a   :  { %v9328_v9 = vpop.f32.mrf.mxu2 }
 0x11b   :  { %13521 = vst [vmem:[#allocation46_spill] sm:$0xff] %v9328_v9  ;;  %v9330_v22 = vpop.f32.mrf.mxu3 }
 0x11c   :  { %13522 = vst [vmem:[#allocation47_spill] sm:$0xff] %v9330_v22 }
 0x11d   :  { %2031 = vmatmul.f32.gmra.mxu2 %v9113_v6 }
 0x11f   :  { %2084 = vmatmul.f32.gmra.mxu3 %v9113_v6 }
 0x120   :  { %1940 = vmatmul.f32.gmra.mxu1 %v1677_v16  ;;  %v9336_v27 = vpop.f32.mrf.mxu0  ;;  %v9338_v53 = vpop.f32.mrf.mxu1 }
 0x121   :  { %13523 = vst [vmem:[#allocation48_spill] sm:$0xff] %v9336_v27  ;;  %1885 = vmatmul.f32.gmra.mxu0 %v9161_v37 }
 0x122   :  { %13524 = vst [vmem:[#allocation49_spill] sm:$0xff] %v9338_v53  ;;  %v9341_v13 = vpop.f32.mrf.mxu2 }
 0x123   :  { %13525 = vst [vmem:[#allocation50_spill] sm:$0xff] %v9341_v13  ;;  %v9343_v35 = vpop.f32.mrf.mxu3 }
 0x124   :  { %13526 = vst [vmem:[#allocation51_spill] sm:$0xff] %v9343_v35 }
 0x125   :  { %2035 = vmatmul.f32.gmra.mxu2 %v9150_v48 }
 0x127   :  { %2088 = vmatmul.f32.gmra.mxu3 %v9150_v48 }
 0x128   :  { %1946 = vmatmul.f32.gmra.mxu1 %v1685_v38  ;;  %v9349_v51 = vpop.f32.mrf.mxu0  ;;  %v9351_v10 = vpop.f32.mrf.mxu1 }
 0x129   :  { %13527 = vst [vmem:[#allocation52_spill] sm:$0xff] %v9349_v51  ;;  %1890 = vmatmul.f32.gmra.mxu0 %v9199_v12 }
 0x12a   :  { %13528 = vst [vmem:[#allocation53_spill] sm:$0xff] %v9351_v10  ;;  %v9354_v29 = vpop.f32.mrf.mxu2  ;;  %v2130_v10 = vld [vmem:[#allocation9 + $0x30] sm:$0xff] }
 0x12b   :  { %13529 = vst [vmem:[#allocation54_spill] sm:$0xff] %v9354_v29  ;;  %v9356_v45 = vpop.f32.mrf.mxu3  ;;  %v2133_v29 = vld [vmem:[#allocation9 + $0x48] sm:$0xff] }
 0x12c   :  { %13530 = vst [vmem:[#allocation55_spill] sm:$0xff] %v9356_v45 }
 0x12d   :  { %2039 = vmatmul.f32.gmra.mxu2 %v9180_v46 }
 0x12f   :  { %2092 = vmatmul.f32.gmra.mxu3 %v9180_v46 }
 0x130   :  { %1952 = vmatmul.f32.gmra.mxu1 %v1693_v33  ;;  %v917_v41 = vpop.f32.mrf.mxu0  ;;  %v9362_v18 = vpop.f32.mrf.mxu1 }
 0x131   :  { %13531 = vst [vmem:[#allocation56_spill] sm:$0xff] %v9362_v18  ;;  %1895 = vmatmul.f32.gmra.mxu0 %v9237_v34  ;;  %v9425_v41 = vsub.f32 %v2137_v11, %v9411_v21 }
 0x132   :  { %v9365_v3 = vpop.f32.mrf.mxu2 }
 0x133   :  { %13532 = vst [vmem:[#allocation57_spill] sm:$0xff] %v9365_v3  ;;  %v9367_v50 = vpop.f32.mrf.mxu3 }
 0x134   :  { %13533 = vst [vmem:[#allocation58_spill] sm:$0xff] %v9367_v50  ;;  %v2134_v50 = vld [vmem:[#allocation9 + $0x50] sm:$0xff] }
 0x135   :  { %2043 = vmatmul.f32.gmra.mxu2 %v9218_v49  ;;  %13548 = vst [vmem:[#allocation73_spill] sm:$0xff] %v9425_v41  ;;  %v9452_v3 = vand.u32 4294901760, %v2134_v50 }
 0x137   :  { %2096 = vmatmul.f32.gmra.mxu3 %v9218_v49  ;;  %v2139_v49 = vld [vmem:[#allocation9 + $0x78] sm:$0xff]  ;;  %13555 = vst [vmem:[#allocation80_spill] sm:$0xff] %v9452_v3 }
 0x138   :  { %1958 = vmatmul.f32.gmra.mxu1 %v1701_v60  ;;  %v9391_v34 = vand.u32 4294901760, %v2139_v49  ;;  %v9396_v60 = vand.u32 4294901760, %v2138_v5 }
 0x13a   :  { %v980_v55 = vpop.f32.mrf.mxu1  ;;  %v9373_v57 = vpop.f32.mrf.mxu0  ;;  %13537 = vst [vmem:[#allocation62_spill] sm:$0xff] %v9391_v34  ;;  %v9394_v36 = vsub.f32 %v2139_v49, %v9391_v34  ;;  %2357 = vmatpush.msra.mxu3 %v9391_v34  ;;  %2161 = vmatpush.msra.mxu0 %v9391_v34  ;;  %v9408_v24 = vsub.f32 %v2138_v5, %v9396_v60  ;;  %v9437_v5 = vand.u32 4294901760, %v9425_v41 }
 0x13b   :  { %v1065_v31 = vpop.f32.mrf.mxu2  ;;  %v1118_v6 = vpop.f32.mrf.mxu3  ;;  %13539 = vst [vmem:[#allocation64_spill] sm:$0xff] %v9396_v60  ;;  %v9429_v55 = vand.u32 4294901760, %v2136_v25 }
 0x13c   :  { %13538 = vst [vmem:[#allocation63_spill] sm:$0xff] %v9394_v36  ;;  %v9405_v23 = vand.u32 4294901760, %v9394_v36  ;;  %2304 = vmatpush.msra.mxu2 %v9394_v36  ;;  %2359 = vmatpush.msra.mxu3 %v9396_v60  ;;  %v9422_v56 = vand.u32 4294901760, %v9408_v24  ;;  %v2135_v31 = vld [vmem:[#allocation9 + $0x58] sm:$0xff] }
 0x13d   :  { %13543 = vst [vmem:[#allocation68_spill] sm:$0xff] %v9408_v24  ;;  %2163 = vmatpush.msra.mxu0 %v9396_v60  ;;  %v9441_v11 = vsub.f32 %v2136_v25, %v9429_v55 }
 0x13e   :  { %13542 = vst [vmem:[#allocation67_spill] sm:$0xff] %v9405_v23  ;;  %v2204_v39 = vsub.f32 %v9394_v36, %v9405_v23  ;;  %2307 = vmatpush.msra.mxu2 %v9408_v24  ;;  %2361 = vmatpush.msra.mxu3 %v9411_v21  ;;  %v2210_v49 = vsub.f32 %v9408_v24, %v9422_v56  ;;  %v9443_v36 = vand.u32 4294901760, %v2135_v31 }
 0x13f   :  { %13547 = vst [vmem:[#allocation72_spill] sm:$0xff] %v9422_v56  ;;  %2165 = vmatpush.msra.mxu0 %v9411_v21  ;;  %v2216_v24 = vsub.f32 %v9425_v41, %v9437_v5  ;;  %v9457_v25 = vand.u32 4294901760, %v9441_v11 }
 0x140   :  { %13549 = vst [vmem:[#allocation74_spill] sm:$0xff] %v9429_v55  ;;  %v9432_v6 = vand.u32 4294901760, %v2204_v39  ;;  %2310 = vmatpush.msra.mxu2 %v9425_v41  ;;  %2363 = vmatpush.msra.mxu3 %v9429_v55  ;;  %v9448_v39 = vand.u32 4294901760, %v2210_v49  ;;  %v9460_v51 = vsub.f32 %v2135_v31, %v9443_v36  ;;  %v9468_v41 = vsub.f32 %v2134_v50, %v9452_v3 }
 0x141   :  { %13551 = vst [vmem:[#allocation76_spill] sm:$0xff] %v9437_v5  ;;  %2167 = vmatpush.msra.mxu0 %v9429_v55  ;;  %v9465_v49 = vand.u32 4294901760, %v2216_v24  ;;  %v2222_v31 = vsub.f32 %v9441_v11, %v9457_v25 }
 0x142   :  { %v9375_v26 = vpop.f32.mrf.mxu0  ;;  %v9377_v16 = vpop.f32.mrf.mxu1  ;;  %13550 = vst [vmem:[#allocation75_spill] sm:$0xff] %v9432_v6  ;;  %2206 = vmatpush.msra.mxu1 %v9432_v6  ;;  %2313 = vmatpush.msra.mxu2 %v9441_v11  ;;  %v9478_v1 = vand.u32 4294901760, %v9460_v51  ;;  %v9486_v50 = vand.u32 4294901760, %v9468_v41 }
 0x143   :  { %13552 = vst [vmem:[#allocation77_spill] sm:$0xff] %v9441_v11  ;;  %2365 = vmatpush.msra.mxu3 %v9443_v36  ;;  %2169 = vmatpush.msra.mxu0 %v9443_v36  ;;  %v9494_v11 = vand.u32 4294901760, %v2222_v31 }
 0x144   :  { %v9379_v48 = vpop.f32.mrf.mxu2  ;;  %13553 = vst [vmem:[#allocation78_spill] sm:$0xff] %v9443_v36  ;;  %2212 = vmatpush.msra.mxu1 %v9448_v39  ;;  %2316 = vmatpush.msra.mxu2 %v9460_v51 }
 0x145   :  { %v9381_v37 = vpop.f32.mrf.mxu3  ;;  %13554 = vst [vmem:[#allocation79_spill] sm:$0xff] %v9448_v39  ;;  %v2132_v39 = vld [vmem:[#allocation9 + $0x40] sm:$0xff]  ;;  %2367 = vmatpush.msra.mxu3 %v9452_v3  ;;  %2171 = vmatpush.msra.mxu0 %v9452_v3 }
 0x146   :  { %13557 = vst [vmem:[#allocation82_spill] sm:$0xff] %v9457_v25  ;;  %2218 = vmatpush.msra.mxu1 %v9465_v49  ;;  %2319 = vmatpush.msra.mxu2 %v9468_v41 }
 0x147   :  { %13558 = vst [vmem:[#allocation83_spill] sm:$0xff] %v9460_v51 }
 0x148   :  { %13559 = vst [vmem:[#allocation84_spill] sm:$0xff] %v9465_v49  ;;  %v2234_v49 = vsub.f32 %v9468_v41, %v9486_v50  ;;  %2224 = vmatpush.msra.mxu1 %v9494_v11 }
 0x149   :  { %13560 = vst [vmem:[#allocation85_spill] sm:$0xff] %v9468_v41 }
 0x14a   :  { %v9383_v38 = vpop.f32.mrf.mxu0  ;;  %v9385_v46 = vpop.f32.mrf.mxu1  ;;  %13563 = vst [vmem:[#allocation88_spill] sm:$0xff] %v9478_v1  ;;  %v9515_v35 = vand.u32 4294901760, %v2234_v49  ;;  %v2129_v49 = vld [vmem:[#allocation9 + $0x28] sm:$0xff] }
 0x14b   :  { %13534 = vst [vmem:[#allocation59_spill] sm:$0xff] %v9383_v38  ;;  %v9538_v27 = vand.u32 4294901760, %v2129_v49  ;;  %v2126_v38 = vld [vmem:[#allocation9 + $0x10] sm:$0xff] }
 0x14c   :  { %v9387_v12 = vpop.f32.mrf.mxu2  ;;  %13565 = vst [vmem:[#allocation90_spill] sm:$0xff] %v9486_v50  ;;  %v9586_v14 = vand.u32 4294901760, %v2126_v38 }
 0x14d   :  { %13535 = vst [vmem:[#allocation60_spill] sm:$0xff] %v9387_v12  ;;  %v9389_v33 = vpop.f32.mrf.mxu3 }
 0x14e   :  { %13536 = vst [vmem:[#allocation61_spill] sm:$0xff] %v9389_v33 }
 0x14f   :  { %13568 = vst [vmem:[#allocation93_spill] sm:$0xff] %v9494_v11 }
 0x150   :  { %13573 = vst [vmem:[#allocation98_spill] sm:$0xff] %v9515_v35 }
 0x151   :  { %13579 = vst [vmem:[#allocation104_spill] sm:$0xff] %v9538_v27 }
 0x152   :  { %v9400_v32 = vpop.f32.mrf.mxu0  ;;  %v9402_v43 = vpop.f32.mrf.mxu1  ;;  %13592 = vst [vmem:[#allocation117_spill] sm:$0xff] %v9586_v14 }
 0x153   :  { %13540 = vst [vmem:[#allocation65_spill] sm:$0xff] %v9400_v32  ;;  %v2228_v32 = vsub.f32 %v9460_v51, %v9478_v1 }
 0x154   :  { %13541 = vst [vmem:[#allocation66_spill] sm:$0xff] %v9402_v43  ;;  %v9414_v62 = vpop.f32.mrf.mxu2 }
 0x155   :  { %13545 = vst [vmem:[#allocation70_spill] sm:$0xff] %v9414_v62  ;;  %v9417_v47 = vpop.f32.mrf.mxu3  ;;  %v9510_v31 = vand.u32 4294901760, %v2228_v32 }
 0x156   :  { %13546 = vst [vmem:[#allocation71_spill] sm:$0xff] %v9417_v47 }
 0x157   :  { %13571 = vst [vmem:[#allocation96_spill] sm:$0xff] %v9510_v31  ;;  %2230 = vmatpush.msra.mxu1 %v9510_v31 }
 0x159   :  { %2236 = vmatpush.msra.mxu1 %v9515_v35  ;;  %v9560_v35 = vsub.f32 %v2129_v49, %v9538_v27 }
 0x15a   :  { %v1213_v18 = vpop.f32.mrf.mxu0  ;;  %v9454_v45 = vpop.f32.mrf.mxu1 }
 0x15b   :  { %13556 = vst [vmem:[#allocation81_spill] sm:$0xff] %v9454_v45  ;;  %v9470_v18 = vand.u32 4294901760, %v2133_v29  ;;  %v9491_v45 = vand.u32 4294901760, %v2132_v39  ;;  %v9575_v49 = vand.u32 4294901760, %v9560_v35 }
 0x15c   :  { %v9473_v6 = vpop.f32.mrf.mxu2  ;;  %13584 = vst [vmem:[#allocation109_spill] sm:$0xff] %v9560_v35 }
 0x15d   :  { %13561 = vst [vmem:[#allocation86_spill] sm:$0xff] %v9470_v18  ;;  %v9482_v24 = vpop.f32.mrf.mxu3  ;;  %2369 = vmatpush.msra.mxu3 %v9470_v18  ;;  %v9506_v47 = vsub.f32 %v2132_v39, %v9491_v45  ;;  %2173 = vmatpush.msra.mxu0 %v9470_v18  ;;  %v9522_v39 = vand.u32 4294901760, %v2130_v10 }
 0x15e   :  { %13562 = vst [vmem:[#allocation87_spill] sm:$0xff] %v9473_v6  ;;  %v9489_v6 = vsub.f32 %v2133_v29, %v9470_v18 }
 0x15f   :  { %13564 = vst [vmem:[#allocation89_spill] sm:$0xff] %v9482_v24  ;;  %v2131_v24 = vld [vmem:[#allocation9 + $0x38] sm:$0xff]  ;;  %v9520_v42 = vand.u32 4294901760, %v9506_v47  ;;  %2371 = vmatpush.msra.mxu3 %v9491_v45  ;;  %2175 = vmatpush.msra.mxu0 %v9491_v45  ;;  %v9536_v62 = vsub.f32 %v2130_v10, %v9522_v39 }
 0x160   :  { %13566 = vst [vmem:[#allocation91_spill] sm:$0xff] %v9489_v6  ;;  %v9503_v29 = vand.u32 4294901760, %v9489_v6  ;;  %2322 = vmatpush.msra.mxu2 %v9489_v6  ;;  %v9513_v51 = vand.u32 4294901760, %v2131_v24 }
 0x161   :  { %13567 = vst [vmem:[#allocation92_spill] sm:$0xff] %v9491_v45  ;;  %v9552_v15 = vand.u32 4294901760, %v9536_v62 }
 0x162   :  { %13569 = vst [vmem:[#allocation94_spill] sm:$0xff] %v9503_v29  ;;  %v2240_v41 = vsub.f32 %v9489_v6, %v9503_v29  ;;  %v9528_v32 = vsub.f32 %v2131_v24, %v9513_v51  ;;  %2325 = vmatpush.msra.mxu2 %v9506_v47  ;;  %v2246_v6 = vsub.f32 %v9506_v47, %v9520_v42 }
 0x163   :  { %13570 = vst [vmem:[#allocation95_spill] sm:$0xff] %v9506_v47  ;;  %2373 = vmatpush.msra.mxu3 %v9513_v51  ;;  %2177 = vmatpush.msra.mxu0 %v9513_v51  ;;  %v2128_v47 = vld [vmem:[#allocation9 + $0x20] sm:$0xff] }
 0x164   :  { %13572 = vst [vmem:[#allocation97_spill] sm:$0xff] %v9513_v51  ;;  %v9531_v11 = vand.u32 4294901760, %v2240_v41  ;;  %v1330_v31 = vpop.f32.mrf.mxu1  ;;  %v9542_v24 = vpop.f32.mrf.mxu0  ;;  %v9546_v41 = vand.u32 4294901760, %v9528_v32  ;;  %2328 = vmatpush.msra.mxu2 %v9528_v32  ;;  %v9549_v19 = vand.u32 4294901760, %v2246_v6  ;;  %v2127_v6 = vld [vmem:[#allocation9 + $0x18] sm:$0xff] }
 0x165   :  { %13574 = vst [vmem:[#allocation99_spill] sm:$0xff] %v9520_v42  ;;  %v1404_v13 = vpop.f32.mrf.mxu2  ;;  %v1467_v10 = vpop.f32.mrf.mxu3  ;;  %2375 = vmatpush.msra.mxu3 %v9522_v39  ;;  %2179 = vmatpush.msra.mxu0 %v9522_v39  ;;  %v9567_v43 = vand.u32 4294901760, %v2127_v6 }
 0x166   :  { %13575 = vst [vmem:[#allocation100_spill] sm:$0xff] %v9522_v39  ;;  %2242 = vmatpush.msra.mxu1 %v9531_v11  ;;  %v2252_v31 = vsub.f32 %v9528_v32, %v9546_v41  ;;  %2331 = vmatpush.msra.mxu2 %v9536_v62  ;;  %v9563_v13 = vand.u32 4294901760, %v2128_v47  ;;  %v2258_v10 = vsub.f32 %v9536_v62, %v9552_v15 }
 0x167   :  { %13576 = vst [vmem:[#allocation101_spill] sm:$0xff] %v9528_v32  ;;  %2377 = vmatpush.msra.mxu3 %v9538_v27  ;;  %2181 = vmatpush.msra.mxu0 %v9538_v27  ;;  %v9584_v33 = vsub.f32 %v2127_v6, %v9567_v43 }
 0x168   :  { %13577 = vst [vmem:[#allocation102_spill] sm:$0xff] %v9531_v11  ;;  %2248 = vmatpush.msra.mxu1 %v9549_v19  ;;  %v9572_v32 = vand.u32 4294901760, %v2252_v31  ;;  %v9578_v11 = vsub.f32 %v2128_v47, %v9563_v13  ;;  %2334 = vmatpush.msra.mxu2 %v9560_v35  ;;  %v2264_v47 = vsub.f32 %v9560_v35, %v9575_v49 }
 0x169   :  { %13578 = vst [vmem:[#allocation103_spill] sm:$0xff] %v9536_v62  ;;  %v9581_v62 = vand.u32 4294901760, %v2258_v10  ;;  %2379 = vmatpush.msra.mxu3 %v9563_v13  ;;  %2183 = vmatpush.msra.mxu0 %v9563_v13  ;;  %v2125_v10 = vld [vmem:[#allocation9 + $0x8] sm:$0xff]  ;;  %v9598_v6 = vand.u32 4294901760, %v9584_v33 }
 0x16a   :  { %13580 = vst [vmem:[#allocation105_spill] sm:$0xff] %v9542_v24  ;;  %2254 = vmatpush.msra.mxu1 %v9572_v32  ;;  %v9594_v31 = vand.u32 4294901760, %v9578_v11  ;;  %2337 = vmatpush.msra.mxu2 %v9578_v11  ;;  %v9603_v53 = vand.u32 4294901760, %v2125_v10  ;;  %v9612_v22 = vand.u32 4294901760, %v2264_v47 }
 0x16b   :  { %13581 = vst [vmem:[#allocation106_spill] sm:$0xff] %v9546_v41  ;;  %2381 = vmatpush.msra.mxu3 %v9567_v43  ;;  %2185 = vmatpush.msra.mxu0 %v9567_v43  ;;  %v2276_v28 = vsub.f32 %v9584_v33, %v9598_v6 }
 0x16c   :  { %13582 = vst [vmem:[#allocation107_spill] sm:$0xff] %v9549_v19  ;;  %v9601_v19 = vsub.f32 %v2126_v38, %v9586_v14  ;;  %v9609_v35 = vpop.f32.mrf.mxu1  ;;  %2260 = vmatpush.msra.mxu1 %v9581_v62  ;;  %v2270_v0 = vsub.f32 %v9578_v11, %v9594_v31  ;;  %2340 = vmatpush.msra.mxu2 %v9584_v33  ;;  %v2124_v38 = vld [vmem:[#allocation9] sm:$0xff] }
 0x16d   :  { %13583 = vst [vmem:[#allocation108_spill] sm:$0xff] %v9552_v15  ;;  %2383 = vmatpush.msra.mxu3 %v9586_v14  ;;  %2187 = vmatpush.msra.mxu0 %v9586_v14 }
 0x16e   :  { %13585 = vst [vmem:[#allocation110_spill] sm:$0xff] %v9563_v13  ;;  %v9620_v12 = vand.u32 4294901760, %v9601_v19  ;;  %2266 = vmatpush.msra.mxu1 %v9612_v22  ;;  %v9627_v47 = vand.u32 4294901760, %v2270_v0  ;;  %2343 = vmatpush.msra.mxu2 %v9601_v19 }
 0x16f   :  { %13586 = vst [vmem:[#allocation111_spill] sm:$0xff] %v9567_v43  ;;  %2385 = vmatpush.msra.mxu3 %v9603_v53  ;;  %2189 = vmatpush.msra.mxu0 %v9603_v53 }
 0x170   :  { %13587 = vst [vmem:[#allocation112_spill] sm:$0xff] %v9572_v32  ;;  %v9607_v32 = vpop.f32.mrf.mxu0  ;;  %v2282_v4 = vsub.f32 %v9601_v19, %v9620_v12  ;;  %2272 = vmatpush.msra.mxu1 %v9627_v47 }
 0x171   :  { %13588 = vst [vmem:[#allocation113_spill] sm:$0xff] %v9575_v49 }
 0x172   :  { %13589 = vst [vmem:[#allocation114_spill] sm:$0xff] %v9578_v11  ;;  %v9630_v11 = vsub.f32 %v2125_v10, %v9603_v53 }
 0x173   :  { %13590 = vst [vmem:[#allocation115_spill] sm:$0xff] %v9581_v62  ;;  %v9633_v62 = vand.u32 4294901760, %v2124_v38 }
 0x174   :  { %13591 = vst [vmem:[#allocation116_spill] sm:$0xff] %v9584_v33  ;;  %v9635_v33 = vpop.f32.mrf.mxu3  ;;  %v9645_v0 = vand.u32 4294901760, %v9630_v11  ;;  %2346 = vmatpush.msra.mxu2 %v9630_v11  ;;  %v9667_v24 = vpop.f32.mrf.mxu1 }
 0x175   :  { %13593 = vst [vmem:[#allocation118_spill] sm:$0xff] %v9594_v31  ;;  %v9648_v10 = vsub.f32 %v2124_v38, %v9633_v62  ;;  %2387 = vmatpush.msra.mxu3 %v9633_v62  ;;  %2191 = vmatpush.msra.mxu0 %v9633_v62 }
 0x176   :  { %13594 = vst [vmem:[#allocation119_spill] sm:$0xff] %v9598_v6 }
 0x177   :  { %13595 = vst [vmem:[#allocation120_spill] sm:$0xff] %v9601_v19  ;;  %v2288_v19 = vsub.f32 %v9630_v11, %v9645_v0  ;;  %2349 = vmatpush.msra.mxu2 %v9648_v10  ;;  %2398 = vmatpush.msrb.mxu0 %v9405_v23 }
 0x178   :  { %13596 = vst [vmem:[#allocation121_spill] sm:$0xff] %v9603_v53  ;;  %v2154_v53 = vld [vmem:[#allocation11 + $0x70] sm:$0xff] }
 0x179   :  { %13597 = vst [vmem:[#allocation122_spill] sm:$0xff] %v9607_v32  ;;  %v9624_v32 = vpop.f32.mrf.mxu2  ;;  %2402 = vmatpush.msrb.mxu0 %v9422_v56 }
 0x17a   :  { %13598 = vst [vmem:[#allocation123_spill] sm:$0xff] %v9609_v35  ;;  %v9637_v35 = vand.u32 4294901760, %v2276_v28  ;;  %v2155_v28 = vld [vmem:[#allocation11 + $0x78] sm:$0xff] }
 0x17b   :  { %13599 = vst [vmem:[#allocation124_spill] sm:$0xff] %v9612_v22  ;;  %v9651_v22 = vand.u32 4294901760, %v2282_v4  ;;  %v9662_v38 = vand.u32 4294901760, %v2155_v28  ;;  %v9665_v4 = vpop.f32.mrf.mxu0  ;;  %2406 = vmatpush.msrb.mxu0 %v9437_v5 }
 0x17c   :  { %13600 = vst [vmem:[#allocation125_spill] sm:$0xff] %v9620_v12  ;;  %2278 = vmatpush.msra.mxu1 %v9637_v35  ;;  %v9697_v56 = vpop.f32.mrf.mxu3 }
 0x17d   :  { %13601 = vst [vmem:[#allocation126_spill] sm:$0xff] %v9627_v47  ;;  %v9659_v47 = vand.u32 4294901760, %v9648_v10  ;;  %2502 = vmatpush.msrb.mxu2 %v9662_v38  ;;  %v9678_v9 = vsub.f32 %v2155_v28, %v9662_v38  ;;  %v13620_v28 = vld [vmem:[#allocation29_spill] sm:$0xff]  ;;  %2410 = vmatpush.msrb.mxu0 %v9457_v25 }
 0x17e   :  { %13602 = vst [vmem:[#allocation127_spill] sm:$0xff] %v9630_v11  ;;  %2284 = vmatpush.msra.mxu1 %v9651_v22  ;;  %v2150_v25 = vld [vmem:[#allocation11 + $0x50] sm:$0xff] }
 0x17f   :  { %13603 = vst [vmem:[#allocation128_spill] sm:$0xff] %v9633_v62  ;;  %v2294_v11 = vsub.f32 %v9648_v10, %v9659_v47  ;;  %v9675_v62 = vand.u32 4294901760, %v2154_v53  ;;  %2414 = vmatpush.msrb.mxu0 %v9478_v1  ;;  %v13635_v1 = vld [vmem:[#allocation35_spill] sm:$0xff] }
 0x180   :  { %13604 = vst [vmem:[#allocation129_spill] sm:$0xff] %v9637_v35  ;;  %v9670_v35 = vand.u32 4294901760, %v2288_v19  ;;  %v9688_v19 = vand.u32 4294901760, %v9678_v9 }
 0x181   :  { %13605 = vst [vmem:[#allocation130_spill] sm:$0xff] %v9645_v0  ;;  %v9681_v23 = vpop.f32.mrf.mxu2  ;;  %2504 = vmatpush.msrb.mxu2 %v9675_v62  ;;  %2418 = vmatpush.msrb.mxu0 %v9486_v50 }
 0x182   :  { %13606 = vst [vmem:[#allocation131_spill] sm:$0xff] %v9648_v10  ;;  %2290 = vmatpush.msra.mxu1 %v9670_v35  ;;  %v9690_v10 = vand.u32 4294901760, %v2153_v63 }
 0x183   :  { %13607 = vst [vmem:[#allocation132_spill] sm:$0xff] %v9651_v22  ;;  %v9684_v22 = vand.u32 4294901760, %v2294_v11  ;;  %v2545_v11 = vsub.f32 %v9678_v9, %v9688_v19  ;;  %2422 = vmatpush.msrb.mxu0 %v9503_v29  ;;  %v13642_v29 = vld [vmem:[#allocation36_spill] sm:$0xff] }
 0x184   :  { %13608 = vst [vmem:[#allocation133_spill] sm:$0xff] %v9659_v47  ;;  %2506 = vmatpush.msrb.mxu2 %v9690_v10  ;;  %v9767_v50 = vpop.f32.mrf.mxu3 }
 0x185   :  { %13609 = vst [vmem:[#allocation134_spill] sm:$0xff] %v9662_v38  ;;  %v13621_v38 = vld [vmem:[#allocation31_spill] sm:$0xff]  ;;  %2296 = vmatpush.msra.mxu1 %v9684_v22  ;;  %v9714_v5 = vand.u32 4294901760, %v2545_v11  ;;  %v9730_v11 = vpop.f32.mrf.mxu0  ;;  %2426 = vmatpush.msrb.mxu0 %v9520_v42 }
 0x186   :  { %13610 = vst [vmem:[#allocation135_spill] sm:$0xff] %v9665_v4  ;;  %v9693_v4 = vsub.f32 %v2154_v53, %v9675_v62 }
 0x187   :  { %13611 = vst [vmem:[#allocation136_spill] sm:$0xff] %v9667_v24  ;;  %v363_v24 = vadd.f32 %v13621_v38, %v13620_v28  ;;  %2465 = vmatpush.msrb.mxu1 %v9391_v34  ;;  %v9711_v38 = vsub.f32 %v2153_v63, %v9690_v10  ;;  %v2151_v28 = vld [vmem:[#allocation11 + $0x58] sm:$0xff]  ;;  %2547 = vmatpush.msrb.mxu3 %v9714_v5 }
 0x188   :  { %13612 = vst [vmem:[#allocation137_spill] sm:$0xff] %v9670_v35  ;;  %v9705_v35 = vand.u32 4294901760, %v9693_v4  ;;  %2430 = vmatpush.msrb.mxu0 %v9546_v41 }
 0x189   :  { %13613 = vst [vmem:[#allocation138_spill] sm:$0xff] %v9675_v62  ;;  %v13628_v62 = vld [vmem:[#allocation32_spill] sm:$0xff]  ;;  %2467 = vmatpush.msrb.mxu1 %v9396_v60  ;;  %v9727_v63 = vand.u32 4294901760, %v9711_v38  ;;  %v13634_v60 = vld [vmem:[#allocation30_spill] sm:$0xff] }
 0x18a   :  { %13614 = vst [vmem:[#allocation139_spill] sm:$0xff] %v9678_v9  ;;  %v9719_v9 = vand.u32 4294901760, %v2151_v28  ;;  %v433_v34 = vadd.f32 %v13628_v62, %v363_v24  ;;  %v9741_v62 = vand.u32 4294901760, %v2150_v25  ;;  %2434 = vmatpush.msrb.mxu0 %v9552_v15 }
 0x18b   :  { %13615 = vst [vmem:[#allocation140_spill] sm:$0xff] %v9681_v23  ;;  %v2152_v23 = vld [vmem:[#allocation11 + $0x60] sm:$0xff]  ;;  %2469 = vmatpush.msrb.mxu1 %v9411_v21  ;;  %v13638_v21 = vld [vmem:[#allocation33_spill] sm:$0xff] }
 0x18c   :  { %13616 = vst [vmem:[#allocation141_spill] sm:$0xff] %v9684_v22  ;;  %v9707_v53 = vand.u32 4294901760, %v2152_v23  ;;  %v2551_v22 = vsub.f32 %v9693_v4, %v9705_v35  ;;  %v9744_v24 = vsub.f32 %v2151_v28, %v9719_v9  ;;  %2438 = vmatpush.msrb.mxu0 %v9575_v49 }
 0x18d   :  { %13617 = vst [vmem:[#allocation142_spill] sm:$0xff] %v9688_v19  ;;  %2471 = vmatpush.msrb.mxu1 %v9429_v55 }
 0x18e   :  { %13618 = vst [vmem:[#allocation143_spill] sm:$0xff] %v9690_v10  ;;  %2508 = vmatpush.msrb.mxu2 %v9707_v53  ;;  %v9722_v19 = vsub.f32 %v2152_v23, %v9707_v53  ;;  %v9752_v10 = vpop.f32.mrf.mxu2  ;;  %v9759_v28 = vand.u32 4294901760, %v9744_v24  ;;  %2442 = vmatpush.msrb.mxu0 %v9594_v31  ;;  %v2141_v31 = vld [vmem:[#allocation11 + $0x8] sm:$0xff] }
 0x18f   :  { %13619 = vst [vmem:[#allocation144_spill] sm:$0xff] %v9693_v4  ;;  %v9732_v4 = vpop.f32.mrf.mxu1  ;;  %2473 = vmatpush.msrb.mxu1 %v9443_v36  ;;  %v13649_v36 = vld [vmem:[#allocation39_spill] sm:$0xff] }
 0x190   :  { %13622 = vst [vmem:[#allocation29_spill] sm:$0xff] %v9705_v35  ;;  %v9735_v35 = vand.u32 4294901760, %v2551_v22  ;;  %2510 = vmatpush.msrb.mxu2 %v9719_v9  ;;  %v9739_v23 = vand.u32 4294901760, %v9722_v19  ;;  %v2149_v22 = vld [vmem:[#allocation11 + $0x48] sm:$0xff]  ;;  %2446 = vmatpush.msrb.mxu0 %v9598_v6 }
 0x191   :  { %13623 = vst [vmem:[#allocation31_spill] sm:$0xff] %v9707_v53  ;;  %v367_v53 = vadd.f32 %v13635_v1, %v13634_v60  ;;  %v9761_v1 = vand.u32 4294901760, %v2149_v22  ;;  %v9764_v60 = vsub.f32 %v2150_v25, %v9741_v62  ;;  %2475 = vmatpush.msrb.mxu1 %v9452_v3 }
 0x192   :  { %13624 = vst [vmem:[#allocation145_spill] sm:$0xff] %v9711_v38  ;;  %2553 = vmatpush.msrb.mxu3 %v9735_v35  ;;  %2512 = vmatpush.msrb.mxu2 %v9741_v62 }
 0x193   :  { %13625 = vst [vmem:[#allocation146_spill] sm:$0xff] %v9714_v5  ;;  %v2557_v5 = vsub.f32 %v9711_v38, %v9727_v63  ;;  %v492_v38 = vadd.f32 %v13638_v21, %v433_v34  ;;  %v9779_v25 = vand.u32 4294901760, %v9764_v60  ;;  %v438_v55 = vadd.f32 %v13642_v29, %v367_v53  ;;  %v2146_v53 = vld [vmem:[#allocation11 + $0x30] sm:$0xff]  ;;  %2477 = vmatpush.msrb.mxu1 %v9470_v18 }
 0x194   :  { %13626 = vst [vmem:[#allocation147_spill] sm:$0xff] %v9719_v9  ;;  %v2148_v9 = vld [vmem:[#allocation11 + $0x40] sm:$0xff]  ;;  %2514 = vmatpush.msrb.mxu2 %v9761_v1  ;;  %v9811_v42 = vand.u32 4294901760, %v2146_v53  ;;  %v13648_v18 = vld [vmem:[#allocation34_spill] sm:$0xff]  ;;  %2450 = vmatpush.msrb.mxu0 %v9620_v12  ;;  %v13667_v12 = vld [vmem:[#allocation121_spill] sm:$0xff] }
 0x195   :  { %13627 = vst [vmem:[#allocation148_spill] sm:$0xff] %v9722_v19  ;;  %v585_v34 = vadd.f32 %v9145_v59, %v492_v38  ;;  %v9784_v21 = vand.u32 4294901760, %v2148_v9  ;;  %2479 = vmatpush.msrb.mxu1 %v9491_v45 }
 0x196   :  { %13629 = vst [vmem:[#allocation32_spill] sm:$0xff] %v9730_v11  ;;  %v2563_v11 = vsub.f32 %v9722_v19, %v9739_v23  ;;  %v9825_v3 = vpop.f32.mrf.mxu2  ;;  %2454 = vmatpush.msrb.mxu0 %v9645_v0  ;;  %v1319_v0 = vadd.f32 %v9385_v46, %v9375_v26  ;;  %v13666_v46 = vld [vmem:[#allocation105_spill] sm:$0xff] }
 0x197   :  { %13630 = vst [vmem:[#allocation149_spill] sm:$0xff] %v9735_v35  ;;  %v9770_v35 = vand.u32 4294901760, %v2557_v5  ;;  %v9787_v5 = vsub.f32 %v2149_v22, %v9761_v1  ;;  %v638_v59 = vadd.f32 %v9174_v17, %v585_v34  ;;  %v9804_v29 = vsub.f32 %v2148_v9, %v9784_v21  ;;  %v9806_v22 = vpop.f32.mrf.mxu1  ;;  %2516 = vmatpush.msrb.mxu2 %v9784_v21 }
 0x198   :  { %13631 = vst [vmem:[#allocation150_spill] sm:$0xff] %v9739_v23  ;;  %v9773_v19 = vand.u32 4294901760, %v2563_v11  ;;  %v2569_v23 = vsub.f32 %v9744_v24, %v9759_v28  ;;  %v2147_v11 = vld [vmem:[#allocation11 + $0x38] sm:$0xff]  ;;  %2481 = vmatpush.msrb.mxu1 %v9513_v51  ;;  %2458 = vmatpush.msrb.mxu0 %v9659_v47 }
 0x199   :  { %13632 = vst [vmem:[#allocation151_spill] sm:$0xff] %v9741_v62  ;;  %2559 = vmatpush.msrb.mxu3 %v9770_v35  ;;  %v9794_v62 = vand.u32 4294901760, %v2147_v11  ;;  %v9801_v38 = vand.u32 4294901760, %v9787_v5  ;;  %v9822_v34 = vand.u32 4294901760, %v9804_v29 }
 0x19a   :  { %13633 = vst [vmem:[#allocation152_spill] sm:$0xff] %v9744_v24  ;;  %v9790_v24 = vand.u32 4294901760, %v2569_v23  ;;  %v1552_v23 = vpop.f32.mrf.mxu0  ;;  %2483 = vmatpush.msrb.mxu1 %v9522_v39 }
 0x19b   :  { %13636 = vst [vmem:[#allocation30_spill] sm:$0xff] %v9759_v28  ;;  %v2575_v28 = vsub.f32 %v9764_v60, %v9779_v25  ;;  %2565 = vmatpush.msrb.mxu3 %v9773_v19  ;;  %v9814_v17 = vsub.f32 %v2147_v11, %v9794_v62  ;;  %v2581_v9 = vsub.f32 %v9787_v5, %v9801_v38  ;;  %v13647_v23 = vld [vmem:[#allocation37_spill] sm:$0xff] }
 0x19c   :  { %13637 = vst [vmem:[#allocation35_spill] sm:$0xff] %v9764_v60  ;;  %2518 = vmatpush.msrb.mxu2 %v9794_v62  ;;  %v695_v60 = vadd.f32 %v9183_v2, %v638_v59  ;;  %v1315_v59 = vadd.f32 %v9377_v16, %v9373_v57  ;;  %v13653_v16 = vld [vmem:[#allocation40_spill] sm:$0xff]  ;;  %2485 = vmatpush.msrb.mxu1 %v9538_v27 }
 0x19d   :  { %13639 = vst [vmem:[#allocation33_spill] sm:$0xff] %v9770_v35  ;;  %v9808_v35 = vand.u32 4294901760, %v2575_v28  ;;  %2571 = vmatpush.msrb.mxu3 %v9790_v24  ;;  %v2145_v28 = vld [vmem:[#allocation11 + $0x28] sm:$0xff]  ;;  %v9829_v11 = vand.u32 4294901760, %v9814_v17 }
 0x19e   :  { %13640 = vst [vmem:[#allocation153_spill] sm:$0xff] %v9773_v19  ;;  %v498_v19 = vadd.f32 %v13647_v23, %v438_v55  ;;  %v9831_v41 = vand.u32 4294901760, %v2145_v28  ;;  %v9842_v55 = vand.u32 4294901760, %v2581_v9  ;;  %v2587_v23 = vsub.f32 %v9804_v29, %v9822_v34  ;;  %2520 = vmatpush.msrb.mxu2 %v9811_v42  ;;  %v1705_v39 = vpop.f32.mrf.mxu2  ;;  %2487 = vmatpush.msrb.mxu1 %v9563_v13  ;;  %v13682_v13 = vld [vmem:[#allocation61_spill] sm:$0xff] }
 0x19f   :  { %13641 = vst [vmem:[#allocation154_spill] sm:$0xff] %v9787_v5  ;;  %v371_v5 = vadd.f32 %v13649_v36, %v13648_v18  ;;  %2577 = vmatpush.msrb.mxu3 %v9808_v35 }
 0x1a0   :  { %13643 = vst [vmem:[#allocation36_spill] sm:$0xff] %v9790_v24  ;;  %v9834_v24 = vsub.f32 %v2146_v53, %v9811_v42  ;;  %v2593_v53 = vsub.f32 %v9814_v17, %v9829_v11  ;;  %v589_v18 = vadd.f32 %v9172_v40, %v498_v19  ;;  %v9862_v9 = vand.u32 4294901760, %v2587_v23  ;;  %2522 = vmatpush.msrb.mxu2 %v9831_v41 }
 0x1a1   :  { %13644 = vst [vmem:[#allocation155_spill] sm:$0xff] %v9794_v62  ;;  %v2144_v62 = vld [vmem:[#allocation11 + $0x20] sm:$0xff]  ;;  %2583 = vmatpush.msrb.mxu3 %v9842_v55  ;;  %v9865_v15 = vsub.f32 %v2145_v28, %v9831_v41  ;;  %v443_v23 = vadd.f32 %v13653_v16, %v371_v5  ;;  %v828_v28 = vadd.f32 %v9187_v8, %v695_v60  ;;  %v1605_v16 = vpop.f32.mrf.mxu1 }
 0x1a2   :  { %13645 = vst [vmem:[#allocation156_spill] sm:$0xff] %v9801_v38  ;;  %v9846_v38 = vpop.f32.mrf.mxu3  ;;  %v9852_v36 = vand.u32 4294901760, %v9834_v24  ;;  %v9854_v2 = vand.u32 4294901760, %v2144_v62  ;;  %v9867_v45 = vand.u32 4294901760, %v2593_v53  ;;  %v642_v49 = vadd.f32 %v9212_v61, %v589_v18  ;;  %v13656_v61 = vld [vmem:[#allocation38_spill] sm:$0xff]  ;;  %2489 = vmatpush.msrb.mxu1 %v9567_v43 }
 0x1a3   :  { %13646 = vst [vmem:[#allocation157_spill] sm:$0xff] %v9808_v35  ;;  %v2143_v35 = vld [vmem:[#allocation11 + $0x18] sm:$0xff]  ;;  %2589 = vmatpush.msrb.mxu3 %v9862_v9  ;;  %v9884_v53 = vand.u32 4294901760, %v9865_v15  ;;  %v375_v60 = vadd.f32 %v9097_v44, %v13656_v61  ;;  %v898_v18 = vadd.f32 %v9305_v7, %v828_v28  ;;  %v9912_v28 = vand.u32 4294901760, %v2141_v31  ;;  %v13657_v61 = vld [vmem:[#allocation41_spill] sm:$0xff] }
 0x1a4   :  { %13650 = vst [vmem:[#allocation37_spill] sm:$0xff] %v9842_v55  ;;  %v2599_v40 = vsub.f32 %v9834_v24, %v9852_v36  ;;  %v9872_v19 = vand.u32 4294901760, %v2143_v35  ;;  %v9875_v57 = vsub.f32 %v2144_v62, %v9854_v2  ;;  %v2142_v55 = vld [vmem:[#allocation11 + $0x10] sm:$0xff]  ;;  %2524 = vmatpush.msrb.mxu2 %v9854_v2  ;;  %v504_v16 = vadd.f32 %v13657_v61, %v443_v23  ;;  %v2140_v61 = vld [vmem:[#allocation11] sm:$0xff] }
 0x1a5   :  { %13651 = vst [vmem:[#allocation34_spill] sm:$0xff] %v9862_v9  ;;  %v9892_v5 = vand.u32 4294901760, %v2142_v55  ;;  %2595 = vmatpush.msrb.mxu3 %v9867_v45  ;;  %v1385_v9 = vadd.f32 %v9379_v48, %v1315_v59  ;;  %v703_v59 = vadd.f32 %v9223_v52, %v642_v49  ;;  %v957_v6 = vadd.f32 %v9325_v58, %v898_v18 }
 0x1a6   :  { %13652 = vst [vmem:[#allocation39_spill] sm:$0xff] %v9867_v45  ;;  %v9886_v51 = vand.u32 4294901760, %v2599_v40  ;;  %v9890_v62 = vand.u32 4294901760, %v9875_v57  ;;  %v9895_v8 = vsub.f32 %v2143_v35, %v9872_v19  ;;  %v2605_v40 = vsub.f32 %v9865_v15, %v9884_v53  ;;  %v1876_v35 = vpop.f32.mrf.mxu0  ;;  %2526 = vmatpush.msrb.mxu2 %v9872_v19  ;;  %2491 = vmatpush.msrb.mxu1 %v9586_v14 }
 0x1a7   :  { %v9921_v39 = vsub.f32 %v2142_v55, %v9892_v5  ;;  %v9937_v58 = vand.u32 4294901760, %v2140_v61  ;;  %v9940_v49 = vsub.f32 %v2141_v31, %v9912_v28  ;;  %v593_v55 = vadd.f32 %v9210_v30, %v504_v16  ;;  %v13664_v31 = vld [vmem:[#allocation25_spill] sm:$0xff]  ;;  %v13665_v16 = vld [vmem:[#allocation46_spill] sm:$0xff] }
 0x1a8   :  { %13654 = vst [vmem:[#allocation40_spill] sm:$0xff] %v9886_v51  ;;  %v2611_v44 = vsub.f32 %v9875_v57, %v9890_v62  ;;  %v9910_v7 = vand.u32 4294901760, %v9895_v8  ;;  %2601 = vmatpush.msrb.mxu3 %v9886_v51  ;;  %v9918_v48 = vand.u32 4294901760, %v2605_v40  ;;  %2528 = vmatpush.msrb.mxu2 %v9892_v5  ;;  %v448_v40 = vadd.f32 %v9103_v20, %v375_v60 }
 0x1a9   :  { %13655 = vst [vmem:[#allocation158_spill] sm:$0xff] %v9895_v8  ;;  %v9935_v52 = vand.u32 4294901760, %v9921_v39  ;;  %v1444_v18 = vadd.f32 %v9381_v37, %v1385_v9  ;;  %v9957_v37 = vand.u32 4294901760, %v9940_v49  ;;  %v646_v9 = vadd.f32 %v13664_v31, %v593_v55  ;;  %v1935_v47 = vpop.f32.mrf.mxu1  ;;  %2493 = vmatpush.msrb.mxu1 %v13667_v12  ;;  %v13676_v12 = vld [vmem:[#allocation26_spill] sm:$0xff] }
 0x1aa   :  { %13658 = vst [vmem:[#allocation38_spill] sm:$0xff] %v9918_v48  ;;  %v9925_v45 = vand.u32 4294901760, %v2611_v44  ;;  %v2617_v23 = vsub.f32 %v9895_v8, %v9910_v7  ;;  %2607 = vmatpush.msrb.mxu3 %v9918_v48  ;;  %v1807_v44 = vadd.f32 %v9635_v33, %v9624_v32  ;;  %v1822_v20 = vpop.f32.mrf.mxu3  ;;  %2530 = vmatpush.msrb.mxu2 %v9912_v28  ;;  %v13675_v48 = vld [vmem:[#allocation42_spill] sm:$0xff] }
 0x1ab   :  { %13659 = vst [vmem:[#allocation41_spill] sm:$0xff] %v9921_v39  ;;  %v2623_v30 = vsub.f32 %v9921_v39, %v9935_v52  ;;  %v9960_v33 = vsub.f32 %v2140_v61, %v9937_v58  ;;  %v832_v32 = vadd.f32 %v9226_v54, %v703_v59  ;;  %v1537_v20 = vadd.f32 %v13666_v46, %v1444_v18  ;;  %v13670_v59 = vld [vmem:[#allocation45_spill] sm:$0xff]  ;;  %v13672_v18 = vld [vmem:[#allocation123_spill] sm:$0xff]  ;;  %v13673_v46 = vld [vmem:[#allocation128_spill] sm:$0xff] }
 0x1ac   :  { %13660 = vst [vmem:[#allocation159_spill] sm:$0xff] %v9925_v45  ;;  %v9946_v60 = vand.u32 4294901760, %v2617_v23  ;;  %2613 = vmatpush.msrb.mxu3 %v9925_v45  ;;  %v1050_v23 = vadd.f32 %v13665_v16, %v957_v6  ;;  %v1877_v26 = vadd.f32 %v1876_v35, %v1807_v44  ;;  %2532 = vmatpush.msrb.mxu2 %v9937_v58  ;;  %v13671_v44 = vld [vmem:[#allocation60_spill] sm:$0xff] }
 0x1ad   :  { %13661 = vst [vmem:[#allocation160_spill] sm:$0xff] %v9940_v49  ;;  %v9969_v45 = vand.u32 4294901760, %v2623_v30  ;;  %v2629_v61 = vsub.f32 %v9940_v49, %v9957_v37  ;;  %v9974_v54 = vand.u32 4294901760, %v9960_v33  ;;  %v903_v6 = vadd.f32 %v13670_v59, %v832_v32  ;;  %2495 = vmatpush.msrb.mxu1 %v13673_v46  ;;  %v2028_v32 = vpop.f32.mrf.mxu2  ;;  %v13677_v59 = vld [vmem:[#allocation47_spill] sm:$0xff] }
 0x1ae   :  { %13662 = vst [vmem:[#allocation161_spill] sm:$0xff] %v9946_v60  ;;  %2619 = vmatpush.msrb.mxu3 %v9946_v60  ;;  %v1881_v35 = vpop.f32.mrf.mxu0  ;;  %v1936_v55 = vadd.f32 %v1935_v47, %v1877_v26  ;;  %v1390_v31 = vadd.f32 %v13671_v44, %v1319_v0  ;;  %v1590_v16 = vadd.f32 %v13672_v18, %v1537_v20  ;;  %v13678_v26 = vld [vmem:[#allocation49_spill] sm:$0xff]  ;;  %v13680_v18 = vld [vmem:[#allocation24_spill] sm:$0xff] }
 0x1af   :  { %13663 = vst [vmem:[#allocation162_spill] sm:$0xff] %v9960_v33  ;;  %v9981_v30 = vand.u32 4294901760, %v2629_v61  ;;  %v2635_v60 = vsub.f32 %v9960_v33, %v9974_v54  ;;  %v510_v51 = vadd.f32 %v13675_v48, %v448_v40  ;;  %v711_v14 = vadd.f32 %v13676_v12, %v646_v9  ;;  %v13683_v40 = vld [vmem:[#allocation59_spill] sm:$0xff]  ;;  %v13684_v12 = vld [vmem:[#allocation66_spill] sm:$0xff] }
 0x1b0   :  { %13668 = vst [vmem:[#allocation25_spill] sm:$0xff] %v9969_v45  ;;  %2625 = vmatpush.msrb.mxu3 %v9969_v45  ;;  %v1103_v47 = vadd.f32 %v13677_v59, %v1050_v23  ;;  %v963_v0 = vadd.f32 %v13678_v26, %v903_v6  ;;  %v2029_v44 = vadd.f32 %v2028_v32, %v1936_v55  ;;  %v13681_v45 = vld [vmem:[#allocation140_spill] sm:$0xff]  ;;  %v13686_v32 = vld [vmem:[#allocation27_spill] sm:$0xff] }
 0x1b1   :  { %13669 = vst [vmem:[#allocation46_spill] sm:$0xff] %v9974_v54  ;;  %v9990_v20 = vand.u32 4294901760, %v2635_v60  ;;  %v597_v61 = vadd.f32 %v13680_v18, %v510_v51  ;;  %v1811_v46 = vadd.f32 %v9697_v56, %v13681_v45  ;;  %v1450_v48 = vadd.f32 %v13682_v13, %v1390_v31  ;;  %v10001_v6 = vld [vmem:[%s13017_s2] ss:$0 sm:$0xff]  ;;  %v13687_v56 = vld [vmem:[#allocation50_spill] sm:$0xff]  ;;  %v1941_v18 = vpop.f32.mrf.mxu1 }
 0x1b2   :  { %13674 = vst [vmem:[#allocation105_spill] sm:$0xff] %v9981_v30  ;;  %2631 = vmatpush.msrb.mxu3 %v9981_v30  ;;  %v2081_v43 = vpop.f32.mrf.mxu3  ;;  %v1323_v9 = vadd.f32 %v13684_v12, %v13683_v40  ;;  %v1608_v27 = vadd.f32 %v1590_v16, %v1103_v47  ;;  %v13685_v60 = vld [vmem:[#allocation28_spill] sm:$0xff]  ;;  %v836_v45 = vadd.f32 %v13686_v32, %v711_v14  ;;  %v13688_v13 = vld [vmem:[#allocation122_spill] sm:$0xff]  ;;  %v13693_v14 = vld [vmem:[#allocation51_spill] sm:$0xff] }
 0x1b3   :  { %13679 = vst [vmem:[#allocation45_spill] sm:$0xff] %v9990_v20  ;;  %v2082_v23 = vadd.f32 %v2081_v43, %v2029_v44  ;;  %v650_v51 = vadd.f32 %v13685_v60, %v597_v61  ;;  %v1882_v55 = vadd.f32 %v1881_v35, %v1811_v46  ;;  %v1054_v59 = vadd.f32 %v13687_v56, %v963_v0  ;;  %v13689_v47 = vld [vmem:[#allocation48_spill] sm:$0xff]  ;;  %v13690_v40 = vld [vmem:[#allocation70_spill] sm:$0xff]  ;;  %v13692_v61 = vld [vmem:[#allocation43_spill] sm:$0xff] }
 0x1b4   :  { %2637 = vmatpush.msrb.mxu3 %v9990_v20  ;;  %v1541_v31 = vadd.f32 %v13688_v13, %v1450_v48  ;;  %v908_v44 = vadd.f32 %v13689_v47, %v836_v45  ;;  %v1395_v12 = vadd.f32 %v13690_v40, %v1323_v9  ;;  %v13691_v30 = vld [vmem:[#allocation136_spill] sm:$0xff]  ;;  %v13694_v0 = vld [vmem:[#allocation53_spill] sm:$0xff]  ;;  %v13695_v45 = vld [vmem:[#allocation71_spill] sm:$0xff] }
 0x1b5   :  { %v2100_v26 = vadd.f32 %v2082_v23, %v1608_v27  ;;  %v1942_v43 = vadd.f32 %v1941_v18, %v1882_v55  ;;  %v719_v35 = vadd.f32 %v13692_v61, %v650_v51  ;;  %v2032_v46 = vpop.f32.mrf.mxu2  ;;  %v1107_v60 = vadd.f32 %v13693_v14, %v1054_v59  ;;  %v13696_v9 = vld [vmem:[#allocation65_spill] sm:$0xff]  ;;  %v13698_v18 = vld [vmem:[#allocation44_spill] sm:$0xff]  ;;  %v13699_v59 = vld [vmem:[#allocation54_spill] sm:$0xff] }
 0x1b6   :  { %v1886_v16 = vpop.f32.mrf.mxu0  ;;  %v1594_v33 = vadd.f32 %v13691_v30, %v1541_v31  ;;  %v969_v32 = vadd.f32 %v13694_v0, %v908_v44  ;;  %v1815_v23 = vadd.f32 %v9767_v50, %v9752_v10  ;;  %v1456_v56 = vadd.f32 %v13695_v45, %v1395_v12  ;;  %v13697_v13 = vld [vmem:[#allocation81_spill] sm:$0xff]  ;;  %v13700_v44 = vld [vmem:[#allocation135_spill] sm:$0xff]  ;;  %v13701_v50 = vld [vmem:[#allocation52_spill] sm:$0xff] }
 0x1b7   :  { %v2109_v20 = vadd.f32 %v10001_v6, %v2100_v26  ;;  %v2033_v27 = vadd.f32 %v2032_v46, %v1942_v43  ;;  %v1327_v30 = vadd.f32 %v13697_v13, %v13696_v9  ;;  %v840_v47 = vadd.f32 %v13698_v18, %v719_v35  ;;  %v13702_v14 = vld [vmem:[#allocation87_spill] sm:$0xff]  ;;  %v13704_v35 = vld [vmem:[#allocation56_spill] sm:$0xff]  ;;  %v13705_v9 = vld [vmem:[#allocation89_spill] sm:$0xff] }
 0x1b8   :  { %v1609_v31 = vadd.f32 %v1594_v33, %v1107_v60  ;;  %v1887_v51 = vadd.f32 %v1886_v16, %v1815_v23  ;;  %v1058_v40 = vadd.f32 %v13699_v59, %v969_v32  ;;  %v13703_v16 = vld [vmem:[#allocation55_spill] sm:$0xff]  ;;  %v1819_v45 = vadd.f32 %v9846_v38, %v9825_v3  ;;  %v13707_v18 = vld [vmem:[#allocation32_spill] sm:$0xff]  ;;  %v13708_v3 = vld [vmem:[#allocation58_spill] sm:$0xff] }
 0x1b9   :  { %v2114_v48 = vmax.f32 %v2109_v20, 0.0  ;;  %v1545_v20 = vadd.f32 %v13700_v44, %v1456_v56  ;;  %v1947_v61 = vpop.f32.mrf.mxu1  ;;  %v913_v10 = vadd.f32 %v13701_v50, %v840_v47  ;;  %v1400_v12 = vadd.f32 %v13702_v14, %v1327_v30 }
 0x1ba   :  { %v2085_v55 = vpop.f32.mrf.mxu3  ;;  %v1948_v46 = vadd.f32 %v1947_v61, %v1887_v51 }
 0x1bb   :  { %2119 = vst [vmem:[#allocation2] sm:$0xff] %v2114_v48  ;;  %v2086_v26 = vadd.f32 %v2085_v55, %v2033_v27  ;;  %v1598_v0 = vadd.f32 %v9732_v4, %v1545_v20  ;;  %v1111_v27 = vadd.f32 %v13703_v16, %v1058_v40  ;;  %v975_v23 = vadd.f32 %v13704_v35, %v913_v10 }
 0x1bc   :  { %v1462_v13 = vadd.f32 %v13705_v9, %v1400_v12  ;;  %v13710_v9 = vld [vmem:[#allocation138_spill] sm:$0xff] }
 0x1bd   :  { %v2101_v43 = vadd.f32 %v2086_v26, %v1609_v31  ;;  %v2036_v48 = vpop.f32.mrf.mxu2  ;;  %v1610_v31 = vadd.f32 %v1598_v0, %v1111_v27  ;;  %v13706_v26 = vld [vmem:[#allocation57_spill] sm:$0xff] }
 0x1be   :  { %v1891_v60 = vpop.f32.mrf.mxu0  ;;  %v2037_v55 = vadd.f32 %v2036_v48, %v1948_v46  ;;  %v1062_v51 = vadd.f32 %v13706_v26, %v975_v23  ;;  %v1549_v47 = vadd.f32 %v13707_v18, %v1462_v13  ;;  %v13711_v13 = vld [vmem:[#allocation142_spill] sm:$0xff]  ;;  %v13715_v18 = vld [vmem:[#allocation139_spill] sm:$0xff] }
 0x1bf   :  { %v2110_v33 = vadd.f32 %v10001_v6, %v2101_v43  ;;  %v1892_v4 = vadd.f32 %v1891_v60, %v1819_v45 }
 0x1c0   :  { %v1602_v20 = vadd.f32 %v9806_v22, %v1549_v47  ;;  %v1115_v38 = vadd.f32 %v13708_v3, %v1062_v51  ;;  %v13714_v51 = vld [vmem:[#allocation31_spill] sm:$0xff]  ;;  %v13723_v3 = vld [vmem:[#allocation156_spill] sm:$0xff] }
 0x1c1   :  { %v2115_v32 = vmax.f32 %v2110_v33, 0.0  ;;  %v1953_v40 = vpop.f32.mrf.mxu1  ;;  %v13716_v47 = vld [vmem:[#allocation147_spill] sm:$0xff] }
 0x1c2   :  { %v2089_v56 = vpop.f32.mrf.mxu3  ;;  %v1954_v44 = vadd.f32 %v1953_v40, %v1892_v4  ;;  %v1611_v33 = vadd.f32 %v1602_v20, %v1115_v38  ;;  %v13713_v4 = vld [vmem:[#allocation29_spill] sm:$0xff]  ;;  %v13718_v40 = vld [vmem:[#allocation144_spill] sm:$0xff]  ;;  %v13720_v20 = vld [vmem:[#allocation30_spill] sm:$0xff] }
 0x1c3   :  { %2120 = vst [vmem:[#allocation2 + $0x8] sm:$0xff] %v2115_v32  ;;  %v2090_v30 = vadd.f32 %v2089_v56, %v2037_v55  ;;  %v13709_v32 = vld [vmem:[#allocation134_spill] sm:$0xff]  ;;  %v13724_v38 = vld [vmem:[#allocation152_spill] sm:$0xff] }
 0x1c5   :  { %v2102_v59 = vadd.f32 %v2090_v30, %v1610_v31  ;;  %v2040_v61 = vpop.f32.mrf.mxu2  ;;  %v13712_v30 = vld [vmem:[#allocation143_spill] sm:$0xff] }
 0x1c6   :  { %v1896_v50 = vpop.f32.mrf.mxu0  ;;  %v2041_v10 = vadd.f32 %v2040_v61, %v1954_v44  ;;  %v13719_v44 = vld [vmem:[#allocation151_spill] sm:$0xff]  ;;  %v13722_v61 = vld [vmem:[#allocation148_spill] sm:$0xff] }
 0x1c7   :  { %v2111_v43 = vadd.f32 %v10001_v6, %v2102_v59  ;;  %v13717_v59 = vld [vmem:[#allocation150_spill] sm:$0xff]  ;;  %v13726_v50 = vld [vmem:[#allocation35_spill] sm:$0xff] }
 0x1c9   :  { %v2116_v46 = vmax.f32 %v2111_v43, 0.0  ;;  %v1959_v27 = vpop.f32.mrf.mxu1  ;;  %v13721_v43 = vld [vmem:[#allocation145_spill] sm:$0xff] }
 0x1ca   :  { %v2093_v14 = vpop.f32.mrf.mxu3  ;;  %v2156_v12 = vld [vmem:[#allocation2] ss:$2 sm:$0x7f]  ;;  %v2158_v0 = vld [vmem:[#allocation2 + $0x1] ss:$2 sm:$0x7f] }
 0x1cb   :  { %2121 = vst [vmem:[#allocation2 + $0x10] sm:$0xff] %v2116_v46  ;;  %v2094_v60 = vadd.f32 %v2093_v14, %v2041_v10  ;;  %v2159_v48 = vmax.f32 %v2156_v12, %v2158_v0  ;;  %v13725_v46 = vld [vmem:[#allocation155_spill] sm:$0xff]  ;;  %v13727_v10 = vld [vmem:[#allocation154_spill] sm:$0xff]  ;;  %v13735_v27 = vld [vmem:[#allocation73_spill] sm:$0xff] }
 0x1cc   :  { %v13728_v14 = vld [vmem:[#allocation75_spill] sm:$0xff] }
 0x1cd   :  { %v2103_v16 = vadd.f32 %v2094_v60, %v1611_v33  ;;  %v10037_v35 = vand.u32 4294901760, %v2159_v48  ;;  %v2044_v55 = vpop.f32.mrf.mxu2  ;;  %v13729_v12 = vld [vmem:[#allocation79_spill] sm:$0xff]  ;;  %v13731_v33 = vld [vmem:[#allocation84_spill] sm:$0xff] }
 0x1ce   :  { %v13730_v0 = vld [vmem:[#allocation63_spill] sm:$0xff]  ;;  %v13732_v60 = vld [vmem:[#allocation68_spill] sm:$0xff]  ;;  %v13737_v55 = vld [vmem:[#allocation162_spill] sm:$0xff] }
 0x1cf   :  { %v2112_v22 = vadd.f32 %v10001_v6, %v2103_v16  ;;  %2298 = vmatmul.f32.vlgmr.msra.gmra.mxu1 %v10037_v35  ;;  %v10042_v23 = vsub.f32 %v2159_v48, %v10037_v35  ;;  %v13733_v48 = vld [vmem:[#allocation62_spill] sm:$0xff]  ;;  %v13734_v16 = vld [vmem:[#allocation93_spill] sm:$0xff] }
 0x1d0   :  { %2698 = vmatpush.msra.mxu1 %v13709_v32 }
 0x1d1   :  { %v2117_v45 = vmax.f32 %v2112_v22, 0.0  ;;  %2352 = vmatmul.f32.vlgmr.msra.gmra.mxu2 %v10042_v23  ;;  %v10047_v56 = vand.u32 4294901760, %v10042_v23  ;;  %v13736_v22 = vld [vmem:[#allocation64_spill] sm:$0xff] }
 0x1d2   :  { %2700 = vmatpush.msra.mxu1 %v13710_v9  ;;  %2739 = vmatpush.msra.mxu2 %v13711_v13  ;;  %v2097_v31 = vpop.f32.mrf.mxu3 }
 0x1d3   :  { %2122 = vst [vmem:[#allocation2 + $0x18] sm:$0xff] %v2117_v45  ;;  %2391 = vmatmul.f32.vlgmr.msra.gmra.mxu3 %v10047_v56  ;;  %v2195_v6 = vsub.f32 %v10042_v23, %v10047_v56  ;;  %v13738_v45 = vld [vmem:[#allocation96_spill] sm:$0xff]  ;;  %v13741_v31 = vld [vmem:[#allocation98_spill] sm:$0xff] }
 0x1d4   :  { %2702 = vmatpush.msra.mxu1 %v13712_v30  ;;  %2743 = vmatpush.msra.mxu2 %v13713_v4 }
 0x1d5   :  { %2806 = vmatpush.msra.mxu3 %v13709_v32  ;;  %v2196_v26 = vand.u32 4294901760, %v2195_v6  ;;  %v13742_v6 = vld [vmem:[#allocation83_spill] sm:$0xff] }
 0x1d6   :  { %2704 = vmatpush.msra.mxu1 %v13714_v51  ;;  %2747 = vmatpush.msra.mxu2 %v9727_v63 }
 0x1d7   :  { %2808 = vmatpush.msra.mxu3 %v13710_v9  ;;  %2197 = vmatmul.f32.vlgmr.msra.gmra.mxu0 %v2196_v26 }
 0x1d8   :  { %2497 = vmatmul.f32.vlgmr.msrb.gmra.mxu1 %v10037_v35  ;;  %2645 = vmatpush.msra.mxu0 %v13715_v18 }
 0x1d9   :  { %2706 = vmatpush.msra.mxu1 %v13716_v47  ;;  %2751 = vmatpush.msra.mxu2 %v13717_v59 }
 0x1da   :  { %2810 = vmatpush.msra.mxu3 %v13712_v30  ;;  %2538 = vmatmul.f32.vlgmr.msrb.gmra.mxu2 %v2196_v26  ;;  %v13743_v26 = vld [vmem:[#allocation74_spill] sm:$0xff] }
 0x1db   :  { %2648 = vmatpush.msra.mxu0 %v13718_v40  ;;  %2708 = vmatpush.msra.mxu1 %v13719_v44 }
 0x1dc   :  { %2755 = vmatpush.msra.mxu2 %v13720_v20  ;;  %2812 = vmatpush.msra.mxu3 %v13714_v51 }
 0x1dd   :  { %2639 = vmatmul.f32.vlgmr.msrb.gmra.mxu3 %v10037_v35  ;;  %2651 = vmatpush.msra.mxu0 %v13721_v43 }
 0x1de   :  { %2710 = vmatpush.msra.mxu1 %v9761_v1  ;;  %2759 = vmatpush.msra.mxu2 %v9779_v25 }
 0x1df   :  { %2814 = vmatpush.msra.mxu3 %v13716_v47  ;;  %2654 = vmatpush.msra.mxu0 %v13722_v61 }
 0x1e0   :  { %2712 = vmatpush.msra.mxu1 %v9784_v21  ;;  %2763 = vmatpush.msra.mxu2 %v13723_v3 }
 0x1e1   :  { %2816 = vmatpush.msra.mxu3 %v13719_v44  ;;  %2460 = vmatmul.f32.vlgmr.msrb.gmra.mxu0 %v10037_v35 }
 0x1e2   :  { %2657 = vmatpush.msra.mxu0 %v13724_v38  ;;  %2714 = vmatpush.msra.mxu1 %v13725_v46 }
 0x1e3   :  { %2767 = vmatpush.msra.mxu2 %v9822_v34  ;;  %2818 = vmatpush.msra.mxu3 %v9761_v1 }
 0x1e4   :  { %2660 = vmatpush.msra.mxu0 %v13726_v50  ;;  %2716 = vmatpush.msra.mxu1 %v9811_v42 }
 0x1e5   :  { %2771 = vmatpush.msra.mxu2 %v9829_v11  ;;  %2820 = vmatpush.msra.mxu3 %v9784_v21 }
 0x1e6   :  { %2663 = vmatpush.msra.mxu0 %v13727_v10  ;;  %2718 = vmatpush.msra.mxu1 %v9831_v41 }
 0x1e7   :  { %2775 = vmatpush.msra.mxu2 %v9852_v36  ;;  %2822 = vmatpush.msra.mxu3 %v13725_v46 }
 0x1e8   :  { %2666 = vmatpush.msra.mxu0 %v9804_v29  ;;  %2720 = vmatpush.msra.mxu1 %v9854_v2 }
 0x1e9   :  { %2779 = vmatpush.msra.mxu2 %v9884_v53  ;;  %2824 = vmatpush.msra.mxu3 %v9811_v42 }
 0x1ea   :  { %2669 = vmatpush.msra.mxu0 %v9814_v17  ;;  %2722 = vmatpush.msra.mxu1 %v9872_v19 }
 0x1eb   :  { %2783 = vmatpush.msra.mxu2 %v9890_v62  ;;  %2826 = vmatpush.msra.mxu3 %v9831_v41 }
 0x1ec   :  { %2672 = vmatpush.msra.mxu0 %v9834_v24  ;;  %2724 = vmatpush.msra.mxu1 %v9892_v5 }
 0x1ed   :  { %2787 = vmatpush.msra.mxu2 %v9910_v7  ;;  %2828 = vmatpush.msra.mxu3 %v9854_v2 }
 0x1ee   :  { %2675 = vmatpush.msra.mxu0 %v9865_v15  ;;  %2726 = vmatpush.msra.mxu1 %v9912_v28 }
 0x1ef   :  { %2791 = vmatpush.msra.mxu2 %v9935_v52  ;;  %2830 = vmatpush.msra.mxu3 %v9872_v19 }
 0x1f0   :  { %2678 = vmatpush.msra.mxu0 %v9875_v57  ;;  %2728 = vmatpush.msra.mxu1 %v9937_v58 }
 0x1f1   :  { %2795 = vmatpush.msra.mxu2 %v9957_v37  ;;  %2832 = vmatpush.msra.mxu3 %v9892_v5 }
 0x1f2   :  { %2732 = vmatmul.f32.vlgmr.msra.gmra.mxu1 %v10047_v56  ;;  %2681 = vmatpush.msra.mxu0 %v9895_v8  ;;  %v13740_v56 = vld [vmem:[#allocation69_spill] sm:$0xff]  ;;  %v13769_v8 = vld [vmem:[#allocation120_spill] sm:$0xff] }
 0x1f3   :  { %2897 = vmatpush.msrb.mxu1 %v13728_v14  ;;  %2799 = vmatpush.msra.mxu2 %v9974_v54  ;;  %v13744_v14 = vld [vmem:[#allocation102_spill] sm:$0xff]  ;;  %v13772_v54 = vld [vmem:[#allocation141_spill] sm:$0xff] }
 0x1f4   :  { %2834 = vmatpush.msra.mxu3 %v9912_v28  ;;  %2801 = vmatmul.f32.vlgmr.msra.gmra.mxu2 %v10037_v35 }
 0x1f5   :  { %2903 = vmatpush.msrb.mxu1 %v13729_v12  ;;  %2995 = vmatpush.msrb.mxu2 %v13730_v0  ;;  %v13745_v12 = vld [vmem:[#allocation85_spill] sm:$0xff]  ;;  %v13747_v0 = vld [vmem:[#allocation107_spill] sm:$0xff] }
 0x1f6   :  { %2684 = vmatpush.msra.mxu0 %v9921_v39  ;;  %2836 = vmatpush.msra.mxu3 %v9937_v58  ;;  %v13763_v39 = vld [vmem:[#allocation114_spill] sm:$0xff] }
 0x1f7   :  { %2838 = vmatmul.f32.vlgmr.msra.gmra.mxu3 %v10037_v35  ;;  %2909 = vmatpush.msrb.mxu1 %v13731_v33  ;;  %v13739_v35 = vld [vmem:[#allocation77_spill] sm:$0xff]  ;;  %v13748_v33 = vld [vmem:[#allocation91_spill] sm:$0xff] }
 0x1f8   :  { %2998 = vmatpush.msrb.mxu2 %v13732_v60  ;;  %3048 = vmatpush.msrb.mxu3 %v13733_v48  ;;  %v13749_v60 = vld [vmem:[#allocation80_spill] sm:$0xff] }
 0x1f9   :  { %2687 = vmatpush.msra.mxu0 %v9940_v49  ;;  %2915 = vmatpush.msrb.mxu1 %v13734_v16  ;;  %v13750_v16 = vld [vmem:[#allocation112_spill] sm:$0xff]  ;;  %v13760_v49 = vld [vmem:[#allocation109_spill] sm:$0xff] }
 0x1fa   :  { %3001 = vmatpush.msrb.mxu2 %v13735_v27  ;;  %3050 = vmatpush.msrb.mxu3 %v13736_v22  ;;  %v13751_v27 = vld [vmem:[#allocation95_spill] sm:$0xff] }
 0x1fb   :  { %2690 = vmatpush.msra.mxu0 %v13737_v55  ;;  %2921 = vmatpush.msrb.mxu1 %v13738_v45  ;;  %v13752_v45 = vld [vmem:[#allocation86_spill] sm:$0xff] }
 0x1fc   :  { %2693 = vmatmul.f32.vlgmr.msra.gmra.mxu0 %v10042_v23  ;;  %3004 = vmatpush.msrb.mxu2 %v13739_v35  ;;  %v13746_v23 = vld [vmem:[#allocation78_spill] sm:$0xff]  ;;  %v2847_v35 = vld [vmem:[#allocation2 + $0x12] ss:$2 sm:$0x7f] }
 0x1fd   :  { %2852 = vmatpush.msrb.mxu0 %v13733_v48  ;;  %3052 = vmatpush.msrb.mxu3 %v13740_v56  ;;  %v13759_v55 = vld [vmem:[#allocation126_spill] sm:$0xff] }
 0x1fe   :  { %2927 = vmatpush.msrb.mxu1 %v13741_v31  ;;  %3007 = vmatpush.msrb.mxu2 %v13742_v6  ;;  %v2849_v31 = vld [vmem:[#allocation2 + $0x13] ss:$2 sm:$0x7f] }
 0x1ff   :  { %2854 = vmatpush.msrb.mxu0 %v13736_v22  ;;  %3054 = vmatpush.msrb.mxu3 %v13743_v26  ;;  %v13753_v6 = vld [vmem:[#allocation115_spill] sm:$0xff] }
 0x200   :  { %2933 = vmatpush.msrb.mxu1 %v13744_v14  ;;  %3010 = vmatpush.msrb.mxu2 %v13745_v12  ;;  %v13754_v14 = vld [vmem:[#allocation101_spill] sm:$0xff]  ;;  %v13755_v12 = vld [vmem:[#allocation92_spill] sm:$0xff] }
 0x201   :  { %2856 = vmatpush.msrb.mxu0 %v13740_v56  ;;  %3056 = vmatpush.msrb.mxu3 %v13746_v23 }
 0x202   :  { %2939 = vmatpush.msrb.mxu1 %v13747_v0  ;;  %3013 = vmatpush.msrb.mxu2 %v13748_v33  ;;  %v13756_v0 = vld [vmem:[#allocation124_spill] sm:$0xff]  ;;  %v13757_v33 = vld [vmem:[#allocation103_spill] sm:$0xff] }
 0x203   :  { %2858 = vmatpush.msrb.mxu0 %v13743_v26  ;;  %3058 = vmatpush.msrb.mxu3 %v13749_v60 }
 0x204   :  { %2945 = vmatpush.msrb.mxu1 %v13750_v16  ;;  %3016 = vmatpush.msrb.mxu2 %v13751_v27  ;;  %v2850_v16 = vmax.f32 %v2847_v35, %v2849_v31  ;;  %v13758_v27 = vld [vmem:[#allocation97_spill] sm:$0xff]  ;;  %v13764_v35 = vld [vmem:[#allocation104_spill] sm:$0xff] }
 0x205   :  { %2860 = vmatpush.msrb.mxu0 %v13746_v23  ;;  %3060 = vmatpush.msrb.mxu3 %v13752_v45  ;;  %v13765_v31 = vld [vmem:[#allocation132_spill] sm:$0xff] }
 0x206   :  { %2951 = vmatpush.msrb.mxu1 %v13753_v6  ;;  %3019 = vmatpush.msrb.mxu2 %v13754_v14  ;;  %v13761_v6 = vld [vmem:[#allocation100_spill] sm:$0xff]  ;;  %v13762_v14 = vld [vmem:[#allocation129_spill] sm:$0xff] }
 0x207   :  { %2862 = vmatpush.msrb.mxu0 %v13749_v60  ;;  %3062 = vmatpush.msrb.mxu3 %v13755_v12 }
 0x208   :  { %2957 = vmatpush.msrb.mxu1 %v13756_v0  ;;  %3022 = vmatpush.msrb.mxu2 %v13757_v33  ;;  %v10165_v0 = vand.u32 4294901760, %v2850_v16  ;;  %v13766_v33 = vld [vmem:[#allocation116_spill] sm:$0xff] }
 0x209   :  { %2864 = vmatpush.msrb.mxu0 %v13752_v45  ;;  %3064 = vmatpush.msrb.mxu3 %v13758_v27 }
 0x20a   :  { %2963 = vmatpush.msrb.mxu1 %v13759_v55  ;;  %3025 = vmatpush.msrb.mxu2 %v13760_v49  ;;  %v13767_v49 = vld [vmem:[#allocation110_spill] sm:$0xff]  ;;  %v13768_v55 = vld [vmem:[#allocation137_spill] sm:$0xff] }
 0x20b   :  { %2866 = vmatpush.msrb.mxu0 %v13755_v12  ;;  %3066 = vmatpush.msrb.mxu3 %v13761_v6 }
 0x20c   :  { %2969 = vmatpush.msrb.mxu1 %v13762_v14  ;;  %3028 = vmatpush.msrb.mxu2 %v13763_v39  ;;  %v10176_v39 = vsub.f32 %v2850_v16, %v10165_v0  ;;  %v13771_v14 = vld [vmem:[#allocation111_spill] sm:$0xff]  ;;  %v13776_v16 = vld [vmem:[#allocation121_spill] sm:$0xff] }
 0x20d   :  { %2868 = vmatpush.msrb.mxu0 %v13758_v27  ;;  %3068 = vmatpush.msrb.mxu3 %v13764_v35 }
 0x20e   :  { %2975 = vmatpush.msrb.mxu1 %v13765_v31  ;;  %3031 = vmatpush.msrb.mxu2 %v13766_v33  ;;  %13770 = vst [vmem:[#allocation60_spill] sm:$0xff] %v10176_v39  ;;  %v13773_v31 = vld [vmem:[#allocation127_spill] sm:$0xff]  ;;  %v13774_v33 = vld [vmem:[#allocation117_spill] sm:$0xff] }
 0x20f   :  { %2870 = vmatpush.msrb.mxu0 %v13761_v6  ;;  %3070 = vmatpush.msrb.mxu3 %v13767_v49 }
 0x210   :  { %2981 = vmatpush.msrb.mxu1 %v13768_v55  ;;  %3034 = vmatpush.msrb.mxu2 %v13769_v8  ;;  %v13775_v55 = vld [vmem:[#allocation131_spill] sm:$0xff]  ;;  %v10187_v8 = vand.u32 4294901760, %v10176_v39 }
 0x211   :  { %2872 = vmatpush.msrb.mxu0 %v13764_v35  ;;  %3072 = vmatpush.msrb.mxu3 %v13771_v14 }
 0x212   :  { %2987 = vmatpush.msrb.mxu1 %v13772_v54  ;;  %3037 = vmatpush.msrb.mxu2 %v13773_v31  ;;  %v13777_v54 = vld [vmem:[#allocation128_spill] sm:$0xff]  ;;  %v2886_v31 = vsub.f32 %v10176_v39, %v10187_v8 }
 0x213   :  { %2874 = vmatpush.msrb.mxu0 %v13767_v49  ;;  %3074 = vmatpush.msrb.mxu3 %v13774_v33 }
 0x214   :  { %2989 = vmatmul.f32.vlgmr.msrb.gmra.mxu1 %v10165_v0  ;;  %3040 = vmatpush.msrb.mxu2 %v13775_v55  ;;  %v2887_v55 = vand.u32 4294901760, %v2886_v31  ;;  %v13785_v31 = vld [vmem:[#allocation36_spill] sm:$0xff] }
 0x215   :  { %3156 = vmatpush.msra.mxu1 %v13733_v48  ;;  %2876 = vmatpush.msrb.mxu0 %v13771_v14  ;;  %v13778_v48 = vld [vmem:[#allocation146_spill] sm:$0xff] }
 0x216   :  { %3076 = vmatpush.msrb.mxu3 %v13776_v16  ;;  %3043 = vmatmul.f32.vlgmr.msrb.gmra.mxu2 %v10176_v39  ;;  %v13781_v39 = vld [vmem:[#allocation33_spill] sm:$0xff] }
 0x217   :  { %3158 = vmatpush.msra.mxu1 %v13736_v22  ;;  %3193 = vmatpush.msra.mxu2 %v13709_v32  ;;  %v13779_v22 = vld [vmem:[#allocation149_spill] sm:$0xff] }
 0x218   :  { %2878 = vmatpush.msrb.mxu0 %v13774_v33  ;;  %3078 = vmatpush.msrb.mxu3 %v13777_v54 }
 0x219   :  { %3082 = vmatmul.f32.vlgmr.msrb.gmra.mxu3 %v10187_v8  ;;  %3160 = vmatpush.msra.mxu1 %v13740_v56  ;;  %v13780_v56 = vld [vmem:[#allocation67_spill] sm:$0xff] }
 0x21a   :  { %3195 = vmatpush.msra.mxu2 %v13710_v9  ;;  %3238 = vmatpush.msra.mxu3 %v13778_v48  ;;  %v13783_v48 = vld [vmem:[#allocation153_spill] sm:$0xff] }
 0x21b   :  { %2880 = vmatpush.msrb.mxu0 %v13776_v16  ;;  %3162 = vmatpush.msra.mxu1 %v13743_v26  ;;  %v13782_v26 = vld [vmem:[#allocation72_spill] sm:$0xff] }
 0x21c   :  { %3197 = vmatpush.msra.mxu2 %v13712_v30  ;;  %3244 = vmatpush.msra.mxu3 %v13779_v22  ;;  %v13788_v22 = vld [vmem:[#allocation88_spill] sm:$0xff] }
 0x21d   :  { %2882 = vmatpush.msrb.mxu0 %v13777_v54  ;;  %3164 = vmatpush.msra.mxu1 %v13746_v23  ;;  %v13784_v23 = vld [vmem:[#allocation76_spill] sm:$0xff] }
 0x21e   :  { %2888 = vmatmul.f32.vlgmr.msrb.gmra.mxu0 %v2887_v55  ;;  %3199 = vmatpush.msra.mxu2 %v13714_v51 }
 0x21f   :  { %3089 = vmatpush.msra.mxu0 %v13780_v56  ;;  %3250 = vmatpush.msra.mxu3 %v13781_v39  ;;  %v13786_v39 = vld [vmem:[#allocation82_spill] sm:$0xff] }
 0x220   :  { %3166 = vmatpush.msra.mxu1 %v13749_v60  ;;  %3201 = vmatpush.msra.mxu2 %v13716_v47  ;;  %v13787_v60 = vld [vmem:[#allocation157_spill] sm:$0xff]  ;;  %v13790_v56 = vld [vmem:[#allocation90_spill] sm:$0xff] }
 0x221   :  { %3093 = vmatpush.msra.mxu0 %v13782_v26  ;;  %3256 = vmatpush.msra.mxu3 %v13783_v48  ;;  %v13792_v26 = vld [vmem:[#allocation94_spill] sm:$0xff]  ;;  %v13794_v48 = vld [vmem:[#allocation99_spill] sm:$0xff] }
 0x222   :  { %3168 = vmatpush.msra.mxu1 %v13752_v45  ;;  %3203 = vmatpush.msra.mxu2 %v13719_v44  ;;  %v13789_v45 = vld [vmem:[#allocation37_spill] sm:$0xff] }
 0x223   :  { %3097 = vmatpush.msra.mxu0 %v13784_v23  ;;  %3262 = vmatpush.msra.mxu3 %v13785_v31  ;;  %v13796_v23 = vld [vmem:[#allocation106_spill] sm:$0xff]  ;;  %v13798_v31 = vld [vmem:[#allocation108_spill] sm:$0xff] }
 0x224   :  { %3170 = vmatpush.msra.mxu1 %v13755_v12  ;;  %3205 = vmatpush.msra.mxu2 %v9761_v1  ;;  %v13791_v12 = vld [vmem:[#allocation34_spill] sm:$0xff] }
 0x225   :  { %3101 = vmatpush.msra.mxu0 %v13786_v39  ;;  %3268 = vmatpush.msra.mxu3 %v13787_v60  ;;  %v13800_v39 = vld [vmem:[#allocation113_spill] sm:$0xff]  ;;  %v13802_v60 = vld [vmem:[#allocation118_spill] sm:$0xff] }
 0x226   :  { %3172 = vmatpush.msra.mxu1 %v13758_v27  ;;  %3207 = vmatpush.msra.mxu2 %v9784_v21  ;;  %v13793_v27 = vld [vmem:[#allocation39_spill] sm:$0xff] }
 0x227   :  { %3105 = vmatpush.msra.mxu0 %v13788_v22  ;;  %3274 = vmatpush.msra.mxu3 %v13789_v45  ;;  %v13805_v22 = vld [vmem:[#allocation105_spill] sm:$0xff] }
 0x228   :  { %3174 = vmatpush.msra.mxu1 %v13761_v6  ;;  %3209 = vmatpush.msra.mxu2 %v13725_v46  ;;  %v13795_v6 = vld [vmem:[#allocation40_spill] sm:$0xff]  ;;  %v13807_v45 = vld [vmem:[#allocation45_spill] sm:$0xff] }
 0x229   :  { %3109 = vmatpush.msra.mxu0 %v13790_v56  ;;  %3280 = vmatpush.msra.mxu3 %v13791_v12  ;;  %v13808_v56 = vld [vmem:[#allocation130_spill] sm:$0xff] }
 0x22a   :  { %3176 = vmatpush.msra.mxu1 %v13764_v35  ;;  %3211 = vmatpush.msra.mxu2 %v9811_v42  ;;  %v13797_v35 = vld [vmem:[#allocation38_spill] sm:$0xff] }
 0x22b   :  { %3113 = vmatpush.msra.mxu0 %v13792_v26  ;;  %3286 = vmatpush.msra.mxu3 %v13793_v27  ;;  %v13813_v27 = vld [vmem:[#allocation160_spill] sm:$0xff] }
 0x22c   :  { %3178 = vmatpush.msra.mxu1 %v13767_v49  ;;  %3213 = vmatpush.msra.mxu2 %v9831_v41  ;;  %v13799_v49 = vld [vmem:[#allocation159_spill] sm:$0xff] }
 0x22d   :  { %3117 = vmatpush.msra.mxu0 %v13794_v48  ;;  %3292 = vmatpush.msra.mxu3 %v13795_v6  ;;  %v3564_v6 = vld [vmem:[#allocation12 + $0xb0] sm:$0xff] }
 0x22e   :  { %3180 = vmatpush.msra.mxu1 %v13771_v14  ;;  %3215 = vmatpush.msra.mxu2 %v9854_v2  ;;  %v13801_v14 = vld [vmem:[#allocation161_spill] sm:$0xff] }
 0x22f   :  { %3121 = vmatpush.msra.mxu0 %v13796_v23  ;;  %3298 = vmatpush.msra.mxu3 %v13797_v35 }
 0x230   :  { %3182 = vmatpush.msra.mxu1 %v13774_v33  ;;  %3217 = vmatpush.msra.mxu2 %v9872_v19  ;;  %v13803_v33 = vld [vmem:[#allocation25_spill] sm:$0xff] }
 0x231   :  { %3125 = vmatpush.msra.mxu0 %v13798_v31  ;;  %3304 = vmatpush.msra.mxu3 %v13799_v49  ;;  %v10408_v31 = vand.u32 4294901760, %v3564_v6  ;;  %v13814_v49 = vld [vmem:[#allocation162_spill] sm:$0xff] }
 0x232   :  { %3184 = vmatpush.msra.mxu1 %v13776_v16  ;;  %3219 = vmatpush.msra.mxu2 %v9892_v5  ;;  %v13804_v16 = vld [vmem:[#allocation119_spill] sm:$0xff] }
 0x233   :  { %3129 = vmatpush.msra.mxu0 %v13800_v39  ;;  %3310 = vmatpush.msra.mxu3 %v13801_v14  ;;  %v3563_v39 = vld [vmem:[#allocation12 + $0xa8] sm:$0xff] }
 0x234   :  { %3186 = vmatpush.msra.mxu1 %v13777_v54  ;;  %3221 = vmatpush.msra.mxu2 %v9912_v28  ;;  %v13806_v54 = vld [vmem:[#allocation125_spill] sm:$0xff]  ;;  %v13815_v14 = vld [vmem:[#allocation60_spill] sm:$0xff] }
 0x235   :  { %3133 = vmatpush.msra.mxu0 %v13802_v60  ;;  %3316 = vmatpush.msra.mxu3 %v13803_v33 }
 0x236   :  { %3188 = vmatmul.f32.vlgmr.msra.gmra.mxu1 %v10165_v0  ;;  %3223 = vmatpush.msra.mxu2 %v9937_v58 }
 0x237   :  { %3389 = vmatpush.msrb.mxu1 %v13709_v32  ;;  %3137 = vmatpush.msra.mxu0 %v13804_v16 }
 0x238   :  { %3322 = vmatpush.msra.mxu3 %v13805_v22  ;;  %3229 = vmatmul.f32.vlgmr.msra.gmra.mxu2 %v2887_v55  ;;  %v10418_v22 = vsub.f32 %v3564_v6, %v10408_v31 }
 0x239   :  { %3391 = vmatpush.msrb.mxu1 %v13710_v9  ;;  %3430 = vmatpush.msrb.mxu2 %v13711_v13  ;;  %v13809_v13 = vld [vmem:[#allocation133_spill] sm:$0xff] }
 0x23a   :  { %3141 = vmatpush.msra.mxu0 %v13806_v54  ;;  %3328 = vmatpush.msra.mxu3 %v13807_v45  ;;  %v10422_v54 = vand.u32 4294901760, %v3563_v39  ;;  %v3562_v45 = vld [vmem:[#allocation12 + $0xa0] sm:$0xff] }
 0x23b   :  { %3330 = vmatmul.f32.vlgmr.msra.gmra.mxu3 %v10165_v0  ;;  %3393 = vmatpush.msrb.mxu1 %v13712_v30 }
 0x23c   :  { %3434 = vmatpush.msrb.mxu2 %v13713_v4  ;;  %3497 = vmatpush.msrb.mxu3 %v13709_v32  ;;  %v3573_v32 = vld [vmem:[#allocation12 + $0xf8] sm:$0xff] }
 0x23d   :  { %3145 = vmatpush.msra.mxu0 %v13808_v56  ;;  %3395 = vmatpush.msrb.mxu1 %v13714_v51 }
 0x23e   :  { %3438 = vmatpush.msrb.mxu2 %v9727_v63  ;;  %3499 = vmatpush.msrb.mxu3 %v13710_v9  ;;  %v10287_v63 = vand.u32 4294901760, %v3573_v32  ;;  %v3570_v9 = vld [vmem:[#allocation12 + $0xe0] sm:$0xff] }
 0x23f   :  { %3149 = vmatpush.msra.mxu0 %v13809_v13  ;;  %3397 = vmatpush.msrb.mxu1 %v13716_v47 }
 0x240   :  { %3151 = vmatmul.f32.vlgmr.msra.gmra.mxu0 %v10165_v0  ;;  %3442 = vmatpush.msrb.mxu2 %v13717_v59  ;;  %v3568_v59 = vld [vmem:[#allocation12 + $0xd0] sm:$0xff] }
 0x241   :  { %3336 = vmatpush.msrb.mxu0 %v13715_v18  ;;  %3501 = vmatpush.msrb.mxu3 %v13712_v30 }
 0x242   :  { %3399 = vmatpush.msrb.mxu1 %v13719_v44  ;;  %3446 = vmatpush.msrb.mxu2 %v13720_v20 }
 0x243   :  { %3339 = vmatpush.msrb.mxu0 %v13718_v40  ;;  %3503 = vmatpush.msrb.mxu3 %v13714_v51  ;;  %v10322_v51 = vand.u32 4294901760, %v3570_v9  ;;  %v10362_v40 = vand.u32 4294901760, %v3568_v59 }
 0x244   :  { %3401 = vmatpush.msrb.mxu1 %v9761_v1  ;;  %3450 = vmatpush.msrb.mxu2 %v9779_v25  ;;  %v10298_v25 = vsub.f32 %v3573_v32, %v10287_v63  ;;  %v3679_v32 = vand.u32 4294901760, %v10418_v22 }
 0x245   :  { %3342 = vmatpush.msrb.mxu0 %v13721_v43  ;;  %3505 = vmatpush.msrb.mxu3 %v13716_v47  ;;  %v10338_v18 = vsub.f32 %v3570_v9, %v10322_v51  ;;  %v13811_v43 = vld [vmem:[#allocation158_spill] sm:$0xff] }
 0x246   :  { %3403 = vmatpush.msrb.mxu1 %v9784_v21  ;;  %3454 = vmatpush.msrb.mxu2 %v13723_v3  ;;  %v3561_v9 = vld [vmem:[#allocation12 + $0x98] sm:$0xff] }
 0x247   :  { %3345 = vmatpush.msrb.mxu0 %v13722_v61  ;;  %3507 = vmatpush.msrb.mxu3 %v13719_v44  ;;  %v3643_v47 = vand.u32 4294901760, %v10338_v18  ;;  %v3566_v61 = vld [vmem:[#allocation12 + $0xc0] sm:$0xff] }
 0x248   :  { %3405 = vmatpush.msrb.mxu1 %v13725_v46  ;;  %3458 = vmatpush.msrb.mxu2 %v9822_v34  ;;  %v3572_v34 = vld [vmem:[#allocation12 + $0xf0] sm:$0xff] }
 0x249   :  { %3348 = vmatpush.msrb.mxu0 %v13724_v38  ;;  %3509 = vmatpush.msrb.mxu3 %v9761_v1  ;;  %v3625_v1 = vand.u32 4294901760, %v10298_v25 }
 0x24a   :  { %3407 = vmatpush.msrb.mxu1 %v9811_v42  ;;  %3462 = vmatpush.msrb.mxu2 %v9829_v11  ;;  %v10311_v11 = vand.u32 4294901760, %v3572_v34 }
 0x24b   :  { %3351 = vmatpush.msrb.mxu0 %v13726_v50  ;;  %3511 = vmatpush.msrb.mxu3 %v9784_v21  ;;  %v3571_v21 = vld [vmem:[#allocation12 + $0xe8] sm:$0xff] }
 0x24c   :  { %3409 = vmatpush.msrb.mxu1 %v9831_v41  ;;  %3466 = vmatpush.msrb.mxu2 %v9852_v36  ;;  %v3569_v36 = vld [vmem:[#allocation12 + $0xd8] sm:$0xff]  ;;  %v10318_v30 = vsub.f32 %v3572_v34, %v10311_v11  ;;  %v10320_v4 = vand.u32 4294901760, %v3571_v21  ;;  %v13812_v50 = vld [vmem:[#allocation41_spill] sm:$0xff]  ;;  %v10429_v34 = vand.u32 4294901760, %v3562_v45 }
 0x24d   :  { %3354 = vmatpush.msrb.mxu0 %v13727_v10  ;;  %3513 = vmatpush.msrb.mxu3 %v13725_v46  ;;  %v10383_v46 = vand.u32 4294901760, %v3566_v61  ;;  %v3565_v10 = vld [vmem:[#allocation12 + $0xb8] sm:$0xff] }
 0x24e   :  { %3411 = vmatpush.msrb.mxu1 %v9854_v2  ;;  %3470 = vmatpush.msrb.mxu2 %v9884_v53  ;;  %v10324_v53 = vand.u32 4294901760, %v3569_v36  ;;  %v10393_v26 = vand.u32 4294901760, %v3565_v10 }
 0x24f   :  { %3357 = vmatpush.msrb.mxu0 %v9804_v29  ;;  %3515 = vmatpush.msrb.mxu3 %v9811_v42  ;;  %v3626_v42 = vsub.f32 %v10298_v25, %v3625_v1  ;;  %v3631_v29 = vand.u32 4294901760, %v10318_v30  ;;  %v10391_v12 = vsub.f32 %v3566_v61, %v10383_v46 }
 0x250   :  { %3413 = vmatpush.msrb.mxu1 %v9872_v19  ;;  %3474 = vmatpush.msrb.mxu2 %v9890_v62  ;;  %v10335_v62 = vsub.f32 %v3571_v21, %v10320_v4  ;;  %v10406_v35 = vsub.f32 %v3565_v10, %v10393_v26  ;;  %v10434_v21 = vsub.f32 %v3563_v39, %v10422_v54  ;;  %v2299_v39 = vpop.f32.mrf.mxu1 }
 0x251   :  { %3360 = vmatpush.msrb.mxu0 %v9814_v17  ;;  %3517 = vmatpush.msrb.mxu3 %v9831_v41  ;;  %v10341_v17 = vsub.f32 %v3569_v36, %v10324_v53  ;;  %v3632_v41 = vsub.f32 %v10318_v30, %v3631_v29  ;;  %v3667_v23 = vand.u32 4294901760, %v10391_v12 }
 0x252   :  { %3415 = vmatpush.msrb.mxu1 %v9892_v5  ;;  %3478 = vmatpush.msrb.mxu2 %v9910_v7  ;;  %v3637_v7 = vand.u32 4294901760, %v10335_v62  ;;  %v3673_v16 = vand.u32 4294901760, %v10406_v35 }
 0x253   :  { %3363 = vmatpush.msrb.mxu0 %v9834_v24  ;;  %3519 = vmatpush.msrb.mxu3 %v9854_v2  ;;  %v3649_v24 = vand.u32 4294901760, %v10341_v17  ;;  %v3627_v2 = vand.u32 4294901760, %v3626_v42  ;;  %v3633_v44 = vand.u32 4294901760, %v3632_v41  ;;  %v3668_v33 = vsub.f32 %v10391_v12, %v3667_v23 }
 0x254   :  { %3417 = vmatpush.msrb.mxu1 %v9912_v28  ;;  %3482 = vmatpush.msrb.mxu2 %v9935_v52  ;;  %v3638_v52 = vsub.f32 %v10335_v62, %v3637_v7  ;;  %v3674_v13 = vsub.f32 %v10406_v35, %v3673_v16  ;;  %v3680_v42 = vsub.f32 %v10418_v22, %v3679_v32 }
 0x255   :  { %3366 = vmatpush.msrb.mxu0 %v9865_v15  ;;  %3521 = vmatpush.msrb.mxu3 %v9872_v19  ;;  %v3567_v15 = vld [vmem:[#allocation12 + $0xc8] sm:$0xff]  ;;  %v13810_v19 = vld [vmem:[#allocation46_spill] sm:$0xff]  ;;  %v3669_v36 = vand.u32 4294901760, %v3668_v33  ;;  %v10441_v41 = vsub.f32 %v3562_v45, %v10429_v34 }
 0x256   :  { %3419 = vmatpush.msrb.mxu1 %v9937_v58  ;;  %3486 = vmatpush.msrb.mxu2 %v9957_v37  ;;  %v3644_v37 = vsub.f32 %v10338_v18, %v3643_v47  ;;  %v10369_v20 = vand.u32 4294901760, %v3567_v15  ;;  %v3639_v3 = vand.u32 4294901760, %v3638_v52  ;;  %v3559_v52 = vld [vmem:[#allocation12 + $0x88] sm:$0xff] }
 0x257   :  { %3369 = vmatpush.msrb.mxu0 %v9875_v57  ;;  %3523 = vmatpush.msrb.mxu3 %v9892_v5  ;;  %v3650_v57 = vsub.f32 %v10341_v17, %v3649_v24  ;;  %v10377_v5 = vsub.f32 %v3568_v59, %v10362_v40  ;;  %v10443_v59 = vand.u32 4294901760, %v3561_v9  ;;  %v3691_v61 = vand.u32 4294901760, %v10441_v41 }
 0x258   :  { %3423 = vmatmul.f32.vlgmr.msrb.gmra.mxu1 %v10187_v8  ;;  %3490 = vmatpush.msrb.mxu2 %v13810_v19  ;;  %v10381_v38 = vsub.f32 %v3567_v15, %v10369_v20  ;;  %v3645_v8 = vand.u32 4294901760, %v3644_v37  ;;  %v3558_v15 = vld [vmem:[#allocation12 + $0x80] sm:$0xff]  ;;  %v3685_v19 = vand.u32 4294901760, %v10434_v21  ;;  %v10450_v37 = vand.u32 4294901760, %v3559_v52 }
 0x259   :  { %3372 = vmatpush.msrb.mxu0 %v13811_v43  ;;  %3525 = vmatpush.msrb.mxu3 %v9912_v28  ;;  %v3655_v28 = vand.u32 4294901760, %v10377_v5  ;;  %v3651_v48 = vand.u32 4294901760, %v3650_v57  ;;  %v10452_v43 = vand.u32 4294901760, %v3558_v15  ;;  %v3675_v57 = vand.u32 4294901760, %v3674_v13  ;;  %v2392_v13 = vpop.f32.mrf.mxu3 }
 0x25a   :  { %3492 = vmatmul.f32.vlgmr.msrb.gmra.mxu2 %v10165_v0  ;;  %3628 = vmatpush.msra.mxu1 %v3627_v2  ;;  %v3661_v55 = vand.u32 4294901760, %v10381_v38  ;;  %v3560_v2 = vld [vmem:[#allocation12 + $0x90] sm:$0xff]  ;;  %v3686_v10 = vsub.f32 %v10434_v21, %v3685_v19  ;;  %v3692_v6 = vsub.f32 %v10441_v41, %v3691_v61 }
 0x25b   :  { %3375 = vmatpush.msrb.mxu0 %v13812_v50  ;;  %3527 = vmatpush.msrb.mxu3 %v9937_v58  ;;  %v3656_v58 = vsub.f32 %v10377_v5, %v3655_v28  ;;  %v2198_v50 = vpop.f32.mrf.mxu0 }
 0x25c   :  { %3529 = vmatmul.f32.vlgmr.msrb.gmra.mxu3 %v10165_v0  ;;  %3634 = vmatpush.msra.mxu1 %v3633_v44  ;;  %v3662_v0 = vsub.f32 %v10381_v38, %v3661_v55  ;;  %v10448_v44 = vand.u32 4294901760, %v3560_v2 }
 0x25d   :  { %3378 = vmatpush.msrb.mxu0 %v13813_v27  ;;  %3730 = vmatpush.msra.mxu2 %v10298_v25  ;;  %v3657_v60 = vand.u32 4294901760, %v3656_v58  ;;  %v10468_v27 = vsub.f32 %v3559_v52, %v10450_v37  ;;  %v3681_v58 = vand.u32 4294901760, %v3680_v42 }
 0x25e   :  { %3640 = vmatpush.msra.mxu1 %v3639_v3  ;;  %3788 = vmatpush.msra.mxu3 %v10287_v63  ;;  %v3663_v56 = vand.u32 4294901760, %v3662_v0  ;;  %v10457_v3 = vsub.f32 %v3561_v9, %v10443_v59  ;;  %v3693_v9 = vand.u32 4294901760, %v3692_v6  ;;  %v2498_v6 = vpop.f32.mrf.mxu1 }
 0x25f   :  { %3381 = vmatpush.msrb.mxu0 %v13814_v49  ;;  %3733 = vmatpush.msra.mxu2 %v10318_v30  ;;  %v10476_v49 = vsub.f32 %v3558_v15, %v10452_v43  ;;  %v3709_v45 = vand.u32 4294901760, %v10468_v27 }
 0x260   :  { %3384 = vmatmul.f32.vlgmr.msrb.gmra.mxu0 %v13815_v14  ;;  %3646 = vmatpush.msra.mxu1 %v3645_v8  ;;  %v10465_v8 = vsub.f32 %v3560_v2, %v10448_v44  ;;  %v3697_v0 = vand.u32 4294901760, %v10457_v3 }
 0x261   :  { %3736 = vmatpush.msra.mxu2 %v10335_v62  ;;  %3790 = vmatpush.msra.mxu3 %v10311_v11  ;;  %v3715_v42 = vand.u32 4294901760, %v10476_v49  ;;  %v3710_v52 = vsub.f32 %v10468_v27, %v3709_v45  ;;  %v3553_v62 = vld [vmem:[#allocation12 + $0x70] sm:$0xff] }
 0x262   :  { %3575 = vmatpush.msra.mxu0 %v10287_v63  ;;  %3652 = vmatpush.msra.mxu1 %v3651_v48  ;;  %v7853_v48 = vmov 0.0   ;;  %v3703_v14 = vand.u32 4294901760, %v10465_v8  ;;  %v3698_v33 = vsub.f32 %v10457_v3, %v3697_v0 }
 0x263   :  { %3739 = vmatpush.msra.mxu2 %v10338_v18  ;;  %3792 = vmatpush.msra.mxu3 %v10320_v4  ;;  %2845 = vst [vmem:[#allocation3 + $0x8] sm:$0x1] %v7853_v48 }
 0x264   :  { %3577 = vmatpush.msra.mxu0 %v10311_v11  ;;  %3658 = vmatpush.msra.mxu1 %v3657_v60  ;;  %2843 = vst [vmem:[#allocation3] sm:$0x1] %v7853_v48  ;;  %v3687_v60 = vand.u32 4294901760, %v3686_v10  ;;  %v3699_v2 = vand.u32 4294901760, %v3698_v33  ;;  %v2461_v10 = vpop.f32.mrf.mxu0 }
 0x265   :  { %3742 = vmatpush.msra.mxu2 %v10341_v17  ;;  %3794 = vmatpush.msra.mxu3 %v10322_v51  ;;  %3534 = vst [vmem:[#allocation3 + $0x9] sm:$0x1] %v7853_v48  ;;  %v10575_v17 = vand.u32 4294901760, %v3553_v62 }
 0x266   :  { %3579 = vmatpush.msra.mxu0 %v10320_v4  ;;  %3664 = vmatpush.msra.mxu1 %v3663_v56  ;;  %3536 = vst [vmem:[#allocation3 + $0x11] sm:$0x1] %v7853_v48  ;;  %v2353_v56 = vpop.f32.mrf.mxu2  ;;  %v2300_v48 = vadd.f32 %v2299_v39, %v2198_v50 }
 0x267   :  { %3745 = vmatpush.msra.mxu2 %v10377_v5  ;;  %3796 = vmatpush.msra.mxu3 %v10324_v53 }
 0x268   :  { %3581 = vmatpush.msra.mxu0 %v10322_v51  ;;  %3670 = vmatpush.msra.mxu1 %v3669_v36  ;;  %v3704_v36 = vsub.f32 %v10465_v8, %v3703_v14  ;;  %v2354_v50 = vadd.f32 %v2353_v56, %v2300_v48 }
 0x269   :  { %3748 = vmatpush.msra.mxu2 %v10381_v38  ;;  %3798 = vmatpush.msra.mxu3 %v10362_v40 }
 0x26a   :  { %3583 = vmatpush.msra.mxu0 %v10324_v53  ;;  %3676 = vmatpush.msra.mxu1 %v3675_v57  ;;  %v3705_v15 = vand.u32 4294901760, %v3704_v36  ;;  %v3716_v57 = vsub.f32 %v10476_v49, %v3715_v42 }
 0x26b   :  { %3751 = vmatpush.msra.mxu2 %v10391_v12  ;;  %3800 = vmatpush.msra.mxu3 %v10369_v20 }
 0x26c   :  { %3585 = vmatpush.msra.mxu0 %v10362_v40  ;;  %3682 = vmatpush.msra.mxu1 %v3681_v58  ;;  %v3711_v58 = vand.u32 4294901760, %v3710_v52 }
 0x26d   :  { %3754 = vmatpush.msra.mxu2 %v10406_v35  ;;  %3802 = vmatpush.msra.mxu3 %v10383_v46 }
 0x26e   :  { %3587 = vmatpush.msra.mxu0 %v10369_v20  ;;  %3688 = vmatpush.msra.mxu1 %v3687_v60  ;;  %v3717_v60 = vand.u32 4294901760, %v3716_v57  ;;  %v2539_v33 = vpop.f32.mrf.mxu2 }
 0x26f   :  { %3757 = vmatpush.msra.mxu2 %v10418_v22  ;;  %3804 = vmatpush.msra.mxu3 %v10393_v26  ;;  %v2733_v56 = vpop.f32.mrf.mxu1 }
 0x270   :  { %3589 = vmatpush.msra.mxu0 %v10383_v46  ;;  %3694 = vmatpush.msra.mxu1 %v3693_v9  ;;  %v2640_v9 = vpop.f32.mrf.mxu3 }
 0x271   :  { %3760 = vmatpush.msra.mxu2 %v10434_v21  ;;  %3806 = vmatpush.msra.mxu3 %v10408_v31  ;;  %v2641_v39 = vadd.f32 %v2640_v9, %v2539_v33  ;;  %v3547_v21 = vld [vmem:[#allocation12 + $0x40] sm:$0xff] }
 0x272   :  { %3591 = vmatpush.msra.mxu0 %v10393_v26  ;;  %3700 = vmatpush.msra.mxu1 %v3699_v2  ;;  %v2393_v2 = vadd.f32 %v2392_v13, %v2354_v50 }
 0x273   :  { %3763 = vmatpush.msra.mxu2 %v10441_v41  ;;  %3808 = vmatpush.msra.mxu3 %v10422_v54  ;;  %v3546_v41 = vld [vmem:[#allocation12 + $0x38] sm:$0xff] }
 0x274   :  { %3593 = vmatpush.msra.mxu0 %v10408_v31  ;;  %3706 = vmatpush.msra.mxu1 %v3705_v15  ;;  %v2462_v15 = vadd.f32 %v2461_v10, %v2393_v2 }
 0x275   :  { %3766 = vmatpush.msra.mxu2 %v10457_v3  ;;  %3810 = vmatpush.msra.mxu3 %v10429_v34 }
 0x276   :  { %3595 = vmatpush.msra.mxu0 %v10422_v54  ;;  %3712 = vmatpush.msra.mxu1 %v3711_v58  ;;  %v2499_v58 = vadd.f32 %v2498_v6, %v2462_v15 }
 0x277   :  { %3769 = vmatpush.msra.mxu2 %v10465_v8  ;;  %3812 = vmatpush.msra.mxu3 %v10443_v59  ;;  %v2802_v48 = vpop.f32.mrf.mxu2 }
 0x278   :  { %3597 = vmatpush.msra.mxu0 %v10429_v34  ;;  %3718 = vmatpush.msra.mxu1 %v3717_v60 }
 0x279   :  { %v2694_v36 = vpop.f32.mrf.mxu0  ;;  %3772 = vmatpush.msra.mxu2 %v10468_v27  ;;  %3814 = vmatpush.msra.mxu3 %v10448_v44  ;;  %v10637_v27 = vand.u32 4294901760, %v3546_v41 }
 0x27a   :  { %v2695_v52 = vadd.f32 %v2694_v36, %v2641_v39  ;;  %3599 = vmatpush.msra.mxu0 %v10443_v59  ;;  %3906 = vmatpush.msrb.mxu1 %v10287_v63  ;;  %v2839_v63 = vpop.f32.mrf.mxu3 }
 0x27b   :  { %3775 = vmatpush.msra.mxu2 %v10476_v49  ;;  %3816 = vmatpush.msra.mxu3 %v10450_v37  ;;  %v10658_v9 = vsub.f32 %v3546_v41, %v10637_v27  ;;  %v3540_v41 = vld [vmem:[#allocation12 + $0x8] sm:$0xff] }
 0x27c   :  { %v2734_v57 = vadd.f32 %v2733_v56, %v2695_v52  ;;  %3601 = vmatpush.msra.mxu0 %v10448_v44  ;;  %3908 = vmatpush.msrb.mxu1 %v10311_v11 }
 0x27d   :  { %3818 = vmatpush.msra.mxu3 %v10452_v43 }
 0x27e   :  { %v2803_v13 = vadd.f32 %v2802_v48, %v2734_v57  ;;  %3603 = vmatpush.msra.mxu0 %v10450_v37  ;;  %3910 = vmatpush.msrb.mxu1 %v10320_v4  ;;  %v4045_v57 = vand.u32 4294901760, %v10658_v9 }
 0x280   :  { %v2840_v60 = vadd.f32 %v2839_v63, %v2803_v13  ;;  %3605 = vmatpush.msra.mxu0 %v10452_v43  ;;  %3912 = vmatpush.msrb.mxu1 %v10322_v51 }
 0x282   :  { %3835 = vmatpush.msrb.mxu0 %v3625_v1  ;;  %v2842_v10 = vmax.f32 %v2499_v58, %v2840_v60  ;;  %3914 = vmatpush.msrb.mxu1 %v10324_v53  ;;  %v3554_v53 = vld [vmem:[#allocation12 + $0x78] sm:$0xff]  ;;  %v3543_v58 = vld [vmem:[#allocation12 + $0x20] sm:$0xff] }
 0x284   :  { %3839 = vmatpush.msrb.mxu0 %v3631_v29  ;;  %2844 = vst [vmem:[#allocation3 + $0x1] sm:$0x7f] %v2842_v10  ;;  %3916 = vmatpush.msrb.mxu1 %v10362_v40  ;;  %v10566_v29 = vand.u32 4294901760, %v3554_v53  ;;  %v10585_v40 = vsub.f32 %v3553_v62, %v10575_v17 }
 0x286   :  { %3843 = vmatpush.msrb.mxu0 %v3637_v7  ;;  %3918 = vmatpush.msrb.mxu1 %v10369_v20  ;;  %v10573_v18 = vsub.f32 %v3554_v53, %v10566_v29  ;;  %v3552_v7 = vld [vmem:[#allocation12 + $0x68] sm:$0xff]  ;;  %v3551_v20 = vld [vmem:[#allocation12 + $0x60] sm:$0xff]  ;;  %v4003_v38 = vand.u32 4294901760, %v10585_v40 }
 0x287   :  { %3947 = vmatpush.msrb.mxu2 %v10566_v29 }
 0x288   :  { %3847 = vmatpush.msrb.mxu0 %v3643_v47  ;;  %3920 = vmatpush.msrb.mxu1 %v10383_v46  ;;  %v3997_v47 = vand.u32 4294901760, %v10573_v18  ;;  %v10595_v46 = vand.u32 4294901760, %v3551_v20 }
 0x289   :  { %3949 = vmatpush.msrb.mxu2 %v10575_v17 }
 0x28a   :  { %3851 = vmatpush.msrb.mxu0 %v3649_v24  ;;  %3922 = vmatpush.msrb.mxu1 %v10393_v26  ;;  %v10582_v24 = vand.u32 4294901760, %v3552_v7  ;;  %v3998_v5 = vsub.f32 %v10573_v18, %v3997_v47  ;;  %v4004_v26 = vsub.f32 %v10585_v40, %v4003_v38 }
 0x28b   :  { %v3555_v25 = vld [vmem:[#allocation3 + $0x1] sm:$0xff] }
 0x28c   :  { %3855 = vmatpush.msrb.mxu0 %v3655_v28  ;;  %v10547_v1 = vand.u32 4294901760, %v3555_v25  ;;  %3924 = vmatpush.msrb.mxu1 %v10408_v31  ;;  %v10599_v28 = vsub.f32 %v3552_v7, %v10582_v24  ;;  %v3999_v12 = vand.u32 4294901760, %v3998_v5  ;;  %v10612_v31 = vsub.f32 %v3551_v20, %v10595_v46  ;;  %v3542_v20 = vld [vmem:[#allocation12 + $0x18] sm:$0xff] }
 0x28d   :  { %3951 = vmatpush.msrb.mxu2 %v10582_v24  ;;  %v4005_v22 = vand.u32 4294901760, %v4004_v26  ;;  %v10707_v5 = vand.u32 4294901760, %v3542_v20  ;;  %v3541_v26 = vld [vmem:[#allocation12 + $0x10] sm:$0xff] }
 0x28e   :  { %3859 = vmatpush.msrb.mxu0 %v3661_v55  ;;  %3720 = vmatmul.f32.vlgmr.msra.gmra.mxu1 %v10547_v1  ;;  %v3607_v11 = vsub.f32 %v3555_v25, %v10547_v1  ;;  %v3550_v55 = vld [vmem:[#allocation12 + $0x58] sm:$0xff]  ;;  %v4009_v35 = vand.u32 4294901760, %v10599_v28 }
 0x28f   :  { %3926 = vmatpush.msrb.mxu1 %v10422_v54  ;;  %3953 = vmatpush.msrb.mxu2 %v10595_v46 }
 0x290   :  { %3863 = vmatpush.msrb.mxu0 %v3667_v23  ;;  %3778 = vmatmul.f32.vlgmr.msra.gmra.mxu2 %v3607_v11  ;;  %v3608_v30 = vand.u32 4294901760, %v3607_v11  ;;  %v10607_v23 = vand.u32 4294901760, %v3550_v55 }
 0x291   :  { %3928 = vmatpush.msrb.mxu1 %v10429_v34  ;;  %4000 = vmatpush.msrb.mxu3 %v3999_v12  ;;  %v3548_v34 = vld [vmem:[#allocation12 + $0x48] sm:$0xff] }
 0x292   :  { %3867 = vmatpush.msrb.mxu0 %v3673_v16  ;;  %3822 = vmatmul.f32.vlgmr.msra.gmra.mxu3 %v3608_v30  ;;  %v3609_v4 = vsub.f32 %v3607_v11, %v3608_v30  ;;  %v3549_v16 = vld [vmem:[#allocation12 + $0x50] sm:$0xff]  ;;  %v4046_v11 = vsub.f32 %v10658_v9, %v4045_v57 }
 0x293   :  { %3930 = vmatpush.msrb.mxu1 %v10443_v59  ;;  %3955 = vmatpush.msrb.mxu2 %v10607_v23  ;;  %v10617_v54 = vand.u32 4294901760, %v3549_v16  ;;  %v4010_v59 = vsub.f32 %v10599_v28, %v4009_v35 }
 0x294   :  { %3871 = vmatpush.msrb.mxu0 %v3679_v32  ;;  %v3610_v51 = vand.u32 4294901760, %v3609_v4  ;;  %v10620_v32 = vsub.f32 %v3550_v55, %v10607_v23  ;;  %4006 = vmatpush.msrb.mxu3 %v4005_v22  ;;  %v10693_v4 = vand.u32 4294901760, %v3543_v58  ;;  %v4047_v62 = vand.u32 4294901760, %v4046_v11 }
 0x295   :  { %3932 = vmatpush.msrb.mxu1 %v10448_v44  ;;  %v10626_v44 = vand.u32 4294901760, %v3548_v34  ;;  %3957 = vmatpush.msrb.mxu2 %v10617_v54  ;;  %v10635_v8 = vsub.f32 %v3549_v16, %v10617_v54  ;;  %v4011_v49 = vand.u32 4294901760, %v4010_v59  ;;  %v10716_v22 = vand.u32 4294901760, %v3541_v26 }
 0x296   :  { %3875 = vmatpush.msrb.mxu0 %v3685_v19  ;;  %v4015_v19 = vand.u32 4294901760, %v10612_v31  ;;  %v4021_v3 = vand.u32 4294901760, %v10620_v32  ;;  %v10710_v55 = vsub.f32 %v3543_v58, %v10693_v4 }
 0x297   :  { %3611 = vmatmul.f32.vlgmr.msra.gmra.mxu0 %v3610_v51  ;;  %3934 = vmatpush.msrb.mxu1 %v10450_v37  ;;  %v10628_v37 = vand.u32 4294901760, %v3547_v21  ;;  %v4027_v33 = vand.u32 4294901760, %v10635_v8 }
 0x298   :  { %3879 = vmatpush.msrb.mxu0 %v3691_v61  ;;  %v3544_v61 = vld [vmem:[#allocation12 + $0x28] sm:$0xff]  ;;  %v4022_v6 = vsub.f32 %v10620_v32, %v4021_v3  ;;  %3959 = vmatpush.msrb.mxu2 %v10626_v44  ;;  %v4063_v16 = vand.u32 4294901760, %v10710_v55 }
 0x299   :  { %3936 = vmatpush.msrb.mxu1 %v10452_v43  ;;  %v3545_v43 = vld [vmem:[#allocation12 + $0x30] sm:$0xff]  ;;  %v10660_v50 = vand.u32 4294901760, %v3544_v61  ;;  %4012 = vmatpush.msrb.mxu3 %v4011_v49  ;;  %v4028_v15 = vsub.f32 %v10635_v8, %v4027_v33  ;;  %v10731_v49 = vsub.f32 %v3541_v26, %v10716_v22 }
 0x29a   :  { %3883 = vmatpush.msrb.mxu0 %v3697_v0  ;;  %v10639_v0 = vand.u32 4294901760, %v3545_v43  ;;  %v4023_v56 = vand.u32 4294901760, %v4022_v6  ;;  %3961 = vmatpush.msrb.mxu2 %v10628_v37  ;;  %v4064_v59 = vsub.f32 %v10710_v55, %v4063_v16 }
 0x29b   :  { %4160 = vmatpush.msra.mxu1 %v10566_v29  ;;  %v10682_v60 = vsub.f32 %v3544_v61, %v10660_v50  ;;  %v4029_v10 = vand.u32 4294901760, %v4028_v15  ;;  %v10728_v61 = vand.u32 4294901760, %v3540_v41 }
 0x29c   :  { %3887 = vmatpush.msrb.mxu0 %v3703_v14  ;;  %v4016_v14 = vsub.f32 %v10612_v31, %v4015_v19  ;;  %v10665_v52 = vsub.f32 %v3545_v43, %v10639_v0  ;;  %3963 = vmatpush.msrb.mxu2 %v10637_v27  ;;  %v4065_v6 = vand.u32 4294901760, %v4064_v59 }
 0x29d   :  { %4162 = vmatpush.msra.mxu1 %v10575_v17  ;;  %v4057_v30 = vand.u32 4294901760, %v10682_v60 }
 0x29e   :  { %3891 = vmatpush.msrb.mxu0 %v3709_v45  ;;  %v10645_v45 = vsub.f32 %v3548_v34, %v10626_v44  ;;  %v4017_v39 = vand.u32 4294901760, %v4016_v14  ;;  %v4051_v63 = vand.u32 4294901760, %v10665_v52  ;;  %3965 = vmatpush.msrb.mxu2 %v10639_v0  ;;  %v10719_v34 = vsub.f32 %v3542_v20, %v10707_v5  ;;  %v3539_v14 = vld [vmem:[#allocation12] sm:$0xff] }
 0x29f   :  { %4164 = vmatpush.msra.mxu1 %v10582_v24  ;;  %v4058_v7 = vsub.f32 %v10682_v60, %v4057_v30  ;;  %v10738_v15 = vand.u32 4294901760, %v3539_v14 }
 0x2a0   :  { %3895 = vmatpush.msrb.mxu0 %v3715_v42  ;;  %v10648_v42 = vsub.f32 %v3547_v21, %v10628_v37  ;;  %v4033_v36 = vand.u32 4294901760, %v10645_v45  ;;  %4018 = vmatpush.msrb.mxu3 %v4017_v39  ;;  %v4052_v53 = vsub.f32 %v10665_v52, %v4051_v63  ;;  %v4069_v43 = vand.u32 4294901760, %v10719_v34 }
 0x2a1   :  { %4166 = vmatpush.msra.mxu1 %v10595_v46  ;;  %3967 = vmatpush.msrb.mxu2 %v10660_v50  ;;  %v4059_v21 = vand.u32 4294901760, %v4058_v7 }
 0x2a2   :  { %4102 = vmatpush.msra.mxu0 %v10573_v18  ;;  %v4039_v2 = vand.u32 4294901760, %v10648_v42  ;;  %v4034_v48 = vsub.f32 %v10645_v45, %v4033_v36  ;;  %4024 = vmatpush.msrb.mxu3 %v4023_v56  ;;  %v4053_v12 = vand.u32 4294901760, %v4052_v53  ;;  %v4070_v39 = vsub.f32 %v10719_v34, %v4069_v43 }
 0x2a3   :  { %4168 = vmatpush.msra.mxu1 %v10607_v23  ;;  %3969 = vmatpush.msrb.mxu2 %v10693_v4  ;;  %v4075_v56 = vand.u32 4294901760, %v10731_v49 }
 0x2a4   :  { %4105 = vmatpush.msra.mxu0 %v10585_v40  ;;  %v4040_v13 = vsub.f32 %v10648_v42, %v4039_v2  ;;  %v4035_v25 = vand.u32 4294901760, %v4034_v48  ;;  %4030 = vmatpush.msrb.mxu3 %v4029_v10  ;;  %v4080_v48 = vsub.f32 %v3540_v41, %v10728_v61  ;;  %v4086_v10 = vsub.f32 %v3539_v14, %v10738_v15 }
 0x2a5   :  { %4170 = vmatpush.msra.mxu1 %v10617_v54  ;;  %3971 = vmatpush.msrb.mxu2 %v10707_v5  ;;  %v4076_v58 = vsub.f32 %v10731_v49, %v4075_v56 }
 0x2a6   :  { %4108 = vmatpush.msra.mxu0 %v10599_v28  ;;  %v4041_v51 = vand.u32 4294901760, %v4040_v13  ;;  %4036 = vmatpush.msrb.mxu3 %v4035_v25  ;;  %v4071_v13 = vand.u32 4294901760, %v4070_v39  ;;  %v4081_v25 = vand.u32 4294901760, %v4080_v48  ;;  %v4330_v39 = vld [vmem:[#allocation12 + $0x148] sm:$0xff] }
 0x2a7   :  { %4172 = vmatpush.msra.mxu1 %v10626_v44  ;;  %3973 = vmatpush.msrb.mxu2 %v10716_v22  ;;  %v4077_v11 = vand.u32 4294901760, %v4076_v58 }
 0x2a8   :  { %4111 = vmatpush.msra.mxu0 %v10612_v31  ;;  %4042 = vmatpush.msrb.mxu3 %v4041_v51  ;;  %v4087_v51 = vand.u32 4294901760, %v4086_v10  ;;  %v4082_v53 = vsub.f32 %v4080_v48, %v4081_v25 }
 0x2a9   :  { %4174 = vmatpush.msra.mxu1 %v10628_v37  ;;  %3975 = vmatpush.msrb.mxu2 %v10728_v61 }
 0x2aa   :  { %4114 = vmatpush.msra.mxu0 %v10620_v32  ;;  %4048 = vmatpush.msrb.mxu3 %v4047_v62  ;;  %v4088_v62 = vsub.f32 %v4086_v10, %v4087_v51  ;;  %v4083_v7 = vand.u32 4294901760, %v4082_v53 }
 0x2ab   :  { %4176 = vmatpush.msra.mxu1 %v10637_v27  ;;  %3977 = vmatpush.msrb.mxu2 %v10738_v15 }
 0x2ac   :  { %4117 = vmatpush.msra.mxu0 %v10635_v8  ;;  %4054 = vmatpush.msrb.mxu3 %v4053_v12  ;;  %v4089_v18 = vand.u32 4294901760, %v4088_v62 }
 0x2ad   :  { %4178 = vmatpush.msra.mxu1 %v10639_v0  ;;  %4207 = vmatpush.msra.mxu2 %v3997_v47  ;;  %v3044_v47 = vpop.f32.mrf.mxu2 }
 0x2ae   :  { %4120 = vmatpush.msra.mxu0 %v10645_v45  ;;  %4060 = vmatpush.msrb.mxu3 %v4059_v21 }
 0x2af   :  { %4180 = vmatpush.msra.mxu1 %v10660_v50  ;;  %4211 = vmatpush.msra.mxu2 %v4003_v38 }
 0x2b0   :  { %4123 = vmatpush.msra.mxu0 %v10648_v42  ;;  %4066 = vmatpush.msrb.mxu3 %v4065_v6 }
 0x2b1   :  { %4182 = vmatpush.msra.mxu1 %v10693_v4  ;;  %4215 = vmatpush.msra.mxu2 %v4009_v35 }
 0x2b2   :  { %4126 = vmatpush.msra.mxu0 %v10658_v9  ;;  %4072 = vmatpush.msrb.mxu3 %v4071_v13 }
 0x2b3   :  { %4184 = vmatpush.msra.mxu1 %v10707_v5  ;;  %4219 = vmatpush.msra.mxu2 %v4015_v19 }
 0x2b4   :  { %4129 = vmatpush.msra.mxu0 %v10665_v52  ;;  %4078 = vmatpush.msrb.mxu3 %v4077_v11  ;;  %v4334_v52 = vld [vmem:[#allocation12 + $0x168] sm:$0xff] }
 0x2b5   :  { %4186 = vmatpush.msra.mxu1 %v10716_v22  ;;  %4223 = vmatpush.msra.mxu2 %v4021_v3 }
 0x2b6   :  { %4132 = vmatpush.msra.mxu0 %v10682_v60  ;;  %4084 = vmatpush.msrb.mxu3 %v4083_v7  ;;  %v4333_v60 = vld [vmem:[#allocation12 + $0x160] sm:$0xff] }
 0x2b7   :  { %4188 = vmatpush.msra.mxu1 %v10728_v61  ;;  %4227 = vmatpush.msra.mxu2 %v4027_v33  ;;  %v4336_v33 = vld [vmem:[#allocation12 + $0x178] sm:$0xff] }
 0x2b8   :  { %4135 = vmatpush.msra.mxu0 %v10710_v55  ;;  %4090 = vmatpush.msrb.mxu3 %v4089_v18  ;;  %v4332_v55 = vld [vmem:[#allocation12 + $0x158] sm:$0xff] }
 0x2b9   :  { %4190 = vmatpush.msra.mxu1 %v10738_v15  ;;  %4231 = vmatpush.msra.mxu2 %v4033_v36  ;;  %v10792_v36 = vand.u32 4294901760, %v4336_v33  ;;  %v10817_v41 = vand.u32 4294901760, %v4332_v55 }
 0x2ba   :  { %4138 = vmatpush.msra.mxu0 %v10719_v34  ;;  %4278 = vmatpush.msra.mxu3 %v10566_v29  ;;  %v2889_v29 = vpop.f32.mrf.mxu0  ;;  %v4331_v34 = vld [vmem:[#allocation12 + $0x150] sm:$0xff] }
 0x2bb   :  { %4235 = vmatpush.msra.mxu2 %v4039_v2  ;;  %v3230_v28 = vpop.f32.mrf.mxu2  ;;  %v3537_v2 = vld [vmem:[#allocation3] sm:$0xff]  ;;  %v10826_v6 = vand.u32 4294901760, %v4331_v34  ;;  %v10835_v58 = vsub.f32 %v4332_v55, %v10817_v41 }
 0x2bc   :  { %4141 = vmatpush.msra.mxu0 %v10731_v49  ;;  %4280 = vmatpush.msra.mxu3 %v10575_v17  ;;  %v2990_v17 = vpop.f32.mrf.mxu1 }
 0x2bd   :  { %4239 = vmatpush.msra.mxu2 %v4045_v57  ;;  %v2991_v38 = vadd.f32 %v2990_v17, %v2889_v29  ;;  %v10847_v7 = vsub.f32 %v4331_v34, %v10826_v6 }
 0x2be   :  { %4144 = vmatpush.msra.mxu0 %v4080_v48  ;;  %4282 = vmatpush.msra.mxu3 %v10582_v24  ;;  %v3083_v24 = vpop.f32.mrf.mxu3 }
 0x2bf   :  { %4243 = vmatpush.msra.mxu2 %v4051_v63  ;;  %v3045_v35 = vadd.f32 %v3044_v47, %v2991_v38  ;;  %v10796_v63 = vand.u32 4294901760, %v3537_v2  ;;  %v13243_v38 = vand.u32 4294901760, %v10835_v58 }
 0x2c0   :  { %4147 = vmatpush.msra.mxu0 %v4086_v10  ;;  %4284 = vmatpush.msra.mxu3 %v10595_v46  ;;  %v4329_v10 = vld [vmem:[#allocation12 + $0x140] sm:$0xff] }
 0x2c1   :  { %4247 = vmatpush.msra.mxu2 %v4057_v30  ;;  %v3084_v32 = vadd.f32 %v3083_v24, %v3045_v35  ;;  %v10799_v30 = vsub.f32 %v4336_v33, %v10792_v36  ;;  %v10809_v12 = vsub.f32 %v3537_v2, %v10796_v63  ;;  %v10855_v47 = vand.u32 4294901760, %v4329_v10  ;;  %v4328_v24 = vld [vmem:[#allocation12 + $0x138] sm:$0xff]  ;;  %v4327_v35 = vld [vmem:[#allocation12 + $0x130] sm:$0xff] }
 0x2c2   :  { %4286 = vmatpush.msra.mxu3 %v10607_v23  ;;  %v3152_v40 = vpop.f32.mrf.mxu0 }
 0x2c3   :  { %4251 = vmatpush.msra.mxu2 %v4063_v16  ;;  %v13248_v16 = vand.u32 4294901760, %v10799_v30  ;;  %v3980_v14 = vand.u32 4294901760, %v10809_v12 }
 0x2c4   :  { %4288 = vmatpush.msra.mxu3 %v10617_v54  ;;  %v3189_v46 = vpop.f32.mrf.mxu1 }
 0x2c5   :  { %4255 = vmatpush.msra.mxu2 %v4069_v43  ;;  %v3981_v62 = vsub.f32 %v10809_v12, %v3980_v14 }
 0x2c6   :  { %4290 = vmatpush.msra.mxu3 %v10626_v44  ;;  %v3331_v23 = vpop.f32.mrf.mxu3 }
 0x2c7   :  { %4259 = vmatpush.msra.mxu2 %v4075_v56  ;;  %v3332_v31 = vadd.f32 %v3331_v23, %v3230_v28  ;;  %v4389_v56 = vsub.f32 %v10799_v30, %v13248_v16  ;;  %v13820_v16 = vand.u32 4294901760, %v10799_v30 }
 0x2c8   :  { %4292 = vmatpush.msra.mxu3 %v10628_v37  ;;  %v3153_v37 = vadd.f32 %v3152_v40, %v3084_v32  ;;  %v10866_v32 = vand.u32 4294901760, %v4328_v24 }
 0x2c9   :  { %4263 = vmatpush.msra.mxu2 %v4081_v25  ;;  %v4390_v18 = vand.u32 4294901760, %v4389_v56 }
 0x2ca   :  { %4294 = vmatpush.msra.mxu3 %v10637_v27  ;;  %v3190_v45 = vadd.f32 %v3189_v46, %v3153_v37  ;;  %v10870_v37 = vsub.f32 %v4329_v10, %v10855_v47  ;;  %v10884_v33 = vsub.f32 %v4328_v24, %v10866_v32 }
 0x2cb   :  { %4267 = vmatpush.msra.mxu2 %v4087_v51  ;;  %v10841_v51 = vand.u32 4294901760, %v4330_v39 }
 0x2cc   :  { %4296 = vmatpush.msra.mxu3 %v10639_v0  ;;  %v13239_v2 = vand.u32 4294901760, %v10870_v37 }
 0x2cd   :  { %v10862_v23 = vsub.f32 %v4330_v39, %v10841_v51  ;;  %v13238_v39 = vand.u32 4294901760, %v10884_v33 }
 0x2ce   :  { %4298 = vmatpush.msra.mxu3 %v10660_v50  ;;  %v4335_v50 = vld [vmem:[#allocation12 + $0x170] sm:$0xff] }
 0x2cf   :  { %v10794_v57 = vand.u32 4294901760, %v4335_v50 }
 0x2d0   :  { %4300 = vmatpush.msra.mxu3 %v10693_v4  ;;  %v10801_v4 = vand.u32 4294901760, %v4334_v52 }
 0x2d1   :  { %v10804_v20 = vsub.f32 %v4335_v50, %v10794_v57 }
 0x2d2   :  { %4302 = vmatpush.msra.mxu3 %v10707_v5  ;;  %v10806_v5 = vand.u32 4294901760, %v4333_v60 }
 0x2d3   :  { %v13246_v43 = vand.u32 4294901760, %v10804_v20 }
 0x2d4   :  { %4304 = vmatpush.msra.mxu3 %v10716_v22  ;;  %v10813_v22 = vsub.f32 %v4334_v52, %v10801_v4 }
 0x2d5   :  { %v3424_v44 = vpop.f32.mrf.mxu1  ;;  %v4395_v25 = vsub.f32 %v10804_v20, %v13246_v43 }
 0x2d6   :  { %4306 = vmatpush.msra.mxu3 %v10728_v61  ;;  %v10821_v61 = vsub.f32 %v4333_v60, %v10806_v5 }
 0x2d7   :  { %v4396_v46 = vand.u32 4294901760, %v4395_v25  ;;  %v4323_v25 = vld [vmem:[#allocation12 + $0x110] sm:$0xff] }
 0x2d8   :  { %4308 = vmatpush.msra.mxu3 %v10738_v15  ;;  %v13245_v15 = vand.u32 4294901760, %v10813_v22  ;;  %v13244_v11 = vand.u32 4294901760, %v10821_v61  ;;  %v10926_v24 = vand.u32 4294901760, %v4323_v25 }
 0x2da   :  { %v4401_v29 = vsub.f32 %v10813_v22, %v13245_v15  ;;  %v4407_v28 = vsub.f32 %v10821_v61, %v13244_v11  ;;  %v4720_v11 = vld [vmem:[#allocation12 + $0x1b0] sm:$0xff] }
 0x2dd   :  { %v3385_v54 = vpop.f32.mrf.mxu0  ;;  %v3493_v8 = vpop.f32.mrf.mxu2 }
 0x2de   :  { %v3386_v19 = vadd.f32 %v3385_v54, %v3332_v31  ;;  %v3982_v31 = vand.u32 4294901760, %v3981_v62  ;;  %v13242_v54 = vand.u32 4294901760, %v10847_v7 }
 0x2df   :  { %v3530_v0 = vpop.f32.mrf.mxu3 }
 0x2e0   :  { %v3425_v3 = vadd.f32 %v3424_v44, %v3386_v19  ;;  %v4402_v19 = vand.u32 4294901760, %v4401_v29  ;;  %v4437_v29 = vsub.f32 %v10884_v33, %v13238_v39 }
 0x2e2   :  { %v3494_v27 = vadd.f32 %v3493_v8, %v3425_v3  ;;  %v4413_v3 = vsub.f32 %v10835_v58, %v13243_v38  ;;  %v10875_v8 = vand.u32 4294901760, %v4327_v35 }
 0x2e4   :  { %v3531_v42 = vadd.f32 %v3530_v0, %v3494_v27  ;;  %v4326_v27 = vld [vmem:[#allocation12 + $0x128] sm:$0xff]  ;;  %v4408_v0 = vand.u32 4294901760, %v4407_v28  ;;  %v4414_v60 = vand.u32 4294901760, %v4413_v3  ;;  %v10895_v55 = vsub.f32 %v4327_v35, %v10875_v8 }
 0x2e5   :  { %v10891_v52 = vand.u32 4294901760, %v4326_v27 }
 0x2e6   :  { %v3533_v9 = vmax.f32 %v3190_v45, %v3531_v42  ;;  %v13241_v45 = vand.u32 4294901760, %v10862_v23  ;;  %v4419_v42 = vsub.f32 %v10847_v7, %v13242_v54 }
 0x2e7   :  { %v10912_v10 = vsub.f32 %v4326_v27, %v10891_v52 }
 0x2e8   :  { %3535 = vst [vmem:[#allocation3 + $0xa] sm:$0x7f] %v3533_v9  ;;  %v4325_v9 = vld [vmem:[#allocation12 + $0x120] sm:$0xff] }
 0x2e9   :  { %v10901_v34 = vand.u32 4294901760, %v4325_v9  ;;  %v13235_v28 = vand.u32 4294901760, %v10912_v10 }
 0x2ef   :  { %v3556_v26 = vld [vmem:[#allocation3 + $0x9] sm:$0x7f] }
 0x2f0   :  { %v10815_v21 = vand.u32 4294901760, %v3556_v26  ;;  %v3538_v59 = vld [vmem:[#allocation3 + $0x8] sm:$0x7f] }
 0x2f1   :  { %v10832_v48 = vand.u32 4294901760, %v3538_v59 }
 0x2f2   :  { %3724 = vmatmul.f32.gmra.mxu1 %v10815_v21  ;;  %v3615_v49 = vsub.f32 %v3556_v26, %v10815_v21  ;;  %v4425_v26 = vsub.f32 %v10862_v23, %v13241_v45  ;;  %v4721_v45 = vld [vmem:[#allocation12 + $0x1b8] sm:$0xff] }
 0x2f3   :  { %v10853_v17 = vsub.f32 %v3538_v59, %v10832_v48  ;;  %v4324_v59 = vld [vmem:[#allocation12 + $0x118] sm:$0xff]  ;;  %v11082_v43 = vand.u32 4294901760, %v4721_v45 }
 0x2f4   :  { %3783 = vmatmul.f32.gmra.mxu2 %v3615_v49  ;;  %v3616_v13 = vand.u32 4294901760, %v3615_v49  ;;  %v4426_v62 = vand.u32 4294901760, %v4425_v26 }
 0x2f5   :  { %v3988_v44 = vand.u32 4294901760, %v10853_v17 }
 0x2f6   :  { %3828 = vmatmul.f32.gmra.mxu3 %v3616_v13  ;;  %v3617_v53 = vsub.f32 %v3615_v49, %v3616_v13  ;;  %v4420_v49 = vand.u32 4294901760, %v4419_v42  ;;  %v4431_v13 = vsub.f32 %v10870_v37, %v13239_v2  ;;  %v10946_v42 = vsub.f32 %v4323_v25, %v10926_v24  ;;  %v4729_v25 = vld [vmem:[#allocation12 + $0x1f8] sm:$0xff] }
 0x2f7   :  { %v3989_v50 = vsub.f32 %v10853_v17, %v3988_v44 }
 0x2f8   :  { %v3618_v40 = vand.u32 4294901760, %v3617_v53  ;;  %v10916_v53 = vand.u32 4294901760, %v4324_v59 }
 0x2f9   :  { %v3990_v56 = vand.u32 4294901760, %v3989_v50 }
 0x2fa   :  { %3619 = vmatmul.f32.gmra.mxu0 %v3618_v40  ;;  %3938 = vmatmul.f32.vlgmr.msrb.gmra.mxu1 %v10547_v1  ;;  %v4322_v40 = vld [vmem:[#allocation12 + $0x108] sm:$0xff] }
 0x2fb   :  { %4391 = vmatpush.msrb.mxu1 %v4390_v18  ;;  %v10920_v18 = vsub.f32 %v4325_v9, %v10901_v34  ;;  %v10941_v27 = vand.u32 4294901760, %v4322_v40  ;;  %v4449_v9 = vsub.f32 %v10912_v10, %v13235_v28  ;;  %v4723_v28 = vld [vmem:[#allocation12 + $0x1c8] sm:$0xff] }
 0x2fc   :  { %3983 = vmatmul.f32.vlgmr.msrb.gmra.mxu2 %v3982_v31  ;;  %v10937_v31 = vsub.f32 %v4324_v59, %v10916_v53  ;;  %v11058_v39 = vand.u32 4294901760, %v4723_v28 }
 0x2fd   :  { %4397 = vmatpush.msrb.mxu1 %v4396_v46  ;;  %4493 = vmatpush.msrb.mxu2 %v10799_v30  ;;  %v4432_v46 = vand.u32 4294901760, %v4431_v13  ;;  %v13234_v3 = vand.u32 4294901760, %v10920_v18  ;;  %v13822_v30 = vand.u32 4294901760, %v10804_v20 }
 0x2fe   :  { %4092 = vmatmul.f32.vlgmr.msrb.gmra.mxu3 %v10796_v63  ;;  %v13233_v26 = vand.u32 4294901760, %v10937_v31  ;;  %v11080_v15 = vsub.f32 %v4723_v28, %v11058_v39 }
 0x2ff   :  { %4403 = vmatpush.msrb.mxu1 %v4402_v19  ;;  %4496 = vmatpush.msrb.mxu2 %v10804_v20  ;;  %v4321_v19 = vld [vmem:[#allocation12 + $0x100] sm:$0xff]  ;;  %v4455_v59 = vsub.f32 %v10920_v18, %v13234_v3 }
 0x300   :  { %4551 = vmatpush.msrb.mxu3 %v10792_v36  ;;  %v10952_v50 = vand.u32 4294901760, %v4321_v19  ;;  %v4461_v13 = vsub.f32 %v10937_v31, %v13233_v26  ;;  %13818 = vst [vmem:[#allocation26_spill] sm:$0xff] %v11080_v15 }
 0x301   :  { %4409 = vmatpush.msrb.mxu1 %v4408_v0  ;;  %4499 = vmatpush.msrb.mxu2 %v10813_v22  ;;  %v4438_v0 = vand.u32 4294901760, %v4437_v29 }
 0x302   :  { %4553 = vmatpush.msrb.mxu3 %v10794_v57  ;;  %3897 = vmatmul.f32.vlgmr.msrb.gmra.mxu0 %v10547_v1  ;;  %v13236_v1 = vand.u32 4294901760, %v10895_v55 }
 0x303   :  { %3942 = vmatmul.f32.gmra.mxu1 %v10815_v21  ;;  %4338 = vmatpush.msrb.mxu0 %v10792_v36 }
 0x304   :  { %4415 = vmatpush.msrb.mxu1 %v4414_v60  ;;  %4502 = vmatpush.msrb.mxu2 %v10821_v61  ;;  %v4443_v35 = vsub.f32 %v10895_v55, %v13236_v1 }
 0x305   :  { %4555 = vmatpush.msrb.mxu3 %v10801_v4  ;;  %3991 = vmatmul.f32.gmra.mxu2 %v3990_v56  ;;  %v4450_v56 = vand.u32 4294901760, %v4449_v9 }
 0x306   :  { %4340 = vmatpush.msrb.mxu0 %v10794_v57  ;;  %4421 = vmatpush.msrb.mxu1 %v4420_v49  ;;  %v4444_v60 = vand.u32 4294901760, %v4443_v35  ;;  %v10964_v49 = vsub.f32 %v4322_v40, %v10941_v27 }
 0x307   :  { %4505 = vmatpush.msrb.mxu2 %v10835_v58  ;;  %4557 = vmatpush.msrb.mxu3 %v10806_v5 }
 0x308   :  { %4096 = vmatmul.f32.gmra.mxu3 %v10832_v48  ;;  %4342 = vmatpush.msrb.mxu0 %v10801_v4  ;;  %v13230_v29 = vand.u32 4294901760, %v10964_v49 }
 0x309   :  { %4427 = vmatpush.msrb.mxu1 %v4426_v62  ;;  %4508 = vmatpush.msrb.mxu2 %v10847_v7  ;;  %v4456_v62 = vand.u32 4294901760, %v4455_v59 }
 0x30a   :  { %4559 = vmatpush.msrb.mxu3 %v10817_v41  ;;  %4344 = vmatpush.msrb.mxu0 %v10806_v5 }
 0x30b   :  { %4433 = vmatpush.msrb.mxu1 %v4432_v46  ;;  %4511 = vmatpush.msrb.mxu2 %v10862_v23  ;;  %v4728_v46 = vld [vmem:[#allocation12 + $0x1f0] sm:$0xff] }
 0x30c   :  { %4561 = vmatpush.msrb.mxu3 %v10826_v6  ;;  %3901 = vmatmul.f32.gmra.mxu0 %v10815_v21  ;;  %v13232_v21 = vand.u32 4294901760, %v10946_v42  ;;  %v10995_v9 = vand.u32 4294901760, %v4728_v46 }
 0x30d   :  { %4194 = vmatmul.f32.vlgmr.msra.gmra.mxu1 %v3980_v14  ;;  %4346 = vmatpush.msrb.mxu0 %v10817_v41  ;;  %v10971_v14 = vsub.f32 %v4321_v19, %v10952_v50  ;;  %v10987_v19 = vand.u32 4294901760, %v4729_v25 }
 0x30e   :  { %4439 = vmatpush.msrb.mxu1 %v4438_v0  ;;  %4514 = vmatpush.msrb.mxu2 %v10870_v37  ;;  %v4467_v40 = vsub.f32 %v10946_v42, %v13232_v21  ;;  %v4462_v0 = vand.u32 4294901760, %v4461_v13  ;;  %v4318_v13 = vld [vmem:[#allocation3 + $0x2] sm:$0xff] }
 0x30f   :  { %4563 = vmatpush.msrb.mxu3 %v10841_v51  ;;  %4269 = vmatmul.f32.vlgmr.msra.gmra.mxu2 %v10796_v63  ;;  %v13231_v35 = vand.u32 4294901760, %v10971_v14 }
 0x310   :  { %4348 = vmatpush.msrb.mxu0 %v10826_v6  ;;  %4445 = vmatpush.msrb.mxu1 %v4444_v60  ;;  %v4727_v60 = vld [vmem:[#allocation12 + $0x1e8] sm:$0xff]  ;;  %v4468_v59 = vand.u32 4294901760, %v4467_v40  ;;  %v11014_v40 = vsub.f32 %v4728_v46, %v10995_v9 }
 0x311   :  { %4517 = vmatpush.msrb.mxu2 %v10884_v33  ;;  %4565 = vmatpush.msrb.mxu3 %v10855_v47 }
 0x312   :  { %4310 = vmatmul.f32.vlgmr.msra.gmra.mxu3 %v10796_v63  ;;  %4350 = vmatpush.msrb.mxu0 %v10841_v51  ;;  %v4473_v63 = vsub.f32 %v10964_v49, %v13230_v29  ;;  %v11009_v29 = vand.u32 4294901760, %v4727_v60 }
 0x313   :  { %4451 = vmatpush.msrb.mxu1 %v4450_v56  ;;  %4520 = vmatpush.msrb.mxu2 %v10895_v55  ;;  %v4479_v56 = vsub.f32 %v10971_v14, %v13231_v35  ;;  %v11017_v35 = vand.u32 4294901760, %v4318_v13 }
 0x314   :  { %4567 = vmatpush.msrb.mxu3 %v10866_v32  ;;  %4352 = vmatpush.msrb.mxu0 %v10855_v47  ;;  %v11027_v46 = vsub.f32 %v4727_v60, %v11009_v29 }
 0x315   :  { %4457 = vmatpush.msrb.mxu1 %v4456_v62  ;;  %4523 = vmatpush.msrb.mxu2 %v10912_v10  ;;  %v11006_v62 = vsub.f32 %v4729_v25, %v10987_v19  ;;  %v4725_v25 = vld [vmem:[#allocation12 + $0x1d8] sm:$0xff] }
 0x316   :  { %4569 = vmatpush.msrb.mxu3 %v10875_v8  ;;  %4150 = vmatmul.f32.vlgmr.msra.gmra.mxu0 %v10809_v12  ;;  %v4726_v12 = vld [vmem:[#allocation12 + $0x1e0] sm:$0xff]  ;;  %v11031_v3 = vand.u32 4294901760, %v4725_v25  ;;  %v13247_v1 = vand.u32 4294901760, %v11027_v46 }
 0x317   :  { %4200 = vmatmul.f32.gmra.mxu1 %v3988_v44  ;;  %4354 = vmatpush.msrb.mxu0 %v10866_v32  ;;  %v4474_v44 = vand.u32 4294901760, %v4473_v63  ;;  %v13237_v21 = vand.u32 4294901760, %v11006_v62  ;;  %v11022_v26 = vand.u32 4294901760, %v4726_v12  ;;  %v4724_v63 = vld [vmem:[#allocation12 + $0x1d0] sm:$0xff] }
 0x318   :  { %4463 = vmatpush.msrb.mxu1 %v4462_v0  ;;  %4526 = vmatpush.msrb.mxu2 %v10920_v18  ;;  %v4480_v0 = vand.u32 4294901760, %v4479_v56  ;;  %v4370_v56 = vsub.f32 %v4318_v13, %v11017_v35  ;;  %v4319_v13 = vld [vmem:[#allocation3 + $0xa] sm:$0x7f]  ;;  %v4794_v54 = vsub.f32 %v11027_v46, %v13247_v1 }
 0x319   :  { %4571 = vmatpush.msrb.mxu3 %v10891_v52  ;;  %4273 = vmatmul.f32.gmra.mxu2 %v10832_v48  ;;  %v11041_v60 = vsub.f32 %v4726_v12, %v11022_v26  ;;  %v11054_v12 = vsub.f32 %v4725_v25, %v11031_v3  ;;  %v11062_v2 = vand.u32 4294901760, %v4319_v13 }
 0x31a   :  { %4356 = vmatpush.msrb.mxu0 %v10875_v8  ;;  %4469 = vmatpush.msrb.mxu1 %v4468_v59  ;;  %v13240_v59 = vand.u32 4294901760, %v11014_v40 }
 0x31b   :  { %4529 = vmatpush.msrb.mxu2 %v10937_v31  ;;  %4573 = vmatpush.msrb.mxu3 %v10901_v34  ;;  %13816 = vst [vmem:[#allocation123_spill] sm:$0xff] %v11041_v60  ;;  %v4378_v1 = vsub.f32 %v4319_v13, %v11062_v2  ;;  %v4718_v13 = vld [vmem:[#allocation12 + $0x1a0] sm:$0xff] }
 0x31c   :  { %4314 = vmatmul.f32.gmra.mxu3 %v10832_v48  ;;  %4358 = vmatpush.msrb.mxu0 %v10891_v52  ;;  %v4782_v48 = vsub.f32 %v11006_v62, %v13237_v21  ;;  %13817 = vst [vmem:[#allocation42_spill] sm:$0xff] %v11054_v12  ;;  %v4722_v21 = vld [vmem:[#allocation12 + $0x1c0] sm:$0xff] }
 0x31d   :  { %4475 = vmatpush.msrb.mxu1 %v4474_v44  ;;  %4532 = vmatpush.msrb.mxu2 %v10946_v42  ;;  %v11043_v44 = vand.u32 4294901760, %v4724_v63  ;;  %v11073_v38 = vand.u32 4294901760, %v4722_v21 }
 0x31e   :  { %4575 = vmatpush.msrb.mxu3 %v10916_v53  ;;  %4360 = vmatpush.msrb.mxu0 %v10901_v34 }
 0x31f   :  { %4481 = vmatpush.msrb.mxu1 %v4480_v0  ;;  %4535 = vmatpush.msrb.mxu2 %v10964_v49  ;;  %v4788_v0 = vsub.f32 %v11014_v40, %v13240_v59  ;;  %v13249_v59 = vand.u32 4294901760, %v11041_v60  ;;  %v11066_v25 = vsub.f32 %v4724_v63, %v11043_v44  ;;  %v11092_v28 = vsub.f32 %v4722_v21, %v11073_v38 }
 0x320   :  { %4577 = vmatpush.msrb.mxu3 %v10926_v24  ;;  %4155 = vmatmul.f32.gmra.mxu0 %v10853_v17  ;;  %v4783_v17 = vand.u32 4294901760, %v4782_v48  ;;  %v11094_v48 = vand.u32 4294901760, %v4720_v11 }
 0x321   :  { %4669 = vmatpush.msra.mxu1 %v10792_v36  ;;  %4362 = vmatpush.msrb.mxu0 %v10916_v53  ;;  %v4371_v36 = vand.u32 4294901760, %v4370_v56 }
 0x322   :  { %4483 = vmatmul.f32.vlgmr.msrb.gmra.mxu1 %v11017_v35  ;;  %4538 = vmatpush.msrb.mxu2 %v10971_v14 }
 0x323   :  { %4579 = vmatpush.msrb.mxu3 %v10941_v27  ;;  %4671 = vmatpush.msra.mxu1 %v10794_v57  ;;  %v4789_v57 = vand.u32 4294901760, %v4788_v0  ;;  %v4372_v63 = vsub.f32 %v4370_v56, %v4371_v36  ;;  %v4800_v0 = vsub.f32 %v11041_v60, %v13249_v59 }
 0x324   :  { %4731 = vmatpush.msra.mxu2 %v10987_v19  ;;  %4364 = vmatpush.msrb.mxu0 %v10926_v24 }
 0x325   :  { %4541 = vmatmul.f32.vlgmr.msrb.gmra.mxu2 %v4370_v56  ;;  %4581 = vmatpush.msrb.mxu3 %v10952_v50  ;;  %v4795_v56 = vand.u32 4294901760, %v4794_v54  ;;  %v11104_v54 = vsub.f32 %v4721_v45, %v11082_v43  ;;  %v11116_v45 = vsub.f32 %v4720_v11, %v11094_v48  ;;  %v4711_v11 = vld [vmem:[#allocation3 + $0x3] sm:$0xff] }
 0x326   :  { %4673 = vmatpush.msra.mxu1 %v10801_v4  ;;  %4733 = vmatpush.msra.mxu2 %v10995_v9  ;;  %v4719_v4 = vld [vmem:[#allocation12 + $0x1a8] sm:$0xff] }
 0x327   :  { %4784 = vmatpush.msra.mxu3 %v4783_v17  ;;  %4366 = vmatpush.msrb.mxu0 %v10941_v27  ;;  %v13819_v17 = vand.u32 4294901760, %v11054_v12  ;;  %v11106_v21 = vand.u32 4294901760, %v4719_v4 }
 0x328   :  { %4585 = vmatmul.f32.vlgmr.msrb.gmra.mxu3 %v4371_v36  ;;  %4675 = vmatpush.msra.mxu1 %v10806_v5  ;;  %v4373_v36 = vand.u32 4294901760, %v4372_v63  ;;  %v11118_v5 = vand.u32 4294901760, %v4718_v13 }
 0x329   :  { %4735 = vmatpush.msra.mxu2 %v11009_v29  ;;  %4790 = vmatpush.msra.mxu3 %v4789_v57  ;;  %v4806_v59 = vsub.f32 %v11054_v12, %v13819_v17  ;;  %v4801_v57 = vand.u32 4294901760, %v4800_v0  ;;  %v4379_v17 = vand.u32 4294901760, %v4378_v1  ;;  %v13821_v12 = vand.u32 4294901760, %v11066_v25  ;;  %v4716_v0 = vld [vmem:[#allocation12 + $0x190] sm:$0xff] }
 0x32a   :  { %4368 = vmatpush.msrb.mxu0 %v10952_v50  ;;  %4677 = vmatpush.msra.mxu1 %v10817_v41  ;;  %v4717_v41 = vld [vmem:[#allocation12 + $0x198] sm:$0xff] }
 0x32b   :  { %4737 = vmatpush.msra.mxu2 %v11022_v26  ;;  %v4812_v60 = vsub.f32 %v11066_v25, %v13821_v12  ;;  %4796 = vmatpush.msra.mxu3 %v4795_v56  ;;  %v13823_v12 = vand.u32 4294901760, %v11080_v15  ;;  %v11132_v63 = vand.u32 4294901760, %v4717_v41 }
 0x32c   :  { %4598 = vmatpush.msra.mxu0 %v13820_v16  ;;  %4487 = vmatmul.f32.gmra.mxu1 %v11062_v2  ;;  %v4807_v16 = vand.u32 4294901760, %v4806_v59  ;;  %v4380_v59 = vsub.f32 %v4378_v1, %v4379_v17 }
 0x32d   :  { %4374 = vmatmul.f32.vlgmr.msrb.gmra.mxu0 %v4373_v36  ;;  %4679 = vmatpush.msra.mxu1 %v10826_v6  ;;  %v4818_v56 = vsub.f32 %v11080_v15, %v13823_v12  ;;  %v11130_v36 = vsub.f32 %v4719_v4, %v11106_v21  ;;  %v4813_v20 = vand.u32 4294901760, %v4812_v60  ;;  %v13825_v6 = vand.u32 4294901760, %v11092_v28 }
 0x32e   :  { %4602 = vmatpush.msra.mxu0 %v13822_v30  ;;  %4739 = vmatpush.msra.mxu2 %v11031_v3  ;;  %v13824_v30 = vand.u32 4294901760, %v10813_v22  ;;  %v11142_v4 = vsub.f32 %v4718_v13, %v11118_v5  ;;  %v11144_v15 = vand.u32 4294901760, %v4716_v0  ;;  %v13826_v22 = vand.u32 4294901760, %v10821_v61 }
 0x32f   :  { %4802 = vmatpush.msra.mxu3 %v4801_v57  ;;  %4546 = vmatmul.f32.gmra.mxu2 %v4378_v1  ;;  %v4824_v12 = vsub.f32 %v11092_v28, %v13825_v6  ;;  %v4715_v57 = vld [vmem:[#allocation12 + $0x188] sm:$0xff]  ;;  %v13827_v1 = vand.u32 4294901760, %v11104_v54  ;;  %v11154_v13 = vsub.f32 %v4717_v41, %v11132_v63  ;;  %v4714_v6 = vld [vmem:[#allocation12 + $0x180] sm:$0xff]  ;;  %v13828_v61 = vand.u32 4294901760, %v10835_v58 }
 0x330   :  { %4606 = vmatpush.msra.mxu0 %v13824_v30  ;;  %4681 = vmatpush.msra.mxu1 %v10841_v51  ;;  %v4819_v51 = vand.u32 4294901760, %v4818_v56  ;;  %v4847_v41 = vand.u32 4294901760, %v11142_v4  ;;  %v11167_v30 = vsub.f32 %v4716_v0, %v11144_v15  ;;  %v13831_v0 = vand.u32 4294901760, %v10847_v7 }
 0x331   :  { %4741 = vmatpush.msra.mxu2 %v11043_v44  ;;  %4808 = vmatpush.msra.mxu3 %v4807_v16  ;;  %v4830_v60 = vsub.f32 %v11104_v54, %v13827_v1  ;;  %v11158_v16 = vand.u32 4294901760, %v4715_v57  ;;  %v4825_v56 = vand.u32 4294901760, %v4824_v12 }
 0x332   :  { %4591 = vmatmul.f32.gmra.mxu3 %v4379_v17  ;;  %4610 = vmatpush.msra.mxu0 %v13826_v22  ;;  %v4381_v17 = vand.u32 4294901760, %v4380_v59  ;;  %v13829_v22 = vand.u32 4294901760, %v11116_v45  ;;  %v13830_v59 = vand.u32 4294901760, %v11130_v36 }
 0x333   :  { %4683 = vmatpush.msra.mxu1 %v10855_v47  ;;  %4743 = vmatpush.msra.mxu2 %v11058_v39  ;;  %v11171_v47 = vand.u32 4294901760, %v4714_v6  ;;  %v4831_v58 = vand.u32 4294901760, %v4830_v60  ;;  %v4848_v60 = vsub.f32 %v11142_v4, %v4847_v41 }
 0x334   :  { %4814 = vmatpush.msra.mxu3 %v4813_v20  ;;  %4614 = vmatpush.msra.mxu0 %v13828_v61  ;;  %v4836_v1 = vsub.f32 %v11116_v45, %v13829_v22  ;;  %v11173_v20 = vand.u32 4294901760, %v4711_v11  ;;  %v4842_v12 = vsub.f32 %v11130_v36, %v13830_v59  ;;  %v4853_v61 = vand.u32 4294901760, %v11154_v13 }
 0x335   :  { %4685 = vmatpush.msra.mxu1 %v10866_v32  ;;  %4745 = vmatpush.msra.mxu2 %v11073_v38  ;;  %v11183_v32 = vsub.f32 %v4715_v57, %v11158_v16  ;;  %v13832_v22 = vand.u32 4294901760, %v10862_v23 }
 0x336   :  { %4820 = vmatpush.msra.mxu3 %v4819_v51  ;;  %4382 = vmatmul.f32.gmra.mxu0 %v4381_v17  ;;  %v4837_v51 = vand.u32 4294901760, %v4836_v1  ;;  %v4859_v17 = vand.u32 4294901760, %v11167_v30  ;;  %v11194_v7 = vsub.f32 %v4711_v11, %v11173_v20  ;;  %v4843_v57 = vand.u32 4294901760, %v4842_v12 }
 0x337   :  { %4618 = vmatpush.msra.mxu0 %v13831_v0  ;;  %4687 = vmatpush.msra.mxu1 %v10875_v8  ;;  %v11197_v8 = vsub.f32 %v4714_v6, %v11171_v47  ;;  %v13833_v1 = vand.u32 4294901760, %v10870_v37  ;;  %v4865_v23 = vand.u32 4294901760, %v11183_v32  ;;  %v4712_v6 = vld [vmem:[#allocation3 + $0xb] sm:$0x7f]  ;;  %v13835_v12 = vand.u32 4294901760, %v10895_v55 }
 0x338   :  { %4747 = vmatpush.msra.mxu2 %v11082_v43  ;;  %4826 = vmatpush.msra.mxu3 %v4825_v56  ;;  %v4854_v56 = vsub.f32 %v11154_v13, %v4853_v61  ;;  %v4860_v11 = vsub.f32 %v11167_v30, %v4859_v17  ;;  %v4764_v37 = vand.u32 4294901760, %v11194_v7  ;;  %v11223_v0 = vand.u32 4294901760, %v4712_v6 }
 0x339   :  { %4622 = vmatpush.msra.mxu0 %v13832_v22  ;;  %4689 = vmatpush.msra.mxu1 %v10891_v52  ;;  %v4849_v52 = vand.u32 4294901760, %v4848_v60  ;;  %v13837_v60 = vand.u32 4294901760, %v10920_v18 }
 0x33a   :  { %4749 = vmatpush.msra.mxu2 %v11094_v48  ;;  %4832 = vmatpush.msra.mxu3 %v4831_v58  ;;  %v13834_v58 = vand.u32 4294901760, %v10884_v33  ;;  %v4855_v59 = vand.u32 4294901760, %v4854_v56  ;;  %v4866_v33 = vsub.f32 %v11183_v32, %v4865_v23  ;;  %v4765_v55 = vsub.f32 %v11194_v7, %v4764_v37 }
 0x33b   :  { %4626 = vmatpush.msra.mxu0 %v13833_v1  ;;  %4691 = vmatpush.msra.mxu1 %v10901_v34  ;;  %v4871_v34 = vand.u32 4294901760, %v11197_v8  ;;  %v11240_v22 = vsub.f32 %v4712_v6, %v11223_v0  ;;  %v13840_v1 = vand.u32 4294901760, %v10946_v42  ;;  %v13843_v42 = vand.u32 4294901760, %v11027_v46 }
 0x33c   :  { %4751 = vmatpush.msra.mxu2 %v11106_v21  ;;  %4838 = vmatpush.msra.mxu3 %v4837_v51  ;;  %v13836_v51 = vand.u32 4294901760, %v10912_v10  ;;  %v4867_v10 = vand.u32 4294901760, %v4866_v33  ;;  %v13844_v6 = vand.u32 4294901760, %v10971_v14  ;;  %v13847_v14 = vld [vmem:[#allocation42_spill] sm:$0xff] }
 0x33d   :  { %4630 = vmatpush.msra.mxu0 %v13834_v58  ;;  %4693 = vmatpush.msra.mxu1 %v10916_v53  ;;  %v4861_v53 = vand.u32 4294901760, %v4860_v11  ;;  %v4772_v18 = vand.u32 4294901760, %v11240_v22  ;;  %v13842_v11 = vand.u32 4294901760, %v10964_v49  ;;  %v13845_v49 = vld [vmem:[#allocation123_spill] sm:$0xff]  ;;  %v5124_v33 = vld [vmem:[#allocation14 + $0x50] sm:$0xff] }
 0x33e   :  { %4753 = vmatpush.msra.mxu2 %v11118_v5  ;;  %4844 = vmatpush.msra.mxu3 %v4843_v57  ;;  %v4766_v57 = vand.u32 4294901760, %v4765_v55  ;;  %v13846_v58 = vand.u32 4294901760, %v13845_v49 }
 0x33f   :  { %4634 = vmatpush.msra.mxu0 %v13835_v12  ;;  %4695 = vmatpush.msra.mxu1 %v10926_v24  ;;  %v4872_v24 = vsub.f32 %v11197_v8, %v4871_v34 }
 0x340   :  { %4755 = vmatpush.msra.mxu2 %v11132_v63  ;;  %4850 = vmatpush.msra.mxu3 %v4849_v52  ;;  %v4773_v52 = vsub.f32 %v11240_v22, %v4772_v18 }
 0x341   :  { %4638 = vmatpush.msra.mxu0 %v13836_v51  ;;  %4697 = vmatpush.msra.mxu1 %v10941_v27  ;;  %v13838_v27 = vand.u32 4294901760, %v10937_v31  ;;  %v4873_v56 = vand.u32 4294901760, %v4872_v24  ;;  %v13841_v31 = vand.u32 4294901760, %v11014_v40 }
 0x342   :  { %4757 = vmatpush.msra.mxu2 %v11144_v15  ;;  %4856 = vmatpush.msra.mxu3 %v4855_v59 }
 0x343   :  { %4642 = vmatpush.msra.mxu0 %v13837_v60  ;;  %4699 = vmatpush.msra.mxu1 %v10952_v50  ;;  %v13839_v50 = vand.u32 4294901760, %v11006_v62  ;;  %v11437_v60 = vand.u32 4294901760, %v5124_v33 }
 0x344   :  { %4759 = vmatpush.msra.mxu2 %v11158_v16  ;;  %4862 = vmatpush.msra.mxu3 %v4861_v53 }
 0x345   :  { %4701 = vmatmul.f32.vlgmr.msra.gmra.mxu1 %v11017_v35  ;;  %4646 = vmatpush.msra.mxu0 %v13838_v27  ;;  %13871 = vst [vmem:[#allocation51_spill] sm:$0xff] %v11437_v60 }
 0x346   :  { %4944 = vmatpush.msrb.mxu1 %v10987_v19  ;;  %4761 = vmatpush.msra.mxu2 %v11171_v47 }
 0x347   :  { %4868 = vmatpush.msra.mxu3 %v4867_v10  ;;  %4767 = vmatmul.f32.vlgmr.msra.gmra.mxu2 %v4766_v57 }
 0x348   :  { %4946 = vmatpush.msrb.mxu1 %v10995_v9  ;;  %4991 = vmatpush.msrb.mxu2 %v13839_v50 }
 0x349   :  { %4650 = vmatpush.msra.mxu0 %v13840_v1  ;;  %4874 = vmatpush.msra.mxu3 %v4873_v56 }
 0x34a   :  { %4876 = vmatmul.f32.vlgmr.msra.gmra.mxu3 %v11173_v20  ;;  %4948 = vmatpush.msrb.mxu1 %v11009_v29 }
 0x34b   :  { %4995 = vmatpush.msrb.mxu2 %v13841_v31  ;;  %5062 = vmatpush.msrb.mxu3 %v10987_v19  ;;  %v4774_v19 = vand.u32 4294901760, %v4773_v52  ;;  %v5122_v31 = vld [vmem:[#allocation14 + $0x40] sm:$0xff] }
 0x34c   :  { %4654 = vmatpush.msra.mxu0 %v13842_v11  ;;  %4950 = vmatpush.msrb.mxu1 %v11022_v26 }
 0x34d   :  { %4999 = vmatpush.msrb.mxu2 %v13843_v42  ;;  %5064 = vmatpush.msrb.mxu3 %v10995_v9  ;;  %v13848_v9 = vand.u32 4294901760, %v13847_v14 }
 0x34e   :  { %4658 = vmatpush.msra.mxu0 %v13844_v6  ;;  %4705 = vmatmul.f32.gmra.mxu1 %v11062_v2 }
 0x34f   :  { %4660 = vmatmul.f32.vlgmr.msra.gmra.mxu0 %v11017_v35  ;;  %4952 = vmatpush.msrb.mxu1 %v11031_v3  ;;  %v13849_v35 = vand.u32 4294901760, %v11066_v25 }
 0x350   :  { %4886 = vmatpush.msrb.mxu0 %v11006_v62  ;;  %5003 = vmatpush.msrb.mxu2 %v13846_v58  ;;  %v5121_v58 = vld [vmem:[#allocation14 + $0x38] sm:$0xff] }
 0x351   :  { %5066 = vmatpush.msrb.mxu3 %v11009_v29  ;;  %4775 = vmatmul.f32.gmra.mxu2 %v4774_v19  ;;  %v13850_v29 = vld [vmem:[#allocation26_spill] sm:$0xff]  ;;  %v11472_v19 = vand.u32 4294901760, %v5122_v31 }
 0x352   :  { %4889 = vmatpush.msrb.mxu0 %v11014_v40  ;;  %4954 = vmatpush.msrb.mxu1 %v11043_v44  ;;  %v13851_v62 = vand.u32 4294901760, %v13850_v29  ;;  %v11358_v40 = vpop.f32.mrf.mxu3 }
 0x353   :  { %5007 = vmatpush.msrb.mxu2 %v13848_v9  ;;  %5068 = vmatpush.msrb.mxu3 %v11022_v26  ;;  %v13852_v26 = vand.u32 4294901760, %v11092_v28  ;;  %13880 = vst [vmem:[#allocation87_spill] sm:$0xff] %v11472_v19 }
 0x354   :  { %4880 = vmatmul.f32.gmra.mxu3 %v11223_v0  ;;  %4892 = vmatpush.msrb.mxu0 %v11027_v46 }
 0x355   :  { %4956 = vmatpush.msrb.mxu1 %v11058_v39  ;;  %5011 = vmatpush.msrb.mxu2 %v13849_v35  ;;  %v11486_v35 = vsub.f32 %v5122_v31, %v11472_v19 }
 0x356   :  { %5070 = vmatpush.msrb.mxu3 %v11031_v3  ;;  %4895 = vmatpush.msrb.mxu0 %v13845_v49  ;;  %v13853_v3 = vand.u32 4294901760, %v11104_v54 }
 0x357   :  { %4958 = vmatpush.msrb.mxu1 %v11073_v38  ;;  %5015 = vmatpush.msrb.mxu2 %v13851_v62  ;;  %13882 = vst [vmem:[#allocation56_spill] sm:$0xff] %v11486_v35 }
 0x358   :  { %5072 = vmatpush.msrb.mxu3 %v11043_v44  ;;  %4664 = vmatmul.f32.gmra.mxu0 %v11062_v2  ;;  %v13854_v2 = vand.u32 4294901760, %v11116_v45 }
 0x359   :  { %4898 = vmatpush.msrb.mxu0 %v13847_v14  ;;  %4960 = vmatpush.msrb.mxu1 %v11082_v43 }
 0x35a   :  { %5019 = vmatpush.msrb.mxu2 %v13852_v26  ;;  %5074 = vmatpush.msrb.mxu3 %v11058_v39  ;;  %v13855_v39 = vand.u32 4294901760, %v11130_v36  ;;  %v5120_v26 = vld [vmem:[#allocation14 + $0x30] sm:$0xff] }
 0x35b   :  { %4901 = vmatpush.msrb.mxu0 %v11066_v25  ;;  %4962 = vmatpush.msrb.mxu1 %v11094_v48 }
 0x35c   :  { %5023 = vmatpush.msrb.mxu2 %v13853_v3  ;;  %5076 = vmatpush.msrb.mxu3 %v11073_v38  ;;  %v11356_v38 = vpop.f32.mrf.mxu2 }
 0x35d   :  { %4904 = vmatpush.msrb.mxu0 %v13850_v29  ;;  %4964 = vmatpush.msrb.mxu1 %v11106_v21  ;;  %v11488_v29 = vand.u32 4294901760, %v5121_v58 }
 0x35e   :  { %5027 = vmatpush.msrb.mxu2 %v13854_v2  ;;  %5078 = vmatpush.msrb.mxu3 %v11082_v43  ;;  %v11352_v43 = vpop.f32.mrf.mxu1 }
 0x35f   :  { %4907 = vmatpush.msrb.mxu0 %v11092_v28  ;;  %4966 = vmatpush.msrb.mxu1 %v11118_v5  ;;  %v5129_v28 = vld [vmem:[#allocation14 + $0x78] sm:$0xff]  ;;  %13883 = vst [vmem:[#allocation89_spill] sm:$0xff] %v11488_v29 }
 0x360   :  { %5031 = vmatpush.msrb.mxu2 %v13855_v39  ;;  %5080 = vmatpush.msrb.mxu3 %v11094_v48  ;;  %v11500_v39 = vand.u32 4294901760, %v11486_v35 }
 0x361   :  { %4910 = vmatpush.msrb.mxu0 %v11104_v54  ;;  %4968 = vmatpush.msrb.mxu1 %v11132_v63 }
 0x362   :  { %5035 = vmatpush.msrb.mxu2 %v4847_v41  ;;  %5082 = vmatpush.msrb.mxu3 %v11106_v21  ;;  %v11372_v21 = vand.u32 4294901760, %v5129_v28  ;;  %13886 = vst [vmem:[#allocation58_spill] sm:$0xff] %v11500_v39 }
 0x363   :  { %4913 = vmatpush.msrb.mxu0 %v11116_v45  ;;  %4970 = vmatpush.msrb.mxu1 %v11144_v15 }
 0x364   :  { %5039 = vmatpush.msrb.mxu2 %v4853_v61  ;;  %5084 = vmatpush.msrb.mxu3 %v11118_v5  ;;  %13856 = vst [vmem:[#allocation47_spill] sm:$0xff] %v11372_v21 }
 0x365   :  { %4916 = vmatpush.msrb.mxu0 %v11130_v36  ;;  %4972 = vmatpush.msrb.mxu1 %v11158_v16  ;;  %v11377_v36 = vsub.f32 %v5129_v28, %v11372_v21  ;;  %v11503_v28 = vsub.f32 %v5121_v58, %v11488_v29 }
 0x366   :  { %5043 = vmatpush.msrb.mxu2 %v4859_v17  ;;  %5086 = vmatpush.msrb.mxu3 %v11132_v63  ;;  %v5128_v63 = vld [vmem:[#allocation14 + $0x70] sm:$0xff] }
 0x367   :  { %4919 = vmatpush.msrb.mxu0 %v11142_v4  ;;  %4974 = vmatpush.msrb.mxu1 %v11171_v47  ;;  %13857 = vst [vmem:[#allocation49_spill] sm:$0xff] %v11377_v36  ;;  %v11379_v4 = vand.u32 4294901760, %v5128_v63 }
 0x368   :  { %5047 = vmatpush.msrb.mxu2 %v4865_v23  ;;  %5088 = vmatpush.msrb.mxu3 %v11144_v15  ;;  %v11354_v15 = vpop.f32.mrf.mxu0  ;;  %13887 = vst [vmem:[#allocation134_spill] sm:$0xff] %v11503_v28 }
 0x369   :  { %4978 = vmatmul.f32.vlgmr.msrb.gmra.mxu1 %v4764_v37  ;;  %4922 = vmatpush.msrb.mxu0 %v11154_v13  ;;  %13858 = vst [vmem:[#allocation24_spill] sm:$0xff] %v11379_v4  ;;  %v11389_v41 = vsub.f32 %v5128_v63, %v11379_v4  ;;  %v11508_v63 = vand.u32 4294901760, %v5120_v26 }
 0x36a   :  { %5051 = vmatpush.msrb.mxu2 %v4871_v34  ;;  %5090 = vmatpush.msrb.mxu3 %v11158_v16  ;;  %v11386_v16 = vand.u32 4294901760, %v11377_v36 }
 0x36b   :  { %5053 = vmatmul.f32.vlgmr.msrb.gmra.mxu2 %v11173_v20  ;;  %4925 = vmatpush.msrb.mxu0 %v11167_v30  ;;  %v5127_v30 = vld [vmem:[#allocation14 + $0x68] sm:$0xff]  ;;  %13860 = vst [vmem:[#allocation61_spill] sm:$0xff] %v11389_v41 }
 0x36c   :  { %5092 = vmatpush.msrb.mxu3 %v11171_v47  ;;  %13859 = vst [vmem:[#allocation140_spill] sm:$0xff] %v11386_v16  ;;  %5294 = vmatpush.msra.mxu2 %v11377_v36  ;;  %v11392_v47 = vand.u32 4294901760, %v5127_v30  ;;  %v5194_v61 = vsub.f32 %v11377_v36, %v11386_v16 }
 0x36d   :  { %5094 = vmatmul.f32.vlgmr.msrb.gmra.mxu3 %v11173_v20  ;;  %4928 = vmatpush.msrb.mxu0 %v11183_v32  ;;  %v5126_v20 = vld [vmem:[#allocation14 + $0x60] sm:$0xff]  ;;  %v11399_v32 = vand.u32 4294901760, %v11389_v41  ;;  %13888 = vst [vmem:[#allocation138_spill] sm:$0xff] %v11508_v63 }
 0x36e   :  { %5347 = vmatpush.msra.mxu3 %v11372_v21  ;;  %13861 = vst [vmem:[#allocation59_spill] sm:$0xff] %v11392_v47  ;;  %v11402_v17 = vsub.f32 %v5127_v30, %v11392_v47  ;;  %5297 = vmatpush.msra.mxu2 %v11389_v41  ;;  %v11409_v23 = vand.u32 4294901760, %v5194_v61  ;;  %v5119_v30 = vld [vmem:[#allocation14 + $0x28] sm:$0xff] }
 0x36f   :  { %4931 = vmatpush.msrb.mxu0 %v11197_v8  ;;  %v11360_v46 = vpop.f32.mrf.mxu1  ;;  %13862 = vst [vmem:[#allocation66_spill] sm:$0xff] %v11399_v32  ;;  %v5125_v8 = vld [vmem:[#allocation14 + $0x58] sm:$0xff]  ;;  %v5200_v37 = vsub.f32 %v11389_v41, %v11399_v32 }
 0x370   :  { %4934 = vmatmul.f32.vlgmr.msrb.gmra.mxu0 %v11194_v7  ;;  %5349 = vmatpush.msra.mxu3 %v11379_v4  ;;  %13863 = vst [vmem:[#allocation28_spill] sm:$0xff] %v11402_v17  ;;  %v11405_v7 = vand.u32 4294901760, %v5126_v20  ;;  %v11414_v34 = vand.u32 4294901760, %v11402_v17  ;;  %v11421_v12 = vand.u32 4294901760, %v5125_v8 }
 0x371   :  { %4984 = vmatmul.f32.gmra.mxu1 %v4772_v18  ;;  %5151 = vmatpush.msra.mxu0 %v11372_v21  ;;  %13865 = vst [vmem:[#allocation50_spill] sm:$0xff] %v11409_v23  ;;  %v11429_v51 = vand.u32 4294901760, %v5200_v37  ;;  %v11452_v18 = vsub.f32 %v5124_v33, %v11437_v60  ;;  %v5236_v37 = vsub.f32 %v11486_v35, %v11500_v39  ;;  %v11519_v33 = vand.u32 4294901760, %v11503_v28 }
 0x372   :  { %13864 = vst [vmem:[#allocation27_spill] sm:$0xff] %v11405_v7  ;;  %5351 = vmatpush.msra.mxu3 %v11392_v47  ;;  %v11417_v59 = vsub.f32 %v5126_v20, %v11405_v7  ;;  %5300 = vmatpush.msra.mxu2 %v11402_v17  ;;  %v5206_v55 = vsub.f32 %v11402_v17, %v11414_v34 }
 0x373   :  { %5057 = vmatmul.f32.gmra.mxu2 %v11223_v0  ;;  %5153 = vmatpush.msra.mxu0 %v11379_v4  ;;  %13866 = vst [vmem:[#allocation122_spill] sm:$0xff] %v11414_v34  ;;  %v11440_v10 = vsub.f32 %v5125_v8, %v11421_v12  ;;  %v11467_v42 = vand.u32 4294901760, %v11452_v18  ;;  %v5242_v58 = vsub.f32 %v11503_v28, %v11519_v33 }
 0x374   :  { %13867 = vst [vmem:[#allocation48_spill] sm:$0xff] %v11417_v59  ;;  %5353 = vmatpush.msra.mxu3 %v11405_v7  ;;  %5196 = vmatpush.msra.mxu1 %v11409_v23  ;;  %v11434_v24 = vand.u32 4294901760, %v11417_v59  ;;  %v11447_v57 = vand.u32 4294901760, %v5206_v55  ;;  %v11521_v55 = vand.u32 4294901760, %v5119_v30 }
 0x375   :  { %5098 = vmatmul.f32.gmra.mxu3 %v11223_v0  ;;  %5155 = vmatpush.msra.mxu0 %v11392_v47  ;;  %13868 = vst [vmem:[#allocation70_spill] sm:$0xff] %v11421_v12  ;;  %v11457_v1 = vand.u32 4294901760, %v11440_v10  ;;  %v5224_v14 = vsub.f32 %v11452_v18, %v11467_v42 }
 0x376   :  { %13869 = vst [vmem:[#allocation136_spill] sm:$0xff] %v11429_v51  ;;  %5303 = vmatpush.msra.mxu2 %v11417_v59  ;;  %5355 = vmatpush.msra.mxu3 %v11421_v12  ;;  %v5212_v56 = vsub.f32 %v11417_v59, %v11434_v24 }
 0x377   :  { %v11362_v44 = vpop.f32.mrf.mxu0  ;;  %v11364_v25 = vpop.f32.mrf.mxu2  ;;  %5157 = vmatpush.msra.mxu0 %v11405_v7  ;;  %13870 = vst [vmem:[#allocation43_spill] sm:$0xff] %v11434_v24  ;;  %5202 = vmatpush.msra.mxu1 %v11429_v51  ;;  %v5218_v49 = vsub.f32 %v11440_v10, %v11457_v1  ;;  %v11495_v3 = vand.u32 4294901760, %v5224_v14  ;;  %v11537_v14 = vsub.f32 %v5119_v30, %v11521_v55 }
 0x378   :  { %4939 = vmatmul.f32.gmra.mxu0 %v11240_v22  ;;  %v11368_v5 = vpop.f32.mrf.mxu1  ;;  %13872 = vst [vmem:[#allocation53_spill] sm:$0xff] %v11440_v10  ;;  %v5123_v22 = vld [vmem:[#allocation14 + $0x48] sm:$0xff]  ;;  %5306 = vmatpush.msra.mxu2 %v11440_v10  ;;  %v11464_v11 = vand.u32 4294901760, %v5212_v56  ;;  %v5118_v56 = vld [vmem:[#allocation14 + $0x20] sm:$0xff] }
 0x379   :  { %v11366_v48 = vpop.f32.mrf.mxu3  ;;  %5159 = vmatpush.msra.mxu0 %v11421_v12  ;;  %13873 = vst [vmem:[#allocation71_spill] sm:$0xff] %v11447_v57  ;;  %v11454_v50 = vand.u32 4294901760, %v5123_v22  ;;  %5357 = vmatpush.msra.mxu3 %v11437_v60  ;;  %v11491_v62 = vand.u32 4294901760, %v5218_v49  ;;  %v11532_v49 = vand.u32 4294901760, %v5236_v37  ;;  %v5117_v37 = vld [vmem:[#allocation14 + $0x18] sm:$0xff]  ;;  %v11553_v30 = vand.u32 4294901760, %v11537_v14 }
 0x37a   :  { %13874 = vst [vmem:[#allocation65_spill] sm:$0xff] %v11452_v18  ;;  %5208 = vmatpush.msra.mxu1 %v11447_v57  ;;  %5309 = vmatpush.msra.mxu2 %v11452_v18  ;;  %v11558_v10 = vand.u32 4294901760, %v5117_v37 }
 0x37b   :  { %13875 = vst [vmem:[#allocation81_spill] sm:$0xff] %v11454_v50  ;;  %v11470_v6 = vsub.f32 %v5123_v22, %v11454_v50  ;;  %5161 = vmatpush.msra.mxu0 %v11437_v60  ;;  %5359 = vmatpush.msra.mxu3 %v11454_v50  ;;  %v11527_v22 = vsub.f32 %v5120_v26, %v11508_v63 }
 0x37c   :  { %13876 = vst [vmem:[#allocation44_spill] sm:$0xff] %v11457_v1  ;;  %5214 = vmatpush.msra.mxu1 %v11464_v11  ;;  %v11574_v59 = vsub.f32 %v5117_v37, %v11558_v10 }
 0x37d   :  { %13877 = vst [vmem:[#allocation54_spill] sm:$0xff] %v11464_v11  ;;  %v11483_v9 = vand.u32 4294901760, %v11470_v6  ;;  %5163 = vmatpush.msra.mxu0 %v11454_v50  ;;  %5312 = vmatpush.msra.mxu2 %v11470_v6  ;;  %v11545_v26 = vand.u32 4294901760, %v11527_v22 }
 0x37e   :  { %13878 = vst [vmem:[#allocation135_spill] sm:$0xff] %v11467_v42  ;;  %5361 = vmatpush.msra.mxu3 %v11472_v19  ;;  %5220 = vmatpush.msra.mxu1 %v11491_v62  ;;  %v11590_v17 = vand.u32 4294901760, %v11574_v59 }
 0x37f   :  { %v11370_v54 = vpop.f32.mrf.mxu0  ;;  %v11374_v45 = vpop.f32.mrf.mxu2  ;;  %13879 = vst [vmem:[#allocation52_spill] sm:$0xff] %v11470_v6  ;;  %v5230_v2 = vsub.f32 %v11470_v6, %v11483_v9  ;;  %5165 = vmatpush.msra.mxu0 %v11472_v19  ;;  %5315 = vmatpush.msra.mxu2 %v11486_v35  ;;  %v5116_v35 = vld [vmem:[#allocation14 + $0x10] sm:$0xff] }
 0x380   :  { %v11424_v0 = vpop.f32.mrf.mxu1  ;;  %13881 = vst [vmem:[#allocation55_spill] sm:$0xff] %v11483_v9  ;;  %5363 = vmatpush.msra.mxu3 %v11488_v29  ;;  %5226 = vmatpush.msra.mxu1 %v11495_v3  ;;  %v5266_v41 = vsub.f32 %v11574_v59, %v11590_v17 }
 0x381   :  { %v11383_v13 = vpop.f32.mrf.mxu3  ;;  %13884 = vst [vmem:[#allocation57_spill] sm:$0xff] %v11491_v62  ;;  %v11514_v8 = vand.u32 4294901760, %v5230_v2  ;;  %5167 = vmatpush.msra.mxu0 %v11488_v29  ;;  %5318 = vmatpush.msra.mxu2 %v11503_v28  ;;  %v11539_v2 = vand.u32 4294901760, %v5118_v56  ;;  %v11550_v28 = vand.u32 4294901760, %v5242_v58  ;;  %v11566_v58 = vand.u32 4294901760, %v5116_v35 }
 0x382   :  { %13885 = vst [vmem:[#allocation32_spill] sm:$0xff] %v11495_v3  ;;  %5365 = vmatpush.msra.mxu3 %v11508_v63  ;;  %v5254_v3 = vsub.f32 %v11537_v14, %v11553_v30  ;;  %v11622_v51 = vand.u32 4294901760, %v5266_v41 }
 0x383   :  { %13889 = vst [vmem:[#allocation142_spill] sm:$0xff] %v11514_v8  ;;  %5169 = vmatpush.msra.mxu0 %v11508_v63  ;;  %5232 = vmatpush.msra.mxu1 %v11514_v8  ;;  %v11556_v18 = vsub.f32 %v5118_v56, %v11539_v2  ;;  %v5248_v8 = vsub.f32 %v11527_v22, %v11545_v26 }
 0x384   :  { %13890 = vst [vmem:[#allocation143_spill] sm:$0xff] %v11519_v33  ;;  %5321 = vmatpush.msra.mxu2 %v11527_v22  ;;  %5367 = vmatpush.msra.mxu3 %v11521_v55  ;;  %v11585_v62 = vand.u32 4294901760, %v5254_v3  ;;  %v5114_v3 = vld [vmem:[#allocation14] sm:$0xff] }
 0x385   :  { %13891 = vst [vmem:[#allocation29_spill] sm:$0xff] %v11521_v55  ;;  %5171 = vmatpush.msra.mxu0 %v11521_v55  ;;  %5238 = vmatpush.msra.mxu1 %v11532_v49  ;;  %v11571_v56 = vand.u32 4294901760, %v11556_v18  ;;  %v11612_v36 = vand.u32 4294901760, %v5114_v3 }
 0x386   :  { %13892 = vst [vmem:[#allocation31_spill] sm:$0xff] %v11527_v22  ;;  %5324 = vmatpush.msra.mxu2 %v11537_v14  ;;  %5369 = vmatpush.msra.mxu3 %v11539_v2  ;;  %v11579_v22 = vand.u32 4294901760, %v5248_v8 }
 0x387   :  { %13893 = vst [vmem:[#allocation139_spill] sm:$0xff] %v11532_v49  ;;  %5173 = vmatpush.msra.mxu0 %v11539_v2  ;;  %5244 = vmatpush.msra.mxu1 %v11550_v28  ;;  %v11583_v49 = vsub.f32 %v5116_v35, %v11566_v58  ;;  %v5260_v37 = vsub.f32 %v11556_v18, %v11571_v56 }
 0x388   :  { %v11444_v27 = vpop.f32.mrf.mxu2  ;;  %13894 = vst [vmem:[#allocation147_spill] sm:$0xff] %v11537_v14  ;;  %5327 = vmatpush.msra.mxu2 %v11556_v18  ;;  %v5115_v14 = vld [vmem:[#allocation14 + $0x8] sm:$0xff]  ;;  %5371 = vmatpush.msra.mxu3 %v11558_v10 }
 0x389   :  { %v11426_v53 = vpop.f32.mrf.mxu0  ;;  %13895 = vst [vmem:[#allocation150_spill] sm:$0xff] %v11545_v26  ;;  %v11592_v11 = vand.u32 4294901760, %v5115_v14  ;;  %5175 = vmatpush.msra.mxu0 %v11558_v10  ;;  %5250 = vmatpush.msra.mxu1 %v11579_v22  ;;  %v11598_v35 = vand.u32 4294901760, %v11583_v49 }
 0x38a   :  { %v11510_v20 = vpop.f32.mrf.mxu1  ;;  %13897 = vst [vmem:[#allocation151_spill] sm:$0xff] %v11550_v28  ;;  %5330 = vmatpush.msra.mxu2 %v11574_v59  ;;  %v11605_v28 = vand.u32 4294901760, %v5260_v37  ;;  %5373 = vmatpush.msra.mxu3 %v11566_v58 }
 0x38b   :  { %v11461_v52 = vpop.f32.mrf.mxu3  ;;  %13898 = vst [vmem:[#allocation30_spill] sm:$0xff] %v11553_v30  ;;  %v11610_v57 = vsub.f32 %v5115_v14, %v11592_v11  ;;  %5177 = vmatpush.msra.mxu0 %v11566_v58  ;;  %5256 = vmatpush.msra.mxu1 %v11585_v62 }
 0x38c   :  { %13899 = vst [vmem:[#allocation145_spill] sm:$0xff] %v11556_v18  ;;  %5333 = vmatpush.msra.mxu2 %v11583_v49  ;;  %5375 = vmatpush.msra.mxu3 %v11592_v11 }
 0x38d   :  { %13900 = vst [vmem:[#allocation148_spill] sm:$0xff] %v11558_v10  ;;  %v11625_v14 = vand.u32 4294901760, %v11610_v57  ;;  %5179 = vmatpush.msra.mxu0 %v11592_v11  ;;  %5262 = vmatpush.msra.mxu1 %v11605_v28 }
 0x38e   :  { %13901 = vst [vmem:[#allocation156_spill] sm:$0xff] %v11566_v58  ;;  %5336 = vmatpush.msra.mxu2 %v11610_v57  ;;  %5377 = vmatpush.msra.mxu3 %v11612_v36 }
 0x38f   :  { %13902 = vst [vmem:[#allocation152_spill] sm:$0xff] %v11571_v56  ;;  %v5278_v41 = vsub.f32 %v11610_v57, %v11625_v14  ;;  %5181 = vmatpush.msra.mxu0 %v11612_v36  ;;  %5268 = vmatpush.msra.mxu1 %v11622_v51 }
 0x390   :  { %13903 = vst [vmem:[#allocation155_spill] sm:$0xff] %v11574_v59  ;;  %v11628_v59 = vsub.f32 %v5114_v3, %v11612_v36  ;;  %v5145_v3 = vld [vmem:[#allocation15 + $0x78] sm:$0xff] }
 0x391   :  { %13904 = vst [vmem:[#allocation35_spill] sm:$0xff] %v11579_v22  ;;  %v5272_v22 = vsub.f32 %v11583_v49, %v11598_v35  ;;  %5388 = vmatpush.msrb.mxu0 %v11386_v16 }
 0x392   :  { %v11530_v31 = vpop.f32.mrf.mxu2  ;;  %13905 = vst [vmem:[#allocation154_spill] sm:$0xff] %v11583_v49  ;;  %v11641_v23 = vand.u32 4294901760, %v11628_v59  ;;  %5339 = vmatpush.msra.mxu2 %v11628_v59 }
 0x393   :  { %v11512_v61 = vpop.f32.mrf.mxu0  ;;  %13906 = vst [vmem:[#allocation75_spill] sm:$0xff] %v11585_v62  ;;  %v11633_v62 = vand.u32 4294901760, %v5272_v22  ;;  %v11647_v22 = vand.u32 4294901760, %v5145_v3  ;;  %5392 = vmatpush.msrb.mxu0 %v11399_v32 }
 0x394   :  { %13907 = vst [vmem:[#allocation79_spill] sm:$0xff] %v11590_v17  ;;  %v11601_v8 = vpop.f32.mrf.mxu1 }
 0x395   :  { %v11548_v6 = vpop.f32.mrf.mxu3  ;;  %13908 = vst [vmem:[#allocation63_spill] sm:$0xff] %v11592_v11  ;;  %5274 = vmatpush.msra.mxu1 %v11633_v62  ;;  %5492 = vmatpush.msrb.mxu2 %v11647_v22 }
 0x396   :  { %13896 = vst [vmem:[#allocation144_spill] sm:$0xff] %v11548_v6  ;;  %v5143_v6 = vld [vmem:[#allocation15 + $0x68] sm:$0xff]  ;;  %5396 = vmatpush.msrb.mxu0 %v11414_v34  ;;  %v5141_v34 = vld [vmem:[#allocation15 + $0x58] sm:$0xff] }
 0x397   :  { %13909 = vst [vmem:[#allocation84_spill] sm:$0xff] %v11598_v35  ;;  %v11669_v16 = vand.u32 4294901760, %v5143_v6 }
 0x398   :  { %13910 = vst [vmem:[#allocation68_spill] sm:$0xff] %v11601_v8  ;;  %5400 = vmatpush.msrb.mxu0 %v11434_v24  ;;  %v5140_v24 = vld [vmem:[#allocation15 + $0x50] sm:$0xff] }
 0x399   :  { %13912 = vst [vmem:[#allocation93_spill] sm:$0xff] %v11605_v28  ;;  %v11649_v28 = vand.u32 4294901760, %v5278_v41 }
 0x39a   :  { %13913 = vst [vmem:[#allocation73_spill] sm:$0xff] %v11610_v57  ;;  %v5144_v57 = vld [vmem:[#allocation15 + $0x70] sm:$0xff]  ;;  %5404 = vmatpush.msrb.mxu0 %v11457_v1  ;;  %v5139_v1 = vld [vmem:[#allocation15 + $0x48] sm:$0xff] }
 0x39b   :  { %13914 = vst [vmem:[#allocation64_spill] sm:$0xff] %v11612_v36  ;;  %5280 = vmatpush.msra.mxu1 %v11649_v28 }
 0x39c   :  { %v11620_v37 = vpop.f32.mrf.mxu2  ;;  %13916 = vst [vmem:[#allocation77_spill] sm:$0xff] %v11622_v51  ;;  %v11659_v51 = vsub.f32 %v5145_v3, %v11647_v22  ;;  %5408 = vmatpush.msrb.mxu0 %v11467_v42 }
 0x39d   :  { %v11603_v18 = vpop.f32.mrf.mxu0  ;;  %13915 = vst [vmem:[#allocation96_spill] sm:$0xff] %v11620_v37  ;;  %v11656_v37 = vand.u32 4294901760, %v5144_v57 }
 0x39e   :  { %13911 = vst [vmem:[#allocation62_spill] sm:$0xff] %v11603_v18  ;;  %v11667_v41 = vand.u32 4294901760, %v11659_v51  ;;  %v11703_v18 = vand.u32 4294901760, %v5141_v34  ;;  %5412 = vmatpush.msrb.mxu0 %v11483_v9 }
 0x39f   :  { %13917 = vst [vmem:[#allocation69_spill] sm:$0xff] %v11625_v14  ;;  %v11636_v49 = vpop.f32.mrf.mxu3  ;;  %5494 = vmatpush.msrb.mxu2 %v11656_v37 }
 0x3a0   :  { %13918 = vst [vmem:[#allocation98_spill] sm:$0xff] %v11628_v59  ;;  %v5535_v32 = vsub.f32 %v11659_v51, %v11667_v41  ;;  %5416 = vmatpush.msrb.mxu0 %v11500_v39 }
 0x3a1   :  { %13919 = vst [vmem:[#allocation83_spill] sm:$0xff] %v11633_v62  ;;  %v11674_v62 = vpop.f32.mrf.mxu1  ;;  %5496 = vmatpush.msrb.mxu2 %v11669_v16 }
 0x3a2   :  { %13920 = vst [vmem:[#allocation74_spill] sm:$0xff] %v11636_v49  ;;  %v5284_v49 = vsub.f32 %v11628_v59, %v11641_v23  ;;  %v11672_v59 = vsub.f32 %v5144_v57, %v11656_v37  ;;  %v11689_v57 = vsub.f32 %v5143_v6, %v11669_v16  ;;  %v3722_v6 = vadd.f32 %v11352_v43, %v11354_v15 }
 0x3a3   :  { %13921 = vst [vmem:[#allocation102_spill] sm:$0xff] %v11641_v23  ;;  %v11720_v43 = vand.u32 4294901760, %v5140_v24  ;;  %5420 = vmatpush.msrb.mxu0 %v11519_v33 }
 0x3a4   :  { %13922 = vst [vmem:[#allocation85_spill] sm:$0xff] %v11647_v22  ;;  %v11661_v8 = vand.u32 4294901760, %v5284_v49  ;;  %v5142_v49 = vld [vmem:[#allocation15 + $0x60] sm:$0xff] }
 0x3a5   :  { %13923 = vst [vmem:[#allocation78_spill] sm:$0xff] %v11649_v28  ;;  %v11684_v28 = vand.u32 4294901760, %v11672_v59  ;;  %v11686_v22 = vand.u32 4294901760, %v5142_v49  ;;  %5424 = vmatpush.msrb.mxu0 %v11545_v26 }
 0x3a6   :  { %13924 = vst [vmem:[#allocation107_spill] sm:$0xff] %v11656_v37  ;;  %5286 = vmatpush.msra.mxu1 %v11661_v8 }
 0x3a7   :  { %13925 = vst [vmem:[#allocation91_spill] sm:$0xff] %v11659_v51  ;;  %v5541_v51 = vsub.f32 %v11672_v59, %v11684_v28  ;;  %5498 = vmatpush.msrb.mxu2 %v11686_v22  ;;  %5428 = vmatpush.msrb.mxu0 %v11553_v30  ;;  %v5133_v30 = vld [vmem:[#allocation15 + $0x18] sm:$0xff] }
 0x3a8   :  { %13926 = vst [vmem:[#allocation80_spill] sm:$0xff] %v11661_v8  ;;  %v11691_v37 = vpop.f32.mrf.mxu2  ;;  %5455 = vmatpush.msrb.mxu1 %v11372_v21  ;;  %v11695_v8 = vand.u32 4294901760, %v5535_v32  ;;  %v11711_v32 = vsub.f32 %v5142_v49, %v11686_v22  ;;  %v11727_v49 = vsub.f32 %v5141_v34, %v11703_v18 }
 0x3a9   :  { %13927 = vst [vmem:[#allocation112_spill] sm:$0xff] %v11667_v41  ;;  %v11701_v41 = vand.u32 4294901760, %v11689_v57  ;;  %v11715_v21 = vand.u32 4294901760, %v5541_v51  ;;  %5500 = vmatpush.msrb.mxu2 %v11703_v18  ;;  %5432 = vmatpush.msrb.mxu0 %v11571_v56 }
 0x3aa   :  { %13928 = vst [vmem:[#allocation95_spill] sm:$0xff] %v11669_v16  ;;  %v11676_v3 = vpop.f32.mrf.mxu0  ;;  %5457 = vmatpush.msrb.mxu1 %v11379_v4  ;;  %5537 = vmatpush.msrb.mxu3 %v11695_v8  ;;  %v11724_v15 = vand.u32 4294901760, %v11711_v32  ;;  %v11737_v4 = vsub.f32 %v5140_v24, %v11720_v43  ;;  %v11744_v42 = vand.u32 4294901760, %v11727_v49 }
 0x3ab   :  { %13929 = vst [vmem:[#allocation86_spill] sm:$0xff] %v11672_v59  ;;  %v11707_v16 = vpop.f32.mrf.mxu3  ;;  %v5547_v59 = vsub.f32 %v11689_v57, %v11701_v41  ;;  %5502 = vmatpush.msrb.mxu2 %v11720_v43  ;;  %5436 = vmatpush.msrb.mxu0 %v11590_v17  ;;  %v5130_v17 = vld [vmem:[#allocation15] sm:$0xff] }
 0x3ac   :  { %13930 = vst [vmem:[#allocation115_spill] sm:$0xff] %v11689_v57  ;;  %5459 = vmatpush.msrb.mxu1 %v11392_v47  ;;  %5543 = vmatpush.msrb.mxu3 %v11715_v21  ;;  %v3780_v47 = vadd.f32 %v11356_v38, %v3722_v6  ;;  %v5553_v34 = vsub.f32 %v11711_v32, %v11724_v15  ;;  %v11757_v6 = vpop.f32.mrf.mxu1 }
 0x3ad   :  { %13931 = vst [vmem:[#allocation101_spill] sm:$0xff] %v11695_v8  ;;  %v11731_v51 = vand.u32 4294901760, %v5547_v59  ;;  %v11734_v8 = vand.u32 4294901760, %v5139_v1  ;;  %v11750_v59 = vand.u32 4294901760, %v11737_v4  ;;  %v5559_v9 = vsub.f32 %v11727_v49, %v11744_v42  ;;  %5440 = vmatpush.msrb.mxu0 %v11598_v35 }
 0x3ae   :  { %13932 = vst [vmem:[#allocation92_spill] sm:$0xff] %v11711_v32  ;;  %5461 = vmatpush.msrb.mxu1 %v11405_v7  ;;  %v11762_v32 = vand.u32 4294901760, %v5553_v34  ;;  %v3824_v34 = vadd.f32 %v11358_v40, %v3780_v47  ;;  %v11906_v35 = vand.u32 4294901760, %v5130_v17 }
 0x3af   :  { %13933 = vst [vmem:[#allocation124_spill] sm:$0xff] %v11715_v21  ;;  %v5138_v21 = vld [vmem:[#allocation15 + $0x40] sm:$0xff]  ;;  %5549 = vmatpush.msrb.mxu3 %v11731_v51  ;;  %5504 = vmatpush.msrb.mxu2 %v11734_v8  ;;  %v11755_v38 = vsub.f32 %v5139_v1, %v11734_v8  ;;  %v5565_v57 = vsub.f32 %v11737_v4, %v11750_v59  ;;  %v11785_v39 = vand.u32 4294901760, %v5559_v9 }
 0x3b0   :  { %13934 = vst [vmem:[#allocation103_spill] sm:$0xff] %v11727_v49  ;;  %v11752_v24 = vand.u32 4294901760, %v5138_v21  ;;  %5463 = vmatpush.msrb.mxu1 %v11421_v12  ;;  %v3726_v49 = vadd.f32 %v11360_v46, %v11362_v44  ;;  %v3899_v46 = vadd.f32 %v11370_v54, %v3824_v34  ;;  %5444 = vmatpush.msrb.mxu0 %v11625_v14 }
 0x3b1   :  { %13935 = vst [vmem:[#allocation97_spill] sm:$0xff] %v11731_v51  ;;  %v5137_v51 = vld [vmem:[#allocation15 + $0x38] sm:$0xff]  ;;  %v11771_v1 = vand.u32 4294901760, %v11755_v38  ;;  %5555 = vmatpush.msrb.mxu3 %v11762_v32  ;;  %v11922_v14 = vsub.f32 %v5130_v17, %v11906_v35 }
 0x3b2   :  { %13936 = vst [vmem:[#allocation126_spill] sm:$0xff] %v11734_v8  ;;  %5506 = vmatpush.msrb.mxu2 %v11752_v24  ;;  %v11773_v8 = vand.u32 4294901760, %v5137_v51  ;;  %v11776_v12 = vsub.f32 %v5138_v21, %v11752_v24  ;;  %5465 = vmatpush.msrb.mxu1 %v11437_v60  ;;  %v3785_v54 = vadd.f32 %v11364_v25, %v3726_v49 }
 0x3b3   :  { %13937 = vst [vmem:[#allocation109_spill] sm:$0xff] %v11737_v4  ;;  %v11759_v7 = vpop.f32.mrf.mxu0  ;;  %v5136_v4 = vld [vmem:[#allocation15 + $0x30] sm:$0xff]  ;;  %v5571_v21 = vsub.f32 %v11755_v38, %v11771_v1  ;;  %5561 = vmatpush.msrb.mxu3 %v11785_v39  ;;  %v3940_v25 = vadd.f32 %v11368_v5, %v3899_v46  ;;  %v11844_v5 = vand.u32 4294901760, %v5133_v30  ;;  %5448 = vmatpush.msrb.mxu0 %v11641_v23  ;;  %v11936_v17 = vand.u32 4294901760, %v11922_v14 }
 0x3b4   :  { %13938 = vst [vmem:[#allocation100_spill] sm:$0xff] %v11744_v42  ;;  %v11781_v42 = vpop.f32.mrf.mxu2  ;;  %5508 = vmatpush.msrb.mxu2 %v11773_v8  ;;  %v11793_v40 = vand.u32 4294901760, %v11776_v12  ;;  %5467 = vmatpush.msrb.mxu1 %v11454_v50  ;;  %v11801_v47 = vand.u32 4294901760, %v5136_v4  ;;  %v11804_v9 = vsub.f32 %v5137_v51, %v11773_v8 }
 0x3b5   :  { %13939 = vst [vmem:[#allocation129_spill] sm:$0xff] %v11750_v59  ;;  %v11787_v59 = vand.u32 4294901760, %v5565_v57  ;;  %v11797_v44 = vpop.f32.mrf.mxu3  ;;  %v5135_v57 = vld [vmem:[#allocation15 + $0x28] sm:$0xff] }
 0x3b6   :  { %13940 = vst [vmem:[#allocation114_spill] sm:$0xff] %v11762_v32  ;;  %v11806_v32 = vand.u32 4294901760, %v5571_v21  ;;  %v5577_v60 = vsub.f32 %v11776_v12, %v11793_v40  ;;  %5469 = vmatpush.msrb.mxu1 %v11472_v19  ;;  %v11815_v34 = vand.u32 4294901760, %v11804_v9  ;;  %v11817_v33 = vand.u32 4294901760, %v5135_v57  ;;  %v5134_v21 = vld [vmem:[#allocation15 + $0x20] sm:$0xff]  ;;  %5510 = vmatpush.msrb.mxu2 %v11801_v47 }
 0x3b7   :  { %13941 = vst [vmem:[#allocation104_spill] sm:$0xff] %v11776_v12  ;;  %5567 = vmatpush.msrb.mxu3 %v11787_v59  ;;  %v11820_v51 = vsub.f32 %v5136_v4, %v11801_v47  ;;  %v11825_v26 = vand.u32 4294901760, %v5134_v21  ;;  %v5131_v12 = vld [vmem:[#allocation15 + $0x8] sm:$0xff] }
 0x3b8   :  { %13942 = vst [vmem:[#allocation132_spill] sm:$0xff] %v11785_v39  ;;  %v11822_v39 = vand.u32 4294901760, %v5577_v60  ;;  %5471 = vmatpush.msrb.mxu1 %v11488_v29  ;;  %v5583_v4 = vsub.f32 %v11804_v9, %v11815_v34  ;;  %v11841_v19 = vsub.f32 %v5135_v57, %v11817_v33  ;;  %5512 = vmatpush.msrb.mxu2 %v11817_v33 }
 0x3b9   :  { %13943 = vst [vmem:[#allocation116_spill] sm:$0xff] %v11787_v59  ;;  %5573 = vmatpush.msrb.mxu3 %v11806_v32  ;;  %v11838_v60 = vand.u32 4294901760, %v11820_v51  ;;  %v11847_v46 = vsub.f32 %v5134_v21, %v11825_v26  ;;  %v5132_v21 = vld [vmem:[#allocation15 + $0x10] sm:$0xff] }
 0x3ba   :  { %13944 = vst [vmem:[#allocation110_spill] sm:$0xff] %v11804_v9  ;;  %5473 = vmatpush.msrb.mxu1 %v11508_v63  ;;  %v11855_v57 = vand.u32 4294901760, %v5583_v4  ;;  %v11860_v9 = vand.u32 4294901760, %v11841_v19  ;;  %5514 = vmatpush.msrb.mxu2 %v11825_v26  ;;  %v3985_v4 = vadd.f32 %v11374_v45, %v3940_v25 }
 0x3bb   :  { %13945 = vst [vmem:[#allocation137_spill] sm:$0xff] %v11806_v32  ;;  %v3830_v32 = vadd.f32 %v11366_v48, %v3785_v54  ;;  %5579 = vmatpush.msrb.mxu3 %v11822_v39  ;;  %v5589_v50 = vsub.f32 %v11820_v51, %v11838_v60  ;;  %v11864_v56 = vand.u32 4294901760, %v11847_v46  ;;  %v11866_v48 = vand.u32 4294901760, %v5132_v21 }
 0x3bc   :  { %13946 = vst [vmem:[#allocation120_spill] sm:$0xff] %v11820_v51  ;;  %v11869_v54 = vsub.f32 %v5133_v30, %v11844_v5  ;;  %5475 = vmatpush.msrb.mxu1 %v11521_v55  ;;  %5516 = vmatpush.msrb.mxu2 %v11844_v5 }
 0x3bd   :  { %13947 = vst [vmem:[#allocation111_spill] sm:$0xff] %v11822_v39  ;;  %v3903_v39 = vadd.f32 %v11426_v53, %v3830_v32  ;;  %5585 = vmatpush.msrb.mxu3 %v11855_v57  ;;  %v11876_v51 = vand.u32 4294901760, %v5589_v50  ;;  %v5601_v30 = vsub.f32 %v11847_v46, %v11864_v56  ;;  %v11886_v53 = vand.u32 4294901760, %v5131_v12 }
 0x3be   :  { %13948 = vst [vmem:[#allocation141_spill] sm:$0xff] %v11825_v26  ;;  %v5595_v26 = vsub.f32 %v11841_v19, %v11860_v9  ;;  %v11884_v45 = vand.u32 4294901760, %v11869_v54  ;;  %v11889_v32 = vsub.f32 %v5132_v21, %v11866_v48  ;;  %v4485_v50 = vadd.f32 %v11674_v62, %v11676_v3  ;;  %5477 = vmatpush.msrb.mxu1 %v11539_v2 }
 0x3bf   :  { %13949 = vst [vmem:[#allocation127_spill] sm:$0xff] %v11855_v57  ;;  %5591 = vmatpush.msrb.mxu3 %v11876_v51  ;;  %v11898_v57 = vand.u32 4294901760, %v5601_v30  ;;  %5518 = vmatpush.msrb.mxu2 %v11866_v48  ;;  %v4094_v62 = vadd.f32 %v11383_v13, %v3985_v4  ;;  %v3944_v3 = vadd.f32 %v11424_v0, %v3903_v39 }
 0x3c0   :  { %13950 = vst [vmem:[#allocation117_spill] sm:$0xff] %v11869_v54  ;;  %v11896_v25 = vand.u32 4294901760, %v5595_v26  ;;  %v5607_v21 = vsub.f32 %v11869_v54, %v11884_v45  ;;  %v11904_v55 = vand.u32 4294901760, %v11889_v32  ;;  %5479 = vmatpush.msrb.mxu1 %v11558_v10  ;;  %v11913_v26 = vsub.f32 %v5131_v12, %v11886_v53 }
 0x3c1   :  { %13951 = vst [vmem:[#allocation131_spill] sm:$0xff] %v11876_v51  ;;  %5520 = vmatpush.msrb.mxu2 %v11886_v53  ;;  %v4152_v0 = vadd.f32 %v11512_v61, %v4094_v62  ;;  %v4543_v39 = vadd.f32 %v11691_v37, %v4485_v50  ;;  %v5625_v61 = vsub.f32 %v11922_v14, %v11936_v17 }
 0x3c2   :  { %v11829_v49 = vpop.f32.mrf.mxu1  ;;  %13952 = vst [vmem:[#allocation121_spill] sm:$0xff] %v11889_v32  ;;  %5597 = vmatpush.msrb.mxu3 %v11896_v25  ;;  %v11916_v30 = vand.u32 4294901760, %v5607_v21  ;;  %v5613_v51 = vsub.f32 %v11889_v32, %v11904_v55  ;;  %5481 = vmatpush.msrb.mxu1 %v11566_v58  ;;  %v11928_v12 = vand.u32 4294901760, %v11913_v26 }
 0x3c3   :  { %13953 = vst [vmem:[#allocation128_spill] sm:$0xff] %v11896_v25  ;;  %5522 = vmatpush.msrb.mxu2 %v11906_v35  ;;  %v3993_v25 = vadd.f32 %v11444_v27, %v3944_v3  ;;  %v4196_v50 = vadd.f32 %v11510_v20, %v4152_v0  ;;  %v4587_v62 = vadd.f32 %v11707_v16, %v4543_v39  ;;  %v13962_v16 = vld [vmem:[#allocation62_spill] sm:$0xff] }
 0x3c4   :  { %13954 = vst [vmem:[#allocation146_spill] sm:$0xff] %v11898_v57  ;;  %5603 = vmatpush.msrb.mxu3 %v11898_v57  ;;  %v11932_v21 = vand.u32 4294901760, %v5613_v51  ;;  %5483 = vmatpush.msrb.mxu1 %v11592_v11  ;;  %v5619_v57 = vsub.f32 %v11913_v26, %v11928_v12  ;;  %v11953_v11 = vand.u32 4294901760, %v5625_v61 }
 0x3c5   :  { %13955 = vst [vmem:[#allocation149_spill] sm:$0xff] %v11913_v26  ;;  %v4098_v27 = vadd.f32 %v11461_v52, %v3993_v25  ;;  %v4271_v20 = vadd.f32 %v11530_v31, %v4196_v50  ;;  %v13963_v25 = vld [vmem:[#allocation144_spill] sm:$0xff] }
 0x3c6   :  { %13956 = vst [vmem:[#allocation67_spill] sm:$0xff] %v11916_v30  ;;  %5609 = vmatpush.msrb.mxu3 %v11916_v30  ;;  %5485 = vmatpush.msrb.mxu1 %v11612_v36  ;;  %v11947_v51 = vand.u32 4294901760, %v5619_v57  ;;  %v4489_v30 = vadd.f32 %v11757_v6, %v11759_v7 }
 0x3c7   :  { %13957 = vst [vmem:[#allocation33_spill] sm:$0xff] %v11922_v14  ;;  %v4157_v0 = vadd.f32 %v13962_v16, %v4098_v27 }
 0x3c8   :  { %13958 = vst [vmem:[#allocation72_spill] sm:$0xff] %v11932_v21  ;;  %5615 = vmatpush.msrb.mxu3 %v11932_v21  ;;  %v4548_v7 = vadd.f32 %v11781_v42, %v4489_v30  ;;  %v13965_v30 = vld [vmem:[#allocation96_spill] sm:$0xff] }
 0x3c9   :  { %13959 = vst [vmem:[#allocation153_spill] sm:$0xff] %v11936_v17 }
 0x3ca   :  { %v11851_v29 = vpop.f32.mrf.mxu2  ;;  %13960 = vst [vmem:[#allocation76_spill] sm:$0xff] %v11947_v51  ;;  %5621 = vmatpush.msrb.mxu3 %v11947_v51 }
 0x3cb   :  { %v4706_v13 = vpop.f32.mrf.mxu1  ;;  %13961 = vst [vmem:[#allocation36_spill] sm:$0xff] %v11953_v11 }
 0x3cc   :  { %v11831_v59 = vpop.f32.mrf.mxu0  ;;  %5627 = vmatpush.msrb.mxu3 %v11953_v11 }
 0x3cd   :  { %v4877_v63 = vpop.f32.mrf.mxu3  ;;  %v4662_v3 = vadd.f32 %v11831_v59, %v4587_v62  ;;  %v4312_v59 = vadd.f32 %v13963_v25, %v4271_v20  ;;  %v13964_v62 = vld [vmem:[#allocation68_spill] sm:$0xff] }
 0x3ce   :  { %v4878_v36 = vadd.f32 %v4877_v63, %v11851_v29  ;;  %v4202_v29 = vadd.f32 %v13964_v62, %v4157_v0  ;;  %v4593_v63 = vadd.f32 %v11797_v44, %v4548_v7  ;;  %v13966_v44 = vld [vmem:[#allocation74_spill] sm:$0xff] }
 0x3cf   :  { %v4703_v61 = vadd.f32 %v11829_v49, %v4662_v3 }
 0x3d0   :  { %v4275_v49 = vadd.f32 %v13965_v30, %v4202_v29  ;;  %v13968_v29 = vld [vmem:[#allocation107_spill] sm:$0xff]  ;;  %v13972_v30 = vld [vmem:[#allocation86_spill] sm:$0xff] }
 0x3d1   :  { %v4709_v31 = vadd.f32 %v4703_v61, %v4312_v59 }
 0x3d4   :  { %v4776_v23 = vpop.f32.mrf.mxu2 }
 0x3d5   :  { %v4665_v4 = vpop.f32.mrf.mxu0 }
 0x3d6   :  { %v4666_v11 = vadd.f32 %v4665_v4, %v4593_v63  ;;  %v13969_v63 = vld [vmem:[#allocation112_spill] sm:$0xff] }
 0x3d7   :  { %v4881_v37 = vpop.f32.mrf.mxu3 }
 0x3d8   :  { %v4882_v10 = vadd.f32 %v4881_v37, %v4776_v23 }
 0x3e6   :  { %v4979_v21 = vpop.f32.mrf.mxu1 }
 0x3ed   :  { %v4935_v57 = vpop.f32.mrf.mxu0 }
 0x3ee   :  { %v4936_v6 = vadd.f32 %v4935_v57, %v4878_v36  ;;  %v5054_v39 = vpop.f32.mrf.mxu2  ;;  %v7640_v36 = vld [vmem:[%s13021_s6] ss:$0 sm:$0xff]  ;;  %v4985_v3 = vpop.f32.mrf.mxu1  ;;  %v4707_v57 = vadd.f32 %v4706_v13, %v4666_v11  ;;  %v13967_v13 = vld [vmem:[#allocation85_spill] sm:$0xff] }
 0x3f0   :  { %v4980_v51 = vadd.f32 %v4979_v21, %v4936_v6  ;;  %v5095_v52 = vpop.f32.mrf.mxu3 }
 0x3f2   :  { %v5055_v58 = vadd.f32 %v5054_v39, %v4980_v51  ;;  %v4316_v51 = vadd.f32 %v13966_v44, %v4275_v49  ;;  %v13973_v49 = vld [vmem:[#allocation100_spill] sm:$0xff]  ;;  %v13981_v44 = vld [vmem:[#allocation141_spill] sm:$0xff] }
 0x3f4   :  { %v5096_v50 = vadd.f32 %v5095_v52, %v5055_v58  ;;  %v4710_v58 = vadd.f32 %v4707_v57, %v4316_v51  ;;  %v13977_v57 = vld [vmem:[#allocation92_spill] sm:$0xff]  ;;  %v13982_v51 = vld [vmem:[#allocation110_spill] sm:$0xff] }
 0x3f5   :  { %v4940_v42 = vpop.f32.mrf.mxu0 }
 0x3f6   :  { %v5102_v21 = vadd.f32 %v5096_v50, %v4709_v31  ;;  %v4941_v27 = vadd.f32 %v4940_v42, %v4882_v10  ;;  %v5058_v0 = vpop.f32.mrf.mxu2  ;;  %v13970_v50 = vld [vmem:[#allocation95_spill] sm:$0xff] }
 0x3f7   :  { %v13971_v42 = vld [vmem:[#allocation91_spill] sm:$0xff] }
 0x3f8   :  { %v5108_v20 = vadd.f32 %v7640_v36, %v5102_v21  ;;  %v4986_v16 = vadd.f32 %v4985_v3, %v4941_v27  ;;  %v5099_v37 = vpop.f32.mrf.mxu3  ;;  %v13974_v21 = vld [vmem:[#allocation115_spill] sm:$0xff]  ;;  %v13975_v27 = vld [vmem:[#allocation126_spill] sm:$0xff]  ;;  %v13976_v3 = vld [vmem:[#allocation129_spill] sm:$0xff] }
 0x3fa   :  { %v5110_v4 = vmax.f32 %v5108_v20, 0.0  ;;  %v5059_v23 = vadd.f32 %v5058_v0, %v4986_v16  ;;  %v13978_v20 = vld [vmem:[#allocation103_spill] sm:$0xff]  ;;  %v13979_v16 = vld [vmem:[#allocation109_spill] sm:$0xff]  ;;  %v13980_v0 = vld [vmem:[#allocation104_spill] sm:$0xff] }
 0x3fc   :  { %5112 = vst [vmem:[#allocation4] sm:$0xff] %v5110_v4  ;;  %v5100_v7 = vadd.f32 %v5099_v37, %v5059_v23  ;;  %v13983_v4 = vld [vmem:[#allocation120_spill] sm:$0xff]  ;;  %v13984_v23 = vld [vmem:[#allocation50_spill] sm:$0xff] }
 0x3fd   :  { %v13985_v37 = vld [vmem:[#allocation136_spill] sm:$0xff] }
 0x3fe   :  { %v5103_v6 = vadd.f32 %v5100_v7, %v4710_v58  ;;  %v13986_v58 = vld [vmem:[#allocation49_spill] sm:$0xff]  ;;  %v13987_v7 = vld [vmem:[#allocation71_spill] sm:$0xff] }
 0x400   :  { %v5109_v39 = vadd.f32 %v7640_v36, %v5103_v6  ;;  %v13988_v6 = vld [vmem:[#allocation61_spill] sm:$0xff] }
 0x402   :  { %v5111_v61 = vmax.f32 %v5109_v39, 0.0  ;;  %v13989_v39 = vld [vmem:[#allocation47_spill] sm:$0xff] }
 0x403   :  { %v5146_v52 = vld [vmem:[#allocation4] ss:$2 sm:$0x7]  ;;  %v5148_v25 = vld [vmem:[#allocation4 + $0x1] ss:$2 sm:$0x7] }
 0x404   :  { %5113 = vst [vmem:[#allocation4 + $0x8] sm:$0x7f] %v5111_v61  ;;  %v5149_v10 = vmax.f32 %v5146_v52, %v5148_v25  ;;  %v13990_v61 = vld [vmem:[#allocation54_spill] sm:$0xff]  ;;  %v13991_v52 = vld [vmem:[#allocation28_spill] sm:$0xff] }
 0x405   :  { %v13992_v25 = vld [vmem:[#allocation24_spill] sm:$0xff] }
 0x406   :  { %v11972_v59 = vand.u32 4294901760, %v5149_v10 }
 0x408   :  { %5288 = vmatmul.f32.vlgmr.msra.gmra.mxu1 %v11972_v59  ;;  %v11976_v11 = vsub.f32 %v5149_v10, %v11972_v59  ;;  %v13993_v10 = vld [vmem:[#allocation57_spill] sm:$0xff] }
 0x409   :  { %5688 = vmatpush.msra.mxu1 %v13967_v13 }
 0x40a   :  { %5342 = vmatmul.f32.vlgmr.msra.gmra.mxu2 %v11976_v11  ;;  %v11981_v62 = vand.u32 4294901760, %v11976_v11 }
 0x40b   :  { %5690 = vmatpush.msra.mxu1 %v13968_v29  ;;  %5729 = vmatpush.msra.mxu2 %v13969_v63 }
 0x40c   :  { %5381 = vmatmul.f32.vlgmr.msra.gmra.mxu3 %v11981_v62  ;;  %v5185_v31 = vsub.f32 %v11976_v11, %v11981_v62 }
 0x40d   :  { %5692 = vmatpush.msra.mxu1 %v13970_v50  ;;  %5733 = vmatpush.msra.mxu2 %v11684_v28 }
 0x40e   :  { %5796 = vmatpush.msra.mxu3 %v13967_v13  ;;  %v5186_v36 = vand.u32 4294901760, %v5185_v31  ;;  %v13996_v31 = vld [vmem:[#allocation32_spill] sm:$0xff] }
 0x40f   :  { %5694 = vmatpush.msra.mxu1 %v11686_v22  ;;  %5737 = vmatpush.msra.mxu2 %v11701_v41 }
 0x410   :  { %5798 = vmatpush.msra.mxu3 %v13968_v29  ;;  %5187 = vmatmul.f32.vlgmr.msra.gmra.mxu0 %v5186_v36 }
 0x411   :  { %5487 = vmatmul.f32.vlgmr.msrb.gmra.mxu1 %v11972_v59  ;;  %5635 = vmatpush.msra.mxu0 %v13971_v42 }
 0x412   :  { %5696 = vmatpush.msra.mxu1 %v11703_v18  ;;  %5741 = vmatpush.msra.mxu2 %v11724_v15 }
 0x413   :  { %5800 = vmatpush.msra.mxu3 %v13970_v50  ;;  %5528 = vmatmul.f32.vlgmr.msrb.gmra.mxu2 %v5186_v36  ;;  %v13997_v36 = vld [vmem:[#allocation53_spill] sm:$0xff] }
 0x414   :  { %5638 = vmatpush.msra.mxu0 %v13972_v30  ;;  %5698 = vmatpush.msra.mxu1 %v11720_v43 }
 0x415   :  { %5745 = vmatpush.msra.mxu2 %v13973_v49  ;;  %5802 = vmatpush.msra.mxu3 %v11686_v22 }
 0x416   :  { %5629 = vmatmul.f32.vlgmr.msrb.gmra.mxu3 %v11972_v59  ;;  %5641 = vmatpush.msra.mxu0 %v13974_v21 }
 0x417   :  { %5700 = vmatpush.msra.mxu1 %v13975_v27  ;;  %5749 = vmatpush.msra.mxu2 %v13976_v3 }
 0x418   :  { %5804 = vmatpush.msra.mxu3 %v11703_v18  ;;  %5644 = vmatpush.msra.mxu0 %v13977_v57 }
 0x419   :  { %5702 = vmatpush.msra.mxu1 %v11752_v24  ;;  %5753 = vmatpush.msra.mxu2 %v11771_v1 }
 0x41a   :  { %5806 = vmatpush.msra.mxu3 %v11720_v43  ;;  %5450 = vmatmul.f32.vlgmr.msrb.gmra.mxu0 %v11972_v59 }
 0x41b   :  { %5647 = vmatpush.msra.mxu0 %v13978_v20  ;;  %5704 = vmatpush.msra.mxu1 %v11773_v8 }
 0x41c   :  { %5757 = vmatpush.msra.mxu2 %v11793_v40  ;;  %5808 = vmatpush.msra.mxu3 %v13975_v27 }
 0x41d   :  { %5650 = vmatpush.msra.mxu0 %v13979_v16  ;;  %5706 = vmatpush.msra.mxu1 %v11801_v47 }
 0x41e   :  { %5761 = vmatpush.msra.mxu2 %v11815_v34  ;;  %5810 = vmatpush.msra.mxu3 %v11752_v24 }
 0x41f   :  { %5653 = vmatpush.msra.mxu0 %v11755_v38  ;;  %5708 = vmatpush.msra.mxu1 %v11817_v33 }
 0x420   :  { %5765 = vmatpush.msra.mxu2 %v11838_v60  ;;  %5812 = vmatpush.msra.mxu3 %v11773_v8 }
 0x421   :  { %5656 = vmatpush.msra.mxu0 %v13980_v0  ;;  %5710 = vmatpush.msra.mxu1 %v13981_v44 }
 0x422   :  { %5769 = vmatpush.msra.mxu2 %v11860_v9  ;;  %5814 = vmatpush.msra.mxu3 %v11801_v47 }
 0x423   :  { %5659 = vmatpush.msra.mxu0 %v13982_v51  ;;  %5712 = vmatpush.msra.mxu1 %v11844_v5 }
 0x424   :  { %5773 = vmatpush.msra.mxu2 %v11864_v56  ;;  %5816 = vmatpush.msra.mxu3 %v11817_v33 }
 0x425   :  { %5662 = vmatpush.msra.mxu0 %v13983_v4  ;;  %5714 = vmatpush.msra.mxu1 %v11866_v48 }
 0x426   :  { %5777 = vmatpush.msra.mxu2 %v11884_v45  ;;  %5818 = vmatpush.msra.mxu3 %v13981_v44 }
 0x427   :  { %5665 = vmatpush.msra.mxu0 %v11841_v19  ;;  %5716 = vmatpush.msra.mxu1 %v11886_v53 }
 0x428   :  { %5781 = vmatpush.msra.mxu2 %v11904_v55  ;;  %5820 = vmatpush.msra.mxu3 %v11844_v5 }
 0x429   :  { %5668 = vmatpush.msra.mxu0 %v11847_v46  ;;  %5718 = vmatpush.msra.mxu1 %v11906_v35 }
 0x42a   :  { %5785 = vmatpush.msra.mxu2 %v11928_v12  ;;  %5822 = vmatpush.msra.mxu3 %v11866_v48 }
 0x42b   :  { %5722 = vmatmul.f32.vlgmr.msra.gmra.mxu1 %v11981_v62  ;;  %5671 = vmatpush.msra.mxu0 %v11869_v54  ;;  %v13995_v62 = vld [vmem:[#allocation59_spill] sm:$0xff]  ;;  %v14018_v54 = vld [vmem:[#allocation145_spill] sm:$0xff] }
 0x42c   :  { %5885 = vmatpush.msrb.mxu1 %v13984_v23  ;;  %5789 = vmatpush.msra.mxu2 %v11936_v17  ;;  %v13998_v23 = vld [vmem:[#allocation27_spill] sm:$0xff]  ;;  %v14026_v17 = vld [vmem:[#allocation80_spill] sm:$0xff] }
 0x42d   :  { %5824 = vmatpush.msra.mxu3 %v11886_v53  ;;  %5791 = vmatmul.f32.vlgmr.msra.gmra.mxu2 %v11972_v59 }
 0x42e   :  { %5891 = vmatpush.msrb.mxu1 %v13985_v37  ;;  %5983 = vmatpush.msrb.mxu2 %v13986_v58  ;;  %v13999_v37 = vld [vmem:[#allocation142_spill] sm:$0xff]  ;;  %v14000_v58 = vld [vmem:[#allocation65_spill] sm:$0xff] }
 0x42f   :  { %5674 = vmatpush.msra.mxu0 %v11889_v32  ;;  %5826 = vmatpush.msra.mxu3 %v11906_v35  ;;  %v14015_v32 = vld [vmem:[#allocation147_spill] sm:$0xff] }
 0x430   :  { %5828 = vmatmul.f32.vlgmr.msra.gmra.mxu3 %v11972_v59  ;;  %5897 = vmatpush.msrb.mxu1 %v13987_v7  ;;  %v13994_v59 = vld [vmem:[#allocation48_spill] sm:$0xff]  ;;  %v14002_v7 = vld [vmem:[#allocation139_spill] sm:$0xff] }
 0x431   :  { %5986 = vmatpush.msrb.mxu2 %v13988_v6  ;;  %6036 = vmatpush.msrb.mxu3 %v13989_v39  ;;  %v14003_v6 = vld [vmem:[#allocation52_spill] sm:$0xff] }
 0x432   :  { %5677 = vmatpush.msra.mxu0 %v11913_v26  ;;  %5903 = vmatpush.msrb.mxu1 %v13990_v61  ;;  %v14004_v61 = vld [vmem:[#allocation51_spill] sm:$0xff]  ;;  %v14014_v26 = vld [vmem:[#allocation93_spill] sm:$0xff] }
 0x433   :  { %5989 = vmatpush.msrb.mxu2 %v13991_v52  ;;  %6038 = vmatpush.msrb.mxu3 %v13992_v25  ;;  %v14005_v52 = vld [vmem:[#allocation151_spill] sm:$0xff] }
 0x434   :  { %5680 = vmatpush.msra.mxu0 %v11922_v14  ;;  %5909 = vmatpush.msrb.mxu1 %v13993_v10  ;;  %v14006_v10 = vld [vmem:[#allocation56_spill] sm:$0xff]  ;;  %v14012_v14 = vld [vmem:[#allocation31_spill] sm:$0xff] }
 0x435   :  { %5683 = vmatmul.f32.vlgmr.msra.gmra.mxu0 %v11976_v11  ;;  %5992 = vmatpush.msrb.mxu2 %v13994_v59  ;;  %v14001_v11 = vld [vmem:[#allocation70_spill] sm:$0xff]  ;;  %v14007_v59 = vld [vmem:[#allocation81_spill] sm:$0xff] }
 0x436   :  { %5840 = vmatpush.msrb.mxu0 %v13989_v39  ;;  %6040 = vmatpush.msrb.mxu3 %v13995_v62 }
 0x437   :  { %5915 = vmatpush.msrb.mxu1 %v13996_v31  ;;  %5995 = vmatpush.msrb.mxu2 %v13997_v36  ;;  %v5835_v31 = vld [vmem:[#allocation4 + $0x9] ss:$2 sm:$0x7]  ;;  %v5837_v36 = vld [vmem:[#allocation4 + $0xa] ss:$2 sm:$0x7] }
 0x438   :  { %5842 = vmatpush.msrb.mxu0 %v13992_v25  ;;  %6042 = vmatpush.msrb.mxu3 %v13998_v23 }
 0x439   :  { %5921 = vmatpush.msrb.mxu1 %v13999_v37  ;;  %5998 = vmatpush.msrb.mxu2 %v14000_v58  ;;  %v14008_v37 = vld [vmem:[#allocation35_spill] sm:$0xff]  ;;  %v14009_v58 = vld [vmem:[#allocation134_spill] sm:$0xff] }
 0x43a   :  { %5844 = vmatpush.msrb.mxu0 %v13995_v62  ;;  %6044 = vmatpush.msrb.mxu3 %v14001_v11 }
 0x43b   :  { %5927 = vmatpush.msrb.mxu1 %v14002_v7  ;;  %6001 = vmatpush.msrb.mxu2 %v14003_v6  ;;  %v14010_v7 = vld [vmem:[#allocation87_spill] sm:$0xff] }
 0x43c   :  { %5846 = vmatpush.msrb.mxu0 %v13998_v23  ;;  %6046 = vmatpush.msrb.mxu3 %v14004_v61  ;;  %v14011_v6 = vld [vmem:[#allocation75_spill] sm:$0xff] }
 0x43d   :  { %5933 = vmatpush.msrb.mxu1 %v14005_v52  ;;  %6004 = vmatpush.msrb.mxu2 %v14006_v10  ;;  %v5838_v52 = vmax.f32 %v5835_v31, %v5837_v36  ;;  %v14013_v10 = vld [vmem:[#allocation89_spill] sm:$0xff]  ;;  %v14020_v31 = vld [vmem:[#allocation83_spill] sm:$0xff] }
 0x43e   :  { %5848 = vmatpush.msrb.mxu0 %v14001_v11  ;;  %6048 = vmatpush.msrb.mxu3 %v14007_v59  ;;  %v14021_v36 = vld [vmem:[#allocation155_spill] sm:$0xff] }
 0x43f   :  { %5939 = vmatpush.msrb.mxu1 %v14008_v37  ;;  %6007 = vmatpush.msrb.mxu2 %v14009_v58  ;;  %v14016_v37 = vld [vmem:[#allocation138_spill] sm:$0xff]  ;;  %v14017_v58 = vld [vmem:[#allocation77_spill] sm:$0xff] }
 0x440   :  { %5850 = vmatpush.msrb.mxu0 %v14004_v61  ;;  %6050 = vmatpush.msrb.mxu3 %v14010_v7 }
 0x441   :  { %5945 = vmatpush.msrb.mxu1 %v14011_v6  ;;  %6010 = vmatpush.msrb.mxu2 %v14012_v14  ;;  %v12099_v6 = vand.u32 4294901760, %v5838_v52  ;;  %v14019_v14 = vld [vmem:[#allocation29_spill] sm:$0xff] }
 0x442   :  { %5852 = vmatpush.msrb.mxu0 %v14007_v59  ;;  %6052 = vmatpush.msrb.mxu3 %v14013_v10 }
 0x443   :  { %5951 = vmatpush.msrb.mxu1 %v14014_v26  ;;  %6013 = vmatpush.msrb.mxu2 %v14015_v32  ;;  %v14022_v32 = vld [vmem:[#allocation78_spill] sm:$0xff] }
 0x444   :  { %5854 = vmatpush.msrb.mxu0 %v14010_v7  ;;  %6054 = vmatpush.msrb.mxu3 %v14016_v37  ;;  %v14023_v26 = vld [vmem:[#allocation154_spill] sm:$0xff] }
 0x445   :  { %5957 = vmatpush.msrb.mxu1 %v14017_v58  ;;  %6016 = vmatpush.msrb.mxu2 %v14018_v54  ;;  %v12110_v54 = vsub.f32 %v5838_v52, %v12099_v6  ;;  %v14025_v58 = vld [vmem:[#allocation148_spill] sm:$0xff]  ;;  %v14030_v52 = vld [vmem:[#allocation63_spill] sm:$0xff] }
 0x446   :  { %5856 = vmatpush.msrb.mxu0 %v14013_v10  ;;  %6056 = vmatpush.msrb.mxu3 %v14019_v14 }
 0x447   :  { %5963 = vmatpush.msrb.mxu1 %v14020_v31  ;;  %6019 = vmatpush.msrb.mxu2 %v14021_v36  ;;  %14024 = vst [vmem:[#allocation82_spill] sm:$0xff] %v12110_v54  ;;  %v14027_v31 = vld [vmem:[#allocation73_spill] sm:$0xff]  ;;  %v14028_v36 = vld [vmem:[#allocation156_spill] sm:$0xff] }
 0x448   :  { %5858 = vmatpush.msrb.mxu0 %v14016_v37  ;;  %6058 = vmatpush.msrb.mxu3 %v11539_v2 }
 0x449   :  { %5969 = vmatpush.msrb.mxu1 %v14022_v32  ;;  %6022 = vmatpush.msrb.mxu2 %v14023_v26  ;;  %v14029_v32 = vld [vmem:[#allocation98_spill] sm:$0xff]  ;;  %v12121_v26 = vand.u32 4294901760, %v12110_v54 }
 0x44a   :  { %5860 = vmatpush.msrb.mxu0 %v14019_v14  ;;  %6060 = vmatpush.msrb.mxu3 %v14025_v58 }
 0x44b   :  { %5975 = vmatpush.msrb.mxu1 %v14026_v17  ;;  %6025 = vmatpush.msrb.mxu2 %v14027_v31  ;;  %v14031_v17 = vld [vmem:[#allocation64_spill] sm:$0xff]  ;;  %v5874_v31 = vsub.f32 %v12110_v54, %v12121_v26 }
 0x44c   :  { %5862 = vmatpush.msrb.mxu0 %v11539_v2  ;;  %6062 = vmatpush.msrb.mxu3 %v14028_v36 }
 0x44d   :  { %5977 = vmatmul.f32.vlgmr.msrb.gmra.mxu1 %v12099_v6  ;;  %6028 = vmatpush.msrb.mxu2 %v14029_v32  ;;  %v5875_v32 = vand.u32 4294901760, %v5874_v31  ;;  %v14039_v31 = vld [vmem:[#allocation132_spill] sm:$0xff] }
 0x44e   :  { %6144 = vmatpush.msra.mxu1 %v13989_v39  ;;  %5864 = vmatpush.msrb.mxu0 %v14025_v58  ;;  %v14032_v39 = vld [vmem:[#allocation101_spill] sm:$0xff] }
 0x44f   :  { %6064 = vmatpush.msrb.mxu3 %v14030_v52  ;;  %6031 = vmatmul.f32.vlgmr.msrb.gmra.mxu2 %v12110_v54  ;;  %v14035_v54 = vld [vmem:[#allocation97_spill] sm:$0xff] }
 0x450   :  { %6146 = vmatpush.msra.mxu1 %v13992_v25  ;;  %6181 = vmatpush.msra.mxu2 %v13967_v13  ;;  %v14033_v25 = vld [vmem:[#allocation124_spill] sm:$0xff] }
 0x451   :  { %5866 = vmatpush.msrb.mxu0 %v14028_v36  ;;  %6066 = vmatpush.msrb.mxu3 %v14031_v17 }
 0x452   :  { %6070 = vmatmul.f32.vlgmr.msrb.gmra.mxu3 %v12121_v26  ;;  %6148 = vmatpush.msra.mxu1 %v13995_v62  ;;  %v14034_v62 = vld [vmem:[#allocation140_spill] sm:$0xff] }
 0x453   :  { %6183 = vmatpush.msra.mxu2 %v13968_v29  ;;  %6226 = vmatpush.msra.mxu3 %v14032_v39  ;;  %v14037_v39 = vld [vmem:[#allocation114_spill] sm:$0xff] }
 0x454   :  { %5868 = vmatpush.msrb.mxu0 %v14030_v52  ;;  %6150 = vmatpush.msra.mxu1 %v13998_v23  ;;  %v14036_v23 = vld [vmem:[#allocation66_spill] sm:$0xff] }
 0x455   :  { %6185 = vmatpush.msra.mxu2 %v13970_v50  ;;  %6232 = vmatpush.msra.mxu3 %v14033_v25  ;;  %v14042_v25 = vld [vmem:[#allocation44_spill] sm:$0xff] }
 0x456   :  { %5870 = vmatpush.msrb.mxu0 %v14031_v17  ;;  %6152 = vmatpush.msra.mxu1 %v14001_v11  ;;  %v14038_v11 = vld [vmem:[#allocation122_spill] sm:$0xff] }
 0x457   :  { %5876 = vmatmul.f32.vlgmr.msrb.gmra.mxu0 %v5875_v32  ;;  %6187 = vmatpush.msra.mxu2 %v11686_v22 }
 0x458   :  { %6077 = vmatpush.msra.mxu0 %v14034_v62  ;;  %6238 = vmatpush.msra.mxu3 %v14035_v54  ;;  %v14040_v54 = vld [vmem:[#allocation43_spill] sm:$0xff] }
 0x459   :  { %6154 = vmatpush.msra.mxu1 %v14004_v61  ;;  %6189 = vmatpush.msra.mxu2 %v11703_v18  ;;  %v14041_v61 = vld [vmem:[#allocation116_spill] sm:$0xff]  ;;  %v14044_v62 = vld [vmem:[#allocation135_spill] sm:$0xff] }
 0x45a   :  { %6081 = vmatpush.msra.mxu0 %v14036_v23  ;;  %6244 = vmatpush.msra.mxu3 %v14037_v39  ;;  %v14046_v23 = vld [vmem:[#allocation55_spill] sm:$0xff]  ;;  %v14048_v39 = vld [vmem:[#allocation58_spill] sm:$0xff] }
 0x45b   :  { %6156 = vmatpush.msra.mxu1 %v14007_v59  ;;  %6191 = vmatpush.msra.mxu2 %v11720_v43  ;;  %v14043_v59 = vld [vmem:[#allocation137_spill] sm:$0xff] }
 0x45c   :  { %6085 = vmatpush.msra.mxu0 %v14038_v11  ;;  %6250 = vmatpush.msra.mxu3 %v14039_v31  ;;  %v14050_v11 = vld [vmem:[#allocation143_spill] sm:$0xff]  ;;  %v14052_v31 = vld [vmem:[#allocation150_spill] sm:$0xff] }
 0x45d   :  { %6158 = vmatpush.msra.mxu1 %v14010_v7  ;;  %6193 = vmatpush.msra.mxu2 %v13975_v27  ;;  %v14045_v7 = vld [vmem:[#allocation111_spill] sm:$0xff] }
 0x45e   :  { %6089 = vmatpush.msra.mxu0 %v14040_v54  ;;  %6256 = vmatpush.msra.mxu3 %v14041_v61  ;;  %v14054_v54 = vld [vmem:[#allocation30_spill] sm:$0xff]  ;;  %v14056_v61 = vld [vmem:[#allocation152_spill] sm:$0xff] }
 0x45f   :  { %6160 = vmatpush.msra.mxu1 %v14013_v10  ;;  %6195 = vmatpush.msra.mxu2 %v11752_v24  ;;  %v14047_v10 = vld [vmem:[#allocation127_spill] sm:$0xff] }
 0x460   :  { %6093 = vmatpush.msra.mxu0 %v14042_v25  ;;  %6262 = vmatpush.msra.mxu3 %v14043_v59  ;;  %v14059_v25 = vld [vmem:[#allocation76_spill] sm:$0xff] }
 0x461   :  { %6162 = vmatpush.msra.mxu1 %v14016_v37  ;;  %6197 = vmatpush.msra.mxu2 %v11773_v8  ;;  %v14049_v37 = vld [vmem:[#allocation131_spill] sm:$0xff]  ;;  %v14061_v59 = vld [vmem:[#allocation36_spill] sm:$0xff] }
 0x462   :  { %6097 = vmatpush.msra.mxu0 %v14044_v62  ;;  %6268 = vmatpush.msra.mxu3 %v14045_v7  ;;  %v14062_v62 = vld [vmem:[#allocation69_spill] sm:$0xff] }
 0x463   :  { %6164 = vmatpush.msra.mxu1 %v14019_v14  ;;  %6199 = vmatpush.msra.mxu2 %v11801_v47  ;;  %v14051_v14 = vld [vmem:[#allocation128_spill] sm:$0xff] }
 0x464   :  { %6101 = vmatpush.msra.mxu0 %v14046_v23  ;;  %6274 = vmatpush.msra.mxu3 %v14047_v10 }
 0x465   :  { %6166 = vmatpush.msra.mxu1 %v11539_v2  ;;  %6201 = vmatpush.msra.mxu2 %v11817_v33  ;;  %v14053_v2 = vld [vmem:[#allocation146_spill] sm:$0xff] }
 0x466   :  { %6105 = vmatpush.msra.mxu0 %v14048_v39  ;;  %6280 = vmatpush.msra.mxu3 %v14049_v37  ;;  %v6553_v37 = vld [vmem:[#allocation17 + $0xd0] sm:$0xff] }
 0x467   :  { %6168 = vmatpush.msra.mxu1 %v14025_v58  ;;  %6203 = vmatpush.msra.mxu2 %v13981_v44  ;;  %v14055_v58 = vld [vmem:[#allocation67_spill] sm:$0xff] }
 0x468   :  { %6109 = vmatpush.msra.mxu0 %v14050_v11  ;;  %6286 = vmatpush.msra.mxu3 %v14051_v14 }
 0x469   :  { %6170 = vmatpush.msra.mxu1 %v14028_v36  ;;  %6205 = vmatpush.msra.mxu2 %v11844_v5  ;;  %v14057_v36 = vld [vmem:[#allocation72_spill] sm:$0xff] }
 0x46a   :  { %6113 = vmatpush.msra.mxu0 %v14052_v31  ;;  %6292 = vmatpush.msra.mxu3 %v14053_v2 }
 0x46b   :  { %6172 = vmatpush.msra.mxu1 %v14030_v52  ;;  %6207 = vmatpush.msra.mxu2 %v11866_v48  ;;  %v14058_v52 = vld [vmem:[#allocation79_spill] sm:$0xff] }
 0x46c   :  { %6117 = vmatpush.msra.mxu0 %v14054_v54  ;;  %6298 = vmatpush.msra.mxu3 %v14055_v58  ;;  %v12319_v54 = vand.u32 4294901760, %v6553_v37  ;;  %v6552_v58 = vld [vmem:[#allocation17 + $0xc8] sm:$0xff] }
 0x46d   :  { %6174 = vmatpush.msra.mxu1 %v14031_v17  ;;  %6209 = vmatpush.msra.mxu2 %v11886_v53  ;;  %v14060_v17 = vld [vmem:[#allocation84_spill] sm:$0xff] }
 0x46e   :  { %6121 = vmatpush.msra.mxu0 %v14056_v61  ;;  %6304 = vmatpush.msra.mxu3 %v14057_v36 }
 0x46f   :  { %6176 = vmatmul.f32.vlgmr.msra.gmra.mxu1 %v12099_v6  ;;  %6211 = vmatpush.msra.mxu2 %v11906_v35 }
 0x470   :  { %6377 = vmatpush.msrb.mxu1 %v13967_v13  ;;  %6125 = vmatpush.msra.mxu0 %v14058_v52 }
 0x471   :  { %6310 = vmatpush.msra.mxu3 %v14059_v25  ;;  %6217 = vmatmul.f32.vlgmr.msra.gmra.mxu2 %v5875_v32  ;;  %v6554_v32 = vld [vmem:[#allocation17 + $0xd8] sm:$0xff]  ;;  %v12327_v25 = vand.u32 4294901760, %v6552_v58 }
 0x472   :  { %6379 = vmatpush.msrb.mxu1 %v13968_v29  ;;  %6418 = vmatpush.msrb.mxu2 %v13969_v63  ;;  %v14063_v63 = vld [vmem:[#allocation102_spill] sm:$0xff]  ;;  %v12306_v39 = vand.u32 4294901760, %v6554_v32 }
 0x473   :  { %6129 = vmatpush.msra.mxu0 %v14060_v17  ;;  %6316 = vmatpush.msra.mxu3 %v14061_v59  ;;  %v12330_v17 = vsub.f32 %v6553_v37, %v12319_v54  ;;  %v6551_v59 = vld [vmem:[#allocation17 + $0xc0] sm:$0xff] }
 0x474   :  { %6318 = vmatmul.f32.vlgmr.msra.gmra.mxu3 %v12099_v6  ;;  %6381 = vmatpush.msrb.mxu1 %v13970_v50  ;;  %v12315_v2 = vsub.f32 %v6554_v32, %v12306_v39 }
 0x475   :  { %6422 = vmatpush.msrb.mxu2 %v11684_v28  ;;  %6485 = vmatpush.msrb.mxu3 %v13967_v13  ;;  %v14065_v28 = vld [vmem:[#allocation117_spill] sm:$0xff] }
 0x476   :  { %6133 = vmatpush.msra.mxu0 %v14062_v62  ;;  %6383 = vmatpush.msrb.mxu1 %v11686_v22  ;;  %v6626_v52 = vand.u32 4294901760, %v12315_v2 }
 0x477   :  { %6426 = vmatpush.msrb.mxu2 %v11701_v41  ;;  %6487 = vmatpush.msrb.mxu3 %v13968_v29 }
 0x478   :  { %6137 = vmatpush.msra.mxu0 %v14063_v63  ;;  %6385 = vmatpush.msrb.mxu1 %v11703_v18  ;;  %v6627_v63 = vsub.f32 %v12315_v2, %v6626_v52 }
 0x479   :  { %6139 = vmatmul.f32.vlgmr.msra.gmra.mxu0 %v12099_v6  ;;  %6430 = vmatpush.msrb.mxu2 %v11724_v15 }
 0x47a   :  { %6324 = vmatpush.msrb.mxu0 %v13971_v42  ;;  %6489 = vmatpush.msrb.mxu3 %v13970_v50  ;;  %v6558_v50 = vld [vmem:[#allocation17 + $0xf8] sm:$0xff] }
 0x47b   :  { %6387 = vmatpush.msrb.mxu1 %v11720_v43  ;;  %6434 = vmatpush.msrb.mxu2 %v13973_v49  ;;  %v12268_v42 = vand.u32 4294901760, %v6558_v50 }
 0x47c   :  { %6327 = vmatpush.msrb.mxu0 %v13972_v30  ;;  %6491 = vmatpush.msrb.mxu3 %v11686_v22 }
 0x47d   :  { %6389 = vmatpush.msrb.mxu1 %v13975_v27  ;;  %6438 = vmatpush.msrb.mxu2 %v13976_v3  ;;  %v12271_v49 = vsub.f32 %v6558_v50, %v12268_v42 }
 0x47e   :  { %6330 = vmatpush.msrb.mxu0 %v13974_v21  ;;  %6493 = vmatpush.msrb.mxu3 %v11703_v18  ;;  %v14064_v18 = vld [vmem:[#allocation153_spill] sm:$0xff] }
 0x47f   :  { %6391 = vmatpush.msrb.mxu1 %v11752_v24  ;;  %6442 = vmatpush.msrb.mxu2 %v11771_v1  ;;  %v6602_v21 = vand.u32 4294901760, %v12271_v49 }
 0x480   :  { %6333 = vmatpush.msrb.mxu0 %v13977_v57  ;;  %6495 = vmatpush.msrb.mxu3 %v11720_v43  ;;  %v6557_v57 = vld [vmem:[#allocation17 + $0xf0] sm:$0xff] }
 0x481   :  { %6393 = vmatpush.msrb.mxu1 %v11773_v8  ;;  %6446 = vmatpush.msrb.mxu2 %v11793_v40 }
 0x482   :  { %6336 = vmatpush.msrb.mxu0 %v13978_v20  ;;  %6497 = vmatpush.msrb.mxu3 %v13975_v27  ;;  %v6603_v27 = vsub.f32 %v12271_v49, %v6602_v21  ;;  %v12280_v20 = vand.u32 4294901760, %v6557_v57 }
 0x483   :  { %6395 = vmatpush.msrb.mxu1 %v11801_v47  ;;  %6450 = vmatpush.msrb.mxu2 %v11815_v34 }
 0x484   :  { %6339 = vmatpush.msrb.mxu0 %v13979_v16  ;;  %6499 = vmatpush.msrb.mxu3 %v11752_v24  ;;  %v6604_v3 = vand.u32 4294901760, %v6603_v27  ;;  %v6556_v16 = vld [vmem:[#allocation17 + $0xe8] sm:$0xff] }
 0x485   :  { %6397 = vmatpush.msrb.mxu1 %v11817_v33  ;;  %6454 = vmatpush.msrb.mxu2 %v11838_v60  ;;  %v5289_v22 = vpop.f32.mrf.mxu1 }
 0x486   :  { %6342 = vmatpush.msrb.mxu0 %v11755_v38  ;;  %6501 = vmatpush.msrb.mxu3 %v11773_v8 }
 0x487   :  { %6399 = vmatpush.msrb.mxu1 %v13981_v44  ;;  %6458 = vmatpush.msrb.mxu2 %v11860_v9 }
 0x488   :  { %6345 = vmatpush.msrb.mxu0 %v13980_v0  ;;  %6503 = vmatpush.msrb.mxu3 %v11801_v47  ;;  %v12283_v0 = vsub.f32 %v6557_v57, %v12280_v20  ;;  %v6543_v57 = vld [vmem:[#allocation17 + $0x80] sm:$0xff] }
 0x489   :  { %6401 = vmatpush.msrb.mxu1 %v11844_v5  ;;  %6462 = vmatpush.msrb.mxu2 %v11864_v56  ;;  %v14069_v56 = vld [vmem:[#allocation82_spill] sm:$0xff] }
 0x48a   :  { %6348 = vmatpush.msrb.mxu0 %v13982_v51  ;;  %6505 = vmatpush.msrb.mxu3 %v11817_v33  ;;  %v14067_v33 = vld [vmem:[#allocation149_spill] sm:$0xff]  ;;  %v6555_v51 = vld [vmem:[#allocation17 + $0xe0] sm:$0xff] }
 0x48b   :  { %6403 = vmatpush.msrb.mxu1 %v11866_v48  ;;  %6466 = vmatpush.msrb.mxu2 %v11884_v45 }
 0x48c   :  { %6351 = vmatpush.msrb.mxu0 %v13983_v4  ;;  %6507 = vmatpush.msrb.mxu3 %v13981_v44  ;;  %v12285_v44 = vand.u32 4294901760, %v6556_v16  ;;  %v6608_v4 = vand.u32 4294901760, %v12283_v0 }
 0x48d   :  { %6405 = vmatpush.msrb.mxu1 %v11886_v53  ;;  %6470 = vmatpush.msrb.mxu2 %v11904_v55  ;;  %v14068_v55 = vld [vmem:[#allocation33_spill] sm:$0xff]  ;;  %v5188_v8 = vpop.f32.mrf.mxu0  ;;  %v5343_v41 = vpop.f32.mrf.mxu2 }
 0x48e   :  { %6354 = vmatpush.msrb.mxu0 %v11841_v19  ;;  %6509 = vmatpush.msrb.mxu3 %v11844_v5  ;;  %v14066_v19 = vld [vmem:[#allocation121_spill] sm:$0xff]  ;;  %v5290_v24 = vadd.f32 %v5289_v22, %v5188_v8  ;;  %v5488_v38 = vpop.f32.mrf.mxu1  ;;  %v6609_v7 = vsub.f32 %v12283_v0, %v6608_v4 }
 0x48f   :  { %6407 = vmatpush.msrb.mxu1 %v11906_v35  ;;  %6474 = vmatpush.msrb.mxu2 %v11928_v12  ;;  %v5382_v43 = vpop.f32.mrf.mxu3 }
 0x490   :  { %6357 = vmatpush.msrb.mxu0 %v11847_v46  ;;  %6511 = vmatpush.msrb.mxu3 %v11866_v48  ;;  %v5344_v47 = vadd.f32 %v5343_v41, %v5290_v24  ;;  %v6610_v11 = vand.u32 4294901760, %v6609_v7  ;;  %v12403_v7 = vand.u32 4294901760, %v6543_v57 }
 0x491   :  { %6411 = vmatmul.f32.vlgmr.msrb.gmra.mxu1 %v12121_v26  ;;  %6478 = vmatpush.msrb.mxu2 %v14064_v18  ;;  %v12294_v26 = vand.u32 4294901760, %v6555_v51  ;;  %v12338_v18 = vsub.f32 %v6552_v58, %v12327_v25 }
 0x492   :  { %6360 = vmatpush.msrb.mxu0 %v14065_v28  ;;  %6513 = vmatpush.msrb.mxu3 %v11886_v53  ;;  %v5383_v34 = vadd.f32 %v5382_v43, %v5344_v47  ;;  %v12340_v28 = vand.u32 4294901760, %v6551_v59  ;;  %v6549_v43 = vld [vmem:[#allocation17 + $0xb0] sm:$0xff]  ;;  %v6548_v47 = vld [vmem:[#allocation17 + $0xa8] sm:$0xff] }
 0x493   :  { %6480 = vmatmul.f32.vlgmr.msrb.gmra.mxu2 %v12099_v6  ;;  %6605 = vmatpush.msra.mxu1 %v6604_v3  ;;  %v12303_v10 = vsub.f32 %v6555_v51, %v12294_v26 }
 0x494   :  { %6363 = vmatpush.msrb.mxu0 %v14066_v19  ;;  %6515 = vmatpush.msrb.mxu3 %v11906_v35  ;;  %v6632_v19 = vand.u32 4294901760, %v12330_v17  ;;  %v12347_v8 = vsub.f32 %v6551_v59, %v12340_v28  ;;  %v12423_v59 = vsub.f32 %v6543_v57, %v12403_v7 }
 0x495   :  { %6517 = vmatmul.f32.vlgmr.msrb.gmra.mxu3 %v12099_v6  ;;  %6703 = vmatpush.msra.mxu2 %v12271_v49  ;;  %v12291_v6 = vsub.f32 %v6556_v16, %v12285_v44  ;;  %v6620_v31 = vand.u32 4294901760, %v12303_v10 }
 0x496   :  { %6366 = vmatpush.msrb.mxu0 %v14067_v33  ;;  %v5529_v1 = vpop.f32.mrf.mxu2  ;;  %6756 = vmatpush.msra.mxu3 %v12268_v42  ;;  %v6550_v33 = vld [vmem:[#allocation17 + $0xb8] sm:$0xff]  ;;  %v6633_v41 = vsub.f32 %v12330_v17, %v6632_v19  ;;  %v6644_v24 = vand.u32 4294901760, %v12347_v8 }
 0x497   :  { %v5451_v15 = vpop.f32.mrf.mxu0  ;;  %6706 = vmatpush.msra.mxu2 %v12283_v0  ;;  %v6614_v23 = vand.u32 4294901760, %v12291_v6  ;;  %6611 = vmatpush.msra.mxu1 %v6610_v11  ;;  %v6621_v36 = vsub.f32 %v12303_v10, %v6620_v31  ;;  %v12349_v22 = vand.u32 4294901760, %v6550_v33 }
 0x498   :  { %6369 = vmatpush.msrb.mxu0 %v14068_v55  ;;  %v5452_v46 = vadd.f32 %v5451_v15, %v5383_v34  ;;  %6758 = vmatpush.msra.mxu3 %v12280_v20  ;;  %v6628_v55 = vand.u32 4294901760, %v6627_v63 }
 0x499   :  { %6372 = vmatmul.f32.vlgmr.msrb.gmra.mxu0 %v14069_v56  ;;  %v5630_v40 = vpop.f32.mrf.mxu3  ;;  %6709 = vmatpush.msra.mxu2 %v12291_v6  ;;  %v6615_v14 = vsub.f32 %v12291_v6, %v6614_v23  ;;  %v6622_v62 = vand.u32 4294901760, %v6621_v36  ;;  %v6638_v56 = vand.u32 4294901760, %v12338_v18 }
 0x49a   :  { %v5631_v9 = vadd.f32 %v5630_v40, %v5529_v1  ;;  %v5489_v13 = vadd.f32 %v5488_v38, %v5452_v46  ;;  %6560 = vmatpush.msra.mxu0 %v12268_v42  ;;  %6760 = vmatpush.msra.mxu3 %v12285_v44  ;;  %v12362_v38 = vsub.f32 %v6550_v33, %v12349_v22  ;;  %v6634_v1 = vand.u32 4294901760, %v6633_v41  ;;  %v6547_v46 = vld [vmem:[#allocation17 + $0xa0] sm:$0xff] }
 0x49b   :  { %6712 = vmatpush.msra.mxu2 %v12303_v10  ;;  %v6616_v61 = vand.u32 4294901760, %v6615_v14  ;;  %v6639_v15 = vsub.f32 %v12338_v18, %v6638_v56  ;;  %v12366_v40 = vand.u32 4294901760, %v6549_v43 }
 0x49c   :  { %6562 = vmatpush.msra.mxu0 %v12280_v20  ;;  %6762 = vmatpush.msra.mxu3 %v12294_v26  ;;  %v6650_v34 = vand.u32 4294901760, %v12362_v38 }
 0x49d   :  { %6715 = vmatpush.msra.mxu2 %v12315_v2  ;;  %6617 = vmatpush.msra.mxu1 %v6616_v61 }
 0x49e   :  { %6564 = vmatpush.msra.mxu0 %v12285_v44  ;;  %6764 = vmatpush.msra.mxu3 %v12306_v39 }
 0x49f   :  { %6718 = vmatpush.msra.mxu2 %v12330_v17  ;;  %6623 = vmatpush.msra.mxu1 %v6622_v62 }
 0x4a0   :  { %6566 = vmatpush.msra.mxu0 %v12294_v26  ;;  %6766 = vmatpush.msra.mxu3 %v12319_v54 }
 0x4a1   :  { %6721 = vmatpush.msra.mxu2 %v12338_v18  ;;  %6629 = vmatpush.msra.mxu1 %v6628_v55 }
 0x4a2   :  { %6568 = vmatpush.msra.mxu0 %v12306_v39  ;;  %6768 = vmatpush.msra.mxu3 %v12327_v25 }
 0x4a3   :  { %6724 = vmatpush.msra.mxu2 %v12347_v8  ;;  %6635 = vmatpush.msra.mxu1 %v6634_v1 }
 0x4a4   :  { %6570 = vmatpush.msra.mxu0 %v12319_v54  ;;  %6770 = vmatpush.msra.mxu3 %v12340_v28 }
 0x4a5   :  { %6727 = vmatpush.msra.mxu2 %v12362_v38 }
 0x4a6   :  { %6572 = vmatpush.msra.mxu0 %v12327_v25  ;;  %6772 = vmatpush.msra.mxu3 %v12349_v22 }
 0x4a8   :  { %v5723_v5 = vpop.f32.mrf.mxu1  ;;  %6574 = vmatpush.msra.mxu0 %v12340_v28  ;;  %6774 = vmatpush.msra.mxu3 %v12366_v40 }
 0x4aa   :  { %6576 = vmatpush.msra.mxu0 %v12349_v22 }
 0x4ac   :  { %6578 = vmatpush.msra.mxu0 %v12366_v40 }
 0x4b0   :  { %v5792_v45 = vpop.f32.mrf.mxu2 }
 0x4b2   :  { %v5684_v35 = vpop.f32.mrf.mxu0 }
 0x4b3   :  { %v5685_v60 = vadd.f32 %v5684_v35, %v5631_v9  ;;  %v5829_v12 = vpop.f32.mrf.mxu3  ;;  %v6640_v9 = vand.u32 4294901760, %v6639_v15  ;;  %v6645_v35 = vsub.f32 %v12347_v8, %v6644_v24 }
 0x4b5   :  { %v5724_v48 = vadd.f32 %v5723_v5, %v5685_v60  ;;  %v12375_v60 = vsub.f32 %v6549_v43, %v12366_v40  ;;  %v12378_v5 = vand.u32 4294901760, %v6548_v47  ;;  %6641 = vmatpush.msra.mxu1 %v6640_v9  ;;  %v6692_v9 = vand.u32 4294901760, %v12423_v59 }
 0x4b7   :  { %v5793_v53 = vadd.f32 %v5792_v45, %v5724_v48  ;;  %v6646_v48 = vand.u32 4294901760, %v6645_v35  ;;  %v6651_v45 = vsub.f32 %v12362_v38, %v6650_v34  ;;  %v6656_v50 = vand.u32 4294901760, %v12375_v60  ;;  %6730 = vmatpush.msra.mxu2 %v12375_v60  ;;  %6776 = vmatpush.msra.mxu3 %v12378_v5 }
 0x4b8   :  { %6580 = vmatpush.msra.mxu0 %v12378_v5 }
 0x4b9   :  { %v5830_v29 = vadd.f32 %v5829_v12, %v5793_v53  ;;  %v12383_v53 = vand.u32 4294901760, %v6547_v46  ;;  %v6546_v12 = vld [vmem:[#allocation17 + $0x98] sm:$0xff]  ;;  %v6652_v16 = vand.u32 4294901760, %v6651_v45  ;;  %6647 = vmatpush.msra.mxu1 %v6646_v48  ;;  %v6657_v37 = vsub.f32 %v12375_v60, %v6656_v50 }
 0x4ba   :  { %v12392_v27 = vand.u32 4294901760, %v6546_v12 }
 0x4bb   :  { %v5832_v30 = vmax.f32 %v5489_v13, %v5830_v29  ;;  %v6545_v13 = vld [vmem:[#allocation17 + $0x90] sm:$0xff]  ;;  %v6544_v29 = vld [vmem:[#allocation17 + $0x88] sm:$0xff]  ;;  %v12397_v51 = vsub.f32 %v6547_v46, %v12383_v53  ;;  %6778 = vmatpush.msra.mxu3 %v12383_v53  ;;  %6582 = vmatpush.msra.mxu0 %v12383_v53  ;;  %v6658_v62 = vand.u32 4294901760, %v6657_v37 }
 0x4bc   :  { %v12394_v3 = vand.u32 4294901760, %v6545_v13  ;;  %v12401_v32 = vand.u32 4294901760, %v6544_v29  ;;  %v12411_v14 = vsub.f32 %v6546_v12, %v12392_v27  ;;  %6653 = vmatpush.msra.mxu1 %v6652_v16  ;;  %v6693_v12 = vsub.f32 %v12423_v59, %v6692_v9  ;;  %v6538_v16 = vld [vmem:[#allocation17 + $0x70] sm:$0xff] }
 0x4bd   :  { %5833 = vst [vmem:[#allocation5] sm:$0x7] %v5832_v30  ;;  %v12389_v30 = vsub.f32 %v6548_v47, %v12378_v5  ;;  %v6668_v61 = vand.u32 4294901760, %v12397_v51  ;;  %6780 = vmatpush.msra.mxu3 %v12392_v27  ;;  %6584 = vmatpush.msra.mxu0 %v12392_v27 }
 0x4be   :  { %v12414_v58 = vsub.f32 %v6545_v13, %v12394_v3  ;;  %v12419_v36 = vsub.f32 %v6544_v29, %v12401_v32  ;;  %v6674_v33 = vand.u32 4294901760, %v12411_v14  ;;  %6659 = vmatpush.msra.mxu1 %v6658_v62  ;;  %v6539_v13 = vld [vmem:[#allocation17 + $0x78] sm:$0xff]  ;;  %v6694_v37 = vand.u32 4294901760, %v6693_v12 }
 0x4bf   :  { %v6662_v11 = vand.u32 4294901760, %v12389_v30  ;;  %6733 = vmatpush.msra.mxu2 %v12389_v30  ;;  %v6669_v41 = vsub.f32 %v12397_v51, %v6668_v61  ;;  %6782 = vmatpush.msra.mxu3 %v12394_v3  ;;  %v12460_v57 = vand.u32 4294901760, %v6539_v13 }
 0x4c0   :  { %v6680_v55 = vand.u32 4294901760, %v12414_v58  ;;  %v6686_v43 = vand.u32 4294901760, %v12419_v36  ;;  %v6675_v1 = vsub.f32 %v12411_v14, %v6674_v33  ;;  %6586 = vmatpush.msra.mxu0 %v12394_v3 }
 0x4c1   :  { %v6663_v63 = vsub.f32 %v12389_v30, %v6662_v11  ;;  %6736 = vmatpush.msra.mxu2 %v12397_v51  ;;  %v6670_v35 = vand.u32 4294901760, %v6669_v41  ;;  %6784 = vmatpush.msra.mxu3 %v12401_v32  ;;  %v12466_v62 = vsub.f32 %v6539_v13, %v12460_v57  ;;  %v6537_v41 = vld [vmem:[#allocation17 + $0x68] sm:$0xff] }
 0x4c2   :  { %v6681_v47 = vsub.f32 %v12414_v58, %v6680_v55  ;;  %v6676_v46 = vand.u32 4294901760, %v6675_v1  ;;  %v6687_v48 = vsub.f32 %v12419_v36, %v6686_v43  ;;  %6588 = vmatpush.msra.mxu0 %v12401_v32  ;;  %v12474_v49 = vand.u32 4294901760, %v6537_v41  ;;  %v6536_v1 = vld [vmem:[#allocation17 + $0x60] sm:$0xff]  ;;  %v6525_v51 = vld [vmem:[#allocation17 + $0x8] sm:$0xff] }
 0x4c3   :  { %v6664_v15 = vand.u32 4294901760, %v6663_v63  ;;  %6739 = vmatpush.msra.mxu2 %v12411_v14  ;;  %6786 = vmatpush.msra.mxu3 %v12403_v7  ;;  %v12468_v63 = vand.u32 4294901760, %v6538_v16 }
 0x4c4   :  { %v6682_v45 = vand.u32 4294901760, %v6681_v47  ;;  %6590 = vmatpush.msra.mxu0 %v12403_v7  ;;  %v6688_v29 = vand.u32 4294901760, %v6687_v48  ;;  %v12486_v47 = vand.u32 4294901760, %v6536_v1 }
 0x4c5   :  { %6665 = vmatpush.msra.mxu1 %v6664_v15  ;;  %6742 = vmatpush.msra.mxu2 %v12414_v58  ;;  %v6943_v15 = vand.u32 4294901760, %v12466_v62 }
 0x4c6   :  { %6797 = vmatpush.msrb.mxu0 %v6602_v21  ;;  %v12477_v21 = vsub.f32 %v6538_v16, %v12468_v63  ;;  %v12503_v12 = vsub.f32 %v6536_v1, %v12486_v47  ;;  %v6533_v16 = vld [vmem:[#allocation17 + $0x48] sm:$0xff]  ;;  %v6532_v1 = vld [vmem:[#allocation17 + $0x40] sm:$0xff] }
 0x4c7   :  { %6671 = vmatpush.msra.mxu1 %v6670_v35  ;;  %6745 = vmatpush.msra.mxu2 %v12419_v36  ;;  %v6944_v0 = vsub.f32 %v12466_v62, %v6943_v15  ;;  %v12489_v35 = vsub.f32 %v6537_v41, %v12474_v49 }
 0x4c8   :  { %6801 = vmatpush.msrb.mxu0 %v6608_v4  ;;  %v6949_v4 = vand.u32 4294901760, %v12477_v21 }
 0x4c9   :  { %6677 = vmatpush.msra.mxu1 %v6676_v46  ;;  %6748 = vmatpush.msra.mxu2 %v12423_v59  ;;  %v6535_v46 = vld [vmem:[#allocation17 + $0x58] sm:$0xff]  ;;  %v6945_v6 = vand.u32 4294901760, %v6944_v0  ;;  %v6955_v48 = vand.u32 4294901760, %v12489_v35  ;;  %v12538_v0 = vand.u32 4294901760, %v6532_v1 }
 0x4ca   :  { %6805 = vmatpush.msrb.mxu0 %v6614_v23  ;;  %v6950_v23 = vsub.f32 %v12477_v21, %v6949_v4 }
 0x4cb   :  { %6683 = vmatpush.msra.mxu1 %v6682_v45  ;;  %6901 = vmatpush.msrb.mxu2 %v12460_v57  ;;  %v12499_v45 = vand.u32 4294901760, %v6535_v46 }
 0x4cc   :  { %6809 = vmatpush.msrb.mxu0 %v6620_v31  ;;  %6946 = vmatpush.msrb.mxu3 %v6945_v6  ;;  %v6951_v10 = vand.u32 4294901760, %v6950_v23  ;;  %v6956_v31 = vsub.f32 %v12489_v35, %v6955_v48  ;;  %v6531_v6 = vld [vmem:[#allocation17 + $0x38] sm:$0xff] }
 0x4cd   :  { %6689 = vmatpush.msra.mxu1 %v6688_v29  ;;  %6903 = vmatpush.msrb.mxu2 %v12468_v63  ;;  %v12514_v29 = vsub.f32 %v6535_v46, %v12499_v45 }
 0x4ce   :  { %6813 = vmatpush.msrb.mxu0 %v6626_v52  ;;  %6952 = vmatpush.msrb.mxu3 %v6951_v10  ;;  %v6957_v2 = vand.u32 4294901760, %v6956_v31  ;;  %v6530_v10 = vld [vmem:[#allocation17 + $0x30] sm:$0xff] }
 0x4cf   :  { %6695 = vmatpush.msra.mxu1 %v6694_v37  ;;  %6905 = vmatpush.msrb.mxu2 %v12474_v49  ;;  %v6967_v52 = vand.u32 4294901760, %v12514_v29  ;;  %v12522_v37 = vand.u32 4294901760, %v6533_v16  ;;  %v12561_v31 = vand.u32 4294901760, %v6530_v10 }
 0x4d0   :  { %6817 = vmatpush.msrb.mxu0 %v6632_v19  ;;  %6958 = vmatpush.msrb.mxu3 %v6957_v2  ;;  %v6529_v2 = vld [vmem:[#allocation17 + $0x28] sm:$0xff] }
 0x4d1   :  { %6864 = vmatpush.msrb.mxu1 %v12268_v42  ;;  %6907 = vmatpush.msrb.mxu2 %v12486_v47  ;;  %v6534_v42 = vld [vmem:[#allocation17 + $0x50] sm:$0xff]  ;;  %v6968_v17 = vsub.f32 %v12514_v29, %v6967_v52 }
 0x4d2   :  { %v12511_v13 = vand.u32 4294901760, %v6534_v42  ;;  %6821 = vmatpush.msrb.mxu0 %v6638_v56 }
 0x4d3   :  { %6866 = vmatpush.msrb.mxu1 %v12280_v20  ;;  %6909 = vmatpush.msrb.mxu2 %v12499_v45  ;;  %v6961_v20 = vand.u32 4294901760, %v12503_v12  ;;  %v6969_v18 = vand.u32 4294901760, %v6968_v17  ;;  %v12574_v17 = vsub.f32 %v6530_v10, %v12561_v31 }
 0x4d4   :  { %v12525_v41 = vsub.f32 %v6534_v42, %v12511_v13  ;;  %6825 = vmatpush.msrb.mxu0 %v6644_v24  ;;  %v12551_v42 = vand.u32 4294901760, %v6531_v6 }
 0x4d5   :  { %6868 = vmatpush.msrb.mxu1 %v12285_v44  ;;  %6911 = vmatpush.msrb.mxu2 %v12511_v13  ;;  %v6962_v44 = vsub.f32 %v12503_v12, %v6961_v20 }
 0x4d6   :  { %v6973_v19 = vand.u32 4294901760, %v12525_v41  ;;  %6829 = vmatpush.msrb.mxu0 %v6650_v34  ;;  %v6528_v34 = vld [vmem:[#allocation17 + $0x20] sm:$0xff] }
 0x4d7   :  { %6870 = vmatpush.msrb.mxu1 %v12294_v26  ;;  %6913 = vmatpush.msrb.mxu2 %v12522_v37  ;;  %v12541_v26 = vsub.f32 %v6533_v16, %v12522_v37  ;;  %v6963_v46 = vand.u32 4294901760, %v6962_v44  ;;  %v12568_v16 = vsub.f32 %v6531_v6, %v12551_v42  ;;  %v12585_v6 = vand.u32 4294901760, %v6528_v34 }
 0x4d8   :  { %v6974_v56 = vsub.f32 %v12525_v41, %v6973_v19  ;;  %6833 = vmatpush.msrb.mxu0 %v6656_v50  ;;  %v6527_v50 = vld [vmem:[#allocation17 + $0x18] sm:$0xff] }
 0x4d9   :  { %6872 = vmatpush.msrb.mxu1 %v12306_v39  ;;  %6915 = vmatpush.msrb.mxu2 %v12538_v0  ;;  %v6979_v23 = vand.u32 4294901760, %v12541_v26  ;;  %v12555_v39 = vsub.f32 %v6532_v1, %v12538_v0  ;;  %v12571_v1 = vand.u32 4294901760, %v6529_v2  ;;  %v13396_v38 = vand.u32 4294901760, %v12568_v16 }
 0x4da   :  { %6964 = vmatpush.msrb.mxu3 %v6963_v46  ;;  %v6975_v8 = vand.u32 4294901760, %v6974_v56  ;;  %v13395_v46 = vand.u32 4294901760, %v12574_v17  ;;  %6837 = vmatpush.msrb.mxu0 %v6662_v11  ;;  %v12604_v30 = vsub.f32 %v6528_v34, %v12585_v6  ;;  %v6526_v11 = vld [vmem:[#allocation17 + $0x10] sm:$0xff] }
 0x4db   :  { %6874 = vmatpush.msrb.mxu1 %v12319_v54  ;;  %v6980_v24 = vsub.f32 %v12541_v26, %v6979_v23  ;;  %6917 = vmatpush.msrb.mxu2 %v12551_v42  ;;  %v13398_v54 = vand.u32 4294901760, %v12555_v39  ;;  %v6992_v60 = vsub.f32 %v12568_v16, %v13396_v38 }
 0x4dc   :  { %6970 = vmatpush.msrb.mxu3 %v6969_v18  ;;  %v12588_v18 = vsub.f32 %v6529_v2, %v12571_v1  ;;  %v6998_v56 = vsub.f32 %v12574_v17, %v13395_v46  ;;  %6841 = vmatpush.msrb.mxu0 %v6668_v61 }
 0x4dd   :  { %6876 = vmatpush.msrb.mxu1 %v12327_v25  ;;  %v6981_v44 = vand.u32 4294901760, %v6980_v24  ;;  %6919 = vmatpush.msrb.mxu2 %v12561_v31  ;;  %v6986_v25 = vsub.f32 %v12555_v39, %v13398_v54 }
 0x4de   :  { %6976 = vmatpush.msrb.mxu3 %v6975_v8  ;;  %v13394_v10 = vand.u32 4294901760, %v12588_v18  ;;  %v12601_v8 = vand.u32 4294901760, %v6527_v50  ;;  %v6999_v24 = vand.u32 4294901760, %v6998_v56  ;;  %6845 = vmatpush.msrb.mxu0 %v6674_v33  ;;  %v5877_v56 = vpop.f32.mrf.mxu0 }
 0x4df   :  { %6878 = vmatpush.msrb.mxu1 %v12340_v28  ;;  %6921 = vmatpush.msrb.mxu2 %v12571_v1  ;;  %v6987_v28 = vand.u32 4294901760, %v6986_v25  ;;  %v12614_v25 = vand.u32 4294901760, %v6526_v11 }
 0x4e0   :  { %6982 = vmatpush.msrb.mxu3 %v6981_v44  ;;  %v7004_v2 = vsub.f32 %v12588_v18, %v13394_v10  ;;  %v13393_v44 = vand.u32 4294901760, %v12604_v30  ;;  %6849 = vmatpush.msrb.mxu0 %v6680_v55 }
 0x4e1   :  { %6880 = vmatpush.msrb.mxu1 %v12349_v22  ;;  %6923 = vmatpush.msrb.mxu2 %v12585_v6  ;;  %v6993_v22 = vand.u32 4294901760, %v6992_v60  ;;  %v12629_v60 = vsub.f32 %v6526_v11, %v12614_v25  ;;  %v5978_v11 = vpop.f32.mrf.mxu1 }
 0x4e2   :  { %6988 = vmatpush.msrb.mxu3 %v6987_v28  ;;  %v7005_v61 = vand.u32 4294901760, %v7004_v2  ;;  %v7010_v34 = vsub.f32 %v12604_v30, %v13393_v44  ;;  %v12626_v28 = vand.u32 4294901760, %v6525_v51  ;;  %6853 = vmatpush.msrb.mxu0 %v6686_v43  ;;  %v6071_v2 = vpop.f32.mrf.mxu3 }
 0x4e3   :  { %6882 = vmatpush.msrb.mxu1 %v12366_v40  ;;  %6925 = vmatpush.msrb.mxu2 %v12601_v8  ;;  %v12620_v40 = vsub.f32 %v6527_v50, %v12601_v8  ;;  %v13391_v33 = vand.u32 4294901760, %v12629_v60  ;;  %v6524_v50 = vld [vmem:[#allocation17] sm:$0xff] }
 0x4e4   :  { %6994 = vmatpush.msrb.mxu3 %v6993_v22  ;;  %v7011_v14 = vand.u32 4294901760, %v7010_v34  ;;  %v12646_v55 = vsub.f32 %v6525_v51, %v12626_v28  ;;  %6857 = vmatpush.msrb.mxu0 %v6692_v9  ;;  %v6032_v9 = vpop.f32.mrf.mxu2 }
 0x4e5   :  { %6884 = vmatpush.msrb.mxu1 %v12378_v5  ;;  %6927 = vmatpush.msrb.mxu2 %v12614_v25  ;;  %v13392_v5 = vand.u32 4294901760, %v12620_v40  ;;  %v7022_v22 = vsub.f32 %v12629_v60, %v13391_v33 }
 0x4e6   :  { %7000 = vmatpush.msrb.mxu3 %v6999_v24  ;;  %v13390_v36 = vand.u32 4294901760, %v12646_v55 }
 0x4e7   :  { %6886 = vmatpush.msrb.mxu1 %v12383_v53  ;;  %6929 = vmatpush.msrb.mxu2 %v12626_v28  ;;  %v7016_v58 = vsub.f32 %v12620_v40, %v13392_v5  ;;  %v12643_v53 = vand.u32 4294901760, %v6524_v50  ;;  %v7023_v24 = vand.u32 4294901760, %v7022_v22 }
 0x4e8   :  { %7006 = vmatpush.msrb.mxu3 %v7005_v61  ;;  %v7028_v59 = vsub.f32 %v12646_v55, %v13390_v36 }
 0x4e9   :  { %6888 = vmatpush.msrb.mxu1 %v12392_v27  ;;  %v7017_v27 = vand.u32 4294901760, %v7016_v58  ;;  %v12656_v43 = vsub.f32 %v6524_v50, %v12643_v53  ;;  %6931 = vmatpush.msrb.mxu2 %v12643_v53 }
 0x4ea   :  { %7012 = vmatpush.msrb.mxu3 %v7011_v14  ;;  %v7029_v51 = vand.u32 4294901760, %v7028_v59  ;;  %v5979_v14 = vadd.f32 %v5978_v11, %v5877_v56 }
 0x4eb   :  { %6890 = vmatpush.msrb.mxu1 %v12394_v3  ;;  %v13397_v3 = vand.u32 4294901760, %v12656_v43 }
 0x4ec   :  { %7018 = vmatpush.msrb.mxu3 %v7017_v27  ;;  %v6177_v50 = vpop.f32.mrf.mxu1  ;;  %v6033_v27 = vadd.f32 %v6032_v9, %v5979_v14  ;;  %v14075_v14 = vand.u32 4294901760, %v12620_v40 }
 0x4ed   :  { %6892 = vmatpush.msrb.mxu1 %v12401_v32  ;;  %v7034_v61 = vsub.f32 %v12656_v43, %v13397_v3 }
 0x4ee   :  { %7024 = vmatpush.msrb.mxu3 %v7023_v24  ;;  %v6072_v5 = vadd.f32 %v6071_v2, %v6033_v27  ;;  %v14076_v27 = vand.u32 4294901760, %v12629_v60 }
 0x4ef   :  { %6894 = vmatpush.msrb.mxu1 %v12403_v7  ;;  %v7035_v34 = vand.u32 4294901760, %v7034_v61 }
 0x4f0   :  { %7030 = vmatpush.msrb.mxu3 %v7029_v51 }
 0x4f2   :  { %7036 = vmatpush.msrb.mxu3 %v7035_v34 }
 0x4f4   :  { %v6218_v58 = vpop.f32.mrf.mxu2 }
 0x4f6   :  { %v6140_v32 = vpop.f32.mrf.mxu0 }
 0x4f7   :  { %v6319_v22 = vpop.f32.mrf.mxu3  ;;  %v6141_v24 = vadd.f32 %v6140_v32, %v6072_v5 }
 0x4f8   :  { %v6320_v36 = vadd.f32 %v6319_v22, %v6218_v58  ;;  %v7251_v22 = vld [vmem:[#allocation17 + $0x138] sm:$0xff] }
 0x4f9   :  { %v6178_v3 = vadd.f32 %v6177_v50, %v6141_v24 }
 0x50e   :  { %v6412_v7 = vpop.f32.mrf.mxu1 }
 0x516   :  { %v6373_v33 = vpop.f32.mrf.mxu0  ;;  %v6481_v10 = vpop.f32.mrf.mxu2 }
 0x517   :  { %v6374_v44 = vadd.f32 %v6373_v33, %v6320_v36  ;;  %v14074_v36 = vand.u32 4294901760, %v12604_v30 }
 0x518   :  { %v6518_v38 = vpop.f32.mrf.mxu3 }
 0x519   :  { %v6413_v59 = vadd.f32 %v6412_v7, %v6374_v44 }
 0x51b   :  { %v6482_v46 = vadd.f32 %v6481_v10, %v6413_v59 }
 0x51d   :  { %v6519_v51 = vadd.f32 %v6518_v38, %v6482_v46 }
 0x51f   :  { %v6521_v61 = vmax.f32 %v6178_v3, %v6519_v51  ;;  %v12798_v51 = vand.u32 4294901760, %v7251_v22 }
 0x521   :  { %6522 = vst [vmem:[#allocation5 + $0x3] sm:$0x7] %v6521_v61  ;;  %v14077_v61 = vand.u32 4294901760, %v12646_v55 }
 0x528   :  { %v6541_v56 = vld [vmem:[#allocation5 + $0x1] ss:$3 sm:$0x3]  ;;  %v6523_v11 = vld [vmem:[#allocation5] ss:$3 sm:$0x3] }
 0x529   :  { %v6591_v34 = vand.u32 4294901760, %v6541_v56  ;;  %v12668_v54 = vand.u32 4294901760, %v6523_v11 }
 0x52b   :  { %6697 = vmatmul.f32.vlgmr.msra.gmra.mxu1 %v6591_v34  ;;  %v6592_v9 = vsub.f32 %v6541_v56, %v6591_v34  ;;  %v12671_v2 = vsub.f32 %v6523_v11, %v12668_v54 }
 0x52c   :  { %7097 = vmatpush.msra.mxu1 %v12460_v57 }
 0x52d   :  { %6751 = vmatmul.f32.vlgmr.msra.gmra.mxu2 %v6592_v9  ;;  %v6593_v44 = vand.u32 4294901760, %v6592_v9  ;;  %v6934_v10 = vand.u32 4294901760, %v12671_v2 }
 0x52e   :  { %7099 = vmatpush.msra.mxu1 %v12468_v63  ;;  %7138 = vmatpush.msra.mxu2 %v6943_v15 }
 0x52f   :  { %6790 = vmatmul.f32.vlgmr.msra.gmra.mxu3 %v6593_v44  ;;  %v6594_v38 = vsub.f32 %v6592_v9, %v6593_v44  ;;  %v6935_v46 = vsub.f32 %v12671_v2, %v6934_v10 }
 0x530   :  { %7101 = vmatpush.msra.mxu1 %v12474_v49  ;;  %7142 = vmatpush.msra.mxu2 %v6949_v4  ;;  %v7256_v4 = vld [vmem:[#allocation17 + $0x160] sm:$0xff] }
 0x531   :  { %7205 = vmatpush.msra.mxu3 %v12460_v57  ;;  %v6595_v5 = vand.u32 4294901760, %v6594_v38  ;;  %v6936_v15 = vand.u32 4294901760, %v6935_v46  ;;  %v7259_v57 = vld [vmem:[#allocation17 + $0x178] sm:$0xff] }
 0x532   :  { %7103 = vmatpush.msra.mxu1 %v12486_v47  ;;  %7146 = vmatpush.msra.mxu2 %v6955_v48 }
 0x533   :  { %7207 = vmatpush.msra.mxu3 %v12468_v63  ;;  %6596 = vmatmul.f32.vlgmr.msra.gmra.mxu0 %v6595_v5  ;;  %v12706_v63 = vand.u32 4294901760, %v7259_v57  ;;  %v7248_v5 = vld [vmem:[#allocation17 + $0x120] sm:$0xff] }
 0x534   :  { %6896 = vmatmul.f32.vlgmr.msrb.gmra.mxu1 %v6591_v34  ;;  %7044 = vmatpush.msra.mxu0 %v12466_v62  ;;  %v7258_v62 = vld [vmem:[#allocation17 + $0x170] sm:$0xff] }
 0x535   :  { %7105 = vmatpush.msra.mxu1 %v12499_v45  ;;  %7150 = vmatpush.msra.mxu2 %v6961_v20  ;;  %v14072_v20 = vand.u32 4294901760, %v12574_v17 }
 0x536   :  { %7209 = vmatpush.msra.mxu3 %v12474_v49  ;;  %6937 = vmatmul.f32.vlgmr.msrb.gmra.mxu2 %v6936_v15  ;;  %v7257_v49 = vld [vmem:[#allocation17 + $0x168] sm:$0xff] }
 0x537   :  { %7047 = vmatpush.msra.mxu0 %v12477_v21  ;;  %7107 = vmatpush.msra.mxu1 %v12511_v13  ;;  %v12712_v21 = vand.u32 4294901760, %v7258_v62  ;;  %v12722_v48 = vand.u32 4294901760, %v7257_v49 }
 0x538   :  { %7154 = vmatpush.msra.mxu2 %v6967_v52  ;;  %7211 = vmatpush.msra.mxu3 %v12486_v47  ;;  %v14070_v47 = vand.u32 4294901760, %v12555_v39 }
 0x539   :  { %7038 = vmatmul.f32.vlgmr.msrb.gmra.mxu3 %v12668_v54  ;;  %7050 = vmatpush.msra.mxu0 %v12489_v35  ;;  %v12720_v35 = vsub.f32 %v7259_v57, %v12706_v63 }
 0x53a   :  { %7109 = vmatpush.msra.mxu1 %v12522_v37  ;;  %7158 = vmatpush.msra.mxu2 %v6973_v19  ;;  %v7254_v19 = vld [vmem:[#allocation17 + $0x150] sm:$0xff] }
 0x53b   :  { %7213 = vmatpush.msra.mxu3 %v12499_v45  ;;  %7053 = vmatpush.msra.mxu0 %v12503_v12  ;;  %v7255_v45 = vld [vmem:[#allocation17 + $0x158] sm:$0xff]  ;;  %v14071_v12 = vand.u32 4294901760, %v12568_v16  ;;  %v7303_v52 = vand.u32 4294901760, %v12720_v35  ;;  %v12756_v33 = vand.u32 4294901760, %v7254_v19 }
 0x53c   :  { %7111 = vmatpush.msra.mxu1 %v12538_v0  ;;  %7162 = vmatpush.msra.mxu2 %v6979_v23 }
 0x53d   :  { %7215 = vmatpush.msra.mxu3 %v12511_v13  ;;  %6859 = vmatmul.f32.vlgmr.msrb.gmra.mxu0 %v6591_v34  ;;  %v12730_v13 = vsub.f32 %v7258_v62, %v12712_v21  ;;  %v7249_v34 = vld [vmem:[#allocation17 + $0x128] sm:$0xff]  ;;  %v7247_v62 = vld [vmem:[#allocation17 + $0x118] sm:$0xff] }
 0x53e   :  { %7056 = vmatpush.msra.mxu0 %v12514_v29  ;;  %7113 = vmatpush.msra.mxu1 %v12551_v42  ;;  %v12732_v29 = vand.u32 4294901760, %v7256_v4 }
 0x53f   :  { %7166 = vmatpush.msra.mxu2 %v14070_v47  ;;  %7217 = vmatpush.msra.mxu3 %v12522_v37  ;;  %v12741_v37 = vsub.f32 %v7257_v49, %v12722_v48  ;;  %v7309_v23 = vand.u32 4294901760, %v12730_v13 }
 0x540   :  { %7059 = vmatpush.msra.mxu0 %v12525_v41  ;;  %7115 = vmatpush.msra.mxu1 %v12561_v31  ;;  %v12743_v41 = vand.u32 4294901760, %v7255_v45 }
 0x541   :  { %7170 = vmatpush.msra.mxu2 %v14071_v12  ;;  %7219 = vmatpush.msra.mxu3 %v12538_v0  ;;  %v7253_v0 = vld [vmem:[#allocation17 + $0x148] sm:$0xff]  ;;  %v7315_v3 = vand.u32 4294901760, %v12741_v37 }
 0x542   :  { %7062 = vmatpush.msra.mxu0 %v12541_v26  ;;  %7117 = vmatpush.msra.mxu1 %v12571_v1  ;;  %v14073_v26 = vand.u32 4294901760, %v12588_v18  ;;  %v12766_v32 = vsub.f32 %v7255_v45, %v12743_v41 }
 0x543   :  { %7174 = vmatpush.msra.mxu2 %v14072_v20  ;;  %7221 = vmatpush.msra.mxu3 %v12551_v42  ;;  %v12752_v42 = vsub.f32 %v7256_v4, %v12732_v29  ;;  %v7316_v7 = vsub.f32 %v12741_v37, %v7315_v3  ;;  %v12838_v4 = vand.u32 4294901760, %v7248_v5  ;;  %v12850_v20 = vand.u32 4294901760, %v7247_v62 }
 0x544   :  { %7065 = vmatpush.msra.mxu0 %v12555_v39  ;;  %7119 = vmatpush.msra.mxu1 %v12585_v6  ;;  %v7252_v39 = vld [vmem:[#allocation17 + $0x140] sm:$0xff]  ;;  %v7327_v24 = vand.u32 4294901760, %v12766_v32 }
 0x545   :  { %7178 = vmatpush.msra.mxu2 %v14073_v26  ;;  %7223 = vmatpush.msra.mxu3 %v12561_v31  ;;  %v7304_v31 = vsub.f32 %v12720_v35, %v7303_v52  ;;  %v7321_v50 = vand.u32 4294901760, %v12752_v42  ;;  %v12779_v58 = vand.u32 4294901760, %v7252_v39  ;;  %v7317_v44 = vand.u32 4294901760, %v7316_v7 }
 0x546   :  { %7068 = vmatpush.msra.mxu0 %v12568_v16  ;;  %7121 = vmatpush.msra.mxu1 %v12601_v8  ;;  %v12768_v16 = vand.u32 4294901760, %v7253_v0  ;;  %v7328_v38 = vsub.f32 %v12766_v32, %v7327_v24 }
 0x547   :  { %7182 = vmatpush.msra.mxu2 %v14074_v36  ;;  %7225 = vmatpush.msra.mxu3 %v12571_v1  ;;  %v7310_v1 = vsub.f32 %v12730_v13, %v7309_v23  ;;  %v7322_v56 = vsub.f32 %v12752_v42, %v7321_v50  ;;  %v12807_v11 = vsub.f32 %v7252_v39, %v12779_v58 }
 0x548   :  { %7071 = vmatpush.msra.mxu0 %v12574_v17  ;;  %7123 = vmatpush.msra.mxu1 %v12614_v25  ;;  %v12784_v17 = vsub.f32 %v7254_v19, %v12756_v33  ;;  %v12794_v59 = vsub.f32 %v7253_v0, %v12768_v16  ;;  %v7329_v47 = vand.u32 4294901760, %v7328_v38  ;;  %v7245_v19 = vld [vmem:[#allocation17 + $0x108] sm:$0xff]  ;;  %v12860_v39 = vsub.f32 %v7248_v5, %v12838_v4 }
 0x549   :  { %7186 = vmatpush.msra.mxu2 %v14075_v14  ;;  %7227 = vmatpush.msra.mxu3 %v12585_v6  ;;  %v7305_v6 = vand.u32 4294901760, %v7304_v31  ;;  %v7323_v15 = vand.u32 4294901760, %v7322_v56  ;;  %v7345_v57 = vand.u32 4294901760, %v12807_v11  ;;  %v7244_v31 = vld [vmem:[#allocation17 + $0x100] sm:$0xff] }
 0x54a   :  { %7074 = vmatpush.msra.mxu0 %v12588_v18  ;;  %7125 = vmatpush.msra.mxu1 %v12626_v28  ;;  %v7250_v18 = vld [vmem:[#allocation17 + $0x130] sm:$0xff]  ;;  %v7339_v46 = vand.u32 4294901760, %v12794_v59 }
 0x54b   :  { %7190 = vmatpush.msra.mxu2 %v14076_v27  ;;  %7229 = vmatpush.msra.mxu3 %v12601_v8  ;;  %v7311_v8 = vand.u32 4294901760, %v7310_v1  ;;  %v12813_v9 = vand.u32 4294901760, %v7250_v18  ;;  %v12874_v27 = vand.u32 4294901760, %v7245_v19 }
 0x54c   :  { %7077 = vmatpush.msra.mxu0 %v12604_v30  ;;  %7127 = vmatpush.msra.mxu1 %v12643_v53  ;;  %v7333_v30 = vand.u32 4294901760, %v12784_v17  ;;  %v7340_v45 = vsub.f32 %v12794_v59, %v7339_v46 }
 0x54d   :  { %7194 = vmatpush.msra.mxu2 %v14077_v61  ;;  %7231 = vmatpush.msra.mxu3 %v12614_v25  ;;  %v14078_v25 = vand.u32 4294901760, %v12656_v43  ;;  %v12836_v49 = vsub.f32 %v7250_v18, %v12813_v9  ;;  %v12886_v18 = vand.u32 4294901760, %v7244_v31 }
 0x54e   :  { %7131 = vmatmul.f32.vlgmr.msra.gmra.mxu1 %v6934_v10  ;;  %7080 = vmatpush.msra.mxu0 %v12620_v40  ;;  %v12824_v40 = vsub.f32 %v7251_v22, %v12798_v51  ;;  %v12826_v10 = vand.u32 4294901760, %v7249_v34  ;;  %v12872_v22 = vsub.f32 %v7247_v62, %v12850_v20 }
 0x54f   :  { %7306 = vmatpush.msrb.mxu1 %v7305_v6  ;;  %7198 = vmatpush.msra.mxu2 %v14078_v25  ;;  %v7357_v26 = vand.u32 4294901760, %v12836_v49  ;;  %v7369_v6 = vand.u32 4294901760, %v12860_v39  ;;  %v12906_v5 = vsub.f32 %v7244_v31, %v12886_v18 }
 0x550   :  { %7233 = vmatpush.msra.mxu3 %v12626_v28  ;;  %7200 = vmatmul.f32.vlgmr.msra.gmra.mxu2 %v12668_v54  ;;  %v7334_v28 = vsub.f32 %v12784_v17, %v7333_v30  ;;  %v12848_v12 = vsub.f32 %v7249_v34, %v12826_v10  ;;  %v7375_v56 = vand.u32 4294901760, %v12872_v22  ;;  %v12896_v34 = vsub.f32 %v7245_v19, %v12874_v27 }
 0x551   :  { %7312 = vmatpush.msrb.mxu1 %v7311_v8  ;;  %7404 = vmatpush.msrb.mxu2 %v12720_v35 }
 0x552   :  { %7083 = vmatpush.msra.mxu0 %v12629_v60  ;;  %7235 = vmatpush.msra.mxu3 %v12643_v53  ;;  %v7246_v60 = vld [vmem:[#allocation17 + $0x110] sm:$0xff]  ;;  %v7351_v53 = vand.u32 4294901760, %v12824_v40  ;;  %v7335_v0 = vand.u32 4294901760, %v7334_v28  ;;  %v7363_v1 = vand.u32 4294901760, %v12848_v12  ;;  %v7376_v62 = vsub.f32 %v12872_v22, %v7375_v56 }
 0x553   :  { %7237 = vmatmul.f32.vlgmr.msra.gmra.mxu3 %v12668_v54  ;;  %7318 = vmatpush.msrb.mxu1 %v7317_v44  ;;  %v7346_v54 = vsub.f32 %v12807_v11, %v7345_v57  ;;  %v12862_v36 = vand.u32 4294901760, %v7246_v60  ;;  %v7370_v44 = vsub.f32 %v12860_v39, %v7369_v6  ;;  %v7387_v28 = vand.u32 4294901760, %v12896_v34 }
 0x554   :  { %7407 = vmatpush.msrb.mxu2 %v12730_v13  ;;  %7457 = vmatpush.msrb.mxu3 %v12706_v63  ;;  %v7352_v14 = vsub.f32 %v12824_v40, %v7351_v53  ;;  %v7364_v8 = vsub.f32 %v12848_v12, %v7363_v1 }
 0x555   :  { %7086 = vmatpush.msra.mxu0 %v12646_v55  ;;  %7324 = vmatpush.msrb.mxu1 %v7323_v15  ;;  %v7341_v55 = vand.u32 4294901760, %v7340_v45  ;;  %v12884_v7 = vsub.f32 %v7246_v60, %v12862_v36  ;;  %v7393_v60 = vand.u32 4294901760, %v12906_v5  ;;  %v7388_v19 = vsub.f32 %v12896_v34, %v7387_v28 }
 0x556   :  { %7410 = vmatpush.msrb.mxu2 %v12741_v37  ;;  %7459 = vmatpush.msrb.mxu3 %v12712_v21  ;;  %v7353_v61 = vand.u32 4294901760, %v7352_v14  ;;  %v7365_v15 = vand.u32 4294901760, %v7364_v8 }
 0x557   :  { %7089 = vmatpush.msra.mxu0 %v12656_v43  ;;  %7330 = vmatpush.msrb.mxu1 %v7329_v47  ;;  %v7347_v43 = vand.u32 4294901760, %v7346_v54  ;;  %v7381_v38 = vand.u32 4294901760, %v12884_v7  ;;  %v7371_v47 = vand.u32 4294901760, %v7370_v44  ;;  %v7377_v54 = vand.u32 4294901760, %v7376_v62 }
 0x558   :  { %7092 = vmatmul.f32.vlgmr.msra.gmra.mxu0 %v12671_v2  ;;  %7413 = vmatpush.msrb.mxu2 %v12752_v42  ;;  %v7358_v2 = vsub.f32 %v12836_v49, %v7357_v26  ;;  %v7394_v31 = vsub.f32 %v12906_v5, %v7393_v60 }
 0x559   :  { %7261 = vmatpush.msrb.mxu0 %v12706_v63  ;;  %7461 = vmatpush.msrb.mxu3 %v12722_v48  ;;  %v7382_v45 = vsub.f32 %v12884_v7, %v7381_v38 }
 0x55a   :  { %7336 = vmatpush.msrb.mxu1 %v7335_v0  ;;  %7416 = vmatpush.msrb.mxu2 %v12766_v32  ;;  %v7359_v25 = vand.u32 4294901760, %v7358_v2  ;;  %v7242_v0 = vld [vmem:[#allocation5 + $0x2] ss:$3 sm:$0x3]  ;;  %v7395_v2 = vand.u32 4294901760, %v7394_v31 }
 0x55b   :  { %7263 = vmatpush.msrb.mxu0 %v12712_v21  ;;  %7463 = vmatpush.msrb.mxu3 %v12732_v29  ;;  %v12936_v14 = vand.u32 4294901760, %v7242_v0 }
 0x55c   :  { %7342 = vmatpush.msrb.mxu1 %v7341_v55  ;;  %7419 = vmatpush.msrb.mxu2 %v12784_v17  ;;  %v7383_v55 = vand.u32 4294901760, %v7382_v45 }
 0x55d   :  { %7265 = vmatpush.msrb.mxu0 %v12722_v48  ;;  %7465 = vmatpush.msrb.mxu3 %v12743_v41 }
 0x55e   :  { %7348 = vmatpush.msrb.mxu1 %v7347_v43  ;;  %7422 = vmatpush.msrb.mxu2 %v12794_v59  ;;  %v7389_v43 = vand.u32 4294901760, %v7388_v19 }
 0x55f   :  { %7267 = vmatpush.msrb.mxu0 %v12732_v29  ;;  %7467 = vmatpush.msrb.mxu3 %v12756_v33 }
 0x560   :  { %7354 = vmatpush.msrb.mxu1 %v7353_v61  ;;  %7425 = vmatpush.msrb.mxu2 %v12807_v11  ;;  %v7293_v61 = vsub.f32 %v7242_v0, %v12936_v14 }
 0x561   :  { %7269 = vmatpush.msrb.mxu0 %v12743_v41  ;;  %7469 = vmatpush.msrb.mxu3 %v12768_v16 }
 0x562   :  { %7360 = vmatpush.msrb.mxu1 %v7359_v25  ;;  %7428 = vmatpush.msrb.mxu2 %v12824_v40  ;;  %v7294_v8 = vand.u32 4294901760, %v7293_v61 }
 0x563   :  { %7271 = vmatpush.msrb.mxu0 %v12756_v33  ;;  %7471 = vmatpush.msrb.mxu3 %v12779_v58 }
 0x564   :  { %7366 = vmatpush.msrb.mxu1 %v7365_v15  ;;  %7431 = vmatpush.msrb.mxu2 %v12836_v49  ;;  %v7295_v25 = vsub.f32 %v7293_v61, %v7294_v8 }
 0x565   :  { %7273 = vmatpush.msrb.mxu0 %v12768_v16  ;;  %7473 = vmatpush.msrb.mxu3 %v12798_v51 }
 0x566   :  { %7372 = vmatpush.msrb.mxu1 %v7371_v47  ;;  %7434 = vmatpush.msrb.mxu2 %v12848_v12 }
 0x567   :  { %7275 = vmatpush.msrb.mxu0 %v12779_v58  ;;  %7475 = vmatpush.msrb.mxu3 %v12813_v9 }
 0x568   :  { %7378 = vmatpush.msrb.mxu1 %v7377_v54  ;;  %7437 = vmatpush.msrb.mxu2 %v12860_v39 }
 0x569   :  { %7277 = vmatpush.msrb.mxu0 %v12798_v51  ;;  %7477 = vmatpush.msrb.mxu3 %v12826_v10 }
 0x56a   :  { %7384 = vmatpush.msrb.mxu1 %v7383_v55  ;;  %7440 = vmatpush.msrb.mxu2 %v12872_v22 }
 0x56b   :  { %7279 = vmatpush.msrb.mxu0 %v12813_v9  ;;  %7479 = vmatpush.msrb.mxu3 %v12838_v4 }
 0x56c   :  { %7390 = vmatpush.msrb.mxu1 %v7389_v43  ;;  %7443 = vmatpush.msrb.mxu2 %v12884_v7 }
 0x56d   :  { %7281 = vmatpush.msrb.mxu0 %v12826_v10  ;;  %7481 = vmatpush.msrb.mxu3 %v12850_v20 }
 0x56e   :  { %7396 = vmatpush.msrb.mxu1 %v7395_v2  ;;  %7446 = vmatpush.msrb.mxu2 %v12896_v34 }
 0x56f   :  { %7283 = vmatpush.msrb.mxu0 %v12838_v4  ;;  %7483 = vmatpush.msrb.mxu3 %v12862_v36 }
 0x570   :  { %7398 = vmatmul.f32.vlgmr.msrb.gmra.mxu1 %v12936_v14  ;;  %7449 = vmatpush.msrb.mxu2 %v12906_v5 }
 0x571   :  { %7565 = vmatpush.msra.mxu1 %v12706_v63  ;;  %7285 = vmatpush.msrb.mxu0 %v12850_v20  ;;  %v7296_v63 = vand.u32 4294901760, %v7295_v25 }
 0x572   :  { %7485 = vmatpush.msrb.mxu3 %v12874_v27  ;;  %7452 = vmatmul.f32.vlgmr.msrb.gmra.mxu2 %v7293_v61 }
 0x573   :  { %7567 = vmatpush.msra.mxu1 %v12712_v21  ;;  %7287 = vmatpush.msrb.mxu0 %v12862_v36 }
 0x574   :  { %7487 = vmatpush.msrb.mxu3 %v12886_v18 }
 0x575   :  { %7491 = vmatmul.f32.vlgmr.msrb.gmra.mxu3 %v7294_v8  ;;  %7569 = vmatpush.msra.mxu1 %v12722_v48 }
 0x576   :  { %7289 = vmatpush.msrb.mxu0 %v12874_v27 }
 0x577   :  { %7571 = vmatpush.msra.mxu1 %v12732_v29 }
 0x578   :  { %7291 = vmatpush.msrb.mxu0 %v12886_v18 }
 0x579   :  { %7297 = vmatmul.f32.vlgmr.msrb.gmra.mxu0 %v7296_v63  ;;  %7573 = vmatpush.msra.mxu1 %v12743_v41 }
 0x57a   :  { %7498 = vmatpush.msra.mxu0 %v7303_v52 }
 0x57b   :  { %7575 = vmatpush.msra.mxu1 %v12756_v33 }
 0x57c   :  { %7502 = vmatpush.msra.mxu0 %v7309_v23 }
 0x57d   :  { %7577 = vmatpush.msra.mxu1 %v12768_v16 }
 0x57e   :  { %7506 = vmatpush.msra.mxu0 %v7315_v3 }
 0x57f   :  { %7579 = vmatpush.msra.mxu1 %v12779_v58 }
 0x580   :  { %7510 = vmatpush.msra.mxu0 %v7321_v50 }
 0x581   :  { %7581 = vmatpush.msra.mxu1 %v12798_v51 }
 0x582   :  { %7514 = vmatpush.msra.mxu0 %v7327_v24 }
 0x583   :  { %7583 = vmatpush.msra.mxu1 %v12813_v9 }
 0x584   :  { %7518 = vmatpush.msra.mxu0 %v7333_v30 }
 0x585   :  { %7585 = vmatpush.msra.mxu1 %v12826_v10 }
 0x586   :  { %7522 = vmatpush.msra.mxu0 %v7339_v46 }
 0x587   :  { %7587 = vmatpush.msra.mxu1 %v12838_v4 }
 0x588   :  { %7526 = vmatpush.msra.mxu0 %v7345_v57 }
 0x589   :  { %7589 = vmatpush.msra.mxu1 %v12850_v20 }
 0x58a   :  { %7530 = vmatpush.msra.mxu0 %v7351_v53 }
 0x58b   :  { %7591 = vmatpush.msra.mxu1 %v12862_v36  ;;  %v7641_v36 = vld [vmem:[%s13025_s10] ss:$0 sm:$0xff] }
 0x58c   :  { %7534 = vmatpush.msra.mxu0 %v7357_v26 }
 0x58d   :  { %7593 = vmatpush.msra.mxu1 %v12874_v27 }
 0x58e   :  { %7538 = vmatpush.msra.mxu0 %v7363_v1 }
 0x58f   :  { %7595 = vmatpush.msra.mxu1 %v12886_v18 }
 0x590   :  { %7542 = vmatpush.msra.mxu0 %v7369_v6  ;;  %7597 = vmatmul.f32.vlgmr.msra.gmra.mxu1 %v12936_v14 }
 0x592   :  { %7546 = vmatpush.msra.mxu0 %v7375_v56 }
 0x594   :  { %7550 = vmatpush.msra.mxu0 %v7381_v38 }
 0x596   :  { %7554 = vmatpush.msra.mxu0 %v7387_v28 }
 0x598   :  { %7558 = vmatpush.msra.mxu0 %v7393_v60 }
 0x599   :  { %7560 = vmatmul.f32.vlgmr.msra.gmra.mxu0 %v12936_v14 }
 0x5a8   :  { %v6698_v35 = vpop.f32.mrf.mxu1 }
 0x5b0   :  { %v6597_v21 = vpop.f32.mrf.mxu0  ;;  %v6752_v13 = vpop.f32.mrf.mxu2 }
 0x5b1   :  { %v6699_v48 = vadd.f32 %v6698_v35, %v6597_v21  ;;  %v6897_v41 = vpop.f32.mrf.mxu1 }
 0x5b2   :  { %v6791_v52 = vpop.f32.mrf.mxu3 }
 0x5b3   :  { %v6753_v29 = vadd.f32 %v6752_v13, %v6699_v48 }
 0x5b5   :  { %v6792_v23 = vadd.f32 %v6791_v52, %v6753_v29 }
 0x5b9   :  { %v6938_v33 = vpop.f32.mrf.mxu2 }
 0x5ba   :  { %v6860_v37 = vpop.f32.mrf.mxu0 }
 0x5bb   :  { %v6861_v42 = vadd.f32 %v6860_v37, %v6792_v23 }
 0x5bc   :  { %v7039_v16 = vpop.f32.mrf.mxu3 }
 0x5bd   :  { %v6898_v32 = vadd.f32 %v6897_v41, %v6861_v42 }
 0x5bf   :  { %v6939_v58 = vadd.f32 %v6938_v33, %v6898_v32 }
 0x5c1   :  { %v7040_v59 = vadd.f32 %v7039_v16, %v6939_v58 }
 0x5cb   :  { %v7132_v50 = vpop.f32.mrf.mxu1 }
 0x5d3   :  { %v7201_v17 = vpop.f32.mrf.mxu2 }
 0x5d5   :  { %v7093_v3 = vpop.f32.mrf.mxu0 }
 0x5d6   :  { %v7238_v51 = vpop.f32.mrf.mxu3  ;;  %v7094_v30 = vadd.f32 %v7093_v3, %v7040_v59 }
 0x5d8   :  { %v7133_v40 = vadd.f32 %v7132_v50, %v7094_v30 }
 0x5da   :  { %v7202_v49 = vadd.f32 %v7201_v17, %v7133_v40 }
 0x5dc   :  { %v7239_v26 = vadd.f32 %v7238_v51, %v7202_v49 }
 0x5ed   :  { %v7399_v11 = vpop.f32.mrf.mxu1 }
 0x5f5   :  { %v7453_v46 = vpop.f32.mrf.mxu2 }
 0x5f6   :  { %v7298_v24 = vpop.f32.mrf.mxu0 }
 0x5f7   :  { %v7400_v9 = vadd.f32 %v7399_v11, %v7298_v24 }
 0x5f8   :  { %v7492_v57 = vpop.f32.mrf.mxu3 }
 0x5f9   :  { %v7454_v10 = vadd.f32 %v7453_v46, %v7400_v9 }
 0x5fb   :  { %v7493_v4 = vadd.f32 %v7492_v57, %v7454_v10 }
 0x60d   :  { %v7598_v20 = vpop.f32.mrf.mxu1 }
 0x616   :  { %v7561_v53 = vpop.f32.mrf.mxu0 }
 0x617   :  { %v7562_v12 = vadd.f32 %v7561_v53, %v7493_v4 }
 0x619   :  { %v7599_v39 = vadd.f32 %v7598_v20, %v7562_v12 }
 0x61b   :  { %v7601_v1 = vadd.f32 %v7599_v39, %v7239_v26 }
 0x61d   :  { %v7606_v22 = vadd.f32 %v7641_v36, %v7601_v1 }
 0x61f   :  { %7607 = vst [vmem:[#allocation18] sm:$0x3] %v7606_v22 }
 0x620   :  { %7618 = dma.vmem_to_hbm [thread:$0]  %s7614_s23, 32, %s7616_s27, [#allocation8]  }
 0x621   :  { %7842 = dma.done.wait [#allocation8], 32  }
 0x622   :  { %7843 = vsyncadd [#allocation8], 4294967264 }
 0x623   :  { %7623 = vsyncpa [#allocation7], 1 }
 0x624   :  { %7624 = vsyncpa [#allocation10], 1 }
 0x625   :  { %7625 = vsyncpa [#allocation13], 1 }
 0x626   :  { %7626 = vsyncpa [#allocation16], 1 }
 0x627   :  { %7627 = vsyncpa [#allocation8], 1 }

</bundles_post_ra>
